<compile_context>
chip_gen: v6e
topology: v6e:2x2x1
jax: 0.10.0
libtpu: 0.0.40
codegen_flags: <defaults>
</compile_context>

<pallas_src>
import math
import functools

import jax
import jax.numpy as jnp
from jax.experimental import pallas as pl
from jax.experimental.pallas import tpu as pltpu


_VMEM = pl.BlockSpec(memory_space=pltpu.MemorySpace.VMEM)
_NEG_INF = -1e9
MXU_DTYPE = jnp.bfloat16     # matmul-operand dtype (accumulation is always f32)


def _round_up(x, m):
    return ((x + m - 1) // m) * m


# ----------------------------------------------------------------------------
# Packed-parameter layout (static, derived from cfg only)
# ----------------------------------------------------------------------------

def _vec_layout(cfg):
    """Ordered layout of all 1-row parameters inside the packed `vecs` slab."""
    dm = cfg["d_model"]
    dp = cfg["pos_expansion_dim"]
    dff = cfg["dim_feedforward"]
    d_in = cfg["d_input"]
    out_pad = _round_up(d_in, 128)        # lane-dense unembed output width

    entries = [("emb_b", dm), ("pexp_b", dp), ("punexp_b", dm), ("unemb_b", out_pad)]
    for li in range(cfg["num_encoder_layers"]):
        p = f"enc{li}."
        entries += [(p + "ln1_g", dm), (p + "ln1_b", dm),
                    (p + "b_in", 3 * dm), (p + "b_out", dm),
                    (p + "ln2_g", dm), (p + "ln2_b", dm),
                    (p + "b1", dff), (p + "b2", dm)]
    entries += [("enc_norm_g", dm), ("enc_norm_b", dm)]
    for li in range(cfg["num_decoder_layers"]):
        p = f"dec{li}."
        entries += [(p + "ln1_g", dm), (p + "ln1_b", dm),
                    (p + "sa_b_in", 3 * dm), (p + "sa_b_out", dm),
                    (p + "ln2_g", dm), (p + "ln2_b", dm),
                    (p + "ca_b_in", 3 * dm), (p + "ca_b_out", dm),
                    (p + "ln3_g", dm), (p + "ln3_b", dm),
                    (p + "b1", dff), (p + "b2", dm)]
    entries += [("dec_norm_g", dm), ("dec_norm_b", dm)]

    vec_w = _round_up(max(w for _, w in entries), 128)
    index = {name: (row, w) for row, (name, w) in enumerate(entries)}
    return entries, index, vec_w, out_pad


def pack_params(params, cfg):
    """One-time host-side packing: weight slabs (bf16) + 1-row-param slab (f32)."""
    entries, _, vec_w, out_pad = _vec_layout(cfg)
    d_in = cfg["d_input"]

    raw = {
        "emb_b": params["emb_b"], "pexp_b": params["pexp_b"],
        "punexp_b": params["punexp_b"],
        "unemb_b": jnp.pad(jnp.reshape(params["unemb_b"], (1, -1)),
                           ((0, 0), (0, out_pad - d_in))),
        "enc_norm_g": params["enc_norm_g"], "enc_norm_b": params["enc_norm_b"],
        "dec_norm_g": params["dec_norm_g"], "dec_norm_b": params["dec_norm_b"],
    }
    for li, lp in enumerate(params["enc_layers"]):
        p = f"enc{li}."
        raw[p + "ln1_g"], raw[p + "ln1_b"] = lp["ln1_g"], lp["ln1_b"]
        raw[p + "b_in"], raw[p + "b_out"] = lp["sa"]["b_in"], lp["sa"]["b_out"]
        raw[p + "ln2_g"], raw[p + "ln2_b"] = lp["ln2_g"], lp["ln2_b"]
        raw[p + "b1"], raw[p + "b2"] = lp["b1"], lp["b2"]
    for li, lp in enumerate(params["dec_layers"]):
        p = f"dec{li}."
        raw[p + "ln1_g"], raw[p + "ln1_b"] = lp["ln1_g"], lp["ln1_b"]
        raw[p + "sa_b_in"], raw[p + "sa_b_out"] = lp["sa"]["b_in"], lp["sa"]["b_out"]
        raw[p + "ln2_g"], raw[p + "ln2_b"] = lp["ln2_g"], lp["ln2_b"]
        raw[p + "ca_b_in"], raw[p + "ca_b_out"] = lp["ca"]["b_in"], lp["ca"]["b_out"]
        raw[p + "ln3_g"], raw[p + "ln3_b"] = lp["ln3_g"], lp["ln3_b"]
        raw[p + "b1"], raw[p + "b2"] = lp["b1"], lp["b2"]

    rows = []
    for name, w in entries:
        v = jnp.asarray(raw[name], jnp.float32).reshape(1, -1)
        rows.append(jnp.pad(v, ((0, 0), (0, vec_w - v.shape[1]))))
    vecs = jnp.concatenate(rows, axis=0)

    def bf(x):
        return jnp.asarray(x, MXU_DTYPE)

    enc_wA = bf(jnp.stack([jnp.concatenate(
        [lp["sa"]["w_in"], lp["sa"]["w_out"], lp["w1"]], axis=1)
        for lp in params["enc_layers"]]))
    enc_w2 = bf(jnp.stack([lp["w2"] for lp in params["enc_layers"]]))
    dec_wA = bf(jnp.stack([jnp.concatenate(
        [lp["sa"]["w_in"], lp["sa"]["w_out"],
         lp["ca"]["w_in"], lp["ca"]["w_out"], lp["w1"]], axis=1)
        for lp in params["dec_layers"]]))
    dec_w2 = bf(jnp.stack([lp["w2"] for lp in params["dec_layers"]]))
    unemb_w = bf(jnp.pad(params["unemb_w"], ((0, 0), (0, out_pad - d_in))))

    return dict(
        vecs=vecs, pe=params["pe"],
        emb_w=bf(params["emb_w"]), pexp_w=bf(params["pexp_w"]),
        punexp_w=bf(params["punexp_w"]), unemb_w=unemb_w,
        enc_wA=enc_wA, enc_w2=enc_w2, dec_wA=dec_wA, dec_w2=dec_w2)


# ----------------------------------------------------------------------------
# The single fused forward kernel
# ----------------------------------------------------------------------------

def _pots_forward_kernel(*refs, N, Ss, St, H, Dh, dff, eps, sqrt_d,
                         n_enc, n_dec, causal,
                         has_tgt_mask, has_src_kpad, has_tgt_kpad, vec_index):
    o_ref = refs[-1]
    it = iter(refs[:-1])
    x_ref, pe_ref = next(it), next(it)
    emb_w, pexp_w, punexp_w, unemb_w = next(it), next(it), next(it), next(it)
    enc_wA, enc_w2, dec_wA, dec_w2 = next(it), next(it), next(it), next(it)
    vecs = next(it)
    tgt_mask_ref = next(it) if has_tgt_mask else None
    src_kpad_ref = next(it) if has_src_kpad else None
    tgt_kpad_ref = next(it) if has_tgt_kpad else None

    E = H * Dh

    def vec(name):                      # (1, width) static view into the packed slab
        row, w = vec_index[name]
        return vecs[row:row + 1, :w]

    def mm(a, w):                       # bf16 MXU inputs, f32 accumulation
        return jnp.dot(a.astype(MXU_DTYPE), w.astype(MXU_DTYPE),
                       preferred_element_type=jnp.float32)

    def layernorm(x, gname, bname):     # f32 elementwise (v5e has no bf16 VPU/EUP)
        mean = jnp.mean(x, axis=-1, keepdims=True)
        c = x - mean
        var = jnp.mean(c * c, axis=-1, keepdims=True)   # biased, like torch
        return c * jax.lax.rsqrt(var + eps) * vec(gname) + vec(bname)

    def attention(q_rows, q_off, kv_rows, k_off, v_off, w_out, b_out,
                  Sq, Skv, use_causal, attn_mask, kpad):
        scale = 1.0 / math.sqrt(Dh)
        # combined additive bias, built & broadcast ONCE (not per head)
        bias = None
        if use_causal:
            ri = jax.lax.broadcasted_iota(jnp.int32, (Sq, Skv), 0)
            ci = jax.lax.broadcasted_iota(jnp.int32, (Sq, Skv), 1)
            bias = jnp.where(ci > ri, _NEG_INF, 0.0).astype(jnp.float32)
        if attn_mask is not None:
            bias = attn_mask if bias is None else bias + attn_mask
        if bias is not None:
            bias = bias[None, :, :]
        if kpad is not None:
            kp = kpad[:, None, :]
            bias = kp if bias is None else bias + kp
        if bias is not None:
            bias = jnp.broadcast_to(bias, (N, Sq, Skv))

        q_all = q_rows[:, q_off:q_off + E] * scale        # (N*Sq, E) f32
        k_all = kv_rows[:, k_off:k_off + E]               # (N*Skv, E) f32
        v_all = kv_rows[:, v_off:v_off + E]

        head_outs = []
        for h in range(H):                                # static, small H
            cs = slice(h * Dh, (h + 1) * Dh)
            qh = q_all[:, cs].reshape(N, Sq, Dh)
            kh = k_all[:, cs].reshape(N, Skv, Dh)
            vh = v_all[:, cs].reshape(N, Skv, Dh)
            s = jnp.einsum('bqd,bkd->bqk', qh.astype(MXU_DTYPE), kh.astype(MXU_DTYPE),
                           preferred_element_type=jnp.float32)      # (N, Sq, Skv)
            if bias is not None:
                s = s + bias
            m = jnp.max(s, axis=-1, keepdims=True)
            p = jnp.exp(s - m)
            p = p / jnp.sum(p, axis=-1, keepdims=True)              # exact divide
            oh = jnp.einsum('bqk,bkd->bqd', p.astype(MXU_DTYPE), vh.astype(MXU_DTYPE),
                            preferred_element_type=jnp.float32)     # (N, Sq, Dh)
            head_outs.append(oh.reshape(N * Sq, Dh))
        o = head_outs[0] if H == 1 else jnp.concatenate(head_outs, axis=-1)
        # single (N*Sq,E) @ (E,E) output projection
        return mm(o, w_out) + b_out

    # ---------------- stem ----------------
    x = x_ref[...]
    y = (mm(x, emb_w[...]) + vec("emb_b")) * sqrt_d
    y = mm(y, pexp_w[...]) + vec("pexp_b")
    y = y + pe_ref[...]
    y = mm(y, punexp_w[...]) + vec("punexp_b")

    Rs = N * Ss
    mem = y[:Rs]                    # encoder stream (N*Ss, E)
    out = y[Rs:]                    # decoder stream (N*St, E)

    tgt_mask = tgt_mask_ref[...] if has_tgt_mask else None
    src_kpad = src_kpad_ref[...] if has_src_kpad else None
    tgt_kpad = tgt_kpad_ref[...] if has_tgt_kpad else None

    # ---------------- encoder ----------------
    for li in range(n_enc):
        lw = enc_wA[li]
        w_in = lw[:, :3 * E]
        w_o = lw[:, 3 * E:4 * E]
        w1 = lw[:, 4 * E:4 * E + dff]
        w2 = enc_w2[li]
        p = f"enc{li}."

        h = layernorm(mem, p + "ln1_g", p + "ln1_b")
        qkv = mm(h, w_in) + vec(p + "b_in")
        mem = mem + attention(qkv, 0, qkv, E, 2 * E, w_o, vec(p + "b_out"),
                              Ss, Ss, False, None, src_kpad)

        h = layernorm(mem, p + "ln2_g", p + "ln2_b")
        h = jnp.maximum(mm(h, w1) + vec(p + "b1"), 0.0)
        mem = mem + mm(h, w2) + vec(p + "b2")
    mem = layernorm(mem, "enc_norm_g", "enc_norm_b")

    # ---------------- decoder ----------------
    for li in range(n_dec):
        lw = dec_wA[li]
        sa_w_in = lw[:, :3 * E]
        sa_w_o = lw[:, 3 * E:4 * E]
        ca_w_q = lw[:, 4 * E:5 * E]
        ca_w_kv = lw[:, 5 * E:7 * E]
        ca_w_o = lw[:, 7 * E:8 * E]
        w1 = lw[:, 8 * E:8 * E + dff]
        w2 = dec_w2[li]
        p = f"dec{li}."

        # masked self-attention (causal mask generated in-kernel)
        h = layernorm(out, p + "ln1_g", p + "ln1_b")
        qkv = mm(h, sa_w_in) + vec(p + "sa_b_in")
        out = out + attention(qkv, 0, qkv, E, 2 * E, sa_w_o, vec(p + "sa_b_out"),
                              St, St, causal, tgt_mask, tgt_kpad)

        # cross-attention on encoder memory (fused K/V projection)
        h = layernorm(out, p + "ln2_g", p + "ln2_b")
        ca_b = vec(p + "ca_b_in")
        q_rows = mm(h, ca_w_q) + ca_b[:, :E]
        kv_rows = mm(mem, ca_w_kv) + ca_b[:, E:]
        out = out + attention(q_rows, 0, kv_rows, 0, E, ca_w_o, vec(p + "ca_b_out"),
                              St, Ss, False, None, src_kpad)

        # feed-forward
        h = layernorm(out, p + "ln3_g", p + "ln3_b")
        h = jnp.maximum(mm(h, w1) + vec(p + "b1"), 0.0)
        out = out + mm(h, w2) + vec(p + "b2")

    # final decoder norm + lane-dense unembedding
    out = layernorm(out, "dec_norm_g", "dec_norm_b")
    logits = mm(out, unemb_w[...]) + vec("unemb_b")
    o_ref[...] = logits.astype(o_ref.dtype)


# ----------------------------------------------------------------------------
# Wrapper (one pallas_call for the whole forward)
# ----------------------------------------------------------------------------

def _rows(x):
    """(S, N, F) seq-major -> (N*S, F) batch-major rows (boundary-only layout op)."""
    S, N, F = x.shape
    return jnp.transpose(x, (1, 0, 2)).reshape(N * S, F)


def _unrows(x2, S, N):
    F = x2.shape[-1]
    return jnp.transpose(x2.reshape(N, S, F), (1, 0, 2))


def pots_transformer_forward(packed, src, tgt, cfg, tgt_mask=None, tgt_is_causal=False,
                             src_key_padding_mask=None, tgt_key_padding_mask=None):
    dm = cfg["d_model"]
    H = cfg["nhead"]
    Dh = dm // H
    dff = cfg["dim_feedforward"]
    d_in = cfg["d_input"]
    eps = cfg["layer_norm_eps"]
    n_enc = cfg["num_encoder_layers"]
    n_dec = cfg["num_decoder_layers"]
    _, vec_index, _, out_pad = _vec_layout(cfg)

    if src.ndim == 2:
        src = src[:, None, :]
    if tgt.ndim == 2:
        tgt = tgt[:, None, :]
    Ss, N, _ = src.shape
    St = tgt.shape[0]

    x_in = jnp.concatenate([_rows(src), _rows(tgt)], axis=0)
    pe = packed["pe"]
    pe_rows = jnp.concatenate([jnp.tile(pe[:Ss], (N, 1)),
                               jnp.tile(pe[:St], (N, 1))], axis=0)

    args = [x_in, pe_rows,
            packed["emb_w"], packed["pexp_w"], packed["punexp_w"], packed["unemb_w"],
            packed["enc_wA"], packed["enc_w2"], packed["dec_wA"], packed["dec_w2"],
            packed["vecs"]]

    has_tm = tgt_mask is not None
    has_sk = src_key_padding_mask is not None
    has_tk = tgt_key_padding_mask is not None
    if has_tm:
        if tgt_mask.dtype == jnp.bool_:
            args.append(jnp.where(tgt_mask, _NEG_INF, 0.0).astype(jnp.float32))
        else:
            args.append(tgt_mask.astype(jnp.float32))
    if has_sk:
        args.append(jnp.where(src_key_padding_mask, _NEG_INF, 0.0).astype(jnp.float32))
    if has_tk:
        args.append(jnp.where(tgt_key_padding_mask, _NEG_INF, 0.0).astype(jnp.float32))

    kern = functools.partial(
        _pots_forward_kernel, N=N, Ss=Ss, St=St, H=H, Dh=Dh, dff=dff, eps=eps,
        sqrt_d=math.sqrt(dm), n_enc=n_enc, n_dec=n_dec, causal=tgt_is_causal,
        has_tgt_mask=has_tm, has_src_kpad=has_sk, has_tgt_kpad=has_tk,
        vec_index=vec_index)

    out_padded = pl.pallas_call(
        kern,
        out_shape=jax.ShapeDtypeStruct((N * St, out_pad), jnp.float32),
        in_specs=[_VMEM] * len(args),
        out_specs=_VMEM,
        compiler_params=pltpu.CompilerParams(vmem_limit_bytes=32 * 1024 * 1024),
    )(*args)

    return _unrows(out_padded[:, :d_in], St, N)


# ----------------------------------------------------------------------------
# Deterministic parameter construction
# ----------------------------------------------------------------------------

def make_pe_table(max_len, d):
    pos = jnp.arange(max_len, dtype=jnp.float32)[:, None]
    div = jnp.exp(jnp.arange(0, d, 2, dtype=jnp.float32) * (-math.log(10000.0) / d))
    pe = jnp.zeros((max_len, d), jnp.float32)
    pe = pe.at[:, 0::2].set(jnp.sin(pos * div))
    pe = pe.at[:, 1::2].set(jnp.cos(pos * div))
    return pe


def init_params(key, cfg, max_len=5000):
    d_in = cfg["d_input"]
    dm = cfg["d_model"]
    dp = cfg["pos_expansion_dim"]
    dff = cfg["dim_feedforward"]
    keys = iter(jax.random.split(key, 256))

    def w(shape, scale=0.05):
        return scale * jax.random.normal(next(keys), shape, jnp.float32)

    def zeros(n):
        return jnp.zeros((1, n), jnp.float32)

    def ones(n):
        return jnp.ones((1, n), jnp.float32)

    def attn_params():
        return dict(w_in=w((dm, 3 * dm)), b_in=zeros(3 * dm),
                    w_out=w((dm, dm)), b_out=zeros(dm))

    def enc_layer_params():
        return dict(ln1_g=ones(dm), ln1_b=zeros(dm), sa=attn_params(),
                    ln2_g=ones(dm), ln2_b=zeros(dm),
                    w1=w((dm, dff)), b1=zeros(dff), w2=w((dff, dm)), b2=zeros(dm))

    def dec_layer_params():
        return dict(ln1_g=ones(dm), ln1_b=zeros(dm), sa=attn_params(),
                    ln2_g=ones(dm), ln2_b=zeros(dm), ca=attn_params(),
                    ln3_g=ones(dm), ln3_b=zeros(dm),
                    w1=w((dm, dff)), b1=zeros(dff), w2=w((dff, dm)), b2=zeros(dm))

    return dict(
        emb_w=w((d_in, dm)), emb_b=zeros(dm),
        unemb_w=w((dm, d_in)), unemb_b=zeros(d_in),
        pexp_w=w((dm, dp)), pexp_b=zeros(dp),
        punexp_w=w((dp, dm)), punexp_b=zeros(dm),
        pe=make_pe_table(max_len, dp),
        enc_layers=[enc_layer_params() for _ in range(cfg["num_encoder_layers"])],
        enc_norm_g=ones(dm), enc_norm_b=zeros(dm),
        dec_layers=[dec_layer_params() for _ in range(cfg["num_decoder_layers"])],
        dec_norm_g=ones(dm), dec_norm_b=zeros(dm),
    )


# ----------------------------------------------------------------------------
# Main
# ----------------------------------------------------------------------------

if __name__ == "__main__":
    cfg = dict(
        d_input=4,
        d_model=32,
        nhead=4,
        num_encoder_layers=2,
        num_decoder_layers=2,
        dim_feedforward=64,
        dropout_p=0.1,
        layer_norm_eps=1e-5,
        pos_expansion_dim=64,
    )
    S_src, S_tgt, N = 8, 8, 2

    root = jax.random.PRNGKey(0)
    k_params, k_src, k_tgt = jax.random.split(root, 3)
    params = init_params(k_params, cfg)
    packed = pack_params(params, cfg)          # one-time host-side packing
    src = jax.random.normal(k_src, (S_src, N, cfg["d_input"]), jnp.float32)
    tgt = jax.random.normal(k_tgt, (S_tgt, N, cfg["d_input"]), jnp.float32)

    # causal target mask generated in-kernel (equivalent to the usual additive
    # -inf-above-diagonal tgt_mask of nn.Transformer).
    fwd = jax.jit(functools.partial(pots_transformer_forward, cfg=cfg, tgt_is_causal=True))

    out = jax.block_until_ready(fwd(packed, src, tgt))

    assert out.shape == (S_tgt, N, cfg["d_input"]), out.shape
    assert bool(jnp.all(jnp.isfinite(out)))
    print("KERNEL_OK")
</pallas_src>

<mosaic_0001>
module attributes {stable_mosaic.version = 11 : i64} {
  func.func @_pots_forward_kernel(%arg0: memref<32x4xf32, #tpu.memory_space<vmem>>, %arg1: memref<32x64xf32, #tpu.memory_space<vmem>>, %arg2: memref<4x32xbf16, #tpu.memory_space<vmem>>, %arg3: memref<32x64xbf16, #tpu.memory_space<vmem>>, %arg4: memref<64x32xbf16, #tpu.memory_space<vmem>>, %arg5: memref<32x128xbf16, #tpu.memory_space<vmem>>, %arg6: memref<2x32x192xbf16, #tpu.memory_space<vmem>>, %arg7: memref<2x64x32xbf16, #tpu.memory_space<vmem>>, %arg8: memref<2x32x320xbf16, #tpu.memory_space<vmem>>, %arg9: memref<2x64x32xbf16, #tpu.memory_space<vmem>>, %arg10: memref<48x128xf32, #tpu.memory_space<vmem>>, %arg11: memref<16x128xf32, #tpu.memory_space<vmem>>) attributes {dimension_semantics = [], scalar_prefetch = 0 : i64, scratch_operands = 0 : i64, tpu.core_type = #tpu.core_type<tc>} {
    %c0 = arith.constant 0 : index
    %c0_0 = arith.constant 0 : index
    %0 = vector.load %arg0[%c0, %c0_0] : memref<32x4xf32, #tpu.memory_space<vmem>>, vector<32x4xf32>
    %c0_1 = arith.constant 0 : index
    %c0_2 = arith.constant 0 : index
    %1 = vector.load %arg2[%c0_1, %c0_2] : memref<4x32xbf16, #tpu.memory_space<vmem>>, vector<4x32xbf16>
    %2 = arith.truncf %0 : vector<32x4xf32> to vector<32x4xbf16>
    %cst = arith.constant dense<0.000000e+00> : vector<32x32xf32>
    %3 = tpu.matmul %2, %1, %cst {dimension_numbers = #tpu.dot_dimension_numbers<[1], [0], [0], [1], [0, 0, 1, 1], [], []>} : vector<32x4xbf16>, vector<4x32xbf16>, vector<32x32xf32> -> vector<32x32xf32>
    %c0_3 = arith.constant 0 : index
    %c0_4 = arith.constant 0 : index
    %4 = vector.load %arg10[%c0_3, %c0_4] : memref<48x128xf32, #tpu.memory_space<vmem>>, vector<1x32xf32>
    %5 = vector.broadcast %4 : vector<1x32xf32> to vector<32x32xf32>
    %6 = arith.addf %3, %5 : vector<32x32xf32>
    %cst_5 = arith.constant 5.65685415 : f32
    %7 = vector.broadcast %cst_5 : f32 to vector<32x32xf32>
    %8 = arith.mulf %6, %7 : vector<32x32xf32>
    %c0_6 = arith.constant 0 : index
    %c0_7 = arith.constant 0 : index
    %9 = vector.load %arg3[%c0_6, %c0_7] : memref<32x64xbf16, #tpu.memory_space<vmem>>, vector<32x64xbf16>
    %10 = arith.truncf %8 : vector<32x32xf32> to vector<32x32xbf16>
    %cst_8 = arith.constant dense<0.000000e+00> : vector<32x64xf32>
    %11 = tpu.matmul %10, %9, %cst_8 {dimension_numbers = #tpu.dot_dimension_numbers<[1], [0], [0], [1], [0, 0, 1, 1], [], []>} : vector<32x32xbf16>, vector<32x64xbf16>, vector<32x64xf32> -> vector<32x64xf32>
    %c1 = arith.constant 1 : index
    %c0_9 = arith.constant 0 : index
    %12 = vector.load %arg10[%c1, %c0_9] : memref<48x128xf32, #tpu.memory_space<vmem>>, vector<1x64xf32>
    %13 = vector.broadcast %12 : vector<1x64xf32> to vector<32x64xf32>
    %14 = arith.addf %11, %13 : vector<32x64xf32>
    %c0_10 = arith.constant 0 : index
    %c0_11 = arith.constant 0 : index
    %15 = vector.load %arg1[%c0_10, %c0_11] : memref<32x64xf32, #tpu.memory_space<vmem>>, vector<32x64xf32>
    %16 = arith.addf %14, %15 : vector<32x64xf32>
    %c0_12 = arith.constant 0 : index
    %c0_13 = arith.constant 0 : index
    %17 = vector.load %arg4[%c0_12, %c0_13] : memref<64x32xbf16, #tpu.memory_space<vmem>>, vector<64x32xbf16>
    %18 = arith.truncf %16 : vector<32x64xf32> to vector<32x64xbf16>
    %cst_14 = arith.constant dense<0.000000e+00> : vector<32x32xf32>
    %19 = tpu.matmul %18, %17, %cst_14 {dimension_numbers = #tpu.dot_dimension_numbers<[1], [0], [0], [1], [0, 0, 1, 1], [], []>} : vector<32x64xbf16>, vector<64x32xbf16>, vector<32x32xf32> -> vector<32x32xf32>
    %c2 = arith.constant 2 : index
    %c0_15 = arith.constant 0 : index
    %20 = vector.load %arg10[%c2, %c0_15] : memref<48x128xf32, #tpu.memory_space<vmem>>, vector<1x32xf32>
    %21 = vector.broadcast %20 : vector<1x32xf32> to vector<32x32xf32>
    %22 = arith.addf %19, %21 : vector<32x32xf32>
    %23 = vector.extract_strided_slice %22 {offsets = [0, 0], sizes = [16, 32], strides = [1, 1]} : vector<32x32xf32> to vector<16x32xf32>
    %24 = vector.extract_strided_slice %22 {offsets = [16, 0], sizes = [16, 32], strides = [1, 1]} : vector<32x32xf32> to vector<16x32xf32>
    %c0_16 = arith.constant 0 : index
    %c0_17 = arith.constant 0 : index
    %c0_18 = arith.constant 0 : index
    %25 = vector.load %arg6[%c0_16, %c0_17, %c0_18] : memref<2x32x192xbf16, #tpu.memory_space<vmem>>, vector<1x32x192xbf16>
    %26 = vector.shape_cast %25 : vector<1x32x192xbf16> to vector<32x192xbf16>
    %27 = vector.extract_strided_slice %26 {offsets = [0, 0], sizes = [32, 96], strides = [1, 1]} : vector<32x192xbf16> to vector<32x96xbf16>
    %28 = vector.extract_strided_slice %26 {offsets = [0, 96], sizes = [32, 32], strides = [1, 1]} : vector<32x192xbf16> to vector<32x32xbf16>
    %29 = vector.extract_strided_slice %26 {offsets = [0, 128], sizes = [32, 64], strides = [1, 1]} : vector<32x192xbf16> to vector<32x64xbf16>
    %c0_19 = arith.constant 0 : index
    %c0_20 = arith.constant 0 : index
    %c0_21 = arith.constant 0 : index
    %30 = vector.load %arg7[%c0_19, %c0_20, %c0_21] : memref<2x64x32xbf16, #tpu.memory_space<vmem>>, vector<1x64x32xbf16>
    %31 = vector.shape_cast %30 : vector<1x64x32xbf16> to vector<64x32xbf16>
    %cst_22 = arith.constant dense<0.000000e+00> : vector<16xf32>
    %32 = vector.multi_reduction <add>, %23, %cst_22 [1] : vector<16x32xf32> to vector<16xf32>
    %33 = vector.shape_cast %32 : vector<16xf32> to vector<16x1xf32>
    %cst_23 = arith.constant 3.200000e+01 : f32
    %34 = vector.broadcast %cst_23 : f32 to vector<16x1xf32>
    %35 = arith.divf %33, %34 : vector<16x1xf32>
    %36 = vector.broadcast %35 : vector<16x1xf32> to vector<16x32xf32>
    %37 = arith.subf %23, %36 : vector<16x32xf32>
    %38 = arith.mulf %37, %37 : vector<16x32xf32>
    %cst_24 = arith.constant dense<0.000000e+00> : vector<16xf32>
    %39 = vector.multi_reduction <add>, %38, %cst_24 [1] : vector<16x32xf32> to vector<16xf32>
    %40 = vector.shape_cast %39 : vector<16xf32> to vector<16x1xf32>
    %cst_25 = arith.constant 3.200000e+01 : f32
    %41 = vector.broadcast %cst_25 : f32 to vector<16x1xf32>
    %42 = arith.divf %40, %41 : vector<16x1xf32>
    %cst_26 = arith.constant 9.99999974E-6 : f32
    %43 = vector.broadcast %cst_26 : f32 to vector<16x1xf32>
    %44 = arith.addf %42, %43 : vector<16x1xf32>
    %45 = math.rsqrt %44 : vector<16x1xf32>
    %46 = vector.broadcast %45 : vector<16x1xf32> to vector<16x32xf32>
    %47 = arith.mulf %37, %46 : vector<16x32xf32>
    %c4 = arith.constant 4 : index
    %c0_27 = arith.constant 0 : index
    %48 = vector.load %arg10[%c4, %c0_27] : memref<48x128xf32, #tpu.memory_space<vmem>>, vector<1x32xf32>
    %49 = vector.broadcast %48 : vector<1x32xf32> to vector<16x32xf32>
    %50 = arith.mulf %47, %49 : vector<16x32xf32>
    %c5 = arith.constant 5 : index
    %c0_28 = arith.constant 0 : index
    %51 = vector.load %arg10[%c5, %c0_28] : memref<48x128xf32, #tpu.memory_space<vmem>>, vector<1x32xf32>
    %52 = vector.broadcast %51 : vector<1x32xf32> to vector<16x32xf32>
    %53 = arith.addf %50, %52 : vector<16x32xf32>
    %54 = arith.truncf %53 : vector<16x32xf32> to vector<16x32xbf16>
    %cst_29 = arith.constant dense<0.000000e+00> : vector<16x96xf32>
    %55 = tpu.matmul %54, %27, %cst_29 {dimension_numbers = #tpu.dot_dimension_numbers<[1], [0], [0], [1], [0, 0, 1, 1], [], []>} : vector<16x32xbf16>, vector<32x96xbf16>, vector<16x96xf32> -> vector<16x96xf32>
    %c6 = arith.constant 6 : index
    %c0_30 = arith.constant 0 : index
    %56 = vector.load %arg10[%c6, %c0_30] : memref<48x128xf32, #tpu.memory_space<vmem>>, vector<1x96xf32>
    %57 = vector.broadcast %56 : vector<1x96xf32> to vector<16x96xf32>
    %58 = arith.addf %55, %57 : vector<16x96xf32>
    %c7 = arith.constant 7 : index
    %c0_31 = arith.constant 0 : index
    %59 = vector.load %arg10[%c7, %c0_31] : memref<48x128xf32, #tpu.memory_space<vmem>>, vector<1x32xf32>
    %60 = vector.extract_strided_slice %58 {offsets = [0, 0], sizes = [16, 32], strides = [1, 1]} : vector<16x96xf32> to vector<16x32xf32>
    %cst_32 = arith.constant 0.353553385 : f32
    %61 = vector.broadcast %cst_32 : f32 to vector<16x32xf32>
    %62 = arith.mulf %60, %61 : vector<16x32xf32>
    %63 = vector.extract_strided_slice %58 {offsets = [0, 32], sizes = [16, 32], strides = [1, 1]} : vector<16x96xf32> to vector<16x32xf32>
    %64 = vector.extract_strided_slice %58 {offsets = [0, 64], sizes = [16, 32], strides = [1, 1]} : vector<16x96xf32> to vector<16x32xf32>
    %65 = vector.extract_strided_slice %62 {offsets = [0, 0], sizes = [16, 8], strides = [1, 1]} : vector<16x32xf32> to vector<16x8xf32>
    %66 = vector.shape_cast %65 : vector<16x8xf32> to vector<2x8x8xf32>
    %67 = vector.extract_strided_slice %63 {offsets = [0, 0], sizes = [16, 8], strides = [1, 1]} : vector<16x32xf32> to vector<16x8xf32>
    %68 = vector.shape_cast %67 : vector<16x8xf32> to vector<2x8x8xf32>
    %69 = vector.extract_strided_slice %64 {offsets = [0, 0], sizes = [16, 8], strides = [1, 1]} : vector<16x32xf32> to vector<16x8xf32>
    %70 = vector.shape_cast %69 : vector<16x8xf32> to vector<2x8x8xf32>
    %71 = arith.truncf %66 : vector<2x8x8xf32> to vector<2x8x8xbf16>
    %72 = arith.truncf %68 : vector<2x8x8xf32> to vector<2x8x8xbf16>
    "tpu.trace_start"() <{level = 10 : i32, message = "bqd,bkd->bqk"}> : () -> ()
    %cst_33 = arith.constant dense<0.000000e+00> : vector<2x8x8xf32>
    %73 = tpu.matmul %71, %72, %cst_33 {dimension_numbers = #tpu.dot_dimension_numbers<[2], [2], [1], [1], [0, 0, 0, 1, 1, 1], [0], [0]>} : vector<2x8x8xbf16>, vector<2x8x8xbf16>, vector<2x8x8xf32> -> vector<2x8x8xf32>
    "tpu.trace_stop"() : () -> ()
    %cst_34 = arith.constant dense<0xFF800000> : vector<2x8xf32>
    %74 = vector.multi_reduction <maximumf>, %73, %cst_34 [2] : vector<2x8x8xf32> to vector<2x8xf32>
    %75 = vector.shape_cast %74 : vector<2x8xf32> to vector<2x8x1xf32>
    %76 = vector.broadcast %75 : vector<2x8x1xf32> to vector<2x8x8xf32>
    %77 = arith.subf %73, %76 : vector<2x8x8xf32>
    %78 = math.exp %77 : vector<2x8x8xf32>
    %cst_35 = arith.constant dense<0.000000e+00> : vector<2x8xf32>
    %79 = vector.multi_reduction <add>, %78, %cst_35 [2] : vector<2x8x8xf32> to vector<2x8xf32>
    %80 = vector.shape_cast %79 : vector<2x8xf32> to vector<2x8x1xf32>
    %81 = vector.broadcast %80 : vector<2x8x1xf32> to vector<2x8x8xf32>
    %82 = arith.divf %78, %81 : vector<2x8x8xf32>
    %83 = arith.truncf %82 : vector<2x8x8xf32> to vector<2x8x8xbf16>
    %84 = arith.truncf %70 : vector<2x8x8xf32> to vector<2x8x8xbf16>
    "tpu.trace_start"() <{level = 10 : i32, message = "bqk,bkd->bqd"}> : () -> ()
    %cst_36 = arith.constant dense<0.000000e+00> : vector<2x8x8xf32>
    %85 = tpu.matmul %83, %84, %cst_36 {dimension_numbers = #tpu.dot_dimension_numbers<[2], [1], [1], [2], [0, 0, 0, 1, 1, 2], [0], [0]>} : vector<2x8x8xbf16>, vector<2x8x8xbf16>, vector<2x8x8xf32> -> vector<2x8x8xf32>
    "tpu.trace_stop"() : () -> ()
    %86 = vector.shape_cast %85 : vector<2x8x8xf32> to vector<16x8xf32>
    %87 = vector.extract_strided_slice %62 {offsets = [0, 8], sizes = [16, 8], strides = [1, 1]} : vector<16x32xf32> to vector<16x8xf32>
    %88 = vector.shape_cast %87 : vector<16x8xf32> to vector<2x8x8xf32>
    %89 = vector.extract_strided_slice %63 {offsets = [0, 8], sizes = [16, 8], strides = [1, 1]} : vector<16x32xf32> to vector<16x8xf32>
    %90 = vector.shape_cast %89 : vector<16x8xf32> to vector<2x8x8xf32>
    %91 = vector.extract_strided_slice %64 {offsets = [0, 8], sizes = [16, 8], strides = [1, 1]} : vector<16x32xf32> to vector<16x8xf32>
    %92 = vector.shape_cast %91 : vector<16x8xf32> to vector<2x8x8xf32>
    %93 = arith.truncf %88 : vector<2x8x8xf32> to vector<2x8x8xbf16>
    %94 = arith.truncf %90 : vector<2x8x8xf32> to vector<2x8x8xbf16>
    "tpu.trace_start"() <{level = 10 : i32, message = "bqd,bkd->bqk"}> : () -> ()
    %cst_37 = arith.constant dense<0.000000e+00> : vector<2x8x8xf32>
    %95 = tpu.matmul %93, %94, %cst_37 {dimension_numbers = #tpu.dot_dimension_numbers<[2], [2], [1], [1], [0, 0, 0, 1, 1, 1], [0], [0]>} : vector<2x8x8xbf16>, vector<2x8x8xbf16>, vector<2x8x8xf32> -> vector<2x8x8xf32>
    "tpu.trace_stop"() : () -> ()
    %cst_38 = arith.constant dense<0xFF800000> : vector<2x8xf32>
    %96 = vector.multi_reduction <maximumf>, %95, %cst_38 [2] : vector<2x8x8xf32> to vector<2x8xf32>
    %97 = vector.shape_cast %96 : vector<2x8xf32> to vector<2x8x1xf32>
    %98 = vector.broadcast %97 : vector<2x8x1xf32> to vector<2x8x8xf32>
    %99 = arith.subf %95, %98 : vector<2x8x8xf32>
    %100 = math.exp %99 : vector<2x8x8xf32>
    %cst_39 = arith.constant dense<0.000000e+00> : vector<2x8xf32>
    %101 = vector.multi_reduction <add>, %100, %cst_39 [2] : vector<2x8x8xf32> to vector<2x8xf32>
    %102 = vector.shape_cast %101 : vector<2x8xf32> to vector<2x8x1xf32>
    %103 = vector.broadcast %102 : vector<2x8x1xf32> to vector<2x8x8xf32>
    %104 = arith.divf %100, %103 : vector<2x8x8xf32>
    %105 = arith.truncf %104 : vector<2x8x8xf32> to vector<2x8x8xbf16>
    %106 = arith.truncf %92 : vector<2x8x8xf32> to vector<2x8x8xbf16>
    "tpu.trace_start"() <{level = 10 : i32, message = "bqk,bkd->bqd"}> : () -> ()
    %cst_40 = arith.constant dense<0.000000e+00> : vector<2x8x8xf32>
    %107 = tpu.matmul %105, %106, %cst_40 {dimension_numbers = #tpu.dot_dimension_numbers<[2], [1], [1], [2], [0, 0, 0, 1, 1, 2], [0], [0]>} : vector<2x8x8xbf16>, vector<2x8x8xbf16>, vector<2x8x8xf32> -> vector<2x8x8xf32>
    "tpu.trace_stop"() : () -> ()
    %108 = vector.shape_cast %107 : vector<2x8x8xf32> to vector<16x8xf32>
    %109 = vector.extract_strided_slice %62 {offsets = [0, 16], sizes = [16, 8], strides = [1, 1]} : vector<16x32xf32> to vector<16x8xf32>
    %110 = vector.shape_cast %109 : vector<16x8xf32> to vector<2x8x8xf32>
    %111 = vector.extract_strided_slice %63 {offsets = [0, 16], sizes = [16, 8], strides = [1, 1]} : vector<16x32xf32> to vector<16x8xf32>
    %112 = vector.shape_cast %111 : vector<16x8xf32> to vector<2x8x8xf32>
    %113 = vector.extract_strided_slice %64 {offsets = [0, 16], sizes = [16, 8], strides = [1, 1]} : vector<16x32xf32> to vector<16x8xf32>
    %114 = vector.shape_cast %113 : vector<16x8xf32> to vector<2x8x8xf32>
    %115 = arith.truncf %110 : vector<2x8x8xf32> to vector<2x8x8xbf16>
    %116 = arith.truncf %112 : vector<2x8x8xf32> to vector<2x8x8xbf16>
    "tpu.trace_start"() <{level = 10 : i32, message = "bqd,bkd->bqk"}> : () -> ()
    %cst_41 = arith.constant dense<0.000000e+00> : vector<2x8x8xf32>
    %117 = tpu.matmul %115, %116, %cst_41 {dimension_numbers = #tpu.dot_dimension_numbers<[2], [2], [1], [1], [0, 0, 0, 1, 1, 1], [0], [0]>} : vector<2x8x8xbf16>, vector<2x8x8xbf16>, vector<2x8x8xf32> -> vector<2x8x8xf32>
    "tpu.trace_stop"() : () -> ()
    %cst_42 = arith.constant dense<0xFF800000> : vector<2x8xf32>
    %118 = vector.multi_reduction <maximumf>, %117, %cst_42 [2] : vector<2x8x8xf32> to vector<2x8xf32>
    %119 = vector.shape_cast %118 : vector<2x8xf32> to vector<2x8x1xf32>
    %120 = vector.broadcast %119 : vector<2x8x1xf32> to vector<2x8x8xf32>
    %121 = arith.subf %117, %120 : vector<2x8x8xf32>
    %122 = math.exp %121 : vector<2x8x8xf32>
    %cst_43 = arith.constant dense<0.000000e+00> : vector<2x8xf32>
    %123 = vector.multi_reduction <add>, %122, %cst_43 [2] : vector<2x8x8xf32> to vector<2x8xf32>
    %124 = vector.shape_cast %123 : vector<2x8xf32> to vector<2x8x1xf32>
    %125 = vector.broadcast %124 : vector<2x8x1xf32> to vector<2x8x8xf32>
    %126 = arith.divf %122, %125 : vector<2x8x8xf32>
    %127 = arith.truncf %126 : vector<2x8x8xf32> to vector<2x8x8xbf16>
    %128 = arith.truncf %114 : vector<2x8x8xf32> to vector<2x8x8xbf16>
    "tpu.trace_start"() <{level = 10 : i32, message = "bqk,bkd->bqd"}> : () -> ()
    %cst_44 = arith.constant dense<0.000000e+00> : vector<2x8x8xf32>
    %129 = tpu.matmul %127, %128, %cst_44 {dimension_numbers = #tpu.dot_dimension_numbers<[2], [1], [1], [2], [0, 0, 0, 1, 1, 2], [0], [0]>} : vector<2x8x8xbf16>, vector<2x8x8xbf16>, vector<2x8x8xf32> -> vector<2x8x8xf32>
    "tpu.trace_stop"() : () -> ()
    %130 = vector.shape_cast %129 : vector<2x8x8xf32> to vector<16x8xf32>
    %131 = vector.extract_strided_slice %62 {offsets = [0, 24], sizes = [16, 8], strides = [1, 1]} : vector<16x32xf32> to vector<16x8xf32>
    %132 = vector.shape_cast %131 : vector<16x8xf32> to vector<2x8x8xf32>
    %133 = vector.extract_strided_slice %63 {offsets = [0, 24], sizes = [16, 8], strides = [1, 1]} : vector<16x32xf32> to vector<16x8xf32>
    %134 = vector.shape_cast %133 : vector<16x8xf32> to vector<2x8x8xf32>
    %135 = vector.extract_strided_slice %64 {offsets = [0, 24], sizes = [16, 8], strides = [1, 1]} : vector<16x32xf32> to vector<16x8xf32>
    %136 = vector.shape_cast %135 : vector<16x8xf32> to vector<2x8x8xf32>
    %137 = arith.truncf %132 : vector<2x8x8xf32> to vector<2x8x8xbf16>
    %138 = arith.truncf %134 : vector<2x8x8xf32> to vector<2x8x8xbf16>
    "tpu.trace_start"() <{level = 10 : i32, message = "bqd,bkd->bqk"}> : () -> ()
    %cst_45 = arith.constant dense<0.000000e+00> : vector<2x8x8xf32>
    %139 = tpu.matmul %137, %138, %cst_45 {dimension_numbers = #tpu.dot_dimension_numbers<[2], [2], [1], [1], [0, 0, 0, 1, 1, 1], [0], [0]>} : vector<2x8x8xbf16>, vector<2x8x8xbf16>, vector<2x8x8xf32> -> vector<2x8x8xf32>
    "tpu.trace_stop"() : () -> ()
    %cst_46 = arith.constant dense<0xFF800000> : vector<2x8xf32>
    %140 = vector.multi_reduction <maximumf>, %139, %cst_46 [2] : vector<2x8x8xf32> to vector<2x8xf32>
    %141 = vector.shape_cast %140 : vector<2x8xf32> to vector<2x8x1xf32>
    %142 = vector.broadcast %141 : vector<2x8x1xf32> to vector<2x8x8xf32>
    %143 = arith.subf %139, %142 : vector<2x8x8xf32>
    %144 = math.exp %143 : vector<2x8x8xf32>
    %cst_47 = arith.constant dense<0.000000e+00> : vector<2x8xf32>
    %145 = vector.multi_reduction <add>, %144, %cst_47 [2] : vector<2x8x8xf32> to vector<2x8xf32>
    %146 = vector.shape_cast %145 : vector<2x8xf32> to vector<2x8x1xf32>
    %147 = vector.broadcast %146 : vector<2x8x1xf32> to vector<2x8x8xf32>
    %148 = arith.divf %144, %147 : vector<2x8x8xf32>
    %149 = arith.truncf %148 : vector<2x8x8xf32> to vector<2x8x8xbf16>
    %150 = arith.truncf %136 : vector<2x8x8xf32> to vector<2x8x8xbf16>
    "tpu.trace_start"() <{level = 10 : i32, message = "bqk,bkd->bqd"}> : () -> ()
    %cst_48 = arith.constant dense<0.000000e+00> : vector<2x8x8xf32>
    %151 = tpu.matmul %149, %150, %cst_48 {dimension_numbers = #tpu.dot_dimension_numbers<[2], [1], [1], [2], [0, 0, 0, 1, 1, 2], [0], [0]>} : vector<2x8x8xbf16>, vector<2x8x8xbf16>, vector<2x8x8xf32> -> vector<2x8x8xf32>
    "tpu.trace_stop"() : () -> ()
    %152 = vector.shape_cast %151 : vector<2x8x8xf32> to vector<16x8xf32>
    %153 = tpu.concatenate %86, %108, %130, %152 in 1 : vector<16x8xf32>, vector<16x8xf32>, vector<16x8xf32>, vector<16x8xf32> -> vector<16x32xf32>
    %154 = arith.truncf %153 : vector<16x32xf32> to vector<16x32xbf16>
    %cst_49 = arith.constant dense<0.000000e+00> : vector<16x32xf32>
    %155 = tpu.matmul %154, %28, %cst_49 {dimension_numbers = #tpu.dot_dimension_numbers<[1], [0], [0], [1], [0, 0, 1, 1], [], []>} : vector<16x32xbf16>, vector<32x32xbf16>, vector<16x32xf32> -> vector<16x32xf32>
    %156 = vector.broadcast %59 : vector<1x32xf32> to vector<16x32xf32>
    %157 = arith.addf %155, %156 : vector<16x32xf32>
    %158 = arith.addf %23, %157 : vector<16x32xf32>
    %cst_50 = arith.constant dense<0.000000e+00> : vector<16xf32>
    %159 = vector.multi_reduction <add>, %158, %cst_50 [1] : vector<16x32xf32> to vector<16xf32>
    %160 = vector.shape_cast %159 : vector<16xf32> to vector<16x1xf32>
    %cst_51 = arith.constant 3.200000e+01 : f32
    %161 = vector.broadcast %cst_51 : f32 to vector<16x1xf32>
    %162 = arith.divf %160, %161 : vector<16x1xf32>
    %163 = vector.broadcast %162 : vector<16x1xf32> to vector<16x32xf32>
    %164 = arith.subf %158, %163 : vector<16x32xf32>
    %165 = arith.mulf %164, %164 : vector<16x32xf32>
    %cst_52 = arith.constant dense<0.000000e+00> : vector<16xf32>
    %166 = vector.multi_reduction <add>, %165, %cst_52 [1] : vector<16x32xf32> to vector<16xf32>
    %167 = vector.shape_cast %166 : vector<16xf32> to vector<16x1xf32>
    %cst_53 = arith.constant 3.200000e+01 : f32
    %168 = vector.broadcast %cst_53 : f32 to vector<16x1xf32>
    %169 = arith.divf %167, %168 : vector<16x1xf32>
    %cst_54 = arith.constant 9.99999974E-6 : f32
    %170 = vector.broadcast %cst_54 : f32 to vector<16x1xf32>
    %171 = arith.addf %169, %170 : vector<16x1xf32>
    %172 = math.rsqrt %171 : vector<16x1xf32>
    %173 = vector.broadcast %172 : vector<16x1xf32> to vector<16x32xf32>
    %174 = arith.mulf %164, %173 : vector<16x32xf32>
    %c8 = arith.constant 8 : index
    %c0_55 = arith.constant 0 : index
    %175 = vector.load %arg10[%c8, %c0_55] : memref<48x128xf32, #tpu.memory_space<vmem>>, vector<1x32xf32>
    %176 = vector.broadcast %175 : vector<1x32xf32> to vector<16x32xf32>
    %177 = arith.mulf %174, %176 : vector<16x32xf32>
    %c9 = arith.constant 9 : index
    %c0_56 = arith.constant 0 : index
    %178 = vector.load %arg10[%c9, %c0_56] : memref<48x128xf32, #tpu.memory_space<vmem>>, vector<1x32xf32>
    %179 = vector.broadcast %178 : vector<1x32xf32> to vector<16x32xf32>
    %180 = arith.addf %177, %179 : vector<16x32xf32>
    %181 = arith.truncf %180 : vector<16x32xf32> to vector<16x32xbf16>
    %cst_57 = arith.constant dense<0.000000e+00> : vector<16x64xf32>
    %182 = tpu.matmul %181, %29, %cst_57 {dimension_numbers = #tpu.dot_dimension_numbers<[1], [0], [0], [1], [0, 0, 1, 1], [], []>} : vector<16x32xbf16>, vector<32x64xbf16>, vector<16x64xf32> -> vector<16x64xf32>
    %c10 = arith.constant 10 : index
    %c0_58 = arith.constant 0 : index
    %183 = vector.load %arg10[%c10, %c0_58] : memref<48x128xf32, #tpu.memory_space<vmem>>, vector<1x64xf32>
    %184 = vector.broadcast %183 : vector<1x64xf32> to vector<16x64xf32>
    %185 = arith.addf %182, %184 : vector<16x64xf32>
    %cst_59 = arith.constant 0.000000e+00 : f32
    %186 = vector.broadcast %cst_59 : f32 to vector<16x64xf32>
    %187 = arith.maximumf %185, %186 : vector<16x64xf32>
    %188 = arith.truncf %187 : vector<16x64xf32> to vector<16x64xbf16>
    %cst_60 = arith.constant dense<0.000000e+00> : vector<16x32xf32>
    %189 = tpu.matmul %188, %31, %cst_60 {dimension_numbers = #tpu.dot_dimension_numbers<[1], [0], [0], [1], [0, 0, 1, 1], [], []>} : vector<16x64xbf16>, vector<64x32xbf16>, vector<16x32xf32> -> vector<16x32xf32>
    %190 = arith.addf %158, %189 : vector<16x32xf32>
    %c11 = arith.constant 11 : index
    %c0_61 = arith.constant 0 : index
    %191 = vector.load %arg10[%c11, %c0_61] : memref<48x128xf32, #tpu.memory_space<vmem>>, vector<1x32xf32>
    %192 = vector.broadcast %191 : vector<1x32xf32> to vector<16x32xf32>
    %193 = arith.addf %190, %192 : vector<16x32xf32>
    %c1_62 = arith.constant 1 : index
    %c0_63 = arith.constant 0 : index
    %c0_64 = arith.constant 0 : index
    %194 = vector.load %arg6[%c1_62, %c0_63, %c0_64] : memref<2x32x192xbf16, #tpu.memory_space<vmem>>, vector<1x32x192xbf16>
    %195 = vector.shape_cast %194 : vector<1x32x192xbf16> to vector<32x192xbf16>
    %196 = vector.extract_strided_slice %195 {offsets = [0, 0], sizes = [32, 96], strides = [1, 1]} : vector<32x192xbf16> to vector<32x96xbf16>
    %197 = vector.extract_strided_slice %195 {offsets = [0, 96], sizes = [32, 32], strides = [1, 1]} : vector<32x192xbf16> to vector<32x32xbf16>
    %198 = vector.extract_strided_slice %195 {offsets = [0, 128], sizes = [32, 64], strides = [1, 1]} : vector<32x192xbf16> to vector<32x64xbf16>
    %c1_65 = arith.constant 1 : index
    %c0_66 = arith.constant 0 : index
    %c0_67 = arith.constant 0 : index
    %199 = vector.load %arg7[%c1_65, %c0_66, %c0_67] : memref<2x64x32xbf16, #tpu.memory_space<vmem>>, vector<1x64x32xbf16>
    %200 = vector.shape_cast %199 : vector<1x64x32xbf16> to vector<64x32xbf16>
    %cst_68 = arith.constant dense<0.000000e+00> : vector<16xf32>
    %201 = vector.multi_reduction <add>, %193, %cst_68 [1] : vector<16x32xf32> to vector<16xf32>
    %202 = vector.shape_cast %201 : vector<16xf32> to vector<16x1xf32>
    %cst_69 = arith.constant 3.200000e+01 : f32
    %203 = vector.broadcast %cst_69 : f32 to vector<16x1xf32>
    %204 = arith.divf %202, %203 : vector<16x1xf32>
    %205 = vector.broadcast %204 : vector<16x1xf32> to vector<16x32xf32>
    %206 = arith.subf %193, %205 : vector<16x32xf32>
    %207 = arith.mulf %206, %206 : vector<16x32xf32>
    %cst_70 = arith.constant dense<0.000000e+00> : vector<16xf32>
    %208 = vector.multi_reduction <add>, %207, %cst_70 [1] : vector<16x32xf32> to vector<16xf32>
    %209 = vector.shape_cast %208 : vector<16xf32> to vector<16x1xf32>
    %cst_71 = arith.constant 3.200000e+01 : f32
    %210 = vector.broadcast %cst_71 : f32 to vector<16x1xf32>
    %211 = arith.divf %209, %210 : vector<16x1xf32>
    %cst_72 = arith.constant 9.99999974E-6 : f32
    %212 = vector.broadcast %cst_72 : f32 to vector<16x1xf32>
    %213 = arith.addf %211, %212 : vector<16x1xf32>
    %214 = math.rsqrt %213 : vector<16x1xf32>
    %215 = vector.broadcast %214 : vector<16x1xf32> to vector<16x32xf32>
    %216 = arith.mulf %206, %215 : vector<16x32xf32>
    %c12 = arith.constant 12 : index
    %c0_73 = arith.constant 0 : index
    %217 = vector.load %arg10[%c12, %c0_73] : memref<48x128xf32, #tpu.memory_space<vmem>>, vector<1x32xf32>
    %218 = vector.broadcast %217 : vector<1x32xf32> to vector<16x32xf32>
    %219 = arith.mulf %216, %218 : vector<16x32xf32>
    %c13 = arith.constant 13 : index
    %c0_74 = arith.constant 0 : index
    %220 = vector.load %arg10[%c13, %c0_74] : memref<48x128xf32, #tpu.memory_space<vmem>>, vector<1x32xf32>
    %221 = vector.broadcast %220 : vector<1x32xf32> to vector<16x32xf32>
    %222 = arith.addf %219, %221 : vector<16x32xf32>
    %223 = arith.truncf %222 : vector<16x32xf32> to vector<16x32xbf16>
    %cst_75 = arith.constant dense<0.000000e+00> : vector<16x96xf32>
    %224 = tpu.matmul %223, %196, %cst_75 {dimension_numbers = #tpu.dot_dimension_numbers<[1], [0], [0], [1], [0, 0, 1, 1], [], []>} : vector<16x32xbf16>, vector<32x96xbf16>, vector<16x96xf32> -> vector<16x96xf32>
    %c14 = arith.constant 14 : index
    %c0_76 = arith.constant 0 : index
    %225 = vector.load %arg10[%c14, %c0_76] : memref<48x128xf32, #tpu.memory_space<vmem>>, vector<1x96xf32>
    %226 = vector.broadcast %225 : vector<1x96xf32> to vector<16x96xf32>
    %227 = arith.addf %224, %226 : vector<16x96xf32>
    %c15 = arith.constant 15 : index
    %c0_77 = arith.constant 0 : index
    %228 = vector.load %arg10[%c15, %c0_77] : memref<48x128xf32, #tpu.memory_space<vmem>>, vector<1x32xf32>
    %229 = vector.extract_strided_slice %227 {offsets = [0, 0], sizes = [16, 32], strides = [1, 1]} : vector<16x96xf32> to vector<16x32xf32>
    %cst_78 = arith.constant 0.353553385 : f32
    %230 = vector.broadcast %cst_78 : f32 to vector<16x32xf32>
    %231 = arith.mulf %229, %230 : vector<16x32xf32>
    %232 = vector.extract_strided_slice %227 {offsets = [0, 32], sizes = [16, 32], strides = [1, 1]} : vector<16x96xf32> to vector<16x32xf32>
    %233 = vector.extract_strided_slice %227 {offsets = [0, 64], sizes = [16, 32], strides = [1, 1]} : vector<16x96xf32> to vector<16x32xf32>
    %234 = vector.extract_strided_slice %231 {offsets = [0, 0], sizes = [16, 8], strides = [1, 1]} : vector<16x32xf32> to vector<16x8xf32>
    %235 = vector.shape_cast %234 : vector<16x8xf32> to vector<2x8x8xf32>
    %236 = vector.extract_strided_slice %232 {offsets = [0, 0], sizes = [16, 8], strides = [1, 1]} : vector<16x32xf32> to vector<16x8xf32>
    %237 = vector.shape_cast %236 : vector<16x8xf32> to vector<2x8x8xf32>
    %238 = vector.extract_strided_slice %233 {offsets = [0, 0], sizes = [16, 8], strides = [1, 1]} : vector<16x32xf32> to vector<16x8xf32>
    %239 = vector.shape_cast %238 : vector<16x8xf32> to vector<2x8x8xf32>
    %240 = arith.truncf %235 : vector<2x8x8xf32> to vector<2x8x8xbf16>
    %241 = arith.truncf %237 : vector<2x8x8xf32> to vector<2x8x8xbf16>
    "tpu.trace_start"() <{level = 10 : i32, message = "bqd,bkd->bqk"}> : () -> ()
    %cst_79 = arith.constant dense<0.000000e+00> : vector<2x8x8xf32>
    %242 = tpu.matmul %240, %241, %cst_79 {dimension_numbers = #tpu.dot_dimension_numbers<[2], [2], [1], [1], [0, 0, 0, 1, 1, 1], [0], [0]>} : vector<2x8x8xbf16>, vector<2x8x8xbf16>, vector<2x8x8xf32> -> vector<2x8x8xf32>
    "tpu.trace_stop"() : () -> ()
    %cst_80 = arith.constant dense<0xFF800000> : vector<2x8xf32>
    %243 = vector.multi_reduction <maximumf>, %242, %cst_80 [2] : vector<2x8x8xf32> to vector<2x8xf32>
    %244 = vector.shape_cast %243 : vector<2x8xf32> to vector<2x8x1xf32>
    %245 = vector.broadcast %244 : vector<2x8x1xf32> to vector<2x8x8xf32>
    %246 = arith.subf %242, %245 : vector<2x8x8xf32>
    %247 = math.exp %246 : vector<2x8x8xf32>
    %cst_81 = arith.constant dense<0.000000e+00> : vector<2x8xf32>
    %248 = vector.multi_reduction <add>, %247, %cst_81 [2] : vector<2x8x8xf32> to vector<2x8xf32>
    %249 = vector.shape_cast %248 : vector<2x8xf32> to vector<2x8x1xf32>
    %250 = vector.broadcast %249 : vector<2x8x1xf32> to vector<2x8x8xf32>
    %251 = arith.divf %247, %250 : vector<2x8x8xf32>
    %252 = arith.truncf %251 : vector<2x8x8xf32> to vector<2x8x8xbf16>
    %253 = arith.truncf %239 : vector<2x8x8xf32> to vector<2x8x8xbf16>
    "tpu.trace_start"() <{level = 10 : i32, message = "bqk,bkd->bqd"}> : () -> ()
    %cst_82 = arith.constant dense<0.000000e+00> : vector<2x8x8xf32>
    %254 = tpu.matmul %252, %253, %cst_82 {dimension_numbers = #tpu.dot_dimension_numbers<[2], [1], [1], [2], [0, 0, 0, 1, 1, 2], [0], [0]>} : vector<2x8x8xbf16>, vector<2x8x8xbf16>, vector<2x8x8xf32> -> vector<2x8x8xf32>
    "tpu.trace_stop"() : () -> ()
    %255 = vector.shape_cast %254 : vector<2x8x8xf32> to vector<16x8xf32>
    %256 = vector.extract_strided_slice %231 {offsets = [0, 8], sizes = [16, 8], strides = [1, 1]} : vector<16x32xf32> to vector<16x8xf32>
    %257 = vector.shape_cast %256 : vector<16x8xf32> to vector<2x8x8xf32>
    %258 = vector.extract_strided_slice %232 {offsets = [0, 8], sizes = [16, 8], strides = [1, 1]} : vector<16x32xf32> to vector<16x8xf32>
    %259 = vector.shape_cast %258 : vector<16x8xf32> to vector<2x8x8xf32>
    %260 = vector.extract_strided_slice %233 {offsets = [0, 8], sizes = [16, 8], strides = [1, 1]} : vector<16x32xf32> to vector<16x8xf32>
    %261 = vector.shape_cast %260 : vector<16x8xf32> to vector<2x8x8xf32>
    %262 = arith.truncf %257 : vector<2x8x8xf32> to vector<2x8x8xbf16>
    %263 = arith.truncf %259 : vector<2x8x8xf32> to vector<2x8x8xbf16>
    "tpu.trace_start"() <{level = 10 : i32, message = "bqd,bkd->bqk"}> : () -> ()
    %cst_83 = arith.constant dense<0.000000e+00> : vector<2x8x8xf32>
    %264 = tpu.matmul %262, %263, %cst_83 {dimension_numbers = #tpu.dot_dimension_numbers<[2], [2], [1], [1], [0, 0, 0, 1, 1, 1], [0], [0]>} : vector<2x8x8xbf16>, vector<2x8x8xbf16>, vector<2x8x8xf32> -> vector<2x8x8xf32>
    "tpu.trace_stop"() : () -> ()
    %cst_84 = arith.constant dense<0xFF800000> : vector<2x8xf32>
    %265 = vector.multi_reduction <maximumf>, %264, %cst_84 [2] : vector<2x8x8xf32> to vector<2x8xf32>
    %266 = vector.shape_cast %265 : vector<2x8xf32> to vector<2x8x1xf32>
    %267 = vector.broadcast %266 : vector<2x8x1xf32> to vector<2x8x8xf32>
    %268 = arith.subf %264, %267 : vector<2x8x8xf32>
    %269 = math.exp %268 : vector<2x8x8xf32>
    %cst_85 = arith.constant dense<0.000000e+00> : vector<2x8xf32>
    %270 = vector.multi_reduction <add>, %269, %cst_85 [2] : vector<2x8x8xf32> to vector<2x8xf32>
    %271 = vector.shape_cast %270 : vector<2x8xf32> to vector<2x8x1xf32>
    %272 = vector.broadcast %271 : vector<2x8x1xf32> to vector<2x8x8xf32>
    %273 = arith.divf %269, %272 : vector<2x8x8xf32>
    %274 = arith.truncf %273 : vector<2x8x8xf32> to vector<2x8x8xbf16>
    %275 = arith.truncf %261 : vector<2x8x8xf32> to vector<2x8x8xbf16>
    "tpu.trace_start"() <{level = 10 : i32, message = "bqk,bkd->bqd"}> : () -> ()
    %cst_86 = arith.constant dense<0.000000e+00> : vector<2x8x8xf32>
    %276 = tpu.matmul %274, %275, %cst_86 {dimension_numbers = #tpu.dot_dimension_numbers<[2], [1], [1], [2], [0, 0, 0, 1, 1, 2], [0], [0]>} : vector<2x8x8xbf16>, vector<2x8x8xbf16>, vector<2x8x8xf32> -> vector<2x8x8xf32>
    "tpu.trace_stop"() : () -> ()
    %277 = vector.shape_cast %276 : vector<2x8x8xf32> to vector<16x8xf32>
    %278 = vector.extract_strided_slice %231 {offsets = [0, 16], sizes = [16, 8], strides = [1, 1]} : vector<16x32xf32> to vector<16x8xf32>
    %279 = vector.shape_cast %278 : vector<16x8xf32> to vector<2x8x8xf32>
    %280 = vector.extract_strided_slice %232 {offsets = [0, 16], sizes = [16, 8], strides = [1, 1]} : vector<16x32xf32> to vector<16x8xf32>
    %281 = vector.shape_cast %280 : vector<16x8xf32> to vector<2x8x8xf32>
    %282 = vector.extract_strided_slice %233 {offsets = [0, 16], sizes = [16, 8], strides = [1, 1]} : vector<16x32xf32> to vector<16x8xf32>
    %283 = vector.shape_cast %282 : vector<16x8xf32> to vector<2x8x8xf32>
    %284 = arith.truncf %279 : vector<2x8x8xf32> to vector<2x8x8xbf16>
    %285 = arith.truncf %281 : vector<2x8x8xf32> to vector<2x8x8xbf16>
    "tpu.trace_start"() <{level = 10 : i32, message = "bqd,bkd->bqk"}> : () -> ()
    %cst_87 = arith.constant dense<0.000000e+00> : vector<2x8x8xf32>
    %286 = tpu.matmul %284, %285, %cst_87 {dimension_numbers = #tpu.dot_dimension_numbers<[2], [2], [1], [1], [0, 0, 0, 1, 1, 1], [0], [0]>} : vector<2x8x8xbf16>, vector<2x8x8xbf16>, vector<2x8x8xf32> -> vector<2x8x8xf32>
    "tpu.trace_stop"() : () -> ()
    %cst_88 = arith.constant dense<0xFF800000> : vector<2x8xf32>
    %287 = vector.multi_reduction <maximumf>, %286, %cst_88 [2] : vector<2x8x8xf32> to vector<2x8xf32>
    %288 = vector.shape_cast %287 : vector<2x8xf32> to vector<2x8x1xf32>
    %289 = vector.broadcast %288 : vector<2x8x1xf32> to vector<2x8x8xf32>
    %290 = arith.subf %286, %289 : vector<2x8x8xf32>
    %291 = math.exp %290 : vector<2x8x8xf32>
    %cst_89 = arith.constant dense<0.000000e+00> : vector<2x8xf32>
    %292 = vector.multi_reduction <add>, %291, %cst_89 [2] : vector<2x8x8xf32> to vector<2x8xf32>
    %293 = vector.shape_cast %292 : vector<2x8xf32> to vector<2x8x1xf32>
    %294 = vector.broadcast %293 : vector<2x8x1xf32> to vector<2x8x8xf32>
    %295 = arith.divf %291, %294 : vector<2x8x8xf32>
    %296 = arith.truncf %295 : vector<2x8x8xf32> to vector<2x8x8xbf16>
    %297 = arith.truncf %283 : vector<2x8x8xf32> to vector<2x8x8xbf16>
    "tpu.trace_start"() <{level = 10 : i32, message = "bqk,bkd->bqd"}> : () -> ()
    %cst_90 = arith.constant dense<0.000000e+00> : vector<2x8x8xf32>
    %298 = tpu.matmul %296, %297, %cst_90 {dimension_numbers = #tpu.dot_dimension_numbers<[2], [1], [1], [2], [0, 0, 0, 1, 1, 2], [0], [0]>} : vector<2x8x8xbf16>, vector<2x8x8xbf16>, vector<2x8x8xf32> -> vector<2x8x8xf32>
    "tpu.trace_stop"() : () -> ()
    %299 = vector.shape_cast %298 : vector<2x8x8xf32> to vector<16x8xf32>
    %300 = vector.extract_strided_slice %231 {offsets = [0, 24], sizes = [16, 8], strides = [1, 1]} : vector<16x32xf32> to vector<16x8xf32>
    %301 = vector.shape_cast %300 : vector<16x8xf32> to vector<2x8x8xf32>
    %302 = vector.extract_strided_slice %232 {offsets = [0, 24], sizes = [16, 8], strides = [1, 1]} : vector<16x32xf32> to vector<16x8xf32>
    %303 = vector.shape_cast %302 : vector<16x8xf32> to vector<2x8x8xf32>
    %304 = vector.extract_strided_slice %233 {offsets = [0, 24], sizes = [16, 8], strides = [1, 1]} : vector<16x32xf32> to vector<16x8xf32>
    %305 = vector.shape_cast %304 : vector<16x8xf32> to vector<2x8x8xf32>
    %306 = arith.truncf %301 : vector<2x8x8xf32> to vector<2x8x8xbf16>
    %307 = arith.truncf %303 : vector<2x8x8xf32> to vector<2x8x8xbf16>
    "tpu.trace_start"() <{level = 10 : i32, message = "bqd,bkd->bqk"}> : () -> ()
    %cst_91 = arith.constant dense<0.000000e+00> : vector<2x8x8xf32>
    %308 = tpu.matmul %306, %307, %cst_91 {dimension_numbers = #tpu.dot_dimension_numbers<[2], [2], [1], [1], [0, 0, 0, 1, 1, 1], [0], [0]>} : vector<2x8x8xbf16>, vector<2x8x8xbf16>, vector<2x8x8xf32> -> vector<2x8x8xf32>
    "tpu.trace_stop"() : () -> ()
    %cst_92 = arith.constant dense<0xFF800000> : vector<2x8xf32>
    %309 = vector.multi_reduction <maximumf>, %308, %cst_92 [2] : vector<2x8x8xf32> to vector<2x8xf32>
    %310 = vector.shape_cast %309 : vector<2x8xf32> to vector<2x8x1xf32>
    %311 = vector.broadcast %310 : vector<2x8x1xf32> to vector<2x8x8xf32>
    %312 = arith.subf %308, %311 : vector<2x8x8xf32>
    %313 = math.exp %312 : vector<2x8x8xf32>
    %cst_93 = arith.constant dense<0.000000e+00> : vector<2x8xf32>
    %314 = vector.multi_reduction <add>, %313, %cst_93 [2] : vector<2x8x8xf32> to vector<2x8xf32>
    %315 = vector.shape_cast %314 : vector<2x8xf32> to vector<2x8x1xf32>
    %316 = vector.broadcast %315 : vector<2x8x1xf32> to vector<2x8x8xf32>
    %317 = arith.divf %313, %316 : vector<2x8x8xf32>
    %318 = arith.truncf %317 : vector<2x8x8xf32> to vector<2x8x8xbf16>
    %319 = arith.truncf %305 : vector<2x8x8xf32> to vector<2x8x8xbf16>
    "tpu.trace_start"() <{level = 10 : i32, message = "bqk,bkd->bqd"}> : () -> ()
    %cst_94 = arith.constant dense<0.000000e+00> : vector<2x8x8xf32>
    %320 = tpu.matmul %318, %319, %cst_94 {dimension_numbers = #tpu.dot_dimension_numbers<[2], [1], [1], [2], [0, 0, 0, 1, 1, 2], [0], [0]>} : vector<2x8x8xbf16>, vector<2x8x8xbf16>, vector<2x8x8xf32> -> vector<2x8x8xf32>
    "tpu.trace_stop"() : () -> ()
    %321 = vector.shape_cast %320 : vector<2x8x8xf32> to vector<16x8xf32>
    %322 = tpu.concatenate %255, %277, %299, %321 in 1 : vector<16x8xf32>, vector<16x8xf32>, vector<16x8xf32>, vector<16x8xf32> -> vector<16x32xf32>
    %323 = arith.truncf %322 : vector<16x32xf32> to vector<16x32xbf16>
    %cst_95 = arith.constant dense<0.000000e+00> : vector<16x32xf32>
    %324 = tpu.matmul %323, %197, %cst_95 {dimension_numbers = #tpu.dot_dimension_numbers<[1], [0], [0], [1], [0, 0, 1, 1], [], []>} : vector<16x32xbf16>, vector<32x32xbf16>, vector<16x32xf32> -> vector<16x32xf32>
    %325 = vector.broadcast %228 : vector<1x32xf32> to vector<16x32xf32>
    %326 = arith.addf %324, %325 : vector<16x32xf32>
    %327 = arith.addf %193, %326 : vector<16x32xf32>
    %cst_96 = arith.constant dense<0.000000e+00> : vector<16xf32>
    %328 = vector.multi_reduction <add>, %327, %cst_96 [1] : vector<16x32xf32> to vector<16xf32>
    %329 = vector.shape_cast %328 : vector<16xf32> to vector<16x1xf32>
    %cst_97 = arith.constant 3.200000e+01 : f32
    %330 = vector.broadcast %cst_97 : f32 to vector<16x1xf32>
    %331 = arith.divf %329, %330 : vector<16x1xf32>
    %332 = vector.broadcast %331 : vector<16x1xf32> to vector<16x32xf32>
    %333 = arith.subf %327, %332 : vector<16x32xf32>
    %334 = arith.mulf %333, %333 : vector<16x32xf32>
    %cst_98 = arith.constant dense<0.000000e+00> : vector<16xf32>
    %335 = vector.multi_reduction <add>, %334, %cst_98 [1] : vector<16x32xf32> to vector<16xf32>
    %336 = vector.shape_cast %335 : vector<16xf32> to vector<16x1xf32>
    %cst_99 = arith.constant 3.200000e+01 : f32
    %337 = vector.broadcast %cst_99 : f32 to vector<16x1xf32>
    %338 = arith.divf %336, %337 : vector<16x1xf32>
    %cst_100 = arith.constant 9.99999974E-6 : f32
    %339 = vector.broadcast %cst_100 : f32 to vector<16x1xf32>
    %340 = arith.addf %338, %339 : vector<16x1xf32>
    %341 = math.rsqrt %340 : vector<16x1xf32>
    %342 = vector.broadcast %341 : vector<16x1xf32> to vector<16x32xf32>
    %343 = arith.mulf %333, %342 : vector<16x32xf32>
    %c16 = arith.constant 16 : index
    %c0_101 = arith.constant 0 : index
    %344 = vector.load %arg10[%c16, %c0_101] : memref<48x128xf32, #tpu.memory_space<vmem>>, vector<1x32xf32>
    %345 = vector.broadcast %344 : vector<1x32xf32> to vector<16x32xf32>
    %346 = arith.mulf %343, %345 : vector<16x32xf32>
    %c17 = arith.constant 17 : index
    %c0_102 = arith.constant 0 : index
    %347 = vector.load %arg10[%c17, %c0_102] : memref<48x128xf32, #tpu.memory_space<vmem>>, vector<1x32xf32>
    %348 = vector.broadcast %347 : vector<1x32xf32> to vector<16x32xf32>
    %349 = arith.addf %346, %348 : vector<16x32xf32>
    %350 = arith.truncf %349 : vector<16x32xf32> to vector<16x32xbf16>
    %cst_103 = arith.constant dense<0.000000e+00> : vector<16x64xf32>
    %351 = tpu.matmul %350, %198, %cst_103 {dimension_numbers = #tpu.dot_dimension_numbers<[1], [0], [0], [1], [0, 0, 1, 1], [], []>} : vector<16x32xbf16>, vector<32x64xbf16>, vector<16x64xf32> -> vector<16x64xf32>
    %c18 = arith.constant 18 : index
    %c0_104 = arith.constant 0 : index
    %352 = vector.load %arg10[%c18, %c0_104] : memref<48x128xf32, #tpu.memory_space<vmem>>, vector<1x64xf32>
    %353 = vector.broadcast %352 : vector<1x64xf32> to vector<16x64xf32>
    %354 = arith.addf %351, %353 : vector<16x64xf32>
    %cst_105 = arith.constant 0.000000e+00 : f32
    %355 = vector.broadcast %cst_105 : f32 to vector<16x64xf32>
    %356 = arith.maximumf %354, %355 : vector<16x64xf32>
    %357 = arith.truncf %356 : vector<16x64xf32> to vector<16x64xbf16>
    %cst_106 = arith.constant dense<0.000000e+00> : vector<16x32xf32>
    %358 = tpu.matmul %357, %200, %cst_106 {dimension_numbers = #tpu.dot_dimension_numbers<[1], [0], [0], [1], [0, 0, 1, 1], [], []>} : vector<16x64xbf16>, vector<64x32xbf16>, vector<16x32xf32> -> vector<16x32xf32>
    %359 = arith.addf %327, %358 : vector<16x32xf32>
    %c19 = arith.constant 19 : index
    %c0_107 = arith.constant 0 : index
    %360 = vector.load %arg10[%c19, %c0_107] : memref<48x128xf32, #tpu.memory_space<vmem>>, vector<1x32xf32>
    %361 = vector.broadcast %360 : vector<1x32xf32> to vector<16x32xf32>
    %362 = arith.addf %359, %361 : vector<16x32xf32>
    %cst_108 = arith.constant dense<0.000000e+00> : vector<16xf32>
    %363 = vector.multi_reduction <add>, %362, %cst_108 [1] : vector<16x32xf32> to vector<16xf32>
    %364 = vector.shape_cast %363 : vector<16xf32> to vector<16x1xf32>
    %cst_109 = arith.constant 3.200000e+01 : f32
    %365 = vector.broadcast %cst_109 : f32 to vector<16x1xf32>
    %366 = arith.divf %364, %365 : vector<16x1xf32>
    %367 = vector.broadcast %366 : vector<16x1xf32> to vector<16x32xf32>
    %368 = arith.subf %362, %367 : vector<16x32xf32>
    %369 = arith.mulf %368, %368 : vector<16x32xf32>
    %cst_110 = arith.constant dense<0.000000e+00> : vector<16xf32>
    %370 = vector.multi_reduction <add>, %369, %cst_110 [1] : vector<16x32xf32> to vector<16xf32>
    %371 = vector.shape_cast %370 : vector<16xf32> to vector<16x1xf32>
    %cst_111 = arith.constant 3.200000e+01 : f32
    %372 = vector.broadcast %cst_111 : f32 to vector<16x1xf32>
    %373 = arith.divf %371, %372 : vector<16x1xf32>
    %cst_112 = arith.constant 9.99999974E-6 : f32
    %374 = vector.broadcast %cst_112 : f32 to vector<16x1xf32>
    %375 = arith.addf %373, %374 : vector<16x1xf32>
    %376 = math.rsqrt %375 : vector<16x1xf32>
    %377 = vector.broadcast %376 : vector<16x1xf32> to vector<16x32xf32>
    %378 = arith.mulf %368, %377 : vector<16x32xf32>
    %c20 = arith.constant 20 : index
    %c0_113 = arith.constant 0 : index
    %379 = vector.load %arg10[%c20, %c0_113] : memref<48x128xf32, #tpu.memory_space<vmem>>, vector<1x32xf32>
    %380 = vector.broadcast %379 : vector<1x32xf32> to vector<16x32xf32>
    %381 = arith.mulf %378, %380 : vector<16x32xf32>
    %c21 = arith.constant 21 : index
    %c0_114 = arith.constant 0 : index
    %382 = vector.load %arg10[%c21, %c0_114] : memref<48x128xf32, #tpu.memory_space<vmem>>, vector<1x32xf32>
    %383 = vector.broadcast %382 : vector<1x32xf32> to vector<16x32xf32>
    %384 = arith.addf %381, %383 : vector<16x32xf32>
    %c0_115 = arith.constant 0 : index
    %c0_116 = arith.constant 0 : index
    %c0_117 = arith.constant 0 : index
    %385 = vector.load %arg8[%c0_115, %c0_116, %c0_117] : memref<2x32x320xbf16, #tpu.memory_space<vmem>>, vector<1x32x320xbf16>
    %386 = vector.shape_cast %385 : vector<1x32x320xbf16> to vector<32x320xbf16>
    %387 = vector.extract_strided_slice %386 {offsets = [0, 0], sizes = [32, 96], strides = [1, 1]} : vector<32x320xbf16> to vector<32x96xbf16>
    %388 = vector.extract_strided_slice %386 {offsets = [0, 96], sizes = [32, 32], strides = [1, 1]} : vector<32x320xbf16> to vector<32x32xbf16>
    %389 = vector.extract_strided_slice %386 {offsets = [0, 128], sizes = [32, 32], strides = [1, 1]} : vector<32x320xbf16> to vector<32x32xbf16>
    %390 = vector.extract_strided_slice %386 {offsets = [0, 160], sizes = [32, 64], strides = [1, 1]} : vector<32x320xbf16> to vector<32x64xbf16>
    %391 = vector.extract_strided_slice %386 {offsets = [0, 224], sizes = [32, 32], strides = [1, 1]} : vector<32x320xbf16> to vector<32x32xbf16>
    %392 = vector.extract_strided_slice %386 {offsets = [0, 256], sizes = [32, 64], strides = [1, 1]} : vector<32x320xbf16> to vector<32x64xbf16>
    %c0_118 = arith.constant 0 : index
    %c0_119 = arith.constant 0 : index
    %c0_120 = arith.constant 0 : index
    %393 = vector.load %arg9[%c0_118, %c0_119, %c0_120] : memref<2x64x32xbf16, #tpu.memory_space<vmem>>, vector<1x64x32xbf16>
    %394 = vector.shape_cast %393 : vector<1x64x32xbf16> to vector<64x32xbf16>
    %cst_121 = arith.constant dense<0.000000e+00> : vector<16xf32>
    %395 = vector.multi_reduction <add>, %24, %cst_121 [1] : vector<16x32xf32> to vector<16xf32>
    %396 = vector.shape_cast %395 : vector<16xf32> to vector<16x1xf32>
    %cst_122 = arith.constant 3.200000e+01 : f32
    %397 = vector.broadcast %cst_122 : f32 to vector<16x1xf32>
    %398 = arith.divf %396, %397 : vector<16x1xf32>
    %399 = vector.broadcast %398 : vector<16x1xf32> to vector<16x32xf32>
    %400 = arith.subf %24, %399 : vector<16x32xf32>
    %401 = arith.mulf %400, %400 : vector<16x32xf32>
    %cst_123 = arith.constant dense<0.000000e+00> : vector<16xf32>
    %402 = vector.multi_reduction <add>, %401, %cst_123 [1] : vector<16x32xf32> to vector<16xf32>
    %403 = vector.shape_cast %402 : vector<16xf32> to vector<16x1xf32>
    %cst_124 = arith.constant 3.200000e+01 : f32
    %404 = vector.broadcast %cst_124 : f32 to vector<16x1xf32>
    %405 = arith.divf %403, %404 : vector<16x1xf32>
    %cst_125 = arith.constant 9.99999974E-6 : f32
    %406 = vector.broadcast %cst_125 : f32 to vector<16x1xf32>
    %407 = arith.addf %405, %406 : vector<16x1xf32>
    %408 = math.rsqrt %407 : vector<16x1xf32>
    %409 = vector.broadcast %408 : vector<16x1xf32> to vector<16x32xf32>
    %410 = arith.mulf %400, %409 : vector<16x32xf32>
    %c22 = arith.constant 22 : index
    %c0_126 = arith.constant 0 : index
    %411 = vector.load %arg10[%c22, %c0_126] : memref<48x128xf32, #tpu.memory_space<vmem>>, vector<1x32xf32>
    %412 = vector.broadcast %411 : vector<1x32xf32> to vector<16x32xf32>
    %413 = arith.mulf %410, %412 : vector<16x32xf32>
    %c23 = arith.constant 23 : index
    %c0_127 = arith.constant 0 : index
    %414 = vector.load %arg10[%c23, %c0_127] : memref<48x128xf32, #tpu.memory_space<vmem>>, vector<1x32xf32>
    %415 = vector.broadcast %414 : vector<1x32xf32> to vector<16x32xf32>
    %416 = arith.addf %413, %415 : vector<16x32xf32>
    %417 = arith.truncf %416 : vector<16x32xf32> to vector<16x32xbf16>
    %cst_128 = arith.constant dense<0.000000e+00> : vector<16x96xf32>
    %418 = tpu.matmul %417, %387, %cst_128 {dimension_numbers = #tpu.dot_dimension_numbers<[1], [0], [0], [1], [0, 0, 1, 1], [], []>} : vector<16x32xbf16>, vector<32x96xbf16>, vector<16x96xf32> -> vector<16x96xf32>
    %c24 = arith.constant 24 : index
    %c0_129 = arith.constant 0 : index
    %419 = vector.load %arg10[%c24, %c0_129] : memref<48x128xf32, #tpu.memory_space<vmem>>, vector<1x96xf32>
    %420 = vector.broadcast %419 : vector<1x96xf32> to vector<16x96xf32>
    %421 = arith.addf %418, %420 : vector<16x96xf32>
    %c25 = arith.constant 25 : index
    %c0_130 = arith.constant 0 : index
    %422 = vector.load %arg10[%c25, %c0_130] : memref<48x128xf32, #tpu.memory_space<vmem>>, vector<1x32xf32>
    %423 = tpu.iota {dimensions = array<i32: 0>} : vector<8x8xi32>
    %424 = tpu.iota {dimensions = array<i32: 1>} : vector<8x8xi32>
    %425 = arith.cmpi sgt, %424, %423 : vector<8x8xi32>
    %cst_131 = arith.constant -1.000000e+09 : f32
    %cst_132 = arith.constant 0.000000e+00 : f32
    %426 = vector.broadcast %cst_131 : f32 to vector<8x8xf32>
    %427 = vector.broadcast %cst_132 : f32 to vector<8x8xf32>
    %428 = arith.select %425, %426, %427 : vector<8x8xi1>, vector<8x8xf32>
    %429 = vector.shape_cast %428 : vector<8x8xf32> to vector<1x8x8xf32>
    %430 = vector.shape_cast %429 : vector<1x8x8xf32> to vector<1x8x8xf32>
    %431 = vector.broadcast %430 : vector<1x8x8xf32> to vector<2x8x8xf32>
    %432 = vector.extract_strided_slice %421 {offsets = [0, 0], sizes = [16, 32], strides = [1, 1]} : vector<16x96xf32> to vector<16x32xf32>
    %cst_133 = arith.constant 0.353553385 : f32
    %433 = vector.broadcast %cst_133 : f32 to vector<16x32xf32>
    %434 = arith.mulf %432, %433 : vector<16x32xf32>
    %435 = vector.extract_strided_slice %421 {offsets = [0, 32], sizes = [16, 32], strides = [1, 1]} : vector<16x96xf32> to vector<16x32xf32>
    %436 = vector.extract_strided_slice %421 {offsets = [0, 64], sizes = [16, 32], strides = [1, 1]} : vector<16x96xf32> to vector<16x32xf32>
    %437 = vector.extract_strided_slice %434 {offsets = [0, 0], sizes = [16, 8], strides = [1, 1]} : vector<16x32xf32> to vector<16x8xf32>
    %438 = vector.shape_cast %437 : vector<16x8xf32> to vector<2x8x8xf32>
    %439 = vector.extract_strided_slice %435 {offsets = [0, 0], sizes = [16, 8], strides = [1, 1]} : vector<16x32xf32> to vector<16x8xf32>
    %440 = vector.shape_cast %439 : vector<16x8xf32> to vector<2x8x8xf32>
    %441 = vector.extract_strided_slice %436 {offsets = [0, 0], sizes = [16, 8], strides = [1, 1]} : vector<16x32xf32> to vector<16x8xf32>
    %442 = vector.shape_cast %441 : vector<16x8xf32> to vector<2x8x8xf32>
    %443 = arith.truncf %438 : vector<2x8x8xf32> to vector<2x8x8xbf16>
    %444 = arith.truncf %440 : vector<2x8x8xf32> to vector<2x8x8xbf16>
    "tpu.trace_start"() <{level = 10 : i32, message = "bqd,bkd->bqk"}> : () -> ()
    %cst_134 = arith.constant dense<0.000000e+00> : vector<2x8x8xf32>
    %445 = tpu.matmul %443, %444, %cst_134 {dimension_numbers = #tpu.dot_dimension_numbers<[2], [2], [1], [1], [0, 0, 0, 1, 1, 1], [0], [0]>} : vector<2x8x8xbf16>, vector<2x8x8xbf16>, vector<2x8x8xf32> -> vector<2x8x8xf32>
    "tpu.trace_stop"() : () -> ()
    %446 = arith.addf %445, %431 : vector<2x8x8xf32>
    %cst_135 = arith.constant dense<0xFF800000> : vector<2x8xf32>
    %447 = vector.multi_reduction <maximumf>, %446, %cst_135 [2] : vector<2x8x8xf32> to vector<2x8xf32>
    %448 = vector.shape_cast %447 : vector<2x8xf32> to vector<2x8x1xf32>
    %449 = vector.broadcast %448 : vector<2x8x1xf32> to vector<2x8x8xf32>
    %450 = arith.subf %446, %449 : vector<2x8x8xf32>
    %451 = math.exp %450 : vector<2x8x8xf32>
    %cst_136 = arith.constant dense<0.000000e+00> : vector<2x8xf32>
    %452 = vector.multi_reduction <add>, %451, %cst_136 [2] : vector<2x8x8xf32> to vector<2x8xf32>
    %453 = vector.shape_cast %452 : vector<2x8xf32> to vector<2x8x1xf32>
    %454 = vector.broadcast %453 : vector<2x8x1xf32> to vector<2x8x8xf32>
    %455 = arith.divf %451, %454 : vector<2x8x8xf32>
    %456 = arith.truncf %455 : vector<2x8x8xf32> to vector<2x8x8xbf16>
    %457 = arith.truncf %442 : vector<2x8x8xf32> to vector<2x8x8xbf16>
    "tpu.trace_start"() <{level = 10 : i32, message = "bqk,bkd->bqd"}> : () -> ()
    %cst_137 = arith.constant dense<0.000000e+00> : vector<2x8x8xf32>
    %458 = tpu.matmul %456, %457, %cst_137 {dimension_numbers = #tpu.dot_dimension_numbers<[2], [1], [1], [2], [0, 0, 0, 1, 1, 2], [0], [0]>} : vector<2x8x8xbf16>, vector<2x8x8xbf16>, vector<2x8x8xf32> -> vector<2x8x8xf32>
    "tpu.trace_stop"() : () -> ()
    %459 = vector.shape_cast %458 : vector<2x8x8xf32> to vector<16x8xf32>
    %460 = vector.extract_strided_slice %434 {offsets = [0, 8], sizes = [16, 8], strides = [1, 1]} : vector<16x32xf32> to vector<16x8xf32>
    %461 = vector.shape_cast %460 : vector<16x8xf32> to vector<2x8x8xf32>
    %462 = vector.extract_strided_slice %435 {offsets = [0, 8], sizes = [16, 8], strides = [1, 1]} : vector<16x32xf32> to vector<16x8xf32>
    %463 = vector.shape_cast %462 : vector<16x8xf32> to vector<2x8x8xf32>
    %464 = vector.extract_strided_slice %436 {offsets = [0, 8], sizes = [16, 8], strides = [1, 1]} : vector<16x32xf32> to vector<16x8xf32>
    %465 = vector.shape_cast %464 : vector<16x8xf32> to vector<2x8x8xf32>
    %466 = arith.truncf %461 : vector<2x8x8xf32> to vector<2x8x8xbf16>
    %467 = arith.truncf %463 : vector<2x8x8xf32> to vector<2x8x8xbf16>
    "tpu.trace_start"() <{level = 10 : i32, message = "bqd,bkd->bqk"}> : () -> ()
    %cst_138 = arith.constant dense<0.000000e+00> : vector<2x8x8xf32>
    %468 = tpu.matmul %466, %467, %cst_138 {dimension_numbers = #tpu.dot_dimension_numbers<[2], [2], [1], [1], [0, 0, 0, 1, 1, 1], [0], [0]>} : vector<2x8x8xbf16>, vector<2x8x8xbf16>, vector<2x8x8xf32> -> vector<2x8x8xf32>
    "tpu.trace_stop"() : () -> ()
    %469 = arith.addf %468, %431 : vector<2x8x8xf32>
    %cst_139 = arith.constant dense<0xFF800000> : vector<2x8xf32>
    %470 = vector.multi_reduction <maximumf>, %469, %cst_139 [2] : vector<2x8x8xf32> to vector<2x8xf32>
    %471 = vector.shape_cast %470 : vector<2x8xf32> to vector<2x8x1xf32>
    %472 = vector.broadcast %471 : vector<2x8x1xf32> to vector<2x8x8xf32>
    %473 = arith.subf %469, %472 : vector<2x8x8xf32>
    %474 = math.exp %473 : vector<2x8x8xf32>
    %cst_140 = arith.constant dense<0.000000e+00> : vector<2x8xf32>
    %475 = vector.multi_reduction <add>, %474, %cst_140 [2] : vector<2x8x8xf32> to vector<2x8xf32>
    %476 = vector.shape_cast %475 : vector<2x8xf32> to vector<2x8x1xf32>
    %477 = vector.broadcast %476 : vector<2x8x1xf32> to vector<2x8x8xf32>
    %478 = arith.divf %474, %477 : vector<2x8x8xf32>
    %479 = arith.truncf %478 : vector<2x8x8xf32> to vector<2x8x8xbf16>
    %480 = arith.truncf %465 : vector<2x8x8xf32> to vector<2x8x8xbf16>
    "tpu.trace_start"() <{level = 10 : i32, message = "bqk,bkd->bqd"}> : () -> ()
    %cst_141 = arith.constant dense<0.000000e+00> : vector<2x8x8xf32>
    %481 = tpu.matmul %479, %480, %cst_141 {dimension_numbers = #tpu.dot_dimension_numbers<[2], [1], [1], [2], [0, 0, 0, 1, 1, 2], [0], [0]>} : vector<2x8x8xbf16>, vector<2x8x8xbf16>, vector<2x8x8xf32> -> vector<2x8x8xf32>
    "tpu.trace_stop"() : () -> ()
    %482 = vector.shape_cast %481 : vector<2x8x8xf32> to vector<16x8xf32>
    %483 = vector.extract_strided_slice %434 {offsets = [0, 16], sizes = [16, 8], strides = [1, 1]} : vector<16x32xf32> to vector<16x8xf32>
    %484 = vector.shape_cast %483 : vector<16x8xf32> to vector<2x8x8xf32>
    %485 = vector.extract_strided_slice %435 {offsets = [0, 16], sizes = [16, 8], strides = [1, 1]} : vector<16x32xf32> to vector<16x8xf32>
    %486 = vector.shape_cast %485 : vector<16x8xf32> to vector<2x8x8xf32>
    %487 = vector.extract_strided_slice %436 {offsets = [0, 16], sizes = [16, 8], strides = [1, 1]} : vector<16x32xf32> to vector<16x8xf32>
    %488 = vector.shape_cast %487 : vector<16x8xf32> to vector<2x8x8xf32>
    %489 = arith.truncf %484 : vector<2x8x8xf32> to vector<2x8x8xbf16>
    %490 = arith.truncf %486 : vector<2x8x8xf32> to vector<2x8x8xbf16>
    "tpu.trace_start"() <{level = 10 : i32, message = "bqd,bkd->bqk"}> : () -> ()
    %cst_142 = arith.constant dense<0.000000e+00> : vector<2x8x8xf32>
    %491 = tpu.matmul %489, %490, %cst_142 {dimension_numbers = #tpu.dot_dimension_numbers<[2], [2], [1], [1], [0, 0, 0, 1, 1, 1], [0], [0]>} : vector<2x8x8xbf16>, vector<2x8x8xbf16>, vector<2x8x8xf32> -> vector<2x8x8xf32>
    "tpu.trace_stop"() : () -> ()
    %492 = arith.addf %491, %431 : vector<2x8x8xf32>
    %cst_143 = arith.constant dense<0xFF800000> : vector<2x8xf32>
    %493 = vector.multi_reduction <maximumf>, %492, %cst_143 [2] : vector<2x8x8xf32> to vector<2x8xf32>
    %494 = vector.shape_cast %493 : vector<2x8xf32> to vector<2x8x1xf32>
    %495 = vector.broadcast %494 : vector<2x8x1xf32> to vector<2x8x8xf32>
    %496 = arith.subf %492, %495 : vector<2x8x8xf32>
    %497 = math.exp %496 : vector<2x8x8xf32>
    %cst_144 = arith.constant dense<0.000000e+00> : vector<2x8xf32>
    %498 = vector.multi_reduction <add>, %497, %cst_144 [2] : vector<2x8x8xf32> to vector<2x8xf32>
    %499 = vector.shape_cast %498 : vector<2x8xf32> to vector<2x8x1xf32>
    %500 = vector.broadcast %499 : vector<2x8x1xf32> to vector<2x8x8xf32>
    %501 = arith.divf %497, %500 : vector<2x8x8xf32>
    %502 = arith.truncf %501 : vector<2x8x8xf32> to vector<2x8x8xbf16>
    %503 = arith.truncf %488 : vector<2x8x8xf32> to vector<2x8x8xbf16>
    "tpu.trace_start"() <{level = 10 : i32, message = "bqk,bkd->bqd"}> : () -> ()
    %cst_145 = arith.constant dense<0.000000e+00> : vector<2x8x8xf32>
    %504 = tpu.matmul %502, %503, %cst_145 {dimension_numbers = #tpu.dot_dimension_numbers<[2], [1], [1], [2], [0, 0, 0, 1, 1, 2], [0], [0]>} : vector<2x8x8xbf16>, vector<2x8x8xbf16>, vector<2x8x8xf32> -> vector<2x8x8xf32>
    "tpu.trace_stop"() : () -> ()
    %505 = vector.shape_cast %504 : vector<2x8x8xf32> to vector<16x8xf32>
    %506 = vector.extract_strided_slice %434 {offsets = [0, 24], sizes = [16, 8], strides = [1, 1]} : vector<16x32xf32> to vector<16x8xf32>
    %507 = vector.shape_cast %506 : vector<16x8xf32> to vector<2x8x8xf32>
    %508 = vector.extract_strided_slice %435 {offsets = [0, 24], sizes = [16, 8], strides = [1, 1]} : vector<16x32xf32> to vector<16x8xf32>
    %509 = vector.shape_cast %508 : vector<16x8xf32> to vector<2x8x8xf32>
    %510 = vector.extract_strided_slice %436 {offsets = [0, 24], sizes = [16, 8], strides = [1, 1]} : vector<16x32xf32> to vector<16x8xf32>
    %511 = vector.shape_cast %510 : vector<16x8xf32> to vector<2x8x8xf32>
    %512 = arith.truncf %507 : vector<2x8x8xf32> to vector<2x8x8xbf16>
    %513 = arith.truncf %509 : vector<2x8x8xf32> to vector<2x8x8xbf16>
    "tpu.trace_start"() <{level = 10 : i32, message = "bqd,bkd->bqk"}> : () -> ()
    %cst_146 = arith.constant dense<0.000000e+00> : vector<2x8x8xf32>
    %514 = tpu.matmul %512, %513, %cst_146 {dimension_numbers = #tpu.dot_dimension_numbers<[2], [2], [1], [1], [0, 0, 0, 1, 1, 1], [0], [0]>} : vector<2x8x8xbf16>, vector<2x8x8xbf16>, vector<2x8x8xf32> -> vector<2x8x8xf32>
    "tpu.trace_stop"() : () -> ()
    %515 = arith.addf %514, %431 : vector<2x8x8xf32>
    %cst_147 = arith.constant dense<0xFF800000> : vector<2x8xf32>
    %516 = vector.multi_reduction <maximumf>, %515, %cst_147 [2] : vector<2x8x8xf32> to vector<2x8xf32>
    %517 = vector.shape_cast %516 : vector<2x8xf32> to vector<2x8x1xf32>
    %518 = vector.broadcast %517 : vector<2x8x1xf32> to vector<2x8x8xf32>
    %519 = arith.subf %515, %518 : vector<2x8x8xf32>
    %520 = math.exp %519 : vector<2x8x8xf32>
    %cst_148 = arith.constant dense<0.000000e+00> : vector<2x8xf32>
    %521 = vector.multi_reduction <add>, %520, %cst_148 [2] : vector<2x8x8xf32> to vector<2x8xf32>
    %522 = vector.shape_cast %521 : vector<2x8xf32> to vector<2x8x1xf32>
    %523 = vector.broadcast %522 : vector<2x8x1xf32> to vector<2x8x8xf32>
    %524 = arith.divf %520, %523 : vector<2x8x8xf32>
    %525 = arith.truncf %524 : vector<2x8x8xf32> to vector<2x8x8xbf16>
    %526 = arith.truncf %511 : vector<2x8x8xf32> to vector<2x8x8xbf16>
    "tpu.trace_start"() <{level = 10 : i32, message = "bqk,bkd->bqd"}> : () -> ()
    %cst_149 = arith.constant dense<0.000000e+00> : vector<2x8x8xf32>
    %527 = tpu.matmul %525, %526, %cst_149 {dimension_numbers = #tpu.dot_dimension_numbers<[2], [1], [1], [2], [0, 0, 0, 1, 1, 2], [0], [0]>} : vector<2x8x8xbf16>, vector<2x8x8xbf16>, vector<2x8x8xf32> -> vector<2x8x8xf32>
    "tpu.trace_stop"() : () -> ()
    %528 = vector.shape_cast %527 : vector<2x8x8xf32> to vector<16x8xf32>
    %529 = tpu.concatenate %459, %482, %505, %528 in 1 : vector<16x8xf32>, vector<16x8xf32>, vector<16x8xf32>, vector<16x8xf32> -> vector<16x32xf32>
    %530 = arith.truncf %529 : vector<16x32xf32> to vector<16x32xbf16>
    %cst_150 = arith.constant dense<0.000000e+00> : vector<16x32xf32>
    %531 = tpu.matmul %530, %388, %cst_150 {dimension_numbers = #tpu.dot_dimension_numbers<[1], [0], [0], [1], [0, 0, 1, 1], [], []>} : vector<16x32xbf16>, vector<32x32xbf16>, vector<16x32xf32> -> vector<16x32xf32>
    %532 = vector.broadcast %422 : vector<1x32xf32> to vector<16x32xf32>
    %533 = arith.addf %531, %532 : vector<16x32xf32>
    %534 = arith.addf %24, %533 : vector<16x32xf32>
    %cst_151 = arith.constant dense<0.000000e+00> : vector<16xf32>
    %535 = vector.multi_reduction <add>, %534, %cst_151 [1] : vector<16x32xf32> to vector<16xf32>
    %536 = vector.shape_cast %535 : vector<16xf32> to vector<16x1xf32>
    %cst_152 = arith.constant 3.200000e+01 : f32
    %537 = vector.broadcast %cst_152 : f32 to vector<16x1xf32>
    %538 = arith.divf %536, %537 : vector<16x1xf32>
    %539 = vector.broadcast %538 : vector<16x1xf32> to vector<16x32xf32>
    %540 = arith.subf %534, %539 : vector<16x32xf32>
    %541 = arith.mulf %540, %540 : vector<16x32xf32>
    %cst_153 = arith.constant dense<0.000000e+00> : vector<16xf32>
    %542 = vector.multi_reduction <add>, %541, %cst_153 [1] : vector<16x32xf32> to vector<16xf32>
    %543 = vector.shape_cast %542 : vector<16xf32> to vector<16x1xf32>
    %cst_154 = arith.constant 3.200000e+01 : f32
    %544 = vector.broadcast %cst_154 : f32 to vector<16x1xf32>
    %545 = arith.divf %543, %544 : vector<16x1xf32>
    %cst_155 = arith.constant 9.99999974E-6 : f32
    %546 = vector.broadcast %cst_155 : f32 to vector<16x1xf32>
    %547 = arith.addf %545, %546 : vector<16x1xf32>
    %548 = math.rsqrt %547 : vector<16x1xf32>
    %549 = vector.broadcast %548 : vector<16x1xf32> to vector<16x32xf32>
    %550 = arith.mulf %540, %549 : vector<16x32xf32>
    %c26 = arith.constant 26 : index
    %c0_156 = arith.constant 0 : index
    %551 = vector.load %arg10[%c26, %c0_156] : memref<48x128xf32, #tpu.memory_space<vmem>>, vector<1x32xf32>
    %552 = vector.broadcast %551 : vector<1x32xf32> to vector<16x32xf32>
    %553 = arith.mulf %550, %552 : vector<16x32xf32>
    %c27 = arith.constant 27 : index
    %c0_157 = arith.constant 0 : index
    %554 = vector.load %arg10[%c27, %c0_157] : memref<48x128xf32, #tpu.memory_space<vmem>>, vector<1x32xf32>
    %555 = vector.broadcast %554 : vector<1x32xf32> to vector<16x32xf32>
    %556 = arith.addf %553, %555 : vector<16x32xf32>
    %c28 = arith.constant 28 : index
    %c0_158 = arith.constant 0 : index
    %557 = vector.load %arg10[%c28, %c0_158] : memref<48x128xf32, #tpu.memory_space<vmem>>, vector<1x96xf32>
    %558 = arith.truncf %556 : vector<16x32xf32> to vector<16x32xbf16>
    %cst_159 = arith.constant dense<0.000000e+00> : vector<16x32xf32>
    %559 = tpu.matmul %558, %389, %cst_159 {dimension_numbers = #tpu.dot_dimension_numbers<[1], [0], [0], [1], [0, 0, 1, 1], [], []>} : vector<16x32xbf16>, vector<32x32xbf16>, vector<16x32xf32> -> vector<16x32xf32>
    %560 = vector.extract_strided_slice %557 {offsets = [0, 0], sizes = [1, 32], strides = [1, 1]} : vector<1x96xf32> to vector<1x32xf32>
    %561 = vector.broadcast %560 : vector<1x32xf32> to vector<16x32xf32>
    %562 = arith.addf %559, %561 : vector<16x32xf32>
    %563 = arith.truncf %384 : vector<16x32xf32> to vector<16x32xbf16>
    %cst_160 = arith.constant dense<0.000000e+00> : vector<16x64xf32>
    %564 = tpu.matmul %563, %390, %cst_160 {dimension_numbers = #tpu.dot_dimension_numbers<[1], [0], [0], [1], [0, 0, 1, 1], [], []>} : vector<16x32xbf16>, vector<32x64xbf16>, vector<16x64xf32> -> vector<16x64xf32>
    %565 = vector.extract_strided_slice %557 {offsets = [0, 32], sizes = [1, 64], strides = [1, 1]} : vector<1x96xf32> to vector<1x64xf32>
    %566 = vector.broadcast %565 : vector<1x64xf32> to vector<16x64xf32>
    %567 = arith.addf %564, %566 : vector<16x64xf32>
    %c29 = arith.constant 29 : index
    %c0_161 = arith.constant 0 : index
    %568 = vector.load %arg10[%c29, %c0_161] : memref<48x128xf32, #tpu.memory_space<vmem>>, vector<1x32xf32>
    %cst_162 = arith.constant 0.353553385 : f32
    %569 = vector.broadcast %cst_162 : f32 to vector<16x32xf32>
    %570 = arith.mulf %562, %569 : vector<16x32xf32>
    %571 = vector.extract_strided_slice %567 {offsets = [0, 0], sizes = [16, 32], strides = [1, 1]} : vector<16x64xf32> to vector<16x32xf32>
    %572 = vector.extract_strided_slice %567 {offsets = [0, 32], sizes = [16, 32], strides = [1, 1]} : vector<16x64xf32> to vector<16x32xf32>
    %573 = vector.extract_strided_slice %570 {offsets = [0, 0], sizes = [16, 8], strides = [1, 1]} : vector<16x32xf32> to vector<16x8xf32>
    %574 = vector.shape_cast %573 : vector<16x8xf32> to vector<2x8x8xf32>
    %575 = vector.extract_strided_slice %571 {offsets = [0, 0], sizes = [16, 8], strides = [1, 1]} : vector<16x32xf32> to vector<16x8xf32>
    %576 = vector.shape_cast %575 : vector<16x8xf32> to vector<2x8x8xf32>
    %577 = vector.extract_strided_slice %572 {offsets = [0, 0], sizes = [16, 8], strides = [1, 1]} : vector<16x32xf32> to vector<16x8xf32>
    %578 = vector.shape_cast %577 : vector<16x8xf32> to vector<2x8x8xf32>
    %579 = arith.truncf %574 : vector<2x8x8xf32> to vector<2x8x8xbf16>
    %580 = arith.truncf %576 : vector<2x8x8xf32> to vector<2x8x8xbf16>
    "tpu.trace_start"() <{level = 10 : i32, message = "bqd,bkd->bqk"}> : () -> ()
    %cst_163 = arith.constant dense<0.000000e+00> : vector<2x8x8xf32>
    %581 = tpu.matmul %579, %580, %cst_163 {dimension_numbers = #tpu.dot_dimension_numbers<[2], [2], [1], [1], [0, 0, 0, 1, 1, 1], [0], [0]>} : vector<2x8x8xbf16>, vector<2x8x8xbf16>, vector<2x8x8xf32> -> vector<2x8x8xf32>
    "tpu.trace_stop"() : () -> ()
    %cst_164 = arith.constant dense<0xFF800000> : vector<2x8xf32>
    %582 = vector.multi_reduction <maximumf>, %581, %cst_164 [2] : vector<2x8x8xf32> to vector<2x8xf32>
    %583 = vector.shape_cast %582 : vector<2x8xf32> to vector<2x8x1xf32>
    %584 = vector.broadcast %583 : vector<2x8x1xf32> to vector<2x8x8xf32>
    %585 = arith.subf %581, %584 : vector<2x8x8xf32>
    %586 = math.exp %585 : vector<2x8x8xf32>
    %cst_165 = arith.constant dense<0.000000e+00> : vector<2x8xf32>
    %587 = vector.multi_reduction <add>, %586, %cst_165 [2] : vector<2x8x8xf32> to vector<2x8xf32>
    %588 = vector.shape_cast %587 : vector<2x8xf32> to vector<2x8x1xf32>
    %589 = vector.broadcast %588 : vector<2x8x1xf32> to vector<2x8x8xf32>
    %590 = arith.divf %586, %589 : vector<2x8x8xf32>
    %591 = arith.truncf %590 : vector<2x8x8xf32> to vector<2x8x8xbf16>
    %592 = arith.truncf %578 : vector<2x8x8xf32> to vector<2x8x8xbf16>
    "tpu.trace_start"() <{level = 10 : i32, message = "bqk,bkd->bqd"}> : () -> ()
    %cst_166 = arith.constant dense<0.000000e+00> : vector<2x8x8xf32>
    %593 = tpu.matmul %591, %592, %cst_166 {dimension_numbers = #tpu.dot_dimension_numbers<[2], [1], [1], [2], [0, 0, 0, 1, 1, 2], [0], [0]>} : vector<2x8x8xbf16>, vector<2x8x8xbf16>, vector<2x8x8xf32> -> vector<2x8x8xf32>
    "tpu.trace_stop"() : () -> ()
    %594 = vector.shape_cast %593 : vector<2x8x8xf32> to vector<16x8xf32>
    %595 = vector.extract_strided_slice %570 {offsets = [0, 8], sizes = [16, 8], strides = [1, 1]} : vector<16x32xf32> to vector<16x8xf32>
    %596 = vector.shape_cast %595 : vector<16x8xf32> to vector<2x8x8xf32>
    %597 = vector.extract_strided_slice %571 {offsets = [0, 8], sizes = [16, 8], strides = [1, 1]} : vector<16x32xf32> to vector<16x8xf32>
    %598 = vector.shape_cast %597 : vector<16x8xf32> to vector<2x8x8xf32>
    %599 = vector.extract_strided_slice %572 {offsets = [0, 8], sizes = [16, 8], strides = [1, 1]} : vector<16x32xf32> to vector<16x8xf32>
    %600 = vector.shape_cast %599 : vector<16x8xf32> to vector<2x8x8xf32>
    %601 = arith.truncf %596 : vector<2x8x8xf32> to vector<2x8x8xbf16>
    %602 = arith.truncf %598 : vector<2x8x8xf32> to vector<2x8x8xbf16>
    "tpu.trace_start"() <{level = 10 : i32, message = "bqd,bkd->bqk"}> : () -> ()
    %cst_167 = arith.constant dense<0.000000e+00> : vector<2x8x8xf32>
    %603 = tpu.matmul %601, %602, %cst_167 {dimension_numbers = #tpu.dot_dimension_numbers<[2], [2], [1], [1], [0, 0, 0, 1, 1, 1], [0], [0]>} : vector<2x8x8xbf16>, vector<2x8x8xbf16>, vector<2x8x8xf32> -> vector<2x8x8xf32>
    "tpu.trace_stop"() : () -> ()
    %cst_168 = arith.constant dense<0xFF800000> : vector<2x8xf32>
    %604 = vector.multi_reduction <maximumf>, %603, %cst_168 [2] : vector<2x8x8xf32> to vector<2x8xf32>
    %605 = vector.shape_cast %604 : vector<2x8xf32> to vector<2x8x1xf32>
    %606 = vector.broadcast %605 : vector<2x8x1xf32> to vector<2x8x8xf32>
    %607 = arith.subf %603, %606 : vector<2x8x8xf32>
    %608 = math.exp %607 : vector<2x8x8xf32>
    %cst_169 = arith.constant dense<0.000000e+00> : vector<2x8xf32>
    %609 = vector.multi_reduction <add>, %608, %cst_169 [2] : vector<2x8x8xf32> to vector<2x8xf32>
    %610 = vector.shape_cast %609 : vector<2x8xf32> to vector<2x8x1xf32>
    %611 = vector.broadcast %610 : vector<2x8x1xf32> to vector<2x8x8xf32>
    %612 = arith.divf %608, %611 : vector<2x8x8xf32>
    %613 = arith.truncf %612 : vector<2x8x8xf32> to vector<2x8x8xbf16>
    %614 = arith.truncf %600 : vector<2x8x8xf32> to vector<2x8x8xbf16>
    "tpu.trace_start"() <{level = 10 : i32, message = "bqk,bkd->bqd"}> : () -> ()
    %cst_170 = arith.constant dense<0.000000e+00> : vector<2x8x8xf32>
    %615 = tpu.matmul %613, %614, %cst_170 {dimension_numbers = #tpu.dot_dimension_numbers<[2], [1], [1], [2], [0, 0, 0, 1, 1, 2], [0], [0]>} : vector<2x8x8xbf16>, vector<2x8x8xbf16>, vector<2x8x8xf32> -> vector<2x8x8xf32>
    "tpu.trace_stop"() : () -> ()
    %616 = vector.shape_cast %615 : vector<2x8x8xf32> to vector<16x8xf32>
    %617 = vector.extract_strided_slice %570 {offsets = [0, 16], sizes = [16, 8], strides = [1, 1]} : vector<16x32xf32> to vector<16x8xf32>
    %618 = vector.shape_cast %617 : vector<16x8xf32> to vector<2x8x8xf32>
    %619 = vector.extract_strided_slice %571 {offsets = [0, 16], sizes = [16, 8], strides = [1, 1]} : vector<16x32xf32> to vector<16x8xf32>
    %620 = vector.shape_cast %619 : vector<16x8xf32> to vector<2x8x8xf32>
    %621 = vector.extract_strided_slice %572 {offsets = [0, 16], sizes = [16, 8], strides = [1, 1]} : vector<16x32xf32> to vector<16x8xf32>
    %622 = vector.shape_cast %621 : vector<16x8xf32> to vector<2x8x8xf32>
    %623 = arith.truncf %618 : vector<2x8x8xf32> to vector<2x8x8xbf16>
    %624 = arith.truncf %620 : vector<2x8x8xf32> to vector<2x8x8xbf16>
    "tpu.trace_start"() <{level = 10 : i32, message = "bqd,bkd->bqk"}> : () -> ()
    %cst_171 = arith.constant dense<0.000000e+00> : vector<2x8x8xf32>
    %625 = tpu.matmul %623, %624, %cst_171 {dimension_numbers = #tpu.dot_dimension_numbers<[2], [2], [1], [1], [0, 0, 0, 1, 1, 1], [0], [0]>} : vector<2x8x8xbf16>, vector<2x8x8xbf16>, vector<2x8x8xf32> -> vector<2x8x8xf32>
    "tpu.trace_stop"() : () -> ()
    %cst_172 = arith.constant dense<0xFF800000> : vector<2x8xf32>
    %626 = vector.multi_reduction <maximumf>, %625, %cst_172 [2] : vector<2x8x8xf32> to vector<2x8xf32>
    %627 = vector.shape_cast %626 : vector<2x8xf32> to vector<2x8x1xf32>
    %628 = vector.broadcast %627 : vector<2x8x1xf32> to vector<2x8x8xf32>
    %629 = arith.subf %625, %628 : vector<2x8x8xf32>
    %630 = math.exp %629 : vector<2x8x8xf32>
    %cst_173 = arith.constant dense<0.000000e+00> : vector<2x8xf32>
    %631 = vector.multi_reduction <add>, %630, %cst_173 [2] : vector<2x8x8xf32> to vector<2x8xf32>
    %632 = vector.shape_cast %631 : vector<2x8xf32> to vector<2x8x1xf32>
    %633 = vector.broadcast %632 : vector<2x8x1xf32> to vector<2x8x8xf32>
    %634 = arith.divf %630, %633 : vector<2x8x8xf32>
    %635 = arith.truncf %634 : vector<2x8x8xf32> to vector<2x8x8xbf16>
    %636 = arith.truncf %622 : vector<2x8x8xf32> to vector<2x8x8xbf16>
    "tpu.trace_start"() <{level = 10 : i32, message = "bqk,bkd->bqd"}> : () -> ()
    %cst_174 = arith.constant dense<0.000000e+00> : vector<2x8x8xf32>
    %637 = tpu.matmul %635, %636, %cst_174 {dimension_numbers = #tpu.dot_dimension_numbers<[2], [1], [1], [2], [0, 0, 0, 1, 1, 2], [0], [0]>} : vector<2x8x8xbf16>, vector<2x8x8xbf16>, vector<2x8x8xf32> -> vector<2x8x8xf32>
    "tpu.trace_stop"() : () -> ()
    %638 = vector.shape_cast %637 : vector<2x8x8xf32> to vector<16x8xf32>
    %639 = vector.extract_strided_slice %570 {offsets = [0, 24], sizes = [16, 8], strides = [1, 1]} : vector<16x32xf32> to vector<16x8xf32>
    %640 = vector.shape_cast %639 : vector<16x8xf32> to vector<2x8x8xf32>
    %641 = vector.extract_strided_slice %571 {offsets = [0, 24], sizes = [16, 8], strides = [1, 1]} : vector<16x32xf32> to vector<16x8xf32>
    %642 = vector.shape_cast %641 : vector<16x8xf32> to vector<2x8x8xf32>
    %643 = vector.extract_strided_slice %572 {offsets = [0, 24], sizes = [16, 8], strides = [1, 1]} : vector<16x32xf32> to vector<16x8xf32>
    %644 = vector.shape_cast %643 : vector<16x8xf32> to vector<2x8x8xf32>
    %645 = arith.truncf %640 : vector<2x8x8xf32> to vector<2x8x8xbf16>
    %646 = arith.truncf %642 : vector<2x8x8xf32> to vector<2x8x8xbf16>
    "tpu.trace_start"() <{level = 10 : i32, message = "bqd,bkd->bqk"}> : () -> ()
    %cst_175 = arith.constant dense<0.000000e+00> : vector<2x8x8xf32>
    %647 = tpu.matmul %645, %646, %cst_175 {dimension_numbers = #tpu.dot_dimension_numbers<[2], [2], [1], [1], [0, 0, 0, 1, 1, 1], [0], [0]>} : vector<2x8x8xbf16>, vector<2x8x8xbf16>, vector<2x8x8xf32> -> vector<2x8x8xf32>
    "tpu.trace_stop"() : () -> ()
    %cst_176 = arith.constant dense<0xFF800000> : vector<2x8xf32>
    %648 = vector.multi_reduction <maximumf>, %647, %cst_176 [2] : vector<2x8x8xf32> to vector<2x8xf32>
    %649 = vector.shape_cast %648 : vector<2x8xf32> to vector<2x8x1xf32>
    %650 = vector.broadcast %649 : vector<2x8x1xf32> to vector<2x8x8xf32>
    %651 = arith.subf %647, %650 : vector<2x8x8xf32>
    %652 = math.exp %651 : vector<2x8x8xf32>
    %cst_177 = arith.constant dense<0.000000e+00> : vector<2x8xf32>
    %653 = vector.multi_reduction <add>, %652, %cst_177 [2] : vector<2x8x8xf32> to vector<2x8xf32>
    %654 = vector.shape_cast %653 : vector<2x8xf32> to vector<2x8x1xf32>
    %655 = vector.broadcast %654 : vector<2x8x1xf32> to vector<2x8x8xf32>
    %656 = arith.divf %652, %655 : vector<2x8x8xf32>
    %657 = arith.truncf %656 : vector<2x8x8xf32> to vector<2x8x8xbf16>
    %658 = arith.truncf %644 : vector<2x8x8xf32> to vector<2x8x8xbf16>
    "tpu.trace_start"() <{level = 10 : i32, message = "bqk,bkd->bqd"}> : () -> ()
    %cst_178 = arith.constant dense<0.000000e+00> : vector<2x8x8xf32>
    %659 = tpu.matmul %657, %658, %cst_178 {dimension_numbers = #tpu.dot_dimension_numbers<[2], [1], [1], [2], [0, 0, 0, 1, 1, 2], [0], [0]>} : vector<2x8x8xbf16>, vector<2x8x8xbf16>, vector<2x8x8xf32> -> vector<2x8x8xf32>
    "tpu.trace_stop"() : () -> ()
    %660 = vector.shape_cast %659 : vector<2x8x8xf32> to vector<16x8xf32>
    %661 = tpu.concatenate %594, %616, %638, %660 in 1 : vector<16x8xf32>, vector<16x8xf32>, vector<16x8xf32>, vector<16x8xf32> -> vector<16x32xf32>
    %662 = arith.truncf %661 : vector<16x32xf32> to vector<16x32xbf16>
    %cst_179 = arith.constant dense<0.000000e+00> : vector<16x32xf32>
    %663 = tpu.matmul %662, %391, %cst_179 {dimension_numbers = #tpu.dot_dimension_numbers<[1], [0], [0], [1], [0, 0, 1, 1], [], []>} : vector<16x32xbf16>, vector<32x32xbf16>, vector<16x32xf32> -> vector<16x32xf32>
    %664 = vector.broadcast %568 : vector<1x32xf32> to vector<16x32xf32>
    %665 = arith.addf %663, %664 : vector<16x32xf32>
    %666 = arith.addf %534, %665 : vector<16x32xf32>
    %cst_180 = arith.constant dense<0.000000e+00> : vector<16xf32>
    %667 = vector.multi_reduction <add>, %666, %cst_180 [1] : vector<16x32xf32> to vector<16xf32>
    %668 = vector.shape_cast %667 : vector<16xf32> to vector<16x1xf32>
    %cst_181 = arith.constant 3.200000e+01 : f32
    %669 = vector.broadcast %cst_181 : f32 to vector<16x1xf32>
    %670 = arith.divf %668, %669 : vector<16x1xf32>
    %671 = vector.broadcast %670 : vector<16x1xf32> to vector<16x32xf32>
    %672 = arith.subf %666, %671 : vector<16x32xf32>
    %673 = arith.mulf %672, %672 : vector<16x32xf32>
    %cst_182 = arith.constant dense<0.000000e+00> : vector<16xf32>
    %674 = vector.multi_reduction <add>, %673, %cst_182 [1] : vector<16x32xf32> to vector<16xf32>
    %675 = vector.shape_cast %674 : vector<16xf32> to vector<16x1xf32>
    %cst_183 = arith.constant 3.200000e+01 : f32
    %676 = vector.broadcast %cst_183 : f32 to vector<16x1xf32>
    %677 = arith.divf %675, %676 : vector<16x1xf32>
    %cst_184 = arith.constant 9.99999974E-6 : f32
    %678 = vector.broadcast %cst_184 : f32 to vector<16x1xf32>
    %679 = arith.addf %677, %678 : vector<16x1xf32>
    %680 = math.rsqrt %679 : vector<16x1xf32>
    %681 = vector.broadcast %680 : vector<16x1xf32> to vector<16x32xf32>
    %682 = arith.mulf %672, %681 : vector<16x32xf32>
    %c30 = arith.constant 30 : index
    %c0_185 = arith.constant 0 : index
    %683 = vector.load %arg10[%c30, %c0_185] : memref<48x128xf32, #tpu.memory_space<vmem>>, vector<1x32xf32>
    %684 = vector.broadcast %683 : vector<1x32xf32> to vector<16x32xf32>
    %685 = arith.mulf %682, %684 : vector<16x32xf32>
    %c31 = arith.constant 31 : index
    %c0_186 = arith.constant 0 : index
    %686 = vector.load %arg10[%c31, %c0_186] : memref<48x128xf32, #tpu.memory_space<vmem>>, vector<1x32xf32>
    %687 = vector.broadcast %686 : vector<1x32xf32> to vector<16x32xf32>
    %688 = arith.addf %685, %687 : vector<16x32xf32>
    %689 = arith.truncf %688 : vector<16x32xf32> to vector<16x32xbf16>
    %cst_187 = arith.constant dense<0.000000e+00> : vector<16x64xf32>
    %690 = tpu.matmul %689, %392, %cst_187 {dimension_numbers = #tpu.dot_dimension_numbers<[1], [0], [0], [1], [0, 0, 1, 1], [], []>} : vector<16x32xbf16>, vector<32x64xbf16>, vector<16x64xf32> -> vector<16x64xf32>
    %c32 = arith.constant 32 : index
    %c0_188 = arith.constant 0 : index
    %691 = vector.load %arg10[%c32, %c0_188] : memref<48x128xf32, #tpu.memory_space<vmem>>, vector<1x64xf32>
    %692 = vector.broadcast %691 : vector<1x64xf32> to vector<16x64xf32>
    %693 = arith.addf %690, %692 : vector<16x64xf32>
    %cst_189 = arith.constant 0.000000e+00 : f32
    %694 = vector.broadcast %cst_189 : f32 to vector<16x64xf32>
    %695 = arith.maximumf %693, %694 : vector<16x64xf32>
    %696 = arith.truncf %695 : vector<16x64xf32> to vector<16x64xbf16>
    %cst_190 = arith.constant dense<0.000000e+00> : vector<16x32xf32>
    %697 = tpu.matmul %696, %394, %cst_190 {dimension_numbers = #tpu.dot_dimension_numbers<[1], [0], [0], [1], [0, 0, 1, 1], [], []>} : vector<16x64xbf16>, vector<64x32xbf16>, vector<16x32xf32> -> vector<16x32xf32>
    %698 = arith.addf %666, %697 : vector<16x32xf32>
    %c33 = arith.constant 33 : index
    %c0_191 = arith.constant 0 : index
    %699 = vector.load %arg10[%c33, %c0_191] : memref<48x128xf32, #tpu.memory_space<vmem>>, vector<1x32xf32>
    %700 = vector.broadcast %699 : vector<1x32xf32> to vector<16x32xf32>
    %701 = arith.addf %698, %700 : vector<16x32xf32>
    %c1_192 = arith.constant 1 : index
    %c0_193 = arith.constant 0 : index
    %c0_194 = arith.constant 0 : index
    %702 = vector.load %arg8[%c1_192, %c0_193, %c0_194] : memref<2x32x320xbf16, #tpu.memory_space<vmem>>, vector<1x32x320xbf16>
    %703 = vector.shape_cast %702 : vector<1x32x320xbf16> to vector<32x320xbf16>
    %704 = vector.extract_strided_slice %703 {offsets = [0, 0], sizes = [32, 96], strides = [1, 1]} : vector<32x320xbf16> to vector<32x96xbf16>
    %705 = vector.extract_strided_slice %703 {offsets = [0, 96], sizes = [32, 32], strides = [1, 1]} : vector<32x320xbf16> to vector<32x32xbf16>
    %706 = vector.extract_strided_slice %703 {offsets = [0, 128], sizes = [32, 32], strides = [1, 1]} : vector<32x320xbf16> to vector<32x32xbf16>
    %707 = vector.extract_strided_slice %703 {offsets = [0, 160], sizes = [32, 64], strides = [1, 1]} : vector<32x320xbf16> to vector<32x64xbf16>
    %708 = vector.extract_strided_slice %703 {offsets = [0, 224], sizes = [32, 32], strides = [1, 1]} : vector<32x320xbf16> to vector<32x32xbf16>
    %709 = vector.extract_strided_slice %703 {offsets = [0, 256], sizes = [32, 64], strides = [1, 1]} : vector<32x320xbf16> to vector<32x64xbf16>
    %c1_195 = arith.constant 1 : index
    %c0_196 = arith.constant 0 : index
    %c0_197 = arith.constant 0 : index
    %710 = vector.load %arg9[%c1_195, %c0_196, %c0_197] : memref<2x64x32xbf16, #tpu.memory_space<vmem>>, vector<1x64x32xbf16>
    %711 = vector.shape_cast %710 : vector<1x64x32xbf16> to vector<64x32xbf16>
    %cst_198 = arith.constant dense<0.000000e+00> : vector<16xf32>
    %712 = vector.multi_reduction <add>, %701, %cst_198 [1] : vector<16x32xf32> to vector<16xf32>
    %713 = vector.shape_cast %712 : vector<16xf32> to vector<16x1xf32>
    %cst_199 = arith.constant 3.200000e+01 : f32
    %714 = vector.broadcast %cst_199 : f32 to vector<16x1xf32>
    %715 = arith.divf %713, %714 : vector<16x1xf32>
    %716 = vector.broadcast %715 : vector<16x1xf32> to vector<16x32xf32>
    %717 = arith.subf %701, %716 : vector<16x32xf32>
    %718 = arith.mulf %717, %717 : vector<16x32xf32>
    %cst_200 = arith.constant dense<0.000000e+00> : vector<16xf32>
    %719 = vector.multi_reduction <add>, %718, %cst_200 [1] : vector<16x32xf32> to vector<16xf32>
    %720 = vector.shape_cast %719 : vector<16xf32> to vector<16x1xf32>
    %cst_201 = arith.constant 3.200000e+01 : f32
    %721 = vector.broadcast %cst_201 : f32 to vector<16x1xf32>
    %722 = arith.divf %720, %721 : vector<16x1xf32>
    %cst_202 = arith.constant 9.99999974E-6 : f32
    %723 = vector.broadcast %cst_202 : f32 to vector<16x1xf32>
    %724 = arith.addf %722, %723 : vector<16x1xf32>
    %725 = math.rsqrt %724 : vector<16x1xf32>
    %726 = vector.broadcast %725 : vector<16x1xf32> to vector<16x32xf32>
    %727 = arith.mulf %717, %726 : vector<16x32xf32>
    %c34 = arith.constant 34 : index
    %c0_203 = arith.constant 0 : index
    %728 = vector.load %arg10[%c34, %c0_203] : memref<48x128xf32, #tpu.memory_space<vmem>>, vector<1x32xf32>
    %729 = vector.broadcast %728 : vector<1x32xf32> to vector<16x32xf32>
    %730 = arith.mulf %727, %729 : vector<16x32xf32>
    %c35 = arith.constant 35 : index
    %c0_204 = arith.constant 0 : index
    %731 = vector.load %arg10[%c35, %c0_204] : memref<48x128xf32, #tpu.memory_space<vmem>>, vector<1x32xf32>
    %732 = vector.broadcast %731 : vector<1x32xf32> to vector<16x32xf32>
    %733 = arith.addf %730, %732 : vector<16x32xf32>
    %734 = arith.truncf %733 : vector<16x32xf32> to vector<16x32xbf16>
    %cst_205 = arith.constant dense<0.000000e+00> : vector<16x96xf32>
    %735 = tpu.matmul %734, %704, %cst_205 {dimension_numbers = #tpu.dot_dimension_numbers<[1], [0], [0], [1], [0, 0, 1, 1], [], []>} : vector<16x32xbf16>, vector<32x96xbf16>, vector<16x96xf32> -> vector<16x96xf32>
    %c36 = arith.constant 36 : index
    %c0_206 = arith.constant 0 : index
    %736 = vector.load %arg10[%c36, %c0_206] : memref<48x128xf32, #tpu.memory_space<vmem>>, vector<1x96xf32>
    %737 = vector.broadcast %736 : vector<1x96xf32> to vector<16x96xf32>
    %738 = arith.addf %735, %737 : vector<16x96xf32>
    %c37 = arith.constant 37 : index
    %c0_207 = arith.constant 0 : index
    %739 = vector.load %arg10[%c37, %c0_207] : memref<48x128xf32, #tpu.memory_space<vmem>>, vector<1x32xf32>
    %740 = tpu.iota {dimensions = array<i32: 0>} : vector<8x8xi32>
    %741 = tpu.iota {dimensions = array<i32: 1>} : vector<8x8xi32>
    %742 = arith.cmpi sgt, %741, %740 : vector<8x8xi32>
    %cst_208 = arith.constant -1.000000e+09 : f32
    %cst_209 = arith.constant 0.000000e+00 : f32
    %743 = vector.broadcast %cst_208 : f32 to vector<8x8xf32>
    %744 = vector.broadcast %cst_209 : f32 to vector<8x8xf32>
    %745 = arith.select %742, %743, %744 : vector<8x8xi1>, vector<8x8xf32>
    %746 = vector.shape_cast %745 : vector<8x8xf32> to vector<1x8x8xf32>
    %747 = vector.shape_cast %746 : vector<1x8x8xf32> to vector<1x8x8xf32>
    %748 = vector.broadcast %747 : vector<1x8x8xf32> to vector<2x8x8xf32>
    %749 = vector.extract_strided_slice %738 {offsets = [0, 0], sizes = [16, 32], strides = [1, 1]} : vector<16x96xf32> to vector<16x32xf32>
    %cst_210 = arith.constant 0.353553385 : f32
    %750 = vector.broadcast %cst_210 : f32 to vector<16x32xf32>
    %751 = arith.mulf %749, %750 : vector<16x32xf32>
    %752 = vector.extract_strided_slice %738 {offsets = [0, 32], sizes = [16, 32], strides = [1, 1]} : vector<16x96xf32> to vector<16x32xf32>
    %753 = vector.extract_strided_slice %738 {offsets = [0, 64], sizes = [16, 32], strides = [1, 1]} : vector<16x96xf32> to vector<16x32xf32>
    %754 = vector.extract_strided_slice %751 {offsets = [0, 0], sizes = [16, 8], strides = [1, 1]} : vector<16x32xf32> to vector<16x8xf32>
    %755 = vector.shape_cast %754 : vector<16x8xf32> to vector<2x8x8xf32>
    %756 = vector.extract_strided_slice %752 {offsets = [0, 0], sizes = [16, 8], strides = [1, 1]} : vector<16x32xf32> to vector<16x8xf32>
    %757 = vector.shape_cast %756 : vector<16x8xf32> to vector<2x8x8xf32>
    %758 = vector.extract_strided_slice %753 {offsets = [0, 0], sizes = [16, 8], strides = [1, 1]} : vector<16x32xf32> to vector<16x8xf32>
    %759 = vector.shape_cast %758 : vector<16x8xf32> to vector<2x8x8xf32>
    %760 = arith.truncf %755 : vector<2x8x8xf32> to vector<2x8x8xbf16>
    %761 = arith.truncf %757 : vector<2x8x8xf32> to vector<2x8x8xbf16>
    "tpu.trace_start"() <{level = 10 : i32, message = "bqd,bkd->bqk"}> : () -> ()
    %cst_211 = arith.constant dense<0.000000e+00> : vector<2x8x8xf32>
    %762 = tpu.matmul %760, %761, %cst_211 {dimension_numbers = #tpu.dot_dimension_numbers<[2], [2], [1], [1], [0, 0, 0, 1, 1, 1], [0], [0]>} : vector<2x8x8xbf16>, vector<2x8x8xbf16>, vector<2x8x8xf32> -> vector<2x8x8xf32>
    "tpu.trace_stop"() : () -> ()
    %763 = arith.addf %762, %748 : vector<2x8x8xf32>
    %cst_212 = arith.constant dense<0xFF800000> : vector<2x8xf32>
    %764 = vector.multi_reduction <maximumf>, %763, %cst_212 [2] : vector<2x8x8xf32> to vector<2x8xf32>
    %765 = vector.shape_cast %764 : vector<2x8xf32> to vector<2x8x1xf32>
    %766 = vector.broadcast %765 : vector<2x8x1xf32> to vector<2x8x8xf32>
    %767 = arith.subf %763, %766 : vector<2x8x8xf32>
    %768 = math.exp %767 : vector<2x8x8xf32>
    %cst_213 = arith.constant dense<0.000000e+00> : vector<2x8xf32>
    %769 = vector.multi_reduction <add>, %768, %cst_213 [2] : vector<2x8x8xf32> to vector<2x8xf32>
    %770 = vector.shape_cast %769 : vector<2x8xf32> to vector<2x8x1xf32>
    %771 = vector.broadcast %770 : vector<2x8x1xf32> to vector<2x8x8xf32>
    %772 = arith.divf %768, %771 : vector<2x8x8xf32>
    %773 = arith.truncf %772 : vector<2x8x8xf32> to vector<2x8x8xbf16>
    %774 = arith.truncf %759 : vector<2x8x8xf32> to vector<2x8x8xbf16>
    "tpu.trace_start"() <{level = 10 : i32, message = "bqk,bkd->bqd"}> : () -> ()
    %cst_214 = arith.constant dense<0.000000e+00> : vector<2x8x8xf32>
    %775 = tpu.matmul %773, %774, %cst_214 {dimension_numbers = #tpu.dot_dimension_numbers<[2], [1], [1], [2], [0, 0, 0, 1, 1, 2], [0], [0]>} : vector<2x8x8xbf16>, vector<2x8x8xbf16>, vector<2x8x8xf32> -> vector<2x8x8xf32>
    "tpu.trace_stop"() : () -> ()
    %776 = vector.shape_cast %775 : vector<2x8x8xf32> to vector<16x8xf32>
    %777 = vector.extract_strided_slice %751 {offsets = [0, 8], sizes = [16, 8], strides = [1, 1]} : vector<16x32xf32> to vector<16x8xf32>
    %778 = vector.shape_cast %777 : vector<16x8xf32> to vector<2x8x8xf32>
    %779 = vector.extract_strided_slice %752 {offsets = [0, 8], sizes = [16, 8], strides = [1, 1]} : vector<16x32xf32> to vector<16x8xf32>
    %780 = vector.shape_cast %779 : vector<16x8xf32> to vector<2x8x8xf32>
    %781 = vector.extract_strided_slice %753 {offsets = [0, 8], sizes = [16, 8], strides = [1, 1]} : vector<16x32xf32> to vector<16x8xf32>
    %782 = vector.shape_cast %781 : vector<16x8xf32> to vector<2x8x8xf32>
    %783 = arith.truncf %778 : vector<2x8x8xf32> to vector<2x8x8xbf16>
    %784 = arith.truncf %780 : vector<2x8x8xf32> to vector<2x8x8xbf16>
    "tpu.trace_start"() <{level = 10 : i32, message = "bqd,bkd->bqk"}> : () -> ()
    %cst_215 = arith.constant dense<0.000000e+00> : vector<2x8x8xf32>
    %785 = tpu.matmul %783, %784, %cst_215 {dimension_numbers = #tpu.dot_dimension_numbers<[2], [2], [1], [1], [0, 0, 0, 1, 1, 1], [0], [0]>} : vector<2x8x8xbf16>, vector<2x8x8xbf16>, vector<2x8x8xf32> -> vector<2x8x8xf32>
    "tpu.trace_stop"() : () -> ()
    %786 = arith.addf %785, %748 : vector<2x8x8xf32>
    %cst_216 = arith.constant dense<0xFF800000> : vector<2x8xf32>
    %787 = vector.multi_reduction <maximumf>, %786, %cst_216 [2] : vector<2x8x8xf32> to vector<2x8xf32>
    %788 = vector.shape_cast %787 : vector<2x8xf32> to vector<2x8x1xf32>
    %789 = vector.broadcast %788 : vector<2x8x1xf32> to vector<2x8x8xf32>
    %790 = arith.subf %786, %789 : vector<2x8x8xf32>
    %791 = math.exp %790 : vector<2x8x8xf32>
    %cst_217 = arith.constant dense<0.000000e+00> : vector<2x8xf32>
    %792 = vector.multi_reduction <add>, %791, %cst_217 [2] : vector<2x8x8xf32> to vector<2x8xf32>
    %793 = vector.shape_cast %792 : vector<2x8xf32> to vector<2x8x1xf32>
    %794 = vector.broadcast %793 : vector<2x8x1xf32> to vector<2x8x8xf32>
    %795 = arith.divf %791, %794 : vector<2x8x8xf32>
    %796 = arith.truncf %795 : vector<2x8x8xf32> to vector<2x8x8xbf16>
    %797 = arith.truncf %782 : vector<2x8x8xf32> to vector<2x8x8xbf16>
    "tpu.trace_start"() <{level = 10 : i32, message = "bqk,bkd->bqd"}> : () -> ()
    %cst_218 = arith.constant dense<0.000000e+00> : vector<2x8x8xf32>
    %798 = tpu.matmul %796, %797, %cst_218 {dimension_numbers = #tpu.dot_dimension_numbers<[2], [1], [1], [2], [0, 0, 0, 1, 1, 2], [0], [0]>} : vector<2x8x8xbf16>, vector<2x8x8xbf16>, vector<2x8x8xf32> -> vector<2x8x8xf32>
    "tpu.trace_stop"() : () -> ()
    %799 = vector.shape_cast %798 : vector<2x8x8xf32> to vector<16x8xf32>
    %800 = vector.extract_strided_slice %751 {offsets = [0, 16], sizes = [16, 8], strides = [1, 1]} : vector<16x32xf32> to vector<16x8xf32>
    %801 = vector.shape_cast %800 : vector<16x8xf32> to vector<2x8x8xf32>
    %802 = vector.extract_strided_slice %752 {offsets = [0, 16], sizes = [16, 8], strides = [1, 1]} : vector<16x32xf32> to vector<16x8xf32>
    %803 = vector.shape_cast %802 : vector<16x8xf32> to vector<2x8x8xf32>
    %804 = vector.extract_strided_slice %753 {offsets = [0, 16], sizes = [16, 8], strides = [1, 1]} : vector<16x32xf32> to vector<16x8xf32>
    %805 = vector.shape_cast %804 : vector<16x8xf32> to vector<2x8x8xf32>
    %806 = arith.truncf %801 : vector<2x8x8xf32> to vector<2x8x8xbf16>
    %807 = arith.truncf %803 : vector<2x8x8xf32> to vector<2x8x8xbf16>
    "tpu.trace_start"() <{level = 10 : i32, message = "bqd,bkd->bqk"}> : () -> ()
    %cst_219 = arith.constant dense<0.000000e+00> : vector<2x8x8xf32>
    %808 = tpu.matmul %806, %807, %cst_219 {dimension_numbers = #tpu.dot_dimension_numbers<[2], [2], [1], [1], [0, 0, 0, 1, 1, 1], [0], [0]>} : vector<2x8x8xbf16>, vector<2x8x8xbf16>, vector<2x8x8xf32> -> vector<2x8x8xf32>
    "tpu.trace_stop"() : () -> ()
    %809 = arith.addf %808, %748 : vector<2x8x8xf32>
    %cst_220 = arith.constant dense<0xFF800000> : vector<2x8xf32>
    %810 = vector.multi_reduction <maximumf>, %809, %cst_220 [2] : vector<2x8x8xf32> to vector<2x8xf32>
    %811 = vector.shape_cast %810 : vector<2x8xf32> to vector<2x8x1xf32>
    %812 = vector.broadcast %811 : vector<2x8x1xf32> to vector<2x8x8xf32>
    %813 = arith.subf %809, %812 : vector<2x8x8xf32>
    %814 = math.exp %813 : vector<2x8x8xf32>
    %cst_221 = arith.constant dense<0.000000e+00> : vector<2x8xf32>
    %815 = vector.multi_reduction <add>, %814, %cst_221 [2] : vector<2x8x8xf32> to vector<2x8xf32>
    %816 = vector.shape_cast %815 : vector<2x8xf32> to vector<2x8x1xf32>
    %817 = vector.broadcast %816 : vector<2x8x1xf32> to vector<2x8x8xf32>
    %818 = arith.divf %814, %817 : vector<2x8x8xf32>
    %819 = arith.truncf %818 : vector<2x8x8xf32> to vector<2x8x8xbf16>
    %820 = arith.truncf %805 : vector<2x8x8xf32> to vector<2x8x8xbf16>
    "tpu.trace_start"() <{level = 10 : i32, message = "bqk,bkd->bqd"}> : () -> ()
    %cst_222 = arith.constant dense<0.000000e+00> : vector<2x8x8xf32>
    %821 = tpu.matmul %819, %820, %cst_222 {dimension_numbers = #tpu.dot_dimension_numbers<[2], [1], [1], [2], [0, 0, 0, 1, 1, 2], [0], [0]>} : vector<2x8x8xbf16>, vector<2x8x8xbf16>, vector<2x8x8xf32> -> vector<2x8x8xf32>
    "tpu.trace_stop"() : () -> ()
    %822 = vector.shape_cast %821 : vector<2x8x8xf32> to vector<16x8xf32>
    %823 = vector.extract_strided_slice %751 {offsets = [0, 24], sizes = [16, 8], strides = [1, 1]} : vector<16x32xf32> to vector<16x8xf32>
    %824 = vector.shape_cast %823 : vector<16x8xf32> to vector<2x8x8xf32>
    %825 = vector.extract_strided_slice %752 {offsets = [0, 24], sizes = [16, 8], strides = [1, 1]} : vector<16x32xf32> to vector<16x8xf32>
    %826 = vector.shape_cast %825 : vector<16x8xf32> to vector<2x8x8xf32>
    %827 = vector.extract_strided_slice %753 {offsets = [0, 24], sizes = [16, 8], strides = [1, 1]} : vector<16x32xf32> to vector<16x8xf32>
    %828 = vector.shape_cast %827 : vector<16x8xf32> to vector<2x8x8xf32>
    %829 = arith.truncf %824 : vector<2x8x8xf32> to vector<2x8x8xbf16>
    %830 = arith.truncf %826 : vector<2x8x8xf32> to vector<2x8x8xbf16>
    "tpu.trace_start"() <{level = 10 : i32, message = "bqd,bkd->bqk"}> : () -> ()
    %cst_223 = arith.constant dense<0.000000e+00> : vector<2x8x8xf32>
    %831 = tpu.matmul %829, %830, %cst_223 {dimension_numbers = #tpu.dot_dimension_numbers<[2], [2], [1], [1], [0, 0, 0, 1, 1, 1], [0], [0]>} : vector<2x8x8xbf16>, vector<2x8x8xbf16>, vector<2x8x8xf32> -> vector<2x8x8xf32>
    "tpu.trace_stop"() : () -> ()
    %832 = arith.addf %831, %748 : vector<2x8x8xf32>
    %cst_224 = arith.constant dense<0xFF800000> : vector<2x8xf32>
    %833 = vector.multi_reduction <maximumf>, %832, %cst_224 [2] : vector<2x8x8xf32> to vector<2x8xf32>
    %834 = vector.shape_cast %833 : vector<2x8xf32> to vector<2x8x1xf32>
    %835 = vector.broadcast %834 : vector<2x8x1xf32> to vector<2x8x8xf32>
    %836 = arith.subf %832, %835 : vector<2x8x8xf32>
    %837 = math.exp %836 : vector<2x8x8xf32>
    %cst_225 = arith.constant dense<0.000000e+00> : vector<2x8xf32>
    %838 = vector.multi_reduction <add>, %837, %cst_225 [2] : vector<2x8x8xf32> to vector<2x8xf32>
    %839 = vector.shape_cast %838 : vector<2x8xf32> to vector<2x8x1xf32>
    %840 = vector.broadcast %839 : vector<2x8x1xf32> to vector<2x8x8xf32>
    %841 = arith.divf %837, %840 : vector<2x8x8xf32>
    %842 = arith.truncf %841 : vector<2x8x8xf32> to vector<2x8x8xbf16>
    %843 = arith.truncf %828 : vector<2x8x8xf32> to vector<2x8x8xbf16>
    "tpu.trace_start"() <{level = 10 : i32, message = "bqk,bkd->bqd"}> : () -> ()
    %cst_226 = arith.constant dense<0.000000e+00> : vector<2x8x8xf32>
    %844 = tpu.matmul %842, %843, %cst_226 {dimension_numbers = #tpu.dot_dimension_numbers<[2], [1], [1], [2], [0, 0, 0, 1, 1, 2], [0], [0]>} : vector<2x8x8xbf16>, vector<2x8x8xbf16>, vector<2x8x8xf32> -> vector<2x8x8xf32>
    "tpu.trace_stop"() : () -> ()
    %845 = vector.shape_cast %844 : vector<2x8x8xf32> to vector<16x8xf32>
    %846 = tpu.concatenate %776, %799, %822, %845 in 1 : vector<16x8xf32>, vector<16x8xf32>, vector<16x8xf32>, vector<16x8xf32> -> vector<16x32xf32>
    %847 = arith.truncf %846 : vector<16x32xf32> to vector<16x32xbf16>
    %cst_227 = arith.constant dense<0.000000e+00> : vector<16x32xf32>
    %848 = tpu.matmul %847, %705, %cst_227 {dimension_numbers = #tpu.dot_dimension_numbers<[1], [0], [0], [1], [0, 0, 1, 1], [], []>} : vector<16x32xbf16>, vector<32x32xbf16>, vector<16x32xf32> -> vector<16x32xf32>
    %849 = vector.broadcast %739 : vector<1x32xf32> to vector<16x32xf32>
    %850 = arith.addf %848, %849 : vector<16x32xf32>
    %851 = arith.addf %701, %850 : vector<16x32xf32>
    %cst_228 = arith.constant dense<0.000000e+00> : vector<16xf32>
    %852 = vector.multi_reduction <add>, %851, %cst_228 [1] : vector<16x32xf32> to vector<16xf32>
    %853 = vector.shape_cast %852 : vector<16xf32> to vector<16x1xf32>
    %cst_229 = arith.constant 3.200000e+01 : f32
    %854 = vector.broadcast %cst_229 : f32 to vector<16x1xf32>
    %855 = arith.divf %853, %854 : vector<16x1xf32>
    %856 = vector.broadcast %855 : vector<16x1xf32> to vector<16x32xf32>
    %857 = arith.subf %851, %856 : vector<16x32xf32>
    %858 = arith.mulf %857, %857 : vector<16x32xf32>
    %cst_230 = arith.constant dense<0.000000e+00> : vector<16xf32>
    %859 = vector.multi_reduction <add>, %858, %cst_230 [1] : vector<16x32xf32> to vector<16xf32>
    %860 = vector.shape_cast %859 : vector<16xf32> to vector<16x1xf32>
    %cst_231 = arith.constant 3.200000e+01 : f32
    %861 = vector.broadcast %cst_231 : f32 to vector<16x1xf32>
    %862 = arith.divf %860, %861 : vector<16x1xf32>
    %cst_232 = arith.constant 9.99999974E-6 : f32
    %863 = vector.broadcast %cst_232 : f32 to vector<16x1xf32>
    %864 = arith.addf %862, %863 : vector<16x1xf32>
    %865 = math.rsqrt %864 : vector<16x1xf32>
    %866 = vector.broadcast %865 : vector<16x1xf32> to vector<16x32xf32>
    %867 = arith.mulf %857, %866 : vector<16x32xf32>
    %c38 = arith.constant 38 : index
    %c0_233 = arith.constant 0 : index
    %868 = vector.load %arg10[%c38, %c0_233] : memref<48x128xf32, #tpu.memory_space<vmem>>, vector<1x32xf32>
    %869 = vector.broadcast %868 : vector<1x32xf32> to vector<16x32xf32>
    %870 = arith.mulf %867, %869 : vector<16x32xf32>
    %c39 = arith.constant 39 : index
    %c0_234 = arith.constant 0 : index
    %871 = vector.load %arg10[%c39, %c0_234] : memref<48x128xf32, #tpu.memory_space<vmem>>, vector<1x32xf32>
    %872 = vector.broadcast %871 : vector<1x32xf32> to vector<16x32xf32>
    %873 = arith.addf %870, %872 : vector<16x32xf32>
    %c40 = arith.constant 40 : index
    %c0_235 = arith.constant 0 : index
    %874 = vector.load %arg10[%c40, %c0_235] : memref<48x128xf32, #tpu.memory_space<vmem>>, vector<1x96xf32>
    %875 = arith.truncf %873 : vector<16x32xf32> to vector<16x32xbf16>
    %cst_236 = arith.constant dense<0.000000e+00> : vector<16x32xf32>
    %876 = tpu.matmul %875, %706, %cst_236 {dimension_numbers = #tpu.dot_dimension_numbers<[1], [0], [0], [1], [0, 0, 1, 1], [], []>} : vector<16x32xbf16>, vector<32x32xbf16>, vector<16x32xf32> -> vector<16x32xf32>
    %877 = vector.extract_strided_slice %874 {offsets = [0, 0], sizes = [1, 32], strides = [1, 1]} : vector<1x96xf32> to vector<1x32xf32>
    %878 = vector.broadcast %877 : vector<1x32xf32> to vector<16x32xf32>
    %879 = arith.addf %876, %878 : vector<16x32xf32>
    %880 = arith.truncf %384 : vector<16x32xf32> to vector<16x32xbf16>
    %cst_237 = arith.constant dense<0.000000e+00> : vector<16x64xf32>
    %881 = tpu.matmul %880, %707, %cst_237 {dimension_numbers = #tpu.dot_dimension_numbers<[1], [0], [0], [1], [0, 0, 1, 1], [], []>} : vector<16x32xbf16>, vector<32x64xbf16>, vector<16x64xf32> -> vector<16x64xf32>
    %882 = vector.extract_strided_slice %874 {offsets = [0, 32], sizes = [1, 64], strides = [1, 1]} : vector<1x96xf32> to vector<1x64xf32>
    %883 = vector.broadcast %882 : vector<1x64xf32> to vector<16x64xf32>
    %884 = arith.addf %881, %883 : vector<16x64xf32>
    %c41 = arith.constant 41 : index
    %c0_238 = arith.constant 0 : index
    %885 = vector.load %arg10[%c41, %c0_238] : memref<48x128xf32, #tpu.memory_space<vmem>>, vector<1x32xf32>
    %cst_239 = arith.constant 0.353553385 : f32
    %886 = vector.broadcast %cst_239 : f32 to vector<16x32xf32>
    %887 = arith.mulf %879, %886 : vector<16x32xf32>
    %888 = vector.extract_strided_slice %884 {offsets = [0, 0], sizes = [16, 32], strides = [1, 1]} : vector<16x64xf32> to vector<16x32xf32>
    %889 = vector.extract_strided_slice %884 {offsets = [0, 32], sizes = [16, 32], strides = [1, 1]} : vector<16x64xf32> to vector<16x32xf32>
    %890 = vector.extract_strided_slice %887 {offsets = [0, 0], sizes = [16, 8], strides = [1, 1]} : vector<16x32xf32> to vector<16x8xf32>
    %891 = vector.shape_cast %890 : vector<16x8xf32> to vector<2x8x8xf32>
    %892 = vector.extract_strided_slice %888 {offsets = [0, 0], sizes = [16, 8], strides = [1, 1]} : vector<16x32xf32> to vector<16x8xf32>
    %893 = vector.shape_cast %892 : vector<16x8xf32> to vector<2x8x8xf32>
    %894 = vector.extract_strided_slice %889 {offsets = [0, 0], sizes = [16, 8], strides = [1, 1]} : vector<16x32xf32> to vector<16x8xf32>
    %895 = vector.shape_cast %894 : vector<16x8xf32> to vector<2x8x8xf32>
    %896 = arith.truncf %891 : vector<2x8x8xf32> to vector<2x8x8xbf16>
    %897 = arith.truncf %893 : vector<2x8x8xf32> to vector<2x8x8xbf16>
    "tpu.trace_start"() <{level = 10 : i32, message = "bqd,bkd->bqk"}> : () -> ()
    %cst_240 = arith.constant dense<0.000000e+00> : vector<2x8x8xf32>
    %898 = tpu.matmul %896, %897, %cst_240 {dimension_numbers = #tpu.dot_dimension_numbers<[2], [2], [1], [1], [0, 0, 0, 1, 1, 1], [0], [0]>} : vector<2x8x8xbf16>, vector<2x8x8xbf16>, vector<2x8x8xf32> -> vector<2x8x8xf32>
    "tpu.trace_stop"() : () -> ()
    %cst_241 = arith.constant dense<0xFF800000> : vector<2x8xf32>
    %899 = vector.multi_reduction <maximumf>, %898, %cst_241 [2] : vector<2x8x8xf32> to vector<2x8xf32>
    %900 = vector.shape_cast %899 : vector<2x8xf32> to vector<2x8x1xf32>
    %901 = vector.broadcast %900 : vector<2x8x1xf32> to vector<2x8x8xf32>
    %902 = arith.subf %898, %901 : vector<2x8x8xf32>
    %903 = math.exp %902 : vector<2x8x8xf32>
    %cst_242 = arith.constant dense<0.000000e+00> : vector<2x8xf32>
    %904 = vector.multi_reduction <add>, %903, %cst_242 [2] : vector<2x8x8xf32> to vector<2x8xf32>
    %905 = vector.shape_cast %904 : vector<2x8xf32> to vector<2x8x1xf32>
    %906 = vector.broadcast %905 : vector<2x8x1xf32> to vector<2x8x8xf32>
    %907 = arith.divf %903, %906 : vector<2x8x8xf32>
    %908 = arith.truncf %907 : vector<2x8x8xf32> to vector<2x8x8xbf16>
    %909 = arith.truncf %895 : vector<2x8x8xf32> to vector<2x8x8xbf16>
    "tpu.trace_start"() <{level = 10 : i32, message = "bqk,bkd->bqd"}> : () -> ()
    %cst_243 = arith.constant dense<0.000000e+00> : vector<2x8x8xf32>
    %910 = tpu.matmul %908, %909, %cst_243 {dimension_numbers = #tpu.dot_dimension_numbers<[2], [1], [1], [2], [0, 0, 0, 1, 1, 2], [0], [0]>} : vector<2x8x8xbf16>, vector<2x8x8xbf16>, vector<2x8x8xf32> -> vector<2x8x8xf32>
    "tpu.trace_stop"() : () -> ()
    %911 = vector.shape_cast %910 : vector<2x8x8xf32> to vector<16x8xf32>
    %912 = vector.extract_strided_slice %887 {offsets = [0, 8], sizes = [16, 8], strides = [1, 1]} : vector<16x32xf32> to vector<16x8xf32>
    %913 = vector.shape_cast %912 : vector<16x8xf32> to vector<2x8x8xf32>
    %914 = vector.extract_strided_slice %888 {offsets = [0, 8], sizes = [16, 8], strides = [1, 1]} : vector<16x32xf32> to vector<16x8xf32>
    %915 = vector.shape_cast %914 : vector<16x8xf32> to vector<2x8x8xf32>
    %916 = vector.extract_strided_slice %889 {offsets = [0, 8], sizes = [16, 8], strides = [1, 1]} : vector<16x32xf32> to vector<16x8xf32>
    %917 = vector.shape_cast %916 : vector<16x8xf32> to vector<2x8x8xf32>
    %918 = arith.truncf %913 : vector<2x8x8xf32> to vector<2x8x8xbf16>
    %919 = arith.truncf %915 : vector<2x8x8xf32> to vector<2x8x8xbf16>
    "tpu.trace_start"() <{level = 10 : i32, message = "bqd,bkd->bqk"}> : () -> ()
    %cst_244 = arith.constant dense<0.000000e+00> : vector<2x8x8xf32>
    %920 = tpu.matmul %918, %919, %cst_244 {dimension_numbers = #tpu.dot_dimension_numbers<[2], [2], [1], [1], [0, 0, 0, 1, 1, 1], [0], [0]>} : vector<2x8x8xbf16>, vector<2x8x8xbf16>, vector<2x8x8xf32> -> vector<2x8x8xf32>
    "tpu.trace_stop"() : () -> ()
    %cst_245 = arith.constant dense<0xFF800000> : vector<2x8xf32>
    %921 = vector.multi_reduction <maximumf>, %920, %cst_245 [2] : vector<2x8x8xf32> to vector<2x8xf32>
    %922 = vector.shape_cast %921 : vector<2x8xf32> to vector<2x8x1xf32>
    %923 = vector.broadcast %922 : vector<2x8x1xf32> to vector<2x8x8xf32>
    %924 = arith.subf %920, %923 : vector<2x8x8xf32>
    %925 = math.exp %924 : vector<2x8x8xf32>
    %cst_246 = arith.constant dense<0.000000e+00> : vector<2x8xf32>
    %926 = vector.multi_reduction <add>, %925, %cst_246 [2] : vector<2x8x8xf32> to vector<2x8xf32>
    %927 = vector.shape_cast %926 : vector<2x8xf32> to vector<2x8x1xf32>
    %928 = vector.broadcast %927 : vector<2x8x1xf32> to vector<2x8x8xf32>
    %929 = arith.divf %925, %928 : vector<2x8x8xf32>
    %930 = arith.truncf %929 : vector<2x8x8xf32> to vector<2x8x8xbf16>
    %931 = arith.truncf %917 : vector<2x8x8xf32> to vector<2x8x8xbf16>
    "tpu.trace_start"() <{level = 10 : i32, message = "bqk,bkd->bqd"}> : () -> ()
    %cst_247 = arith.constant dense<0.000000e+00> : vector<2x8x8xf32>
    %932 = tpu.matmul %930, %931, %cst_247 {dimension_numbers = #tpu.dot_dimension_numbers<[2], [1], [1], [2], [0, 0, 0, 1, 1, 2], [0], [0]>} : vector<2x8x8xbf16>, vector<2x8x8xbf16>, vector<2x8x8xf32> -> vector<2x8x8xf32>
    "tpu.trace_stop"() : () -> ()
    %933 = vector.shape_cast %932 : vector<2x8x8xf32> to vector<16x8xf32>
    %934 = vector.extract_strided_slice %887 {offsets = [0, 16], sizes = [16, 8], strides = [1, 1]} : vector<16x32xf32> to vector<16x8xf32>
    %935 = vector.shape_cast %934 : vector<16x8xf32> to vector<2x8x8xf32>
    %936 = vector.extract_strided_slice %888 {offsets = [0, 16], sizes = [16, 8], strides = [1, 1]} : vector<16x32xf32> to vector<16x8xf32>
    %937 = vector.shape_cast %936 : vector<16x8xf32> to vector<2x8x8xf32>
    %938 = vector.extract_strided_slice %889 {offsets = [0, 16], sizes = [16, 8], strides = [1, 1]} : vector<16x32xf32> to vector<16x8xf32>
    %939 = vector.shape_cast %938 : vector<16x8xf32> to vector<2x8x8xf32>
    %940 = arith.truncf %935 : vector<2x8x8xf32> to vector<2x8x8xbf16>
    %941 = arith.truncf %937 : vector<2x8x8xf32> to vector<2x8x8xbf16>
    "tpu.trace_start"() <{level = 10 : i32, message = "bqd,bkd->bqk"}> : () -> ()
    %cst_248 = arith.constant dense<0.000000e+00> : vector<2x8x8xf32>
    %942 = tpu.matmul %940, %941, %cst_248 {dimension_numbers = #tpu.dot_dimension_numbers<[2], [2], [1], [1], [0, 0, 0, 1, 1, 1], [0], [0]>} : vector<2x8x8xbf16>, vector<2x8x8xbf16>, vector<2x8x8xf32> -> vector<2x8x8xf32>
    "tpu.trace_stop"() : () -> ()
    %cst_249 = arith.constant dense<0xFF800000> : vector<2x8xf32>
    %943 = vector.multi_reduction <maximumf>, %942, %cst_249 [2] : vector<2x8x8xf32> to vector<2x8xf32>
    %944 = vector.shape_cast %943 : vector<2x8xf32> to vector<2x8x1xf32>
    %945 = vector.broadcast %944 : vector<2x8x1xf32> to vector<2x8x8xf32>
    %946 = arith.subf %942, %945 : vector<2x8x8xf32>
    %947 = math.exp %946 : vector<2x8x8xf32>
    %cst_250 = arith.constant dense<0.000000e+00> : vector<2x8xf32>
    %948 = vector.multi_reduction <add>, %947, %cst_250 [2] : vector<2x8x8xf32> to vector<2x8xf32>
    %949 = vector.shape_cast %948 : vector<2x8xf32> to vector<2x8x1xf32>
    %950 = vector.broadcast %949 : vector<2x8x1xf32> to vector<2x8x8xf32>
    %951 = arith.divf %947, %950 : vector<2x8x8xf32>
    %952 = arith.truncf %951 : vector<2x8x8xf32> to vector<2x8x8xbf16>
    %953 = arith.truncf %939 : vector<2x8x8xf32> to vector<2x8x8xbf16>
    "tpu.trace_start"() <{level = 10 : i32, message = "bqk,bkd->bqd"}> : () -> ()
    %cst_251 = arith.constant dense<0.000000e+00> : vector<2x8x8xf32>
    %954 = tpu.matmul %952, %953, %cst_251 {dimension_numbers = #tpu.dot_dimension_numbers<[2], [1], [1], [2], [0, 0, 0, 1, 1, 2], [0], [0]>} : vector<2x8x8xbf16>, vector<2x8x8xbf16>, vector<2x8x8xf32> -> vector<2x8x8xf32>
    "tpu.trace_stop"() : () -> ()
    %955 = vector.shape_cast %954 : vector<2x8x8xf32> to vector<16x8xf32>
    %956 = vector.extract_strided_slice %887 {offsets = [0, 24], sizes = [16, 8], strides = [1, 1]} : vector<16x32xf32> to vector<16x8xf32>
    %957 = vector.shape_cast %956 : vector<16x8xf32> to vector<2x8x8xf32>
    %958 = vector.extract_strided_slice %888 {offsets = [0, 24], sizes = [16, 8], strides = [1, 1]} : vector<16x32xf32> to vector<16x8xf32>
    %959 = vector.shape_cast %958 : vector<16x8xf32> to vector<2x8x8xf32>
    %960 = vector.extract_strided_slice %889 {offsets = [0, 24], sizes = [16, 8], strides = [1, 1]} : vector<16x32xf32> to vector<16x8xf32>
    %961 = vector.shape_cast %960 : vector<16x8xf32> to vector<2x8x8xf32>
    %962 = arith.truncf %957 : vector<2x8x8xf32> to vector<2x8x8xbf16>
    %963 = arith.truncf %959 : vector<2x8x8xf32> to vector<2x8x8xbf16>
    "tpu.trace_start"() <{level = 10 : i32, message = "bqd,bkd->bqk"}> : () -> ()
    %cst_252 = arith.constant dense<0.000000e+00> : vector<2x8x8xf32>
    %964 = tpu.matmul %962, %963, %cst_252 {dimension_numbers = #tpu.dot_dimension_numbers<[2], [2], [1], [1], [0, 0, 0, 1, 1, 1], [0], [0]>} : vector<2x8x8xbf16>, vector<2x8x8xbf16>, vector<2x8x8xf32> -> vector<2x8x8xf32>
    "tpu.trace_stop"() : () -> ()
    %cst_253 = arith.constant dense<0xFF800000> : vector<2x8xf32>
    %965 = vector.multi_reduction <maximumf>, %964, %cst_253 [2] : vector<2x8x8xf32> to vector<2x8xf32>
    %966 = vector.shape_cast %965 : vector<2x8xf32> to vector<2x8x1xf32>
    %967 = vector.broadcast %966 : vector<2x8x1xf32> to vector<2x8x8xf32>
    %968 = arith.subf %964, %967 : vector<2x8x8xf32>
    %969 = math.exp %968 : vector<2x8x8xf32>
    %cst_254 = arith.constant dense<0.000000e+00> : vector<2x8xf32>
    %970 = vector.multi_reduction <add>, %969, %cst_254 [2] : vector<2x8x8xf32> to vector<2x8xf32>
    %971 = vector.shape_cast %970 : vector<2x8xf32> to vector<2x8x1xf32>
    %972 = vector.broadcast %971 : vector<2x8x1xf32> to vector<2x8x8xf32>
    %973 = arith.divf %969, %972 : vector<2x8x8xf32>
    %974 = arith.truncf %973 : vector<2x8x8xf32> to vector<2x8x8xbf16>
    %975 = arith.truncf %961 : vector<2x8x8xf32> to vector<2x8x8xbf16>
    "tpu.trace_start"() <{level = 10 : i32, message = "bqk,bkd->bqd"}> : () -> ()
    %cst_255 = arith.constant dense<0.000000e+00> : vector<2x8x8xf32>
    %976 = tpu.matmul %974, %975, %cst_255 {dimension_numbers = #tpu.dot_dimension_numbers<[2], [1], [1], [2], [0, 0, 0, 1, 1, 2], [0], [0]>} : vector<2x8x8xbf16>, vector<2x8x8xbf16>, vector<2x8x8xf32> -> vector<2x8x8xf32>
    "tpu.trace_stop"() : () -> ()
    %977 = vector.shape_cast %976 : vector<2x8x8xf32> to vector<16x8xf32>
    %978 = tpu.concatenate %911, %933, %955, %977 in 1 : vector<16x8xf32>, vector<16x8xf32>, vector<16x8xf32>, vector<16x8xf32> -> vector<16x32xf32>
    %979 = arith.truncf %978 : vector<16x32xf32> to vector<16x32xbf16>
    %cst_256 = arith.constant dense<0.000000e+00> : vector<16x32xf32>
    %980 = tpu.matmul %979, %708, %cst_256 {dimension_numbers = #tpu.dot_dimension_numbers<[1], [0], [0], [1], [0, 0, 1, 1], [], []>} : vector<16x32xbf16>, vector<32x32xbf16>, vector<16x32xf32> -> vector<16x32xf32>
    %981 = vector.broadcast %885 : vector<1x32xf32> to vector<16x32xf32>
    %982 = arith.addf %980, %981 : vector<16x32xf32>
    %983 = arith.addf %851, %982 : vector<16x32xf32>
    %cst_257 = arith.constant dense<0.000000e+00> : vector<16xf32>
    %984 = vector.multi_reduction <add>, %983, %cst_257 [1] : vector<16x32xf32> to vector<16xf32>
    %985 = vector.shape_cast %984 : vector<16xf32> to vector<16x1xf32>
    %cst_258 = arith.constant 3.200000e+01 : f32
    %986 = vector.broadcast %cst_258 : f32 to vector<16x1xf32>
    %987 = arith.divf %985, %986 : vector<16x1xf32>
    %988 = vector.broadcast %987 : vector<16x1xf32> to vector<16x32xf32>
    %989 = arith.subf %983, %988 : vector<16x32xf32>
    %990 = arith.mulf %989, %989 : vector<16x32xf32>
    %cst_259 = arith.constant dense<0.000000e+00> : vector<16xf32>
    %991 = vector.multi_reduction <add>, %990, %cst_259 [1] : vector<16x32xf32> to vector<16xf32>
    %992 = vector.shape_cast %991 : vector<16xf32> to vector<16x1xf32>
    %cst_260 = arith.constant 3.200000e+01 : f32
    %993 = vector.broadcast %cst_260 : f32 to vector<16x1xf32>
    %994 = arith.divf %992, %993 : vector<16x1xf32>
    %cst_261 = arith.constant 9.99999974E-6 : f32
    %995 = vector.broadcast %cst_261 : f32 to vector<16x1xf32>
    %996 = arith.addf %994, %995 : vector<16x1xf32>
    %997 = math.rsqrt %996 : vector<16x1xf32>
    %998 = vector.broadcast %997 : vector<16x1xf32> to vector<16x32xf32>
    %999 = arith.mulf %989, %998 : vector<16x32xf32>
    %c42 = arith.constant 42 : index
    %c0_262 = arith.constant 0 : index
    %1000 = vector.load %arg10[%c42, %c0_262] : memref<48x128xf32, #tpu.memory_space<vmem>>, vector<1x32xf32>
    %1001 = vector.broadcast %1000 : vector<1x32xf32> to vector<16x32xf32>
    %1002 = arith.mulf %999, %1001 : vector<16x32xf32>
    %c43 = arith.constant 43 : index
    %c0_263 = arith.constant 0 : index
    %1003 = vector.load %arg10[%c43, %c0_263] : memref<48x128xf32, #tpu.memory_space<vmem>>, vector<1x32xf32>
    %1004 = vector.broadcast %1003 : vector<1x32xf32> to vector<16x32xf32>
    %1005 = arith.addf %1002, %1004 : vector<16x32xf32>
    %1006 = arith.truncf %1005 : vector<16x32xf32> to vector<16x32xbf16>
    %cst_264 = arith.constant dense<0.000000e+00> : vector<16x64xf32>
    %1007 = tpu.matmul %1006, %709, %cst_264 {dimension_numbers = #tpu.dot_dimension_numbers<[1], [0], [0], [1], [0, 0, 1, 1], [], []>} : vector<16x32xbf16>, vector<32x64xbf16>, vector<16x64xf32> -> vector<16x64xf32>
    %c44 = arith.constant 44 : index
    %c0_265 = arith.constant 0 : index
    %1008 = vector.load %arg10[%c44, %c0_265] : memref<48x128xf32, #tpu.memory_space<vmem>>, vector<1x64xf32>
    %1009 = vector.broadcast %1008 : vector<1x64xf32> to vector<16x64xf32>
    %1010 = arith.addf %1007, %1009 : vector<16x64xf32>
    %cst_266 = arith.constant 0.000000e+00 : f32
    %1011 = vector.broadcast %cst_266 : f32 to vector<16x64xf32>
    %1012 = arith.maximumf %1010, %1011 : vector<16x64xf32>
    %1013 = arith.truncf %1012 : vector<16x64xf32> to vector<16x64xbf16>
    %cst_267 = arith.constant dense<0.000000e+00> : vector<16x32xf32>
    %1014 = tpu.matmul %1013, %711, %cst_267 {dimension_numbers = #tpu.dot_dimension_numbers<[1], [0], [0], [1], [0, 0, 1, 1], [], []>} : vector<16x64xbf16>, vector<64x32xbf16>, vector<16x32xf32> -> vector<16x32xf32>
    %1015 = arith.addf %983, %1014 : vector<16x32xf32>
    %c45 = arith.constant 45 : index
    %c0_268 = arith.constant 0 : index
    %1016 = vector.load %arg10[%c45, %c0_268] : memref<48x128xf32, #tpu.memory_space<vmem>>, vector<1x32xf32>
    %1017 = vector.broadcast %1016 : vector<1x32xf32> to vector<16x32xf32>
    %1018 = arith.addf %1015, %1017 : vector<16x32xf32>
    %cst_269 = arith.constant dense<0.000000e+00> : vector<16xf32>
    %1019 = vector.multi_reduction <add>, %1018, %cst_269 [1] : vector<16x32xf32> to vector<16xf32>
    %1020 = vector.shape_cast %1019 : vector<16xf32> to vector<16x1xf32>
    %cst_270 = arith.constant 3.200000e+01 : f32
    %1021 = vector.broadcast %cst_270 : f32 to vector<16x1xf32>
    %1022 = arith.divf %1020, %1021 : vector<16x1xf32>
    %1023 = vector.broadcast %1022 : vector<16x1xf32> to vector<16x32xf32>
    %1024 = arith.subf %1018, %1023 : vector<16x32xf32>
    %1025 = arith.mulf %1024, %1024 : vector<16x32xf32>
    %cst_271 = arith.constant dense<0.000000e+00> : vector<16xf32>
    %1026 = vector.multi_reduction <add>, %1025, %cst_271 [1] : vector<16x32xf32> to vector<16xf32>
    %1027 = vector.shape_cast %1026 : vector<16xf32> to vector<16x1xf32>
    %cst_272 = arith.constant 3.200000e+01 : f32
    %1028 = vector.broadcast %cst_272 : f32 to vector<16x1xf32>
    %1029 = arith.divf %1027, %1028 : vector<16x1xf32>
    %cst_273 = arith.constant 9.99999974E-6 : f32
    %1030 = vector.broadcast %cst_273 : f32 to vector<16x1xf32>
    %1031 = arith.addf %1029, %1030 : vector<16x1xf32>
    %1032 = math.rsqrt %1031 : vector<16x1xf32>
    %1033 = vector.broadcast %1032 : vector<16x1xf32> to vector<16x32xf32>
    %1034 = arith.mulf %1024, %1033 : vector<16x32xf32>
    %c46 = arith.constant 46 : index
    %c0_274 = arith.constant 0 : index
    %1035 = vector.load %arg10[%c46, %c0_274] : memref<48x128xf32, #tpu.memory_space<vmem>>, vector<1x32xf32>
    %1036 = vector.broadcast %1035 : vector<1x32xf32> to vector<16x32xf32>
    %1037 = arith.mulf %1034, %1036 : vector<16x32xf32>
    %c47 = arith.constant 47 : index
    %c0_275 = arith.constant 0 : index
    %1038 = vector.load %arg10[%c47, %c0_275] : memref<48x128xf32, #tpu.memory_space<vmem>>, vector<1x32xf32>
    %1039 = vector.broadcast %1038 : vector<1x32xf32> to vector<16x32xf32>
    %1040 = arith.addf %1037, %1039 : vector<16x32xf32>
    %c0_276 = arith.constant 0 : index
    %c0_277 = arith.constant 0 : index
    %1041 = vector.load %arg5[%c0_276, %c0_277] : memref<32x128xbf16, #tpu.memory_space<vmem>>, vector<32x128xbf16>
    %1042 = arith.truncf %1040 : vector<16x32xf32> to vector<16x32xbf16>
    %cst_278 = arith.constant dense<0.000000e+00> : vector<16x128xf32>
    %1043 = tpu.matmul %1042, %1041, %cst_278 {dimension_numbers = #tpu.dot_dimension_numbers<[1], [0], [0], [1], [0, 0, 1, 1], [], []>} : vector<16x32xbf16>, vector<32x128xbf16>, vector<16x128xf32> -> vector<16x128xf32>
    %c3 = arith.constant 3 : index
    %c0_279 = arith.constant 0 : index
    %1044 = vector.load %arg10[%c3, %c0_279] : memref<48x128xf32, #tpu.memory_space<vmem>>, vector<1x128xf32>
    %1045 = vector.broadcast %1044 : vector<1x128xf32> to vector<16x128xf32>
    %1046 = arith.addf %1043, %1045 : vector<16x128xf32>
    %c0_280 = arith.constant 0 : index
    %c0_281 = arith.constant 0 : index
    %1047 = vector.load %arg11[%c0_280, %c0_281] : memref<16x128xf32, #tpu.memory_space<vmem>>, vector<16x128xf32>
    tpu.vector_store %arg11[%c0_280, %c0_281], %1046 {strides = array<i32>} : memref<16x128xf32, #tpu.memory_space<vmem>>, vector<16x128xf32>,
    return
  }
}

</mosaic_0001>

<bundles_post_ra>
// kernel: pots_transformer_forward.1
= control target key start
LH: loop header
LB: loop body
LE: loop exit
PB: predicated region body
PF: predicated region fallthrough
CT: control target
= control target key end

     0   :  { %16 = vsyncpa [#allocation3], 0  ;;  %s11360_s0 = inlined_call_operand.vmem [shape: f32[32,4], index: 0, kind: input, shape index: {}]   ;;  %s11361_s1 = inlined_call_operand.vmem [shape: f32[32,64], index: 1, kind: input, shape index: {}]   ;;  %s11362_s2 = inlined_call_operand.hbm [shape: bf16[4,32], index: 2, kind: input, shape index: {}]   ;;  %s11363_s3 = inlined_call_operand.hbm [shape: bf16[32,64], index: 3, kind: input, shape index: {}]   ;;  %s11364_s4 = inlined_call_operand.vmem [shape: bf16[64,32], index: 4, kind: input, shape index: {}]   ;;  %s11365_s5 = inlined_call_operand.hbm [shape: bf16[32,128], index: 5, kind: input, shape index: {}]   ;;  %s11366_s6 = inlined_call_operand.hbm [shape: bf16[2,32,192], index: 6, kind: input, shape index: {}]   ;;  %s11367_s7 = inlined_call_operand.vmem [shape: bf16[2,64,32], index: 7, kind: input, shape index: {}]   ;;  %s11368_s8 = inlined_call_operand.hbm [shape: bf16[2,32,320], index: 8, kind: input, shape index: {}]   ;;  %s11369_s9 = inlined_call_operand.vmem [shape: bf16[2,64,32], index: 9, kind: input, shape index: {}]   ;;  %s11370_s10 = inlined_call_operand.hbm [shape: f32[48,128], index: 10, kind: input, shape index: {}]   ;;  %s11371_s11 = inlined_call_operand.vmem [shape: f32[16,128], index: 11, kind: output, shape index: {}]  }
   0x1   :  { %17 = vsyncpa [#allocation5], 0 }
   0x2   :  { %18 = vsyncpa [#allocation8], 0 }
   0x3   :  { %19 = vsyncpa [#allocation11], 0  ;;  %s9725_s17 = smov [#allocation4]  }
   0x4   :  { %s39_s18 = sshll.u32 %s9725_s17, 4  ;;  %s40_s18 = int_to_ptr.vmem [resolvable:$true] %s39_s18 }
   0x5   :  { %s9605_s19 = scalar_lea.vmem %s40_s18, 256  ;;  %p9610_p1 = scmp.lt.s32.totalorder %s40_s18, %s40_s18 }
   0x6   :  { %p9606_p0 = scmp.ne.s32.totalorder %s40_s18, %s9605_s19  ;;  %p9611_p2 = scmp.lt.s32.totalorder %s9605_s19, %s9605_s19 }
   0x8   :  { %p9612_p3 = por %p9611_p2, %p9610_p1 }
   0xa   :  { %p9613_p4 = pnand %p9612_p3, %p9606_p0 }
   0xc   :  { %9616 = shalt.err (!%p9613_p4)
}
   0xd   :  { %s9726_s20 = smov 64   ;;  %s9727_s21 = smov 4  }
   0xe   :  { %45 = dma.hbm_to_vmem [thread:$0]  %s11363_s3, 256, %s40_s18, [#allocation5], %s9726_s20, %s9726_s20, %s9727_s21  }
   0xf   :  { %s9728_s24 = smov [#allocation7]  }
  0x10   :  { %s65_s25 = sshll.u32 %s9728_s24, 4  ;;  %s66_s25 = int_to_ptr.vmem [resolvable:$true] %s65_s25 }
  0x11   :  { %s9625_s26 = scalar_lea.vmem %s66_s25, 1024  ;;  %p9630_p6 = scmp.lt.s32.totalorder %s66_s25, %s66_s25 }
  0x12   :  { %p9626_p5 = scmp.ne.s32.totalorder %s66_s25, %s9625_s26  ;;  %p9631_p7 = scmp.lt.s32.totalorder %s9625_s26, %s9625_s26 }
  0x14   :  { %p9632_p8 = por %p9631_p7, %p9630_p6 }
  0x16   :  { %p9633_p9 = pnand %p9632_p8, %p9626_p5 }
  0x18   :  { %9636 = shalt.err (!%p9633_p9)
}
  0x19   :  { %s9729_s27 = smov 128   ;;  %s9730_s28 = smov 8  }
  0x1a   :  { %71 = dma.hbm_to_vmem [thread:$0]  %s11366_s6, 1024, %s66_s25, [#allocation8], %s9729_s27, %s9729_s27, %s9730_s28  }
  0x1b   :  { %s9731_s3 = smov [#allocation2]   ;;  %s9732_s13 = smov [#allocation6]  }
  0x1c   :  { %s30_s12 = sshll.u32 %s9731_s3, 4  ;;  %s53_s14 = sshll.u32 %s9732_s13, 4  ;;  %s31_s12 = int_to_ptr.vmem [resolvable:$true] %s30_s12  ;;  %s54_s14 = int_to_ptr.vmem [resolvable:$true] %s53_s14 }
  0x1d   :  { %s9645_s15 = scalar_lea.vmem %s31_s12, 32  ;;  %p9650_p11 = scmp.lt.s32.totalorder %s31_s12, %s31_s12 }
  0x1e   :  { %p9646_p10 = scmp.ne.s32.totalorder %s31_s12, %s9645_s15  ;;  %p9651_p12 = scmp.lt.s32.totalorder %s9645_s15, %s9645_s15 }
  0x20   :  { %p9652_p13 = por %p9651_p12, %p9650_p11 }
  0x22   :  { %p9653_p0 = pnand %p9652_p13, %p9646_p10 }
  0x24   :  { %9656 = shalt.err (!%p9653_p0)
}
  0x25   :  { %33 = dma.hbm_to_vmem [thread:$0]  %s11362_s2, 32, %s31_s12, [#allocation3]  }
  0x26   :  { %s9665_s18 = scalar_lea.vmem %s54_s14, 256  ;;  %p9670_p2 = scmp.lt.s32.totalorder %s54_s14, %s54_s14 }
  0x27   :  { %p9666_p1 = scmp.ne.s32.totalorder %s54_s14, %s9665_s18  ;;  %p9671_p3 = scmp.lt.s32.totalorder %s9665_s18, %s9665_s18 }
  0x29   :  { %p9672_p4 = por %p9671_p3, %p9670_p2 }
  0x2b   :  { %p9673_p5 = pnand %p9672_p4, %p9666_p1 }
  0x2d   :  { %9676 = shalt.err (!%p9673_p5)
}
  0x2e   :  { %59 = dma.hbm_to_vmem [thread:$0]  %s11365_s5, 256, %s54_s14, [#allocation5], %s9726_s20, %s9726_s20, %s9727_s21  }
  0x2f   :  { %s9733_s22 = smov [#allocation9]  }
  0x30   :  { %s79_s23 = sshll.u32 %s9733_s22, 4  ;;  %s80_s23 = int_to_ptr.vmem [resolvable:$true] %s79_s23 }
  0x31   :  { %s9685_s24 = scalar_lea.vmem %s80_s23, 1536  ;;  %p9690_p7 = scmp.lt.s32.totalorder %s80_s23, %s80_s23 }
  0x32   :  { %p9686_p6 = scmp.ne.s32.totalorder %s80_s23, %s9685_s24  ;;  %p9691_p8 = scmp.lt.s32.totalorder %s9685_s24, %s9685_s24 }
  0x34   :  { %p9692_p9 = por %p9691_p8, %p9690_p7 }
  0x36   :  { %p9693_p10 = pnand %p9692_p9, %p9686_p6 }
  0x38   :  { %9696 = shalt.err (!%p9693_p10)
}
  0x39   :  { %s9734_s2 = smov 192   ;;  %s9735_s25 = smov 12  }
  0x3a   :  { %85 = dma.hbm_to_vmem [thread:$0]  %s11368_s8, 1536, %s80_s23, [#allocation8], %s9734_s2, %s9734_s2, %s9735_s25  }
  0x3b   :  { %s9736_s30 = smov [#allocation10]  }
  0x3c   :  { %s93_s3 = sshll.u32 %s9736_s30, 4  ;;  %s94_s3 = int_to_ptr.vmem [resolvable:$true] %s93_s3 }
  0x3d   :  { %s9705_s5 = scalar_lea.vmem %s94_s3, 768  ;;  %p9710_p12 = scmp.lt.s32.totalorder %s94_s3, %s94_s3 }
  0x3e   :  { %p9706_p11 = scmp.ne.s32.totalorder %s94_s3, %s9705_s5  ;;  %p9711_p13 = scmp.lt.s32.totalorder %s9705_s5, %s9705_s5 }
  0x40   :  { %p9712_p0 = por %p9711_p13, %p9710_p12 }
  0x42   :  { %p9713_p1 = pnand %p9712_p0, %p9706_p11 }
  0x44   :  { %9716 = shalt.err (!%p9713_p1)
}
  0x45   :  { %99 = dma.hbm_to_vmem [thread:$0]  %s11370_s10, 768, %s94_s3, [#allocation11], %s9729_s27, %s9729_s27, %s9730_s28  }
  0x46   :  { %9717 = dma.done.wait [#allocation3], 32  }
  0x47   :  { %9718 = vsyncadd [#allocation3], 4294967264 }
  0x48   :  { %9719 = dma.done.wait [#allocation5], 512  }
  0x49   :  { %9720 = vsyncadd [#allocation5], 4294966784 }
  0x4a   :  { %9721 = dma.done.wait [#allocation8], 2560  }
  0x4b   :  { %9722 = vsyncadd [#allocation8], 4294964736 }
  0x4c   :  { %9723 = dma.done.wait [#allocation11], 768  }
  0x4d   :  { %9724 = vsyncadd [#allocation11], 4294966528  ;;  %vm138_vm0 = vcmask 1041408   ;;  %v123_v0 = vld [vmem:[#allocation2] sm:$0x3]  ;;  %v120_v2 = vld [vmem:[%s11360_s0 + $0x8] sm:$0xff] }
  0x4e   :  { %v119_v1 = vld [vmem:[%s11360_s0] sm:$0xff]  ;;  %vm131_vm1 = vcmask 31744   ;;  %9187 = vmatprep.subr.msk.bf16.mxu0 %vm138_vm0, %v123_v0  ;;  %v140_v3 = vsel %vm138_vm0, %v123_v0, 0  ;;  %v121_v5 = vld [vmem:[%s11360_s0 + $0x10] sm:$0xff]  ;;  %v122_v6 = vld [vmem:[%s11360_s0 + $0x18] sm:$0xff]  ;;  %vm218_vm2 = vcmask 261120  }
  0x4f   :  { %v124_v4 = vpack.c.bf16 %v120_v2, %v119_v1  ;;  %8386 = vmatpush3.bf16.msra.mxu0 %v140_v3  ;;  %v125_v7 = vpack.c.bf16 %v122_v6, %v121_v5  ;;  %v9305_v8 = vld [vmem:[#allocation4 + $0x8] sm:$0xff]   ;;  %v9306_v9 = vld [vmem:[#allocation4] sm:$0xff]   ;;  %v9307_v10 = vld [vmem:[%s11364_s4 + $0x18] sm:$0xff]   ;;  %vm321_vm3 = vcmask 523264   ;;  %v9737_v6 = vmov 0.0   ;;  %s9740_s12 = smov 88  }
  0x50   :  { %8391 = vmatprep.subr.bf16.mxu1 %v9305_v8  ;;  %8399 = vmatprep.subr.bf16.mxu0 %v9307_v10  ;;  %v7870_v13 = vld [vmem:[#allocation10] ss:$0 sm:$0xff]  ;;  %v9308_v26 = vld [vmem:[%s11364_s4 + $0x10] sm:$0xff]   ;;  %v9309_v27 = vld [vmem:[%s11364_s4 + $0x8] sm:$0xff]   ;;  %vm9738_vm4 = vmmov 0   ;;  %vm502_vm5 = vcmask 64512  }
  0x51   :  { %8387 = vmatprep.mubr.msk.bf16.mxu0 %vm131_vm1, %v124_v4  ;;  %8392 = vmatpush3.bf16.msra.mxu1 %v9305_v8  ;;  %v9310_v28 = vld [vmem:[%s11364_s4] sm:$0xff]   ;;  %v277_v35 = vld [vmem:[%s11361_s1 + $0x18] sm:$0xff]  ;;  %v275_v39 = vld [vmem:[%s11361_s1 + $0x8] sm:$0xff]  ;;  %vm627_vm6 = vcmask 1043456   ;;  %s9741_s8 = smov 120   ;;  %s9742_s13 = smov 56  }
  0x52   :  { %8388 = vmatmul.mubr.msk.bf16.vlgmr.msra.gmra.mxu0 %vm131_vm1, %v125_v7  ;;  %8393 = vmatprep.subr.bf16.mxu1 %v9306_v9  ;;  %v7873_v31 = vld [vmem:[#allocation10 + $0x1] ss:$0 sm:$0xff]  ;;  %v276_v40 = vld [vmem:[%s11361_s1 + $0x10] sm:$0xff]  ;;  %v7878_v48 = vld [vmem:[#allocation10 + $0x2] ss:$0 sm:$0xff]  ;;  %s9743_s14 = smov 80  }
  0x53   :  { %8400 = vmatpush3.bf16.msra.mxu0 %v9307_v10  ;;  %v274_v37 = vld [vmem:[%s11361_s1] sm:$0xff]  ;;  %v9898_v5 = vld [vmem:[#allocation7 + $0x10] ss:$8 sps:$4 sm:$0xff]   ;;  %s9739_s1 = smov 96   ;;  %s9744_s15 = smov 112   ;;  %vm1407_vm7 = vcmask 130048  }
  0x54   :  { %8401 = vmatprep.subr.bf16.mxu0 %v9308_v26  ;;  %v9903_v7 = vld [vmem:[#allocation7] ss:$8 sps:$4 sm:$0xff]   ;;  %s9745_s10 = smov 48   ;;  %s9746_s27 = smov 72   ;;  %vm1410_vm8 = vcmask 195584  }
  0x55   :  { %8394 = vmatpush3.bf16.msra.mxu1 %v9306_v9  ;;  %s9747_s16 = smov 104   ;;  %s9748_s17 = smov 40  }
  0x56   :  { %8411 = vmatprep.subr.bf16.mxu1 %v9737_v6  ;;  %s9749_s18 = smov 32   ;;  %s9750_s6 = smov 16  }
  0x57   :  { %8402 = vmatpush3.bf16.msra.mxu0 %v9308_v26  ;;  %s9751_s0 = smov 24  }
  0x58   :  { %8403 = vmatprep.subr.bf16.mxu0 %v9309_v27 }
  0x5b   :  { %8404 = vmatpush3.bf16.msra.mxu0 %v9309_v27 }
  0x5c   :  { %8405 = vmatprep.subr.bf16.mxu0 %v9310_v28 }
  0x5f   :  { %8406 = vmatpush3.bf16.msra.mxu0 %v9310_v28 }
  0x60   :  { %8425 = vmatprep.subr.bf16.mxu0 %v9737_v6 }
 0x112   :  { %v8389_v11 = vpop.f32.mrf.mxu0 }
 0x113   :  { %v185_v17 = vadd.f32 %v8389_v11, %v7870_v13 }
 0x114   :  { %v176_v12 = vpop.f32.mrf.mxu0 }
 0x115   :  { %v177_v15 = vadd.f32 %v7870_v13, %v176_v12  ;;  %v193_v23 = vmul.f32 5.656854, %v185_v17 }
 0x116   :  { %v8390_v14 = vpop.f32.mrf.mxu0 }
 0x117   :  { %v188_v16 = vadd.f32 %v8390_v14, %v7870_v13  ;;  %v191_v21 = vmul.f32 5.656854, %v177_v15 }
 0x118   :  { %v179_v18 = vpop.f32.mrf.mxu0 }
 0x119   :  { %v180_v19 = vadd.f32 %v7870_v13, %v179_v18  ;;  %v194_v20 = vmul.f32 5.656854, %v188_v16  ;;  %v7885_v16 = vld [vmem:[#allocation10 + $0x4] ss:$0 sm:$0xff] }
 0x11b   :  { %v192_v22 = vmul.f32 5.656854, %v180_v19  ;;  %v200_v25 = vpack.c.bf16 %v194_v20, %v193_v23  ;;  %v7886_v20 = vld [vmem:[#allocation10 + $0x5] ss:$0 sm:$0xff] }
 0x11d   :  { %v199_v24 = vpack.c.bf16 %v192_v22, %v191_v21 }
 0x11f   :  { %8395 = vmatprep.mubr.msk.bf16.mxu1 %vm218_vm2, %v199_v24 }
 0x120   :  { %8396 = vmatmul.mubr.msk.bf16.vlgmr.msra.gmra.mxu1 %vm218_vm2, %v200_v25  ;;  %v7887_v25 = vld [vmem:[#allocation10 + $0x6] ss:$0 sm:$0xff] }
 0x121   :  { %8412 = vmatpush3.bf16.msra.mxu1 %v9898_v5  ;;  %8415 = vmatprep.mubr.msk.bf16.mxu1 %vm9738_vm4, %v9737_v6 }
 0x122   :  { %8413 = vmatprep.subr.bf16.mxu1 %v9737_v6 }
 0x125   :  { %8414 = vmatpush3.bf16.msra.mxu1 %v9903_v7 }
 0x126   :  { %8419 = vmatprep.subr.bf16.mxu1 %v9737_v6 }
 0x1e0   :  { %v8397_v29 = vpop.f32.mrf.mxu1 }
 0x1e1   :  { %v268_v36 = vadd.f32 %v8397_v29, %v7873_v31 }
 0x1e2   :  { %v259_v30 = vpop.f32.mrf.mxu1 }
 0x1e3   :  { %v260_v33 = vadd.f32 %v7873_v31, %v259_v30  ;;  %v280_v45 = vadd.f32 %v276_v40, %v268_v36 }
 0x1e4   :  { %v8398_v32 = vpop.f32.mrf.mxu1 }
 0x1e5   :  { %v271_v34 = vadd.f32 %v8398_v32, %v7873_v31  ;;  %v278_v43 = vadd.f32 %v274_v37, %v260_v33 }
 0x1e6   :  { %v262_v38 = vpop.f32.mrf.mxu1 }
 0x1e7   :  { %v263_v41 = vadd.f32 %v7873_v31, %v262_v38  ;;  %v281_v42 = vadd.f32 %v277_v35, %v271_v34 }
 0x1e9   :  { %v279_v44 = vadd.f32 %v275_v39, %v263_v41  ;;  %v291_v47 = vpack.c.bf16 %v281_v42, %v280_v45 }
 0x1eb   :  { %v290_v46 = vpack.c.bf16 %v279_v44, %v278_v43 }
 0x1ed   :  { %8407 = vmatprep.mubr.msk.bf16.mxu0 %vm321_vm3, %v290_v46 }
 0x1ee   :  { %8408 = vmatmul.mubr.msk.bf16.vlgmr.msra.gmra.mxu0 %vm321_vm3, %v291_v47 }
 0x1ef   :  { %8427 = vmatprep.mubr.msk.bf16.mxu0 %vm9738_vm4, %v9737_v6 }
 0x2ae   :  { %v8409_v49 = vpop.f32.mrf.mxu0 }
 0x2af   :  { %v9882_v50 = vadd.f32 %v8409_v49, %v7878_v48 }
 0x2b0   :  { %v362_v51 = vpop.f32.mrf.mxu0 }
 0x2b1   :  { %v9884_v52 = vadd.f32 %v7878_v48, %v362_v51 }
 0x2b2   :  { %v8410_v53 = vpop.f32.mrf.mxu0 }
 0x2b3   :  { %v9886_v54 = vadd.f32 %v8410_v53, %v7878_v48  ;;  %v389_v55 = vsel %vm218_vm2, %v9884_v52, 0.0 }
 0x2b4   :  { %v365_v56 = vpop.f32.mrf.mxu0  ;;  %390 = vadd.xlane.f32.xlu0 %v389_v55 }
 0x2b5   :  { %v9890_v57 = vadd.f32 %v7878_v48, %v365_v56 }
 0x2b7   :  { %v392_v58 = vsel %vm218_vm2, %v9890_v57, 0.0 }
 0x2b8   :  { %393 = vadd.xlane.f32.xlu0 %v392_v58 }
 0x33d   :  { %v391_v59 = vpop.xlane.xlu0 %390 }
 0x33e   :  { %v396_v60 = vmul.f32 0.03125, %v391_v59 }
 0x340   :  { %v398_v61 = vsub.f32 %v9884_v52, %v396_v60 }
 0x341   :  { %v394_v62 = vpop.xlane.xlu0 %393 }
 0x342   :  { %v397_v63 = vmul.f32 0.03125, %v394_v62  ;;  %v400_v0 = vmul.f32 %v398_v61, %v398_v61 }
 0x344   :  { %v399_v1 = vsub.f32 %v9890_v57, %v397_v63  ;;  %v402_v2 = vsel %vm218_vm2, %v400_v0, 0.0 }
 0x345   :  { %403 = vadd.xlane.f32.xlu1 %v402_v2 }
 0x346   :  { %v401_v3 = vmul.f32 %v399_v1, %v399_v1 }
 0x348   :  { %v405_v4 = vsel %vm218_vm2, %v401_v3, 0.0 }
 0x349   :  { %406 = vadd.xlane.f32.xlu1 %v405_v4 }
 0x3ce   :  { %v404_v8 = vpop.xlane.xlu1 %403 }
 0x3cf   :  { %v408_v9 = vmul.f32 0.03125, %v404_v8 }
 0x3d1   :  { %v410_v10 = vadd.f32 1e-05, %v408_v9 }
 0x3d2   :  { %v407_v11 = vpop.xlane.xlu1 %406 }
 0x3d3   :  { %9357 = vrsqrt.f32 %v410_v10  ;;  %v409_v12 = vmul.f32 0.03125, %v407_v11 }
 0x3d5   :  { %v411_v13 = vadd.f32 1e-05, %v409_v12 }
 0x3d7   :  { %9359 = vrsqrt.f32 %v411_v13 }
 0x3e0   :  { %v9358_v14 = vpop.eup %9357 }
 0x3e1   :  { %v414_v15 = vmul.f32 %v9358_v14, %v398_v61 }
 0x3e3   :  { %v421_v19 = vmul.f32 %v7885_v16, %v414_v15 }
 0x3e4   :  { %v9360_v17 = vpop.eup %9359 }
 0x3e5   :  { %v415_v18 = vmul.f32 %v9360_v17, %v399_v1  ;;  %v428_v22 = vadd.f32 %v7886_v20, %v421_v19 }
 0x3e7   :  { %v422_v21 = vmul.f32 %v7885_v16, %v415_v18 }
 0x3e9   :  { %v429_v23 = vadd.f32 %v7886_v20, %v422_v21 }
 0x3eb   :  { %v430_v24 = vpack.c.bf16 %v429_v23, %v428_v22 }
 0x3ed   :  { %8416 = vmatmul.mubr.msk.bf16.vlgmr.msra.gmra.mxu1 %vm218_vm2, %v430_v24 }
 0x3ee   :  { %8421 = vmatprep.mubr.msk.bf16.mxu1 %vm9738_vm4, %v9737_v6 }
 0x4ad   :  { %v485_v26 = vpop.f32.mrf.mxu1 }
 0x4ae   :  { %v486_v27 = vadd.f32 %v7887_v25, %v485_v26 }
 0x4af   :  { %v8417_v28 = vpop.f32.mrf.mxu1 }
 0x4b0   :  { %v9915_v29 = vpack.c.bf16 %v486_v27, %v486_v27  ;;  %v493_v36 = vmul.f32 0.35355338, %v486_v27 }
 0x4b1   :  { %v488_v30 = vpop.f32.mrf.mxu1 }
 0x4b2   :  { %v489_v31 = vadd.f32 %v7887_v25, %v488_v30  ;;  %500 = vrot.lane.b32.xlu0 %v9915_v29, %s9739_s1  ;;  %v9926_v39 = vpack.c.bf16 %v493_v36, %v493_v36 }
 0x4b3   :  { %v8418_v32 = vpop.f32.mrf.mxu1 }
 0x4b4   :  { %v9919_v33 = vpack.c.bf16 %v489_v31, %v489_v31  ;;  %v494_v40 = vmul.f32 0.35355338, %v489_v31 }
 0x4b6   :  { %550 = vrot.lane.b32.xlu1 %v9919_v33, %s9739_s1  ;;  %v9933_v41 = vpack.c.bf16 %v494_v40, %v494_v40 }
 0x524   :  { %v501_v34 = vpop.permute.xlu0 %500 }
 0x525   :  { %v507_v35 = vsel %vm502_vm5, %v501_v34, 0 }
 0x526   :  { %8420 = vmatpush3.bf16.xpose.msra.mxu1 %v507_v35 }
 0x527   :  { %8431 = vmatprep.subr.bf16.mxu1 %v9737_v6 }
 0x528   :  { %v551_v37 = vpop.permute.xlu1 %550 }
 0x529   :  { %v556_v38 = vsel %vm502_vm5, %v551_v37, 0 }
 0x52a   :  { %8426 = vmatpush3.bf16.xpose.msra.mxu0 %v556_v38 }
 0x52b   :  { %8437 = vmatprep.subr.bf16.mxu0 %v9737_v6 }
 0x52d   :  { %8422 = vmatmul.mubr.msk.bf16.vlgmr.msra.gmra.mxu1 %vm502_vm5, %v9926_v39 }
 0x52e   :  { %8433 = vmatprep.mubr.msk.bf16.mxu1 %vm9738_vm4, %v9737_v6 }
 0x531   :  { %8428 = vmatmul.mubr.msk.bf16.vlgmr.msra.gmra.mxu0 %vm502_vm5, %v9933_v41 }
 0x532   :  { %8439 = vmatprep.mubr.msk.bf16.mxu0 %vm9738_vm4, %v9737_v6 }
 0x5ed   :  { %v543_v42 = vpop.f32.mrf.mxu1 }
 0x5ee   :  { %v598_v43 = vsel %vm502_vm5, %v543_v42, -inf }
 0x5ef   :  { %599 = vmax.xlane.f32.xlu1 %v598_v43  ;;  %v8423_v44 = vpop.f32.mrf.mxu1 }
 0x5f1   :  { %v546_v45 = vpop.f32.mrf.mxu1  ;;  %v592_v46 = vpop.f32.mrf.mxu0 }
 0x5f2   :  { %v601_v47 = vsel %vm502_vm5, %v592_v46, -inf }
 0x5f3   :  { %602 = vmax.xlane.f32.xlu0 %v601_v47  ;;  %v8424_v48 = vpop.f32.mrf.mxu1  ;;  %v8429_v49 = vpop.f32.mrf.mxu0 }
 0x5f5   :  { %v595_v51 = vpop.f32.mrf.mxu0 }
 0x5f7   :  { %v8430_v53 = vpop.f32.mrf.mxu0 }
 0x600   :  { %671 = vrot.lane.b32.xlu1 %v9919_v33, %s9726_s20 }
 0x604   :  { %722 = vrot.lane.b32.xlu1 %v9915_v29, %s9740_s12 }
 0x678   :  { %v600_v55 = vpop.xlane.xlu1 %599 }
 0x679   :  { %v604_v56 = vsub.f32 %v543_v42, %v600_v55 }
 0x67b   :  { %v606_v58 = vmul.f32 1.442695, %v604_v56 }
 0x67c   :  { %v603_v59 = vpop.xlane.xlu0 %602  ;;  %v672_v60 = vpop.permute.xlu1 %671 }
 0x67d   :  { %9361 = vpow2.f32 %v606_v58  ;;  %v605_v61 = vsub.f32 %v592_v46, %v603_v59  ;;  %v677_v62 = vsel %vm627_vm6, %v672_v60, 0 }
 0x67e   :  { %8438 = vmatpush3.bf16.msra.mxu0 %v677_v62 }
 0x67f   :  { %v608_v63 = vmul.f32 1.442695, %v605_v61  ;;  %8449 = vmatprep.subr.bf16.mxu0 %v9737_v6 }
 0x680   :  { %v723_v4 = vpop.permute.xlu1 %722 }
 0x681   :  { %9363 = vpow2.f32 %v608_v63  ;;  %v728_v16 = vsel %vm502_vm5, %v723_v4, 0 }
 0x68a   :  { %v9362_v0 = vpop.eup %9361 }
 0x68b   :  { %v610_v1 = vsel %vm502_vm5, %v9362_v0, 0.0 }
 0x68c   :  { %611 = vadd.xlane.f32.xlu0 %v610_v1 }
 0x68e   :  { %v9364_v2 = vpop.eup %9363 }
 0x68f   :  { %v613_v3 = vsel %vm502_vm5, %v9364_v2, 0.0 }
 0x690   :  { %614 = vadd.xlane.f32.xlu1 %v613_v3 }
 0x6a1   :  { %773 = vrot.lane.b32.xlu1 %v9919_v33, %s9740_s12 }
 0x6a2   :  { %622 = vrot.lane.b32.xlu0 %v9915_v29, %s9726_s20 }
 0x6a5   :  { %771 = vrot.lane.b32.xlu1 %v9933_v41, %s9741_s8 }
 0x6a6   :  { %720 = vrot.lane.b32.xlu0 %v9926_v39, %s9741_s8 }
 0x715   :  { %v612_v8 = vpop.xlane.xlu0 %611 }
 0x716   :  { %9365 = vrcp.f32 %v612_v8 }
 0x719   :  { %v623_v9 = vpop.permute.xlu0 %622  ;;  %v615_v10 = vpop.xlane.xlu1 %614 }
 0x71a   :  { %v629_v11 = vsel %vm627_vm6, %v623_v9, 0  ;;  %9367 = vrcp.f32 %v615_v10 }
 0x71b   :  { %8432 = vmatpush3.bf16.msra.mxu1 %v629_v11 }
 0x71c   :  { %8443 = vmatprep.subr.bf16.mxu1 %v9737_v6 }
 0x71d   :  { %v774_v18 = vpop.permute.xlu1 %773  ;;  %v721_v21 = vpop.permute.xlu0 %720 }
 0x71e   :  { %v779_v20 = vsel %vm502_vm5, %v774_v18, 0 }
 0x721   :  { %v772_v22 = vpop.permute.xlu1 %771 }
 0x723   :  { %v9366_v12 = vpop.eup %9365 }
 0x724   :  { %v617_v13 = vmul.f32 %v9366_v12, %v9362_v0 }
 0x726   :  { %v620_v14 = vpack.c.bf16 %v617_v13, %v617_v13 }
 0x727   :  { %v9368_v15 = vpop.eup %9367 }
 0x728   :  { %8434 = vmatmul.mubr.msk.bf16.vlgmr.msra.gmra.mxu1 %vm502_vm5, %v620_v14  ;;  %v619_v17 = vmul.f32 %v9368_v15, %v9364_v2 }
 0x729   :  { %8444 = vmatpush3.bf16.xpose.msra.mxu1 %v728_v16  ;;  %8445 = vmatprep.mubr.msk.bf16.mxu1 %vm9738_vm4, %v9737_v6 }
 0x72a   :  { %v621_v19 = vpack.c.bf16 %v619_v17, %v619_v17  ;;  %8455 = vmatprep.subr.bf16.mxu1 %v9737_v6 }
 0x72c   :  { %8440 = vmatmul.mubr.msk.bf16.vlgmr.msra.gmra.mxu0 %vm502_vm5, %v621_v19 }
 0x72d   :  { %8450 = vmatpush3.bf16.xpose.msra.mxu0 %v779_v20  ;;  %8451 = vmatprep.mubr.msk.bf16.mxu0 %vm9738_vm4, %v9737_v6 }
 0x72e   :  { %8461 = vmatprep.subr.bf16.mxu0 %v9737_v6 }
 0x730   :  { %8446 = vmatmul.mubr.msk.bf16.vlgmr.msra.gmra.mxu1 %vm502_vm5, %v721_v21 }
 0x731   :  { %8457 = vmatprep.mubr.msk.bf16.mxu1 %vm9738_vm4, %v9737_v6 }
 0x734   :  { %8452 = vmatmul.mubr.msk.bf16.vlgmr.msra.gmra.mxu0 %vm502_vm5, %v772_v22 }
 0x735   :  { %8463 = vmatprep.mubr.msk.bf16.mxu0 %vm9738_vm4, %v9737_v6 }
 0x7e8   :  { %v9975_v23 = vpop.f32.mrf.mxu1 }
 0x7ea   :  { %v8435_v24 = vpop.f32.mrf.mxu1 }
 0x7ec   :  { %v668_v25 = vpop.f32.mrf.mxu1  ;;  %v9977_v26 = vpop.f32.mrf.mxu0 }
 0x7ee   :  { %v8436_v27 = vpop.f32.mrf.mxu1  ;;  %v8441_v28 = vpop.f32.mrf.mxu0 }
 0x7f0   :  { %v716_v30 = vpop.f32.mrf.mxu0  ;;  %v764_v31 = vpop.f32.mrf.mxu1 }
 0x7f1   :  { %v821_v32 = vsel %vm502_vm5, %v764_v31, -inf }
 0x7f2   :  { %v8442_v34 = vpop.f32.mrf.mxu0  ;;  %822 = vmax.xlane.f32.xlu0 %v821_v32  ;;  %v8447_v35 = vpop.f32.mrf.mxu1 }
 0x7f4   :  { %v767_v36 = vpop.f32.mrf.mxu1  ;;  %v815_v37 = vpop.f32.mrf.mxu0 }
 0x7f5   :  { %v824_v38 = vsel %vm502_vm5, %v815_v37, -inf }
 0x7f6   :  { %825 = vmax.xlane.f32.xlu1 %v824_v38  ;;  %v8448_v40 = vpop.f32.mrf.mxu1  ;;  %v8453_v42 = vpop.f32.mrf.mxu0 }
 0x7f8   :  { %v818_v43 = vpop.f32.mrf.mxu0 }
 0x7fa   :  { %v8454_v44 = vpop.f32.mrf.mxu0 }
 0x807   :  { %893 = vrot.lane.b32.xlu1 %v9919_v33, %s9742_s13 }
 0x80b   :  { %943 = vrot.lane.b32.xlu1 %v9915_v29, %s9743_s14 }
 0x80f   :  { %993 = vrot.lane.b32.xlu1 %v9919_v33, %s9743_s14 }
 0x813   :  { %991 = vrot.lane.b32.xlu1 %v9933_v41, %s9744_s15 }
 0x87b   :  { %v823_v45 = vpop.xlane.xlu0 %822 }
 0x87c   :  { %v827_v46 = vsub.f32 %v764_v31, %v823_v45 }
 0x87e   :  { %v829_v47 = vmul.f32 1.442695, %v827_v46 }
 0x87f   :  { %v826_v48 = vpop.xlane.xlu1 %825 }
 0x880   :  { %9369 = vpow2.f32 %v829_v47  ;;  %v828_v49 = vsub.f32 %v815_v37, %v826_v48 }
 0x882   :  { %v831_v51 = vmul.f32 1.442695, %v828_v49 }
 0x883   :  { %v894_v53 = vpop.permute.xlu1 %893 }
 0x884   :  { %9371 = vpow2.f32 %v831_v51  ;;  %v899_v55 = vsel %vm627_vm6, %v894_v53, 0 }
 0x885   :  { %8462 = vmatpush3.bf16.msra.mxu0 %v899_v55 }
 0x886   :  { %8473 = vmatprep.subr.bf16.mxu0 %v9737_v6 }
 0x887   :  { %v944_v2 = vpop.permute.xlu1 %943 }
 0x888   :  { %v949_v9 = vsel %vm502_vm5, %v944_v2, 0 }
 0x88b   :  { %v994_v11 = vpop.permute.xlu1 %993 }
 0x88c   :  { %v999_v13 = vsel %vm502_vm5, %v994_v11, 0 }
 0x88d   :  { %v9370_v56 = vpop.eup %9369 }
 0x88e   :  { %v833_v58 = vsel %vm502_vm5, %v9370_v56, 0.0 }
 0x88f   :  { %834 = vadd.xlane.f32.xlu0 %v833_v58  ;;  %v992_v15 = vpop.permute.xlu1 %991 }
 0x891   :  { %v9372_v59 = vpop.eup %9371 }
 0x892   :  { %v836_v60 = vsel %vm502_vm5, %v9372_v59, 0.0 }
 0x893   :  { %837 = vadd.xlane.f32.xlu0 %v836_v60 }
 0x8a9   :  { %845 = vrot.lane.b32.xlu0 %v9915_v29, %s9742_s13 }
 0x8ad   :  { %941 = vrot.lane.b32.xlu0 %v9926_v39, %s9744_s15 }
 0x918   :  { %v835_v61 = vpop.xlane.xlu0 %834 }
 0x919   :  { %9373 = vrcp.f32 %v835_v61 }
 0x91c   :  { %v838_v62 = vpop.xlane.xlu0 %837 }
 0x91d   :  { %9375 = vrcp.f32 %v838_v62 }
 0x920   :  { %v846_v63 = vpop.permute.xlu0 %845 }
 0x921   :  { %v851_v0 = vsel %vm627_vm6, %v846_v63, 0 }
 0x922   :  { %8456 = vmatpush3.bf16.msra.mxu1 %v851_v0 }
 0x923   :  { %8467 = vmatprep.subr.bf16.mxu1 %v9737_v6 }
 0x924   :  { %v942_v14 = vpop.permute.xlu0 %941 }
 0x926   :  { %v9374_v1 = vpop.eup %9373 }
 0x927   :  { %v840_v3 = vmul.f32 %v9374_v1, %v9370_v56 }
 0x929   :  { %v843_v4 = vpack.c.bf16 %v840_v3, %v840_v3 }
 0x92a   :  { %v9376_v8 = vpop.eup %9375 }
 0x92b   :  { %8458 = vmatmul.mubr.msk.bf16.vlgmr.msra.gmra.mxu1 %vm502_vm5, %v843_v4  ;;  %v842_v10 = vmul.f32 %v9376_v8, %v9372_v59 }
 0x92c   :  { %8468 = vmatpush3.bf16.xpose.msra.mxu1 %v949_v9  ;;  %8469 = vmatprep.mubr.msk.bf16.mxu1 %vm9738_vm4, %v9737_v6 }
 0x92d   :  { %v844_v12 = vpack.c.bf16 %v842_v10, %v842_v10  ;;  %8479 = vmatprep.subr.bf16.mxu1 %v9737_v6 }
 0x92f   :  { %8464 = vmatmul.mubr.msk.bf16.vlgmr.msra.gmra.mxu0 %vm502_vm5, %v844_v12 }
 0x930   :  { %8474 = vmatpush3.bf16.xpose.msra.mxu0 %v999_v13  ;;  %8475 = vmatprep.mubr.msk.bf16.mxu0 %vm9738_vm4, %v9737_v6 }
 0x931   :  { %8485 = vmatprep.subr.bf16.mxu0 %v9737_v6 }
 0x933   :  { %8470 = vmatmul.mubr.msk.bf16.vlgmr.msra.gmra.mxu1 %vm502_vm5, %v942_v14 }
 0x934   :  { %8481 = vmatprep.mubr.msk.bf16.mxu1 %vm9738_vm4, %v9737_v6 }
 0x937   :  { %8476 = vmatmul.mubr.msk.bf16.vlgmr.msra.gmra.mxu0 %vm502_vm5, %v992_v15 }
 0x938   :  { %8487 = vmatprep.mubr.msk.bf16.mxu0 %vm9738_vm4, %v9737_v6 }
 0x9eb   :  { %v10015_v16 = vpop.f32.mrf.mxu1 }
 0x9ed   :  { %v8459_v17 = vpop.f32.mrf.mxu1 }
 0x9ef   :  { %v890_v18 = vpop.f32.mrf.mxu1  ;;  %v10017_v19 = vpop.f32.mrf.mxu0 }
 0x9f0   :  { %v9215_v20 = vpack.i.bf16 %v10017_v19, %v10015_v16 }
 0x9f1   :  { %v8460_v21 = vpop.f32.mrf.mxu1  ;;  %v8465_v22 = vpop.f32.mrf.mxu0 }
 0x9f3   :  { %v938_v24 = vpop.f32.mrf.mxu0  ;;  %v985_v25 = vpop.f32.mrf.mxu1 }
 0x9f4   :  { %v1041_v27 = vsel %vm502_vm5, %v985_v25, -inf }
 0x9f5   :  { %v8466_v28 = vpop.f32.mrf.mxu0  ;;  %1042 = vmax.xlane.f32.xlu0 %v1041_v27  ;;  %v8471_v30 = vpop.f32.mrf.mxu1 }
 0x9f7   :  { %v988_v31 = vpop.f32.mrf.mxu1  ;;  %v1035_v32 = vpop.f32.mrf.mxu0 }
 0x9f8   :  { %v1044_v34 = vsel %vm502_vm5, %v1035_v32, -inf }
 0x9f9   :  { %1045 = vmax.xlane.f32.xlu1 %v1044_v34  ;;  %v8472_v35 = vpop.f32.mrf.mxu1  ;;  %v8477_v36 = vpop.f32.mrf.mxu0 }
 0x9fb   :  { %v1038_v37 = vpop.f32.mrf.mxu0 }
 0x9fd   :  { %v8478_v38 = vpop.f32.mrf.mxu0 }
 0xa0a   :  { %1113 = vrot.lane.b32.xlu1 %v9919_v33, %s9745_s10 }
 0xa0e   :  { %1163 = vrot.lane.b32.xlu1 %v9915_v29, %s9746_s27 }
 0xa12   :  { %1213 = vrot.lane.b32.xlu1 %v9919_v33, %s9746_s27 }
 0xa16   :  { %1211 = vrot.lane.b32.xlu1 %v9933_v41, %s9747_s16 }
 0xa7e   :  { %v1043_v40 = vpop.xlane.xlu0 %1042 }
 0xa7f   :  { %v1047_v42 = vsub.f32 %v985_v25, %v1043_v40 }
 0xa81   :  { %v1049_v43 = vmul.f32 1.442695, %v1047_v42 }
 0xa82   :  { %v1046_v44 = vpop.xlane.xlu1 %1045 }
 0xa83   :  { %9377 = vpow2.f32 %v1049_v43  ;;  %v1048_v45 = vsub.f32 %v1035_v32, %v1046_v44 }
 0xa85   :  { %v1051_v46 = vmul.f32 1.442695, %v1048_v45 }
 0xa86   :  { %v1114_v47 = vpop.permute.xlu1 %1113 }
 0xa87   :  { %9379 = vpow2.f32 %v1051_v46  ;;  %v1119_v48 = vsel %vm627_vm6, %v1114_v47, 0 }
 0xa88   :  { %8486 = vmatpush3.bf16.msra.mxu0 %v1119_v48 }
 0xa89   :  { %8497 = vmatprep.subr.bf16.mxu0 %v9737_v6 }
 0xa8a   :  { %v1164_v61 = vpop.permute.xlu1 %1163 }
 0xa8b   :  { %v1169_v1 = vsel %vm502_vm5, %v1164_v61, 0 }
 0xa8e   :  { %v1214_v2 = vpop.permute.xlu1 %1213 }
 0xa8f   :  { %v1219_v4 = vsel %vm502_vm5, %v1214_v2, 0 }
 0xa90   :  { %v9378_v49 = vpop.eup %9377 }
 0xa91   :  { %v1053_v51 = vsel %vm502_vm5, %v9378_v49, 0.0 }
 0xa92   :  { %1054 = vadd.xlane.f32.xlu0 %v1053_v51  ;;  %v1212_v9 = vpop.permute.xlu1 %1211 }
 0xa94   :  { %v9380_v53 = vpop.eup %9379 }
 0xa95   :  { %v1056_v41 = vsel %vm502_vm5, %v9380_v53, 0.0 }
 0xa96   :  { %1057 = vadd.xlane.f32.xlu0 %v1056_v41 }
 0xaac   :  { %1065 = vrot.lane.b32.xlu0 %v9915_v29, %s9745_s10 }
 0xab0   :  { %1161 = vrot.lane.b32.xlu0 %v9926_v39, %s9747_s16 }
 0xb1b   :  { %v1055_v55 = vpop.xlane.xlu0 %1054 }
 0xb1c   :  { %9381 = vrcp.f32 %v1055_v55 }
 0xb1f   :  { %v1058_v56 = vpop.xlane.xlu0 %1057 }
 0xb20   :  { %9383 = vrcp.f32 %v1058_v56 }
 0xb23   :  { %v1066_v58 = vpop.permute.xlu0 %1065 }
 0xb24   :  { %v1071_v59 = vsel %vm627_vm6, %v1066_v58, 0 }
 0xb25   :  { %8480 = vmatpush3.bf16.msra.mxu1 %v1071_v59 }
 0xb26   :  { %8491 = vmatprep.subr.bf16.mxu1 %v9737_v6 }
 0xb27   :  { %v1162_v8 = vpop.permute.xlu0 %1161 }
 0xb29   :  { %v9382_v60 = vpop.eup %9381 }
 0xb2a   :  { %v1060_v62 = vmul.f32 %v9382_v60, %v9378_v49 }
 0xb2c   :  { %v1063_v63 = vpack.c.bf16 %v1060_v62, %v1060_v62 }
 0xb2d   :  { %v9384_v0 = vpop.eup %9383 }
 0xb2e   :  { %8482 = vmatmul.mubr.msk.bf16.vlgmr.msra.gmra.mxu1 %vm502_vm5, %v1063_v63  ;;  %v1062_v39 = vmul.f32 %v9384_v0, %v9380_v53 }
 0xb2f   :  { %8492 = vmatpush3.bf16.xpose.msra.mxu1 %v1169_v1  ;;  %8493 = vmatprep.mubr.msk.bf16.mxu1 %vm9738_vm4, %v9737_v6 }
 0xb30   :  { %v1064_v3 = vpack.c.bf16 %v1062_v39, %v1062_v39  ;;  %8503 = vmatprep.subr.bf16.mxu1 %v9737_v6 }
 0xb32   :  { %8488 = vmatmul.mubr.msk.bf16.vlgmr.msra.gmra.mxu0 %vm502_vm5, %v1064_v3 }
 0xb33   :  { %8498 = vmatpush3.bf16.xpose.msra.mxu0 %v1219_v4  ;;  %8499 = vmatprep.mubr.msk.bf16.mxu0 %vm9738_vm4, %v9737_v6 }
 0xb34   :  { %8509 = vmatprep.subr.bf16.mxu0 %v9737_v6 }
 0xb36   :  { %8494 = vmatmul.mubr.msk.bf16.vlgmr.msra.gmra.mxu1 %vm502_vm5, %v1162_v8 }
 0xb37   :  { %8505 = vmatprep.mubr.msk.bf16.mxu1 %vm9738_vm4, %v9737_v6 }
 0xb3a   :  { %8500 = vmatmul.mubr.msk.bf16.vlgmr.msra.gmra.mxu0 %vm502_vm5, %v1212_v9 }
 0xb3b   :  { %8511 = vmatprep.mubr.msk.bf16.mxu0 %vm9738_vm4, %v9737_v6 }
 0xbee   :  { %v1107_v10 = vpop.f32.mrf.mxu1 }
 0xbf0   :  { %v8483_v11 = vpop.f32.mrf.mxu1 }
 0xbf2   :  { %v1110_v12 = vpop.f32.mrf.mxu1  ;;  %v1155_v13 = vpop.f32.mrf.mxu0 }
 0xbf3   :  { %v9220_v14 = vpack.i.bf16 %v1155_v13, %v1107_v10 }
 0xbf4   :  { %v8484_v15 = vpop.f32.mrf.mxu1  ;;  %v8489_v17 = vpop.f32.mrf.mxu0 }
 0xbf6   :  { %v1158_v18 = vpop.f32.mrf.mxu0  ;;  %v1205_v21 = vpop.f32.mrf.mxu1 }
 0xbf7   :  { %v1261_v22 = vsel %vm502_vm5, %v1205_v21, -inf }
 0xbf8   :  { %v8490_v24 = vpop.f32.mrf.mxu0  ;;  %1262 = vmax.xlane.f32.xlu0 %v1261_v22  ;;  %v8495_v25 = vpop.f32.mrf.mxu1 }
 0xbfa   :  { %v1208_v27 = vpop.f32.mrf.mxu1  ;;  %v1255_v28 = vpop.f32.mrf.mxu0 }
 0xbfb   :  { %v1264_v30 = vsel %vm502_vm5, %v1255_v28, -inf }
 0xbfc   :  { %1265 = vmax.xlane.f32.xlu1 %v1264_v30  ;;  %v8496_v31 = vpop.f32.mrf.mxu1  ;;  %v8501_v32 = vpop.f32.mrf.mxu0 }
 0xbfe   :  { %v1258_v34 = vpop.f32.mrf.mxu0 }
 0xc00   :  { %v8502_v35 = vpop.f32.mrf.mxu0 }
 0xc0d   :  { %1333 = vrot.lane.b32.xlu1 %v9919_v33, %s9748_s17 }
 0xc11   :  { %1420 = vrot.lane.b32.xlu1 %v9898_v5, %s9749_s18 }
 0xc15   :  { %9216 = vrot.lane.b32.xlu1 %v9215_v20, %s9730_s28 }
 0xc81   :  { %v1263_v36 = vpop.xlane.xlu0 %1262 }
 0xc82   :  { %v1267_v37 = vsub.f32 %v1205_v21, %v1263_v36 }
 0xc84   :  { %v1269_v38 = vmul.f32 1.442695, %v1267_v37 }
 0xc85   :  { %v1266_v40 = vpop.xlane.xlu1 %1265 }
 0xc86   :  { %9385 = vpow2.f32 %v1269_v38  ;;  %v1268_v42 = vsub.f32 %v1255_v28, %v1266_v40 }
 0xc88   :  { %v1271_v43 = vmul.f32 1.442695, %v1268_v42 }
 0xc89   :  { %v1334_v44 = vpop.permute.xlu1 %1333 }
 0xc8a   :  { %9387 = vpow2.f32 %v1271_v43  ;;  %v1339_v33 = vsel %vm627_vm6, %v1334_v44, 0 }
 0xc8b   :  { %8510 = vmatpush3.bf16.msra.mxu0 %v1339_v33 }
 0xc8c   :  { %8523 = vmatprep.subr.bf16.mxu0 %v9737_v6 }
 0xc8d   :  { %v1421_v41 = vpop.permute.xlu1 %1420 }
 0xc91   :  { %v9217_v3 = vpop.permute.xlu1 %9216 }
 0xc92   :  { %v9219_v4 = vunpack.i.h.bf16 %v9217_v3  ;;  %v9218_v8 = vunpack.i.l.bf16 %v9217_v3 }
 0xc93   :  { %v9386_v5 = vpop.eup %9385 }
 0xc94   :  { %v1273_v45 = vsel %vm502_vm5, %v9386_v5, 0.0  ;;  %v1406_v12 = vsel %vm502_vm5, %v9977_v26, %v9219_v4  ;;  %v1405_v13 = vsel %vm502_vm5, %v9975_v23, %v9218_v8  ;;  %v7907_v26 = vld [vmem:[#allocation10 + $0x7] ss:$0 sm:$0xff] }
 0xc95   :  { %1274 = vadd.xlane.f32.xlu0 %v1273_v45  ;;  %v9315_v45 = vld [vmem:[#allocation7 + $0x14] ss:$8 sps:$4 sm:$0xff]  }
 0xc97   :  { %v9388_v16 = vpop.eup %9387 }
 0xc98   :  { %v1276_v19 = vsel %vm502_vm5, %v9388_v16, 0.0 }
 0xc99   :  { %1277 = vadd.xlane.f32.xlu0 %v1276_v19  ;;  %v9317_v19 = vld [vmem:[%s11367_s7 + $0x18] sm:$0xff]  }
 0xcaf   :  { %1285 = vrot.lane.b32.xlu0 %v9915_v29, %s9748_s17 }
 0xcb3   :  { %9221 = vrot.lane.b32.xlu0 %v9220_v14, %s9750_s6 }
 0xcb7   :  { %1418 = vrot.lane.b32.xlu0 %v9903_v7, %s9749_s18 }
 0xd1e   :  { %v1275_v20 = vpop.xlane.xlu0 %1274 }
 0xd1f   :  { %9389 = vrcp.f32 %v1275_v20 }
 0xd22   :  { %v1278_v46 = vpop.xlane.xlu0 %1277 }
 0xd23   :  { %9391 = vrcp.f32 %v1278_v46 }
 0xd26   :  { %v1286_v47 = vpop.permute.xlu0 %1285 }
 0xd27   :  { %v1291_v48 = vsel %vm627_vm6, %v1286_v47, 0 }
 0xd28   :  { %8504 = vmatpush3.bf16.msra.mxu1 %v1291_v48 }
 0xd29   :  { %8515 = vmatprep.subr.bf16.mxu1 %v9737_v6 }
 0xd2a   :  { %v9222_v56 = vpop.permute.xlu0 %9221 }
 0xd2b   :  { %v9224_v9 = vunpack.i.h.bf16 %v9222_v56  ;;  %v9223_v10 = vunpack.i.l.bf16 %v9222_v56 }
 0xd2c   :  { %v9390_v49 = vpop.eup %9389 }
 0xd2d   :  { %v1280_v51 = vmul.f32 %v9390_v49, %v9386_v5  ;;  %v1409_v17 = vsel %vm1407_vm7, %v1406_v12, %v9224_v9  ;;  %v1408_v18 = vsel %vm1407_vm7, %v1405_v13, %v9223_v10 }
 0xd2e   :  { %v1419_v58 = vpop.permute.xlu0 %1418 }
 0xd2f   :  { %v1283_v53 = vpack.c.bf16 %v1280_v51, %v1280_v51 }
 0xd30   :  { %v9392_v29 = vpop.eup %9391 }
 0xd31   :  { %8506 = vmatmul.mubr.msk.bf16.vlgmr.msra.gmra.mxu1 %vm502_vm5, %v1283_v53  ;;  %v1282_v55 = vmul.f32 %v9392_v29, %v9388_v16  ;;  %v9316_v16 = vld [vmem:[#allocation7 + $0x4] ss:$8 sps:$4 sm:$0xff]  }
 0xd32   :  { %8516 = vmatpush3.bf16.msra.mxu1 %v1421_v41  ;;  %8519 = vmatprep.mubr.msk.bf16.mxu1 %vm9738_vm4, %v9737_v6  ;;  %v7909_v41 = vld [vmem:[#allocation10 + $0x8] ss:$0 sm:$0xff] }
 0xd33   :  { %v1284_v7 = vpack.c.bf16 %v1282_v55, %v1282_v55  ;;  %8517 = vmatprep.subr.bf16.mxu1 %v9737_v6 }
 0xd35   :  { %8512 = vmatmul.mubr.msk.bf16.vlgmr.msra.gmra.mxu0 %vm502_vm5, %v1284_v7 }
 0xd36   :  { %8527 = vmatprep.mubr.msk.bf16.mxu0 %vm9738_vm4, %v9737_v6  ;;  %8518 = vmatpush3.bf16.msra.mxu1 %v1419_v58  ;;  %v7910_v58 = vld [vmem:[#allocation10 + $0x9] ss:$0 sm:$0xff] }
 0xd37   :  { %8531 = vmatprep.subr.bf16.mxu1 %v9737_v6  ;;  %8524 = vmatpush3.bf16.msra.mxu0 %v9315_v45 }
 0xd38   :  { %8525 = vmatprep.subr.bf16.mxu0 %v9737_v6 }
 0xd3b   :  { %8526 = vmatpush3.bf16.msra.mxu0 %v9316_v16 }
 0xd3c   :  { %8543 = vmatprep.subr.bf16.mxu0 %v9737_v6 }
 0xdf1   :  { %v1327_v59 = vpop.f32.mrf.mxu1 }
 0xdf3   :  { %v8507_v60 = vpop.f32.mrf.mxu1 }
 0xdf5   :  { %v1330_v61 = vpop.f32.mrf.mxu1  ;;  %v1375_v62 = vpop.f32.mrf.mxu0 }
 0xdf6   :  { %v9225_v63 = vpack.i.bf16 %v1375_v62, %v1327_v59 }
 0xdf7   :  { %v8508_v0 = vpop.f32.mrf.mxu1  ;;  %v8513_v1 = vpop.f32.mrf.mxu0 }
 0xdf8   :  { %9226 = vrot.lane.b32.xlu1 %v9225_v63, %s9751_s0  ;;  %v9318_v63 = vld [vmem:[%s11367_s7 + $0x10] sm:$0xff]   ;;  %v9319_v0 = vld [vmem:[%s11367_s7 + $0x8] sm:$0xff]   ;;  %v9320_v1 = vld [vmem:[%s11367_s7] sm:$0xff]  }
 0xdf9   :  { %v1378_v39 = vpop.f32.mrf.mxu0 }
 0xdfa   :  { %v7911_v39 = vld [vmem:[#allocation10 + $0xa] ss:$0 sm:$0xff] }
 0xdfb   :  { %v8514_v2 = vpop.f32.mrf.mxu0 }
 0xe6a   :  { %v9227_v11 = vpop.permute.xlu1 %9226 }
 0xe6b   :  { %v9229_v14 = vunpack.i.h.bf16 %v9227_v11  ;;  %v9228_v15 = vunpack.i.l.bf16 %v9227_v11 }
 0xe6d   :  { %v1412_v21 = vsel %vm1410_vm8, %v1409_v17, %v9229_v14  ;;  %v1411_v22 = vsel %vm1410_vm8, %v1408_v18, %v9228_v15  ;;  %v7920_v15 = vld [vmem:[#allocation10 + $0xb] ss:$0 sm:$0xff] }
 0xe6e   :  { %v1413_v24 = vpack.c.bf16 %v1412_v21, %v1411_v22 }
 0xe70   :  { %8520 = vmatmul.mubr.msk.bf16.vlgmr.msra.gmra.mxu1 %vm218_vm2, %v1413_v24 }
 0xe71   :  { %8539 = vmatprep.mubr.msk.bf16.mxu1 %vm9738_vm4, %v9737_v6  ;;  %8532 = vmatpush3.bf16.msra.mxu1 %v9317_v19 }
 0xe72   :  { %8533 = vmatprep.subr.bf16.mxu1 %v9737_v6 }
 0xe75   :  { %8534 = vmatpush3.bf16.msra.mxu1 %v9318_v63 }
 0xe76   :  { %8535 = vmatprep.subr.bf16.mxu1 %v9737_v6 }
 0xe79   :  { %8536 = vmatpush3.bf16.msra.mxu1 %v9319_v0 }
 0xe7a   :  { %8537 = vmatprep.subr.bf16.mxu1 %v9737_v6 }
 0xe7d   :  { %8538 = vmatpush3.bf16.msra.mxu1 %v9320_v1 }
 0xe7e   :  { %8557 = vmatprep.subr.bf16.mxu1 %v9737_v6 }
 0xf30   :  { %v1461_v25 = vpop.f32.mrf.mxu1 }
 0xf31   :  { %v1462_v27 = vadd.f32 %v7907_v26, %v1461_v25 }
 0xf32   :  { %v8521_v23 = vpop.f32.mrf.mxu1 }
 0xf33   :  { %v10099_v28 = vadd.f32 %v1462_v27, %v9884_v52 }
 0xf34   :  { %v1464_v30 = vpop.f32.mrf.mxu1 }
 0xf35   :  { %v1465_v31 = vadd.f32 %v7907_v26, %v1464_v30  ;;  %v1470_v32 = vsel %vm218_vm2, %v10099_v28, 0.0 }
 0xf36   :  { %1471 = vadd.xlane.f32.xlu1 %v1470_v32  ;;  %v8522_v34 = vpop.f32.mrf.mxu1 }
 0xf37   :  { %v10104_v35 = vadd.f32 %v1465_v31, %v9890_v57 }
 0xf39   :  { %v1473_v36 = vsel %vm218_vm2, %v10104_v35, 0.0 }
 0xf3a   :  { %1474 = vadd.xlane.f32.xlu0 %v1473_v36 }
 0xfbf   :  { %v1472_v37 = vpop.xlane.xlu1 %1471 }
 0xfc0   :  { %v1476_v38 = vmul.f32 0.03125, %v1472_v37 }
 0xfc2   :  { %v1478_v40 = vsub.f32 %v10099_v28, %v1476_v38 }
 0xfc3   :  { %v1475_v52 = vpop.xlane.xlu0 %1474 }
 0xfc4   :  { %v1477_v42 = vmul.f32 0.03125, %v1475_v52  ;;  %v1480_v43 = vmul.f32 %v1478_v40, %v1478_v40  ;;  %v10150_v52 = vld [vmem:[#allocation7 + $0x30] ss:$8 sps:$4 sm:$0xff]  }
 0xfc6   :  { %v1479_v44 = vsub.f32 %v10104_v35, %v1477_v42  ;;  %v1482_v33 = vsel %vm218_vm2, %v1480_v43, 0.0  ;;  %v10153_v42 = vld [vmem:[#allocation7 + $0x20] ss:$8 sps:$4 sm:$0xff]  }
 0xfc7   :  { %1483 = vadd.xlane.f32.xlu0 %v1482_v33 }
 0xfc8   :  { %v1481_v5 = vmul.f32 %v1479_v44, %v1479_v44 }
 0xfca   :  { %v1485_v57 = vsel %vm218_vm2, %v1481_v5, 0.0 }
 0xfcb   :  { %1486 = vadd.xlane.f32.xlu0 %v1485_v57 }
0x1050   :  { %v1484_v20 = vpop.xlane.xlu0 %1483 }
0x1051   :  { %v1488_v46 = vmul.f32 0.03125, %v1484_v20  ;;  %v7929_v20 = vld [vmem:[#allocation10 + $0xc] ss:$0 sm:$0xff] }
0x1053   :  { %v1490_v47 = vadd.f32 1e-05, %v1488_v46 }
0x1054   :  { %v1487_v48 = vpop.xlane.xlu0 %1486 }
0x1055   :  { %9393 = vrsqrt.f32 %v1490_v47  ;;  %v1489_v49 = vmul.f32 0.03125, %v1487_v48 }
0x1057   :  { %v1491_v51 = vadd.f32 1e-05, %v1489_v49  ;;  %v7930_v49 = vld [vmem:[#allocation10 + $0xd] ss:$0 sm:$0xff] }
0x1059   :  { %9395 = vrsqrt.f32 %v1491_v51 }
0x1062   :  { %v9394_v53 = vpop.eup %9393 }
0x1063   :  { %v1494_v29 = vmul.f32 %v9394_v53, %v1478_v40 }
0x1065   :  { %v1501_v56 = vmul.f32 %v7909_v41, %v1494_v29 }
0x1066   :  { %v9396_v55 = vpop.eup %9395 }
0x1067   :  { %v1495_v7 = vmul.f32 %v9396_v55, %v1479_v44  ;;  %v1508_v60 = vadd.f32 %v7910_v58, %v1501_v56  ;;  %v7931_v55 = vld [vmem:[#allocation10 + $0xe] ss:$0 sm:$0xff] }
0x1069   :  { %v1502_v59 = vmul.f32 %v7909_v41, %v1495_v7 }
0x106b   :  { %v1509_v61 = vadd.f32 %v7910_v58, %v1502_v59 }
0x106d   :  { %v1510_v62 = vpack.c.bf16 %v1509_v61, %v1508_v60 }
0x106f   :  { %8528 = vmatmul.mubr.msk.bf16.vlgmr.msra.gmra.mxu0 %vm218_vm2, %v1510_v62 }
0x1070   :  { %8547 = vmatprep.mubr.msk.bf16.mxu0 %vm9738_vm4, %v9737_v6  ;;  %8544 = vmatpush3.bf16.msra.mxu0 %v10150_v52 }
0x1071   :  { %8545 = vmatprep.subr.bf16.mxu0 %v9737_v6 }
0x1074   :  { %8546 = vmatpush3.bf16.msra.mxu0 %v10153_v42 }
0x1075   :  { %8551 = vmatprep.subr.bf16.mxu0 %v9737_v6 }
0x112f   :  { %v1561_v2 = vpop.f32.mrf.mxu0 }
0x1130   :  { %v1562_v4 = vadd.f32 %v7911_v39, %v1561_v2 }
0x1131   :  { %v8529_v3 = vpop.f32.mrf.mxu0 }
0x1132   :  { %v1568_v11 = vmax.f32 %v1562_v4, 0.0 }
0x1133   :  { %v1564_v8 = vpop.f32.mrf.mxu0 }
0x1134   :  { %v1565_v9 = vadd.f32 %v7911_v39, %v1564_v8 }
0x1135   :  { %v8530_v10 = vpop.f32.mrf.mxu0 }
0x1136   :  { %v1569_v12 = vmax.f32 %v1565_v9, 0.0 }
0x1138   :  { %v1570_v13 = vpack.c.bf16 %v1569_v12, %v1568_v11 }
0x113a   :  { %8540 = vmatmul.mubr.msk.bf16.vlgmr.msra.gmra.mxu1 %vm321_vm3, %v1570_v13 }
0x113b   :  { %8559 = vmatprep.mubr.msk.bf16.mxu1 %vm9738_vm4, %v9737_v6 }
0x11fa   :  { %v1632_v14 = vpop.f32.mrf.mxu1 }
0x11fb   :  { %v1639_v17 = vadd.f32 %v1632_v14, %v10099_v28 }
0x11fc   :  { %v8541_v18 = vpop.f32.mrf.mxu1 }
0x11fd   :  { %v10137_v21 = vadd.f32 %v7920_v15, %v1639_v17 }
0x11fe   :  { %v1635_v22 = vpop.f32.mrf.mxu1 }
0x11ff   :  { %v1640_v24 = vadd.f32 %v1635_v22, %v10104_v35  ;;  %v1662_v26 = vsel %vm218_vm2, %v10137_v21, 0.0 }
0x1200   :  { %1663 = vadd.xlane.f32.xlu1 %v1662_v26  ;;  %v8542_v25 = vpop.f32.mrf.mxu1 }
0x1201   :  { %v10142_v27 = vadd.f32 %v7920_v15, %v1640_v24 }
0x1203   :  { %v1665_v23 = vsel %vm218_vm2, %v10142_v27, 0.0 }
0x1204   :  { %1666 = vadd.xlane.f32.xlu0 %v1665_v23 }
0x1289   :  { %v1664_v30 = vpop.xlane.xlu1 %1663 }
0x128a   :  { %v1668_v31 = vmul.f32 0.03125, %v1664_v30 }
0x128c   :  { %v1670_v28 = vsub.f32 %v10137_v21, %v1668_v31 }
0x128d   :  { %v1667_v32 = vpop.xlane.xlu0 %1666 }
0x128e   :  { %v1669_v34 = vmul.f32 0.03125, %v1667_v32  ;;  %v1672_v36 = vmul.f32 %v1670_v28, %v1670_v28 }
0x1290   :  { %v1671_v35 = vsub.f32 %v10142_v27, %v1669_v34  ;;  %v1674_v37 = vsel %vm218_vm2, %v1672_v36, 0.0 }
0x1291   :  { %1675 = vadd.xlane.f32.xlu1 %v1674_v37 }
0x1292   :  { %v1673_v38 = vmul.f32 %v1671_v35, %v1671_v35 }
0x1294   :  { %v1677_v40 = vsel %vm218_vm2, %v1673_v38, 0.0 }
0x1295   :  { %1678 = vadd.xlane.f32.xlu0 %v1677_v40 }
0x131a   :  { %v1676_v43 = vpop.xlane.xlu1 %1675 }
0x131b   :  { %v1680_v44 = vmul.f32 0.03125, %v1676_v43 }
0x131d   :  { %v1682_v33 = vadd.f32 1e-05, %v1680_v44 }
0x131e   :  { %v1679_v5 = vpop.xlane.xlu0 %1678 }
0x131f   :  { %9397 = vrsqrt.f32 %v1682_v33  ;;  %v1681_v57 = vmul.f32 0.03125, %v1679_v5 }
0x1321   :  { %v1683_v45 = vadd.f32 1e-05, %v1681_v57 }
0x1323   :  { %9399 = vrsqrt.f32 %v1683_v45 }
0x132c   :  { %v9398_v16 = vpop.eup %9397 }
0x132d   :  { %v1686_v19 = vmul.f32 %v9398_v16, %v1670_v28 }
0x132f   :  { %v1693_v48 = vmul.f32 %v7929_v20, %v1686_v19 }
0x1330   :  { %v9400_v46 = vpop.eup %9399 }
0x1331   :  { %v1687_v47 = vmul.f32 %v9400_v46, %v1671_v35  ;;  %v1700_v53 = vadd.f32 %v7930_v49, %v1693_v48 }
0x1333   :  { %v1694_v51 = vmul.f32 %v7929_v20, %v1687_v47 }
0x1335   :  { %v1701_v29 = vadd.f32 %v7930_v49, %v1694_v51 }
0x1337   :  { %v1702_v41 = vpack.c.bf16 %v1701_v29, %v1700_v53 }
0x1339   :  { %8548 = vmatmul.mubr.msk.bf16.vlgmr.msra.gmra.mxu0 %vm218_vm2, %v1702_v41 }
0x133a   :  { %8553 = vmatprep.mubr.msk.bf16.mxu0 %vm9738_vm4, %v9737_v6 }
0x13f9   :  { %v1757_v7 = vpop.f32.mrf.mxu0 }
0x13fa   :  { %v1758_v56 = vadd.f32 %v7931_v55, %v1757_v7 }
0x13fb   :  { %v8549_v58 = vpop.f32.mrf.mxu0 }
0x13fc   :  { %v10161_v59 = vpack.c.bf16 %v1758_v56, %v1758_v56  ;;  %v1765_v39 = vmul.f32 0.35355338, %v1758_v56 }
0x13fd   :  { %v1760_v60 = vpop.f32.mrf.mxu0 }
0x13fe   :  { %v1761_v61 = vadd.f32 %v7931_v55, %v1760_v60  ;;  %1772 = vrot.lane.b32.xlu1 %v10161_v59, %s9739_s1  ;;  %v10172_v4 = vpack.c.bf16 %v1765_v39, %v1765_v39 }
0x13ff   :  { %v8550_v62 = vpop.f32.mrf.mxu0 }
0x1400   :  { %v10165_v63 = vpack.c.bf16 %v1761_v61, %v1761_v61  ;;  %v1766_v8 = vmul.f32 0.35355338, %v1761_v61 }
0x1402   :  { %1821 = vrot.lane.b32.xlu0 %v10165_v63, %s9739_s1  ;;  %v10179_v9 = vpack.c.bf16 %v1766_v8, %v1766_v8 }
0x1470   :  { %v1773_v0 = vpop.permute.xlu1 %1772 }
0x1471   :  { %v1778_v1 = vsel %vm502_vm5, %v1773_v0, 0 }
0x1472   :  { %8552 = vmatpush3.bf16.xpose.msra.mxu0 %v1778_v1 }
0x1473   :  { %8563 = vmatprep.subr.bf16.mxu0 %v9737_v6 }
0x1474   :  { %v1822_v2 = vpop.permute.xlu0 %1821 }
0x1475   :  { %v1827_v3 = vsel %vm502_vm5, %v1822_v2, 0 }
0x1476   :  { %8558 = vmatpush3.bf16.xpose.msra.mxu1 %v1827_v3 }
0x1477   :  { %8569 = vmatprep.subr.bf16.mxu1 %v9737_v6 }
0x1479   :  { %8554 = vmatmul.mubr.msk.bf16.vlgmr.msra.gmra.mxu0 %vm502_vm5, %v10172_v4 }
0x147a   :  { %8565 = vmatprep.mubr.msk.bf16.mxu0 %vm9738_vm4, %v9737_v6 }
0x147d   :  { %8560 = vmatmul.mubr.msk.bf16.vlgmr.msra.gmra.mxu1 %vm502_vm5, %v10179_v9 }
0x147e   :  { %8571 = vmatprep.mubr.msk.bf16.mxu1 %vm9738_vm4, %v9737_v6 }
0x1539   :  { %v1814_v10 = vpop.f32.mrf.mxu0 }
0x153a   :  { %v1869_v11 = vsel %vm502_vm5, %v1814_v10, -inf }
0x153b   :  { %1870 = vmax.xlane.f32.xlu1 %v1869_v11  ;;  %v8555_v12 = vpop.f32.mrf.mxu0 }
0x153d   :  { %v1817_v13 = vpop.f32.mrf.mxu0  ;;  %v1863_v14 = vpop.f32.mrf.mxu1 }
0x153e   :  { %v1872_v15 = vsel %vm502_vm5, %v1863_v14, -inf }
0x153f   :  { %v8556_v17 = vpop.f32.mrf.mxu0  ;;  %1873 = vmax.xlane.f32.xlu0 %v1872_v15  ;;  %v8561_v18 = vpop.f32.mrf.mxu1 }
0x1541   :  { %v1866_v22 = vpop.f32.mrf.mxu1 }
0x1543   :  { %v8562_v24 = vpop.f32.mrf.mxu1 }
0x154c   :  { %1893 = vrot.lane.b32.xlu1 %v10161_v59, %s9726_s20 }
0x15c4   :  { %v1871_v26 = vpop.xlane.xlu1 %1870 }
0x15c5   :  { %v1875_v25 = vsub.f32 %v1814_v10, %v1871_v26 }
0x15c7   :  { %v1877_v23 = vmul.f32 1.442695, %v1875_v25 }
0x15c8   :  { %v1894_v30 = vpop.permute.xlu1 %1893  ;;  %v1874_v31 = vpop.xlane.xlu0 %1873 }
0x15c9   :  { %9401 = vpow2.f32 %v1877_v23  ;;  %v1899_v28 = vsel %vm627_vm6, %v1894_v30, 0  ;;  %v1876_v32 = vsub.f32 %v1863_v14, %v1874_v31 }
0x15ca   :  { %8564 = vmatpush3.bf16.msra.mxu0 %v1899_v28 }
0x15cb   :  { %v1879_v34 = vmul.f32 1.442695, %v1876_v32  ;;  %8575 = vmatprep.subr.bf16.mxu0 %v9737_v6 }
0x15cd   :  { %9403 = vpow2.f32 %v1879_v34 }
0x15d6   :  { %v9402_v36 = vpop.eup %9401 }
0x15d7   :  { %v1881_v35 = vsel %vm502_vm5, %v9402_v36, 0.0 }
0x15d8   :  { %1882 = vadd.xlane.f32.xlu1 %v1881_v35 }
0x15da   :  { %v9404_v37 = vpop.eup %9403 }
0x15db   :  { %v1884_v38 = vsel %vm502_vm5, %v9404_v37, 0.0 }
0x15dc   :  { %1885 = vadd.xlane.f32.xlu0 %v1884_v38 }
0x15e9   :  { %1992 = vrot.lane.b32.xlu1 %v10161_v59, %s9740_s12 }
0x15ed   :  { %2043 = vrot.lane.b32.xlu1 %v10165_v63, %s9740_s12 }
0x15f1   :  { %1990 = vrot.lane.b32.xlu1 %v10172_v4, %s9741_s8 }
0x15f2   :  { %1941 = vrot.lane.b32.xlu0 %v10165_v63, %s9726_s20 }
0x15f6   :  { %2041 = vrot.lane.b32.xlu0 %v10179_v9, %s9741_s8 }
0x1661   :  { %v1883_v40 = vpop.xlane.xlu1 %1882 }
0x1662   :  { %9405 = vrcp.f32 %v1883_v40 }
0x1665   :  { %v1886_v43 = vpop.xlane.xlu0 %1885  ;;  %v1993_v57 = vpop.permute.xlu1 %1992 }
0x1666   :  { %9407 = vrcp.f32 %v1886_v43  ;;  %v1998_v20 = vsel %vm502_vm5, %v1993_v57, 0 }
0x1669   :  { %v1942_v44 = vpop.permute.xlu0 %1941  ;;  %v2044_v47 = vpop.permute.xlu1 %2043 }
0x166a   :  { %v1947_v33 = vsel %vm627_vm6, %v1942_v44, 0  ;;  %v2049_v49 = vsel %vm502_vm5, %v2044_v47, 0 }
0x166b   :  { %8570 = vmatpush3.bf16.msra.mxu1 %v1947_v33 }
0x166c   :  { %8581 = vmatprep.subr.bf16.mxu1 %v9737_v6 }
0x166d   :  { %v1991_v51 = vpop.permute.xlu1 %1990  ;;  %v2042_v53 = vpop.permute.xlu0 %2041 }
0x166f   :  { %v9406_v5 = vpop.eup %9405 }
0x1670   :  { %v1888_v45 = vmul.f32 %v9406_v5, %v9402_v36 }
0x1672   :  { %v1891_v16 = vpack.c.bf16 %v1888_v45, %v1888_v45 }
0x1673   :  { %v9408_v19 = vpop.eup %9407 }
0x1674   :  { %8566 = vmatmul.mubr.msk.bf16.vlgmr.msra.gmra.mxu0 %vm502_vm5, %v1891_v16  ;;  %v1890_v46 = vmul.f32 %v9408_v19, %v9404_v37 }
0x1675   :  { %8576 = vmatpush3.bf16.xpose.msra.mxu0 %v1998_v20  ;;  %8577 = vmatprep.mubr.msk.bf16.mxu0 %vm9738_vm4, %v9737_v6 }
0x1676   :  { %v1892_v48 = vpack.c.bf16 %v1890_v46, %v1890_v46  ;;  %8587 = vmatprep.subr.bf16.mxu0 %v9737_v6 }
0x1678   :  { %8572 = vmatmul.mubr.msk.bf16.vlgmr.msra.gmra.mxu1 %vm502_vm5, %v1892_v48 }
0x1679   :  { %8582 = vmatpush3.bf16.xpose.msra.mxu1 %v2049_v49  ;;  %8583 = vmatprep.mubr.msk.bf16.mxu1 %vm9738_vm4, %v9737_v6 }
0x167a   :  { %8593 = vmatprep.subr.bf16.mxu1 %v9737_v6 }
0x167c   :  { %8578 = vmatmul.mubr.msk.bf16.vlgmr.msra.gmra.mxu0 %vm502_vm5, %v1991_v51 }
0x167d   :  { %8589 = vmatprep.mubr.msk.bf16.mxu0 %vm9738_vm4, %v9737_v6 }
0x1680   :  { %8584 = vmatmul.mubr.msk.bf16.vlgmr.msra.gmra.mxu1 %vm502_vm5, %v2042_v53 }
0x1681   :  { %8595 = vmatprep.mubr.msk.bf16.mxu1 %vm9738_vm4, %v9737_v6 }
0x1734   :  { %v10221_v29 = vpop.f32.mrf.mxu0 }
0x1736   :  { %v8567_v41 = vpop.f32.mrf.mxu0 }
0x1738   :  { %v1938_v55 = vpop.f32.mrf.mxu0  ;;  %v10223_v7 = vpop.f32.mrf.mxu1 }
0x173a   :  { %v8568_v56 = vpop.f32.mrf.mxu0  ;;  %v8573_v58 = vpop.f32.mrf.mxu1 }
0x173c   :  { %v1986_v60 = vpop.f32.mrf.mxu1  ;;  %v2034_v61 = vpop.f32.mrf.mxu0 }
0x173d   :  { %v2091_v62 = vsel %vm502_vm5, %v2034_v61, -inf }
0x173e   :  { %2092 = vmax.xlane.f32.xlu1 %v2091_v62  ;;  %v8574_v0 = vpop.f32.mrf.mxu1  ;;  %v8579_v1 = vpop.f32.mrf.mxu0 }
0x1740   :  { %v2037_v39 = vpop.f32.mrf.mxu0  ;;  %v2085_v2 = vpop.f32.mrf.mxu1 }
0x1741   :  { %v2094_v3 = vsel %vm502_vm5, %v2085_v2, -inf }
0x1742   :  { %v8580_v8 = vpop.f32.mrf.mxu0  ;;  %2095 = vmax.xlane.f32.xlu0 %v2094_v3  ;;  %v8585_v10 = vpop.f32.mrf.mxu1 }
0x1744   :  { %v2088_v11 = vpop.f32.mrf.mxu1 }
0x1746   :  { %v8586_v12 = vpop.f32.mrf.mxu1 }
0x174f   :  { %2115 = vrot.lane.b32.xlu1 %v10161_v59, %s9742_s13 }
0x1753   :  { %2213 = vrot.lane.b32.xlu1 %v10161_v59, %s9743_s14 }
0x1757   :  { %2263 = vrot.lane.b32.xlu1 %v10165_v63, %s9743_s14 }
0x175b   :  { %2211 = vrot.lane.b32.xlu1 %v10172_v4, %s9744_s15 }
0x17c7   :  { %v2093_v13 = vpop.xlane.xlu1 %2092 }
0x17c8   :  { %v2097_v14 = vsub.f32 %v2034_v61, %v2093_v13 }
0x17ca   :  { %v2099_v15 = vmul.f32 1.442695, %v2097_v14 }
0x17cb   :  { %v2116_v17 = vpop.permute.xlu1 %2115  ;;  %v2096_v18 = vpop.xlane.xlu0 %2095 }
0x17cc   :  { %9409 = vpow2.f32 %v2099_v15  ;;  %v2121_v22 = vsel %vm627_vm6, %v2116_v17, 0  ;;  %v2098_v24 = vsub.f32 %v2085_v2, %v2096_v18 }
0x17cd   :  { %8588 = vmatpush3.bf16.msra.mxu0 %v2121_v22 }
0x17ce   :  { %v2101_v26 = vmul.f32 1.442695, %v2098_v24  ;;  %8599 = vmatprep.subr.bf16.mxu0 %v9737_v6 }
0x17cf   :  { %v2214_v37 = vpop.permute.xlu1 %2213 }
0x17d0   :  { %9411 = vpow2.f32 %v2101_v26  ;;  %v2219_v44 = vsel %vm502_vm5, %v2214_v37, 0 }
0x17d3   :  { %v2264_v5 = vpop.permute.xlu1 %2263 }
0x17d4   :  { %v2269_v45 = vsel %vm502_vm5, %v2264_v5, 0 }
0x17d7   :  { %v2212_v16 = vpop.permute.xlu1 %2211 }
0x17d9   :  { %v9410_v25 = vpop.eup %9409 }
0x17da   :  { %v2103_v23 = vsel %vm502_vm5, %v9410_v25, 0.0 }
0x17db   :  { %2104 = vadd.xlane.f32.xlu0 %v2103_v23 }
0x17dd   :  { %v9412_v30 = vpop.eup %9411 }
0x17de   :  { %v2106_v31 = vsel %vm502_vm5, %v9412_v30, 0.0 }
0x17df   :  { %2107 = vadd.xlane.f32.xlu0 %v2106_v31 }
0x17f5   :  { %2163 = vrot.lane.b32.xlu0 %v10165_v63, %s9742_s13 }
0x17f9   :  { %2261 = vrot.lane.b32.xlu0 %v10179_v9, %s9744_s15 }
0x1864   :  { %v2105_v28 = vpop.xlane.xlu0 %2104 }
0x1865   :  { %9413 = vrcp.f32 %v2105_v28 }
0x1868   :  { %v2108_v32 = vpop.xlane.xlu0 %2107 }
0x1869   :  { %9415 = vrcp.f32 %v2108_v32 }
0x186c   :  { %v2164_v34 = vpop.permute.xlu0 %2163 }
0x186d   :  { %v2169_v36 = vsel %vm627_vm6, %v2164_v34, 0 }
0x186e   :  { %8594 = vmatpush3.bf16.msra.mxu1 %v2169_v36 }
0x186f   :  { %8605 = vmatprep.subr.bf16.mxu1 %v9737_v6 }
0x1870   :  { %v2262_v19 = vpop.permute.xlu0 %2261 }
0x1872   :  { %v9414_v35 = vpop.eup %9413 }
0x1873   :  { %v2110_v38 = vmul.f32 %v9414_v35, %v9410_v25 }
0x1875   :  { %v2113_v40 = vpack.c.bf16 %v2110_v38, %v2110_v38 }
0x1876   :  { %v9416_v43 = vpop.eup %9415 }
0x1877   :  { %8590 = vmatmul.mubr.msk.bf16.vlgmr.msra.gmra.mxu0 %vm502_vm5, %v2113_v40  ;;  %v2112_v33 = vmul.f32 %v9416_v43, %v9412_v30 }
0x1878   :  { %8600 = vmatpush3.bf16.xpose.msra.mxu0 %v2219_v44  ;;  %8601 = vmatprep.mubr.msk.bf16.mxu0 %vm9738_vm4, %v9737_v6 }
0x1879   :  { %v2114_v57 = vpack.c.bf16 %v2112_v33, %v2112_v33  ;;  %8611 = vmatprep.subr.bf16.mxu0 %v9737_v6 }
0x187b   :  { %8596 = vmatmul.mubr.msk.bf16.vlgmr.msra.gmra.mxu1 %vm502_vm5, %v2114_v57 }
0x187c   :  { %8606 = vmatpush3.bf16.xpose.msra.mxu1 %v2269_v45  ;;  %8607 = vmatprep.mubr.msk.bf16.mxu1 %vm9738_vm4, %v9737_v6 }
0x187d   :  { %8617 = vmatprep.subr.bf16.mxu1 %v9737_v6 }
0x187f   :  { %8602 = vmatmul.mubr.msk.bf16.vlgmr.msra.gmra.mxu0 %vm502_vm5, %v2212_v16 }
0x1880   :  { %8613 = vmatprep.mubr.msk.bf16.mxu0 %vm9738_vm4, %v9737_v6 }
0x1883   :  { %8608 = vmatmul.mubr.msk.bf16.vlgmr.msra.gmra.mxu1 %vm502_vm5, %v2262_v19 }
0x1884   :  { %8619 = vmatprep.mubr.msk.bf16.mxu1 %vm9738_vm4, %v9737_v6 }
0x1937   :  { %v10261_v20 = vpop.f32.mrf.mxu0 }
0x1939   :  { %v8591_v46 = vpop.f32.mrf.mxu0 }
0x193b   :  { %v2160_v47 = vpop.f32.mrf.mxu0  ;;  %v10263_v48 = vpop.f32.mrf.mxu1 }
0x193c   :  { %v9230_v49 = vpack.i.bf16 %v10263_v48, %v10261_v20 }
0x193d   :  { %v8592_v51 = vpop.f32.mrf.mxu0  ;;  %v8597_v53 = vpop.f32.mrf.mxu1 }
0x193f   :  { %v2208_v41 = vpop.f32.mrf.mxu1  ;;  %v2255_v55 = vpop.f32.mrf.mxu0 }
0x1940   :  { %v2311_v56 = vsel %vm502_vm5, %v2255_v55, -inf }
0x1941   :  { %2312 = vmax.xlane.f32.xlu1 %v2311_v56  ;;  %v8598_v58 = vpop.f32.mrf.mxu1  ;;  %v8603_v60 = vpop.f32.mrf.mxu0 }
0x1943   :  { %v2258_v61 = vpop.f32.mrf.mxu0  ;;  %v2305_v62 = vpop.f32.mrf.mxu1 }
0x1944   :  { %v2314_v0 = vsel %vm502_vm5, %v2305_v62, -inf }
0x1945   :  { %v8604_v1 = vpop.f32.mrf.mxu0  ;;  %2315 = vmax.xlane.f32.xlu0 %v2314_v0  ;;  %v8609_v39 = vpop.f32.mrf.mxu1 }
0x1947   :  { %v2308_v2 = vpop.f32.mrf.mxu1 }
0x1949   :  { %v8610_v3 = vpop.f32.mrf.mxu1 }
0x1952   :  { %2335 = vrot.lane.b32.xlu1 %v10161_v59, %s9745_s10 }
0x1956   :  { %2433 = vrot.lane.b32.xlu1 %v10161_v59, %s9746_s27 }
0x195a   :  { %2483 = vrot.lane.b32.xlu1 %v10165_v63, %s9746_s27 }
0x195e   :  { %2431 = vrot.lane.b32.xlu1 %v10172_v4, %s9747_s16 }
0x19ca   :  { %v2313_v8 = vpop.xlane.xlu1 %2312 }
0x19cb   :  { %v2317_v10 = vsub.f32 %v2255_v55, %v2313_v8 }
0x19cd   :  { %v2319_v11 = vmul.f32 1.442695, %v2317_v10 }
0x19ce   :  { %v2336_v12 = vpop.permute.xlu1 %2335  ;;  %v2316_v13 = vpop.xlane.xlu0 %2315 }
0x19cf   :  { %9417 = vpow2.f32 %v2319_v11  ;;  %v2341_v14 = vsel %vm627_vm6, %v2336_v12, 0  ;;  %v2318_v15 = vsub.f32 %v2305_v62, %v2316_v13 }
0x19d0   :  { %8612 = vmatpush3.bf16.msra.mxu0 %v2341_v14 }
0x19d1   :  { %v2321_v17 = vmul.f32 1.442695, %v2318_v15  ;;  %8623 = vmatprep.subr.bf16.mxu0 %v9737_v6 }
0x19d2   :  { %v2434_v28 = vpop.permute.xlu1 %2433 }
0x19d3   :  { %9419 = vpow2.f32 %v2321_v17  ;;  %v2439_v35 = vsel %vm502_vm5, %v2434_v28, 0 }
0x19d6   :  { %v2484_v37 = vpop.permute.xlu1 %2483 }
0x19d7   :  { %v2489_v40 = vsel %vm502_vm5, %v2484_v37, 0 }
0x19da   :  { %v2432_v43 = vpop.permute.xlu1 %2431 }
0x19dc   :  { %v9418_v18 = vpop.eup %9417 }
0x19dd   :  { %v2323_v22 = vsel %vm502_vm5, %v9418_v18, 0.0 }
0x19de   :  { %2324 = vadd.xlane.f32.xlu0 %v2323_v22 }
0x19e0   :  { %v9420_v24 = vpop.eup %9419 }
0x19e1   :  { %v2326_v4 = vsel %vm502_vm5, %v9420_v24, 0.0 }
0x19e2   :  { %2327 = vadd.xlane.f32.xlu0 %v2326_v4 }
0x19f8   :  { %2383 = vrot.lane.b32.xlu0 %v10165_v63, %s9745_s10 }
0x19fc   :  { %2481 = vrot.lane.b32.xlu0 %v10179_v9, %s9747_s16 }
0x1a67   :  { %v2325_v26 = vpop.xlane.xlu0 %2324 }
0x1a68   :  { %9421 = vrcp.f32 %v2325_v26 }
0x1a6b   :  { %v2328_v25 = vpop.xlane.xlu0 %2327 }
0x1a6c   :  { %9423 = vrcp.f32 %v2328_v25 }
0x1a6f   :  { %v2384_v23 = vpop.permute.xlu0 %2383 }
0x1a70   :  { %v2389_v30 = vsel %vm627_vm6, %v2384_v23, 0 }
0x1a71   :  { %8618 = vmatpush3.bf16.msra.mxu1 %v2389_v30 }
0x1a72   :  { %8629 = vmatprep.subr.bf16.mxu1 %v9737_v6 }
0x1a73   :  { %v2482_v44 = vpop.permute.xlu0 %2481 }
0x1a75   :  { %v9422_v31 = vpop.eup %9421 }
0x1a76   :  { %v2330_v32 = vmul.f32 %v9422_v31, %v9418_v18 }
0x1a78   :  { %v2333_v34 = vpack.c.bf16 %v2330_v32, %v2330_v32 }
0x1a79   :  { %v9424_v36 = vpop.eup %9423 }
0x1a7a   :  { %8614 = vmatmul.mubr.msk.bf16.vlgmr.msra.gmra.mxu0 %vm502_vm5, %v2333_v34  ;;  %v2332_v9 = vmul.f32 %v9424_v36, %v9420_v24 }
0x1a7b   :  { %8624 = vmatpush3.bf16.xpose.msra.mxu0 %v2439_v35  ;;  %8625 = vmatprep.mubr.msk.bf16.mxu0 %vm9738_vm4, %v9737_v6 }
0x1a7c   :  { %v2334_v38 = vpack.c.bf16 %v2332_v9, %v2332_v9  ;;  %8635 = vmatprep.subr.bf16.mxu0 %v9737_v6 }
0x1a7e   :  { %8620 = vmatmul.mubr.msk.bf16.vlgmr.msra.gmra.mxu1 %vm502_vm5, %v2334_v38 }
0x1a7f   :  { %8630 = vmatpush3.bf16.xpose.msra.mxu1 %v2489_v40  ;;  %8631 = vmatprep.mubr.msk.bf16.mxu1 %vm9738_vm4, %v9737_v6 }
0x1a80   :  { %8641 = vmatprep.subr.bf16.mxu1 %v9737_v6 }
0x1a82   :  { %8626 = vmatmul.mubr.msk.bf16.vlgmr.msra.gmra.mxu0 %vm502_vm5, %v2432_v43 }
0x1a83   :  { %8637 = vmatprep.mubr.msk.bf16.mxu0 %vm9738_vm4, %v9737_v6 }
0x1a86   :  { %8632 = vmatmul.mubr.msk.bf16.vlgmr.msra.gmra.mxu1 %vm502_vm5, %v2482_v44 }
0x1a87   :  { %8643 = vmatprep.mubr.msk.bf16.mxu1 %vm9738_vm4, %v9737_v6 }
0x1b3a   :  { %v2377_v33 = vpop.f32.mrf.mxu0 }
0x1b3c   :  { %v8615_v5 = vpop.f32.mrf.mxu0 }
0x1b3e   :  { %v2380_v57 = vpop.f32.mrf.mxu0  ;;  %v2425_v45 = vpop.f32.mrf.mxu1 }
0x1b3f   :  { %v9235_v1 = vpack.i.bf16 %v2425_v45, %v2377_v33 }
0x1b40   :  { %v8616_v16 = vpop.f32.mrf.mxu0  ;;  %v8621_v19 = vpop.f32.mrf.mxu1 }
0x1b42   :  { %v2428_v46 = vpop.f32.mrf.mxu1  ;;  %v2475_v47 = vpop.f32.mrf.mxu0 }
0x1b43   :  { %v2531_v51 = vsel %vm502_vm5, %v2475_v47, -inf }
0x1b44   :  { %2532 = vmax.xlane.f32.xlu1 %v2531_v51  ;;  %v8622_v53 = vpop.f32.mrf.mxu1  ;;  %v8627_v41 = vpop.f32.mrf.mxu0 }
0x1b46   :  { %v2478_v55 = vpop.f32.mrf.mxu0  ;;  %v2525_v56 = vpop.f32.mrf.mxu1 }
0x1b47   :  { %v2534_v58 = vsel %vm502_vm5, %v2525_v56, -inf }
0x1b48   :  { %v8628_v60 = vpop.f32.mrf.mxu0  ;;  %2535 = vmax.xlane.f32.xlu0 %v2534_v58  ;;  %v8633_v61 = vpop.f32.mrf.mxu1 }
0x1b4a   :  { %v2528_v62 = vpop.f32.mrf.mxu1 }
0x1b4c   :  { %v8634_v0 = vpop.f32.mrf.mxu1 }
0x1b55   :  { %2555 = vrot.lane.b32.xlu1 %v10161_v59, %s9748_s17 }
0x1b59   :  { %2688 = vrot.lane.b32.xlu1 %v10150_v52, %s9749_s18 }
0x1b5d   :  { %9231 = vrot.lane.b32.xlu1 %v9230_v49, %s9730_s28 }
0x1b61   :  { %9236 = vrot.lane.b32.xlu1 %v9235_v1, %s9750_s6 }
0x1b65   :  { %2686 = vrot.lane.b32.xlu1 %v10153_v42, %s9749_s18 }
0x1bcd   :  { %v2533_v39 = vpop.xlane.xlu1 %2532 }
0x1bce   :  { %v2537_v2 = vsub.f32 %v2475_v47, %v2533_v39  ;;  %v2972_v39 = vsel %vm218_vm2, %v9882_v50, 0.0 }
0x1bd0   :  { %v2539_v3 = vmul.f32 1.442695, %v2537_v2 }
0x1bd1   :  { %v2556_v8 = vpop.permute.xlu1 %2555  ;;  %v2536_v10 = vpop.xlane.xlu0 %2535 }
0x1bd2   :  { %9425 = vpow2.f32 %v2539_v3  ;;  %v2561_v59 = vsel %vm627_vm6, %v2556_v8, 0  ;;  %v2538_v52 = vsub.f32 %v2525_v56, %v2536_v10 }
0x1bd3   :  { %8636 = vmatpush3.bf16.msra.mxu0 %v2561_v59 }
0x1bd4   :  { %v2541_v11 = vmul.f32 1.442695, %v2538_v52  ;;  %8647 = vmatprep.subr.bf16.mxu0 %v9737_v6 }
0x1bd5   :  { %v2689_v4 = vpop.permute.xlu1 %2688 }
0x1bd6   :  { %9427 = vpow2.f32 %v2541_v11 }
0x1bd9   :  { %v9232_v25 = vpop.permute.xlu1 %9231 }
0x1bda   :  { %v9234_v40 = vunpack.i.h.bf16 %v9232_v25  ;;  %v9233_v43 = vunpack.i.l.bf16 %v9232_v25  ;;  %v9331_v25 = vld [vmem:[%s11367_s7 + $0x38] sm:$0xff]  }
0x1bdc   :  { %v2676_v57 = vsel %vm502_vm5, %v10223_v7, %v9234_v40  ;;  %v2675_v45 = vsel %vm502_vm5, %v10221_v29, %v9233_v43  ;;  %v7951_v7 = vld [vmem:[#allocation10 + $0xf] ss:$0 sm:$0xff] }
0x1bdd   :  { %v9237_v23 = vpop.permute.xlu1 %9236 }
0x1bde   :  { %v9239_v44 = vunpack.i.h.bf16 %v9237_v23  ;;  %v9238_v33 = vunpack.i.l.bf16 %v9237_v23 }
0x1bdf   :  { %v9426_v20 = vpop.eup %9425 }
0x1be0   :  { %v2543_v48 = vsel %vm502_vm5, %v9426_v20, 0.0  ;;  %v2678_v46 = vsel %vm1407_vm7, %v2676_v57, %v9239_v44  ;;  %v2677_v47 = vsel %vm1407_vm7, %v2675_v45, %v9238_v33  ;;  %v7953_v33 = vld [vmem:[#allocation10 + $0x10] ss:$0 sm:$0xff] }
0x1be1   :  { %2544 = vadd.xlane.f32.xlu0 %v2543_v48  ;;  %v2687_v30 = vpop.permute.xlu1 %2686 }
0x1be3   :  { %v9428_v49 = vpop.eup %9427 }
0x1be4   :  { %v2546_v42 = vsel %vm502_vm5, %v9428_v49, 0.0 }
0x1be5   :  { %2547 = vadd.xlane.f32.xlu0 %v2546_v42 }
0x1bfb   :  { %2603 = vrot.lane.b32.xlu0 %v10165_v63, %s9748_s17 }
0x1c6a   :  { %v2545_v12 = vpop.xlane.xlu0 %2544 }
0x1c6b   :  { %9429 = vrcp.f32 %v2545_v12 }
0x1c6e   :  { %v2548_v13 = vpop.xlane.xlu0 %2547 }
0x1c6f   :  { %9431 = vrcp.f32 %v2548_v13 }
0x1c72   :  { %v2604_v14 = vpop.permute.xlu0 %2603 }
0x1c73   :  { %v2609_v15 = vsel %vm627_vm6, %v2604_v14, 0 }
0x1c74   :  { %8642 = vmatpush3.bf16.msra.mxu1 %v2609_v15 }
0x1c75   :  { %8655 = vmatprep.subr.bf16.mxu1 %v9737_v6 }
0x1c78   :  { %v9430_v17 = vpop.eup %9429 }
0x1c79   :  { %v2550_v18 = vmul.f32 %v9430_v17, %v9426_v20 }
0x1c7b   :  { %v2553_v22 = vpack.c.bf16 %v2550_v18, %v2550_v18 }
0x1c7c   :  { %v9432_v24 = vpop.eup %9431 }
0x1c7d   :  { %8638 = vmatmul.mubr.msk.bf16.vlgmr.msra.gmra.mxu0 %vm502_vm5, %v2553_v22  ;;  %v2552_v26 = vmul.f32 %v9432_v24, %v9428_v49 }
0x1c7e   :  { %8648 = vmatpush3.bf16.msra.mxu0 %v2689_v4  ;;  %8651 = vmatprep.mubr.msk.bf16.mxu0 %vm9738_vm4, %v9737_v6 }
0x1c7f   :  { %v2554_v63 = vpack.c.bf16 %v2552_v26, %v2552_v26  ;;  %8649 = vmatprep.subr.bf16.mxu0 %v9737_v6  ;;  %v9325_v26 = vld [vmem:[#allocation7 + $0x34] ss:$8 sps:$4 sm:$0xff]  }
0x1c81   :  { %8644 = vmatmul.mubr.msk.bf16.vlgmr.msra.gmra.mxu1 %vm502_vm5, %v2554_v63  ;;  %v9326_v63 = vld [vmem:[#allocation7 + $0x24] ss:$8 sps:$4 sm:$0xff]  }
0x1c82   :  { %8659 = vmatprep.mubr.msk.bf16.mxu1 %vm9738_vm4, %v9737_v6  ;;  %8650 = vmatpush3.bf16.msra.mxu0 %v2687_v30 }
0x1c83   :  { %8663 = vmatprep.subr.bf16.mxu0 %v9737_v6  ;;  %8656 = vmatpush3.bf16.msra.mxu1 %v9325_v26 }
0x1c84   :  { %8657 = vmatprep.subr.bf16.mxu1 %v9737_v6 }
0x1c87   :  { %8658 = vmatpush3.bf16.msra.mxu1 %v9326_v63 }
0x1c88   :  { %8675 = vmatprep.subr.bf16.mxu1 %v9737_v6 }
0x1d3d   :  { %v2597_v31 = vpop.f32.mrf.mxu0 }
0x1d3f   :  { %v8639_v28 = vpop.f32.mrf.mxu0 }
0x1d41   :  { %v2600_v32 = vpop.f32.mrf.mxu0  ;;  %v2645_v34 = vpop.f32.mrf.mxu1 }
0x1d42   :  { %v9240_v36 = vpack.i.bf16 %v2645_v34, %v2597_v31 }
0x1d43   :  { %v8640_v35 = vpop.f32.mrf.mxu0  ;;  %v8645_v9 = vpop.f32.mrf.mxu1 }
0x1d44   :  { %9241 = vrot.lane.b32.xlu0 %v9240_v36, %s9751_s0 }
0x1d45   :  { %v2648_v37 = vpop.f32.mrf.mxu1 }
0x1d47   :  { %v8646_v38 = vpop.f32.mrf.mxu1 }
0x1db6   :  { %v9242_v5 = vpop.permute.xlu0 %9241 }
0x1db7   :  { %v9244_v16 = vunpack.i.h.bf16 %v9242_v5  ;;  %v9243_v19 = vunpack.i.l.bf16 %v9242_v5 }
0x1db9   :  { %v2680_v51 = vsel %vm1410_vm8, %v2678_v46, %v9244_v16  ;;  %v2679_v53 = vsel %vm1410_vm8, %v2677_v47, %v9243_v19  ;;  %v7954_v19 = vld [vmem:[#allocation10 + $0x11] ss:$0 sm:$0xff] }
0x1dba   :  { %v2681_v41 = vpack.c.bf16 %v2680_v51, %v2679_v53 }
0x1dbc   :  { %8652 = vmatmul.mubr.msk.bf16.vlgmr.msra.gmra.mxu0 %vm218_vm2, %v2681_v41 }
0x1dbd   :  { %8671 = vmatprep.mubr.msk.bf16.mxu0 %vm9738_vm4, %v9737_v6  ;;  %8664 = vmatpush3.bf16.msra.mxu0 %v9331_v25 }
0x1dbe   :  { %8665 = vmatprep.subr.bf16.mxu0 %v9737_v6 }
0x1e7c   :  { %v2729_v55 = vpop.f32.mrf.mxu0 }
0x1e7d   :  { %v2730_v56 = vadd.f32 %v7951_v7, %v2729_v55  ;;  %v10372_v55 = vld [vmem:[#allocation9 + $0x18] ss:$12 sps:$4 sm:$0xff]  }
0x1e7e   :  { %v8653_v29 = vpop.f32.mrf.mxu0 }
0x1e7f   :  { %v10345_v58 = vadd.f32 %v2730_v56, %v10137_v21  ;;  %v2975_v21 = vsel %vm218_vm2, %v9886_v54, 0.0  ;;  %v7967_v56 = vld [vmem:[#allocation10 + $0x16] ss:$0 sm:$0xff] }
0x1e80   :  { %v2732_v60 = vpop.f32.mrf.mxu0 }
0x1e81   :  { %v2733_v61 = vadd.f32 %v7951_v7, %v2732_v60  ;;  %v2738_v62 = vsel %vm218_vm2, %v10345_v58, 0.0 }
0x1e82   :  { %2739 = vadd.xlane.f32.xlu0 %v2738_v62  ;;  %v8654_v0 = vpop.f32.mrf.mxu0  ;;  %v10376_v62 = vld [vmem:[#allocation9] ss:$12 sps:$4 sm:$0xff]  }
0x1e83   :  { %v10350_v1 = vadd.f32 %v2733_v61, %v10142_v27  ;;  %v7968_v0 = vld [vmem:[#allocation10 + $0x17] ss:$0 sm:$0xff] }
0x1e85   :  { %v2741_v2 = vsel %vm218_vm2, %v10350_v1, 0.0 }
0x1e86   :  { %2973 = vadd.xlane.f32.xlu0 %v2972_v39  ;;  %2742 = vadd.xlane.f32.xlu1 %v2741_v2 }
0x1e8a   :  { %2976 = vadd.xlane.f32.xlu0 %v2975_v21 }
0x1f0b   :  { %v2740_v3 = vpop.xlane.xlu0 %2739 }
0x1f0c   :  { %v2744_v8 = vmul.f32 0.03125, %v2740_v3  ;;  %v9332_v3 = vld [vmem:[%s11367_s7 + $0x30] sm:$0xff]  }
0x1f0d   :  { %8666 = vmatpush3.bf16.msra.mxu0 %v9332_v3 }
0x1f0e   :  { %v2746_v10 = vsub.f32 %v10345_v58, %v2744_v8  ;;  %8667 = vmatprep.subr.bf16.mxu0 %v9737_v6  ;;  %v9333_v8 = vld [vmem:[%s11367_s7 + $0x28] sm:$0xff]  }
0x1f0f   :  { %v2974_v59 = vpop.xlane.xlu0 %2973  ;;  %v2743_v52 = vpop.xlane.xlu1 %2742 }
0x1f10   :  { %v2978_v27 = vmul.f32 0.03125, %v2974_v59  ;;  %v2745_v11 = vmul.f32 0.03125, %v2743_v52  ;;  %v2748_v20 = vmul.f32 %v2746_v10, %v2746_v10  ;;  %v7955_v59 = vld [vmem:[#allocation10 + $0x12] ss:$0 sm:$0xff] }
0x1f11   :  { %8668 = vmatpush3.bf16.msra.mxu0 %v9333_v8 }
0x1f12   :  { %v2980_v48 = vsub.f32 %v9882_v50, %v2978_v27  ;;  %v2747_v49 = vsub.f32 %v10350_v1, %v2745_v11  ;;  %v2750_v42 = vsel %vm218_vm2, %v2748_v20, 0.0  ;;  %8669 = vmatprep.subr.bf16.mxu0 %v9737_v6 }
0x1f13   :  { %2751 = vadd.xlane.f32.xlu0 %v2750_v42  ;;  %v2977_v12 = vpop.xlane.xlu0 %2976  ;;  %v7969_v42 = vld [vmem:[#allocation10 + $0x18] ss:$0 sm:$0xff] }
0x1f14   :  { %v2979_v13 = vmul.f32 0.03125, %v2977_v12  ;;  %v2982_v14 = vmul.f32 %v2980_v48, %v2980_v48  ;;  %v2749_v15 = vmul.f32 %v2747_v49, %v2747_v49 }
0x1f16   :  { %v2981_v17 = vsub.f32 %v9886_v54, %v2979_v13  ;;  %v2984_v18 = vsel %vm218_vm2, %v2982_v14, 0.0  ;;  %v2753_v22 = vsel %vm218_vm2, %v2749_v15, 0.0 }
0x1f17   :  { %2985 = vadd.xlane.f32.xlu0 %v2984_v18  ;;  %2754 = vadd.xlane.f32.xlu1 %v2753_v22 }
0x1f18   :  { %v2983_v24 = vmul.f32 %v2981_v17, %v2981_v17 }
0x1f1a   :  { %v2987_v4 = vsel %vm218_vm2, %v2983_v24, 0.0 }
0x1f1b   :  { %2988 = vadd.xlane.f32.xlu1 %v2987_v4 }
0x1f9c   :  { %v2752_v23 = vpop.xlane.xlu0 %2751 }
0x1f9d   :  { %v2756_v30 = vmul.f32 0.03125, %v2752_v23 }
0x1f9f   :  { %v2758_v31 = vadd.f32 1e-05, %v2756_v30 }
0x1fa0   :  { %v2986_v28 = vpop.xlane.xlu0 %2985  ;;  %v2755_v32 = vpop.xlane.xlu1 %2754 }
0x1fa1   :  { %9433 = vrsqrt.f32 %v2758_v31  ;;  %v2990_v34 = vmul.f32 0.03125, %v2986_v28  ;;  %v2757_v36 = vmul.f32 0.03125, %v2755_v32 }
0x1fa3   :  { %v2759_v35 = vadd.f32 1e-05, %v2757_v36  ;;  %v2992_v9 = vadd.f32 1e-05, %v2990_v34 }
0x1fa4   :  { %v2989_v37 = vpop.xlane.xlu1 %2988 }
0x1fa5   :  { %v2991_v38 = vmul.f32 0.03125, %v2989_v37  ;;  %9435 = vrsqrt.f32 %v2759_v35 }
0x1fa6   :  { %9437 = vrsqrt.f32 %v2992_v9  ;;  %v10425_v9 = vld [vmem:[#allocation10 + $0x13] ss:$0 sm:$0xff] }
0x1fa7   :  { %v2993_v40 = vadd.f32 1e-05, %v2991_v38 }
0x1fa9   :  { %9439 = vrsqrt.f32 %v2993_v40 }
0x1fae   :  { %v9434_v43 = vpop.eup %9433 }
0x1faf   :  { %v2762_v44 = vmul.f32 %v9434_v43, %v2746_v10  ;;  %v9334_v10 = vld [vmem:[%s11367_s7 + $0x20] sm:$0xff]  }
0x1fb0   :  { %8670 = vmatpush3.bf16.msra.mxu0 %v9334_v10 }
0x1fb1   :  { %v2769_v45 = vmul.f32 %v7953_v33, %v2762_v44  ;;  %8689 = vmatprep.subr.bf16.mxu0 %v9737_v6 }
0x1fb2   :  { %v9436_v5 = vpop.eup %9435 }
0x1fb3   :  { %v2763_v57 = vmul.f32 %v9436_v5, %v2747_v49  ;;  %v9438_v16 = vpop.eup %9437  ;;  %v2776_v41 = vadd.f32 %v7954_v19, %v2769_v45 }
0x1fb4   :  { %v2996_v53 = vmul.f32 %v9438_v16, %v2980_v48 }
0x1fb5   :  { %v2770_v47 = vmul.f32 %v7953_v33, %v2763_v57  ;;  %v3075_v33 = vlaneseq }
0x1fb6   :  { %v9440_v46 = vpop.eup %9439  ;;  %v3003_v61 = vmul.f32 %v7967_v56, %v2996_v53 }
0x1fb7   :  { %v2997_v51 = vmul.f32 %v9440_v46, %v2981_v17  ;;  %v2777_v7 = vadd.f32 %v7954_v19, %v2770_v47  ;;  %v3076_v5 = vshrl.u32 %v3075_v33, 7  ;;  %v3078_v57 = vand.u32 127, %v3075_v33 }
0x1fb8   :  { %v3010_v2 = vadd.f32 %v7968_v0, %v3003_v61 }
0x1fb9   :  { %v2778_v29 = vpack.c.bf16 %v2777_v7, %v2776_v41  ;;  %v3004_v60 = vmul.f32 %v7967_v56, %v2997_v51  ;;  %vm3079_vm9 = vcmp.gt.s32.totalorder %v3078_v57, %v3076_v5 }
0x1fba   :  { %v10434_v45 = vsel %vm3079_vm9, -1e+09, %v9737_v6 }
0x1fbb   :  { %8660 = vmatmul.mubr.msk.bf16.vlgmr.msra.gmra.mxu1 %vm218_vm2, %v2778_v29  ;;  %v3011_v39 = vadd.f32 %v7968_v0, %v3004_v60 }
0x1fbc   :  { %8676 = vmatpush3.bf16.msra.mxu1 %v10372_v55  ;;  %8679 = vmatprep.mubr.msk.bf16.mxu1 %vm9738_vm4, %v9737_v6 }
0x1fbd   :  { %8677 = vmatprep.subr.bf16.mxu1 %v9737_v6  ;;  %v3012_v21 = vpack.c.bf16 %v3011_v39, %v3010_v2 }
0x1fc0   :  { %8678 = vmatpush3.bf16.msra.mxu1 %v10376_v62 }
0x1fc1   :  { %8683 = vmatprep.subr.bf16.mxu1 %v9737_v6 }
0x1fc3   :  { %8680 = vmatmul.mubr.msk.bf16.vlgmr.msra.gmra.mxu1 %vm218_vm2, %v3012_v21 }
0x1fc4   :  { %8685 = vmatprep.mubr.msk.bf16.mxu1 %vm9738_vm4, %v9737_v6 }
0x207b   :  { %v2829_v52 = vpop.f32.mrf.mxu1 }
0x207c   :  { %v2830_v11 = vadd.f32 %v7955_v59, %v2829_v52 }
0x207d   :  { %v8661_v27 = vpop.f32.mrf.mxu1 }
0x207e   :  { %v2836_v12 = vmax.f32 %v2830_v11, 0.0 }
0x207f   :  { %v2832_v20 = vpop.f32.mrf.mxu1 }
0x2080   :  { %v2833_v48 = vadd.f32 %v7955_v59, %v2832_v20 }
0x2081   :  { %v8662_v49 = vpop.f32.mrf.mxu1 }
0x2082   :  { %v2837_v13 = vmax.f32 %v2833_v48, 0.0 }
0x2083   :  { %v3067_v14 = vpop.f32.mrf.mxu1 }
0x2084   :  { %v2838_v15 = vpack.c.bf16 %v2837_v13, %v2836_v12  ;;  %v3068_v17 = vadd.f32 %v7969_v42, %v3067_v14 }
0x2085   :  { %v8681_v18 = vpop.f32.mrf.mxu1 }
0x2086   :  { %v10398_v22 = vpack.c.bf16 %v3068_v17, %v3068_v17  ;;  %8672 = vmatmul.mubr.msk.bf16.vlgmr.msra.gmra.mxu0 %vm321_vm3, %v2838_v15  ;;  %v3081_v30 = vmul.f32 0.35355338, %v3068_v17 }
0x2087   :  { %v3070_v24 = vpop.f32.mrf.mxu1  ;;  %8691 = vmatprep.mubr.msk.bf16.mxu0 %vm9738_vm4, %v9737_v6 }
0x2088   :  { %v3071_v4 = vadd.f32 %v7969_v42, %v3070_v24  ;;  %3088 = vrot.lane.b32.xlu0 %v10398_v22, %s9739_s1  ;;  %v10412_v32 = vpack.c.bf16 %v3081_v30, %v3081_v30 }
0x2089   :  { %v8682_v26 = vpop.f32.mrf.mxu1 }
0x208a   :  { %v10405_v63 = vpack.c.bf16 %v3071_v4, %v3071_v4  ;;  %v3082_v34 = vmul.f32 0.35355338, %v3071_v4 }
0x208c   :  { %3137 = vrot.lane.b32.xlu1 %v10405_v63, %s9739_s1  ;;  %v10419_v36 = vpack.c.bf16 %v3082_v34, %v3082_v34 }
0x20fa   :  { %v3089_v25 = vpop.permute.xlu0 %3088 }
0x20fb   :  { %v3094_v23 = vsel %vm502_vm5, %v3089_v25, 0 }
0x20fc   :  { %8684 = vmatpush3.bf16.xpose.msra.mxu1 %v3094_v23 }
0x20fd   :  { %8695 = vmatprep.subr.bf16.mxu1 %v9737_v6 }
0x20fe   :  { %v3138_v31 = vpop.permute.xlu1 %3137 }
0x20ff   :  { %v3143_v28 = vsel %vm502_vm5, %v3138_v31, 0 }
0x2100   :  { %8690 = vmatpush3.bf16.xpose.msra.mxu0 %v3143_v28 }
0x2101   :  { %8701 = vmatprep.subr.bf16.mxu0 %v9737_v6 }
0x2103   :  { %8686 = vmatmul.mubr.msk.bf16.vlgmr.msra.gmra.mxu1 %vm502_vm5, %v10412_v32 }
0x2104   :  { %8697 = vmatprep.mubr.msk.bf16.mxu1 %vm9738_vm4, %v9737_v6 }
0x2107   :  { %8692 = vmatmul.mubr.msk.bf16.vlgmr.msra.gmra.mxu0 %vm502_vm5, %v10419_v36 }
0x2108   :  { %8703 = vmatprep.mubr.msk.bf16.mxu0 %vm9738_vm4, %v9737_v6 }
0x2146   :  { %v2900_v35 = vpop.f32.mrf.mxu0 }
0x2147   :  { %v2907_v37 = vadd.f32 %v2900_v35, %v10345_v58 }
0x2148   :  { %v8673_v38 = vpop.f32.mrf.mxu0 }
0x2149   :  { %v10429_v40 = vadd.f32 %v10425_v9, %v2907_v37 }
0x214a   :  { %v10431_v43 = vpop.f32.mrf.mxu0 }
0x214c   :  { %v8674_v44 = vpop.f32.mrf.mxu0 }
0x21c3   :  { %v3130_v16 = vpop.f32.mrf.mxu1 }
0x21c4   :  { %v3131_v19 = vadd.f32 %v3130_v16, %v10434_v45 }
0x21c5   :  { %v8687_v46 = vpop.f32.mrf.mxu1 }
0x21c6   :  { %v3185_v58 = vsel %vm502_vm5, %v3131_v19, -inf }
0x21c7   :  { %v3179_v47 = vpop.f32.mrf.mxu0  ;;  %3186 = vmax.xlane.f32.xlu1 %v3185_v58  ;;  %v3133_v51 = vpop.f32.mrf.mxu1 }
0x21c8   :  { %v3180_v53 = vadd.f32 %v3179_v47, %v10434_v45 }
0x21c9   :  { %v8688_v41 = vpop.f32.mrf.mxu1  ;;  %v8693_v7 = vpop.f32.mrf.mxu0 }
0x21ca   :  { %v3188_v56 = vsel %vm502_vm5, %v3180_v53, -inf }
0x21cb   :  { %3189 = vmax.xlane.f32.xlu0 %v3188_v56  ;;  %v3182_v29 = vpop.f32.mrf.mxu0 }
0x21cd   :  { %v8694_v60 = vpop.f32.mrf.mxu0 }
0x21d8   :  { %3257 = vrot.lane.b32.xlu1 %v10405_v63, %s9726_s20 }
0x21dc   :  { %3308 = vrot.lane.b32.xlu1 %v10398_v22, %s9740_s12 }
0x2250   :  { %v3187_v61 = vpop.xlane.xlu1 %3186 }
0x2251   :  { %v3191_v0 = vsub.f32 %v3131_v19, %v3187_v61 }
0x2253   :  { %v3193_v39 = vmul.f32 1.442695, %v3191_v0 }
0x2254   :  { %v3190_v2 = vpop.xlane.xlu0 %3189  ;;  %v3258_v21 = vpop.permute.xlu1 %3257 }
0x2255   :  { %9441 = vpow2.f32 %v3193_v39  ;;  %v3192_v3 = vsub.f32 %v3180_v53, %v3190_v2  ;;  %v3263_v8 = vsel %vm627_vm6, %v3258_v21, 0 }
0x2256   :  { %8702 = vmatpush3.bf16.msra.mxu0 %v3263_v8 }
0x2257   :  { %v3195_v10 = vmul.f32 1.442695, %v3192_v3  ;;  %8713 = vmatprep.subr.bf16.mxu0 %v9737_v6 }
0x2258   :  { %v3309_v20 = vpop.permute.xlu1 %3308 }
0x2259   :  { %9443 = vpow2.f32 %v3195_v10  ;;  %v3314_v18 = vsel %vm502_vm5, %v3309_v20, 0 }
0x2262   :  { %v9442_v59 = vpop.eup %9441 }
0x2263   :  { %v3197_v52 = vsel %vm502_vm5, %v9442_v59, 0.0 }
0x2264   :  { %3198 = vadd.xlane.f32.xlu0 %v3197_v52 }
0x2266   :  { %v9444_v27 = vpop.eup %9443 }
0x2267   :  { %v3200_v11 = vsel %vm502_vm5, %v9444_v27, 0.0 }
0x2268   :  { %3201 = vadd.xlane.f32.xlu1 %v3200_v11 }
0x2279   :  { %3359 = vrot.lane.b32.xlu1 %v10405_v63, %s9740_s12 }
0x227a   :  { %3209 = vrot.lane.b32.xlu0 %v10398_v22, %s9726_s20 }
0x227d   :  { %3357 = vrot.lane.b32.xlu1 %v10419_v36, %s9741_s8 }
0x227e   :  { %3306 = vrot.lane.b32.xlu0 %v10412_v32, %s9741_s8 }
0x22ed   :  { %v3199_v48 = vpop.xlane.xlu0 %3198 }
0x22ee   :  { %9445 = vrcp.f32 %v3199_v48 }
0x22f1   :  { %v3210_v49 = vpop.permute.xlu0 %3209  ;;  %v3202_v42 = vpop.xlane.xlu1 %3201 }
0x22f2   :  { %v3215_v12 = vsel %vm627_vm6, %v3210_v49, 0  ;;  %9447 = vrcp.f32 %v3202_v42 }
0x22f3   :  { %8696 = vmatpush3.bf16.msra.mxu1 %v3215_v12 }
0x22f4   :  { %8707 = vmatprep.subr.bf16.mxu1 %v9737_v6 }
0x22f5   :  { %v3360_v4 = vpop.permute.xlu1 %3359  ;;  %v3307_v23 = vpop.permute.xlu0 %3306 }
0x22f6   :  { %v3365_v25 = vsel %vm502_vm5, %v3360_v4, 0 }
0x22f9   :  { %v3358_v30 = vpop.permute.xlu1 %3357 }
0x22fb   :  { %v9446_v13 = vpop.eup %9445 }
0x22fc   :  { %v3204_v14 = vmul.f32 %v9446_v13, %v9442_v59 }
0x22fe   :  { %v3207_v15 = vpack.c.bf16 %v3204_v14, %v3204_v14 }
0x22ff   :  { %v9448_v17 = vpop.eup %9447 }
0x2300   :  { %8698 = vmatmul.mubr.msk.bf16.vlgmr.msra.gmra.mxu1 %vm502_vm5, %v3207_v15  ;;  %v3206_v24 = vmul.f32 %v9448_v17, %v9444_v27 }
0x2301   :  { %8708 = vmatpush3.bf16.xpose.msra.mxu1 %v3314_v18  ;;  %8709 = vmatprep.mubr.msk.bf16.mxu1 %vm9738_vm4, %v9737_v6 }
0x2302   :  { %v3208_v26 = vpack.c.bf16 %v3206_v24, %v3206_v24  ;;  %8719 = vmatprep.subr.bf16.mxu1 %v9737_v6 }
0x2304   :  { %8704 = vmatmul.mubr.msk.bf16.vlgmr.msra.gmra.mxu0 %vm502_vm5, %v3208_v26 }
0x2305   :  { %8714 = vmatpush3.bf16.xpose.msra.mxu0 %v3365_v25  ;;  %8715 = vmatprep.mubr.msk.bf16.mxu0 %vm9738_vm4, %v9737_v6 }
0x2306   :  { %8725 = vmatprep.subr.bf16.mxu0 %v9737_v6 }
0x2308   :  { %8710 = vmatmul.mubr.msk.bf16.vlgmr.msra.gmra.mxu1 %vm502_vm5, %v3307_v23 }
0x2309   :  { %8721 = vmatprep.mubr.msk.bf16.mxu1 %vm9738_vm4, %v9737_v6 }
0x230c   :  { %8716 = vmatmul.mubr.msk.bf16.vlgmr.msra.gmra.mxu0 %vm502_vm5, %v3358_v30 }
0x230d   :  { %8727 = vmatprep.mubr.msk.bf16.mxu0 %vm9738_vm4, %v9737_v6 }
0x23c0   :  { %v10474_v31 = vpop.f32.mrf.mxu1 }
0x23c2   :  { %v8699_v28 = vpop.f32.mrf.mxu1 }
0x23c4   :  { %v3254_v34 = vpop.f32.mrf.mxu1  ;;  %v10476_v35 = vpop.f32.mrf.mxu0 }
0x23c6   :  { %v8700_v37 = vpop.f32.mrf.mxu1  ;;  %v8705_v38 = vpop.f32.mrf.mxu0 }
0x23c8   :  { %v3302_v44 = vpop.f32.mrf.mxu0  ;;  %v3350_v33 = vpop.f32.mrf.mxu1 }
0x23c9   :  { %v3351_v5 = vadd.f32 %v3350_v33, %v10434_v45 }
0x23ca   :  { %v8706_v57 = vpop.f32.mrf.mxu0  ;;  %v8711_v16 = vpop.f32.mrf.mxu1 }
0x23cb   :  { %v3407_v19 = vsel %vm502_vm5, %v3351_v5, -inf }
0x23cc   :  { %v3401_v46 = vpop.f32.mrf.mxu0  ;;  %3408 = vmax.xlane.f32.xlu0 %v3407_v19  ;;  %v3353_v58 = vpop.f32.mrf.mxu1 }
0x23cd   :  { %v3402_v47 = vadd.f32 %v3401_v46, %v10434_v45 }
0x23ce   :  { %v8712_v51 = vpop.f32.mrf.mxu1  ;;  %v8717_v53 = vpop.f32.mrf.mxu0 }
0x23cf   :  { %v3410_v41 = vsel %vm502_vm5, %v3402_v47, -inf }
0x23d0   :  { %3411 = vmax.xlane.f32.xlu1 %v3410_v41  ;;  %v3404_v7 = vpop.f32.mrf.mxu0 }
0x23d2   :  { %v8718_v56 = vpop.f32.mrf.mxu0 }
0x23e1   :  { %3479 = vrot.lane.b32.xlu1 %v10405_v63, %s9742_s13 }
0x23e5   :  { %3529 = vrot.lane.b32.xlu1 %v10398_v22, %s9743_s14 }
0x23e9   :  { %3579 = vrot.lane.b32.xlu1 %v10405_v63, %s9743_s14 }
0x23ed   :  { %3577 = vrot.lane.b32.xlu1 %v10419_v36, %s9744_s15 }
0x2455   :  { %v3409_v29 = vpop.xlane.xlu0 %3408 }
0x2456   :  { %v3413_v60 = vsub.f32 %v3351_v5, %v3409_v29 }
0x2458   :  { %v3415_v61 = vmul.f32 1.442695, %v3413_v60 }
0x2459   :  { %v3412_v0 = vpop.xlane.xlu1 %3411 }
0x245a   :  { %9449 = vpow2.f32 %v3415_v61  ;;  %v3414_v39 = vsub.f32 %v3402_v47, %v3412_v0 }
0x245c   :  { %v3417_v2 = vmul.f32 1.442695, %v3414_v39 }
0x245d   :  { %v3480_v21 = vpop.permute.xlu1 %3479 }
0x245e   :  { %9451 = vpow2.f32 %v3417_v2  ;;  %v3485_v3 = vsel %vm627_vm6, %v3480_v21, 0 }
0x245f   :  { %8726 = vmatpush3.bf16.msra.mxu0 %v3485_v3 }
0x2460   :  { %8737 = vmatprep.subr.bf16.mxu0 %v9737_v6 }
0x2461   :  { %v3530_v42 = vpop.permute.xlu1 %3529 }
0x2462   :  { %v3535_v15 = vsel %vm502_vm5, %v3530_v42, 0 }
0x2465   :  { %v3580_v18 = vpop.permute.xlu1 %3579 }
0x2466   :  { %v3585_v4 = vsel %vm502_vm5, %v3580_v18, 0 }
0x2467   :  { %v9450_v8 = vpop.eup %9449 }
0x2468   :  { %v3419_v10 = vsel %vm502_vm5, %v9450_v8, 0.0 }
0x2469   :  { %3420 = vadd.xlane.f32.xlu0 %v3419_v10  ;;  %v3578_v25 = vpop.permute.xlu1 %3577 }
0x246b   :  { %v9452_v59 = vpop.eup %9451 }
0x246c   :  { %v3422_v52 = vsel %vm502_vm5, %v9452_v59, 0.0 }
0x246d   :  { %3423 = vadd.xlane.f32.xlu0 %v3422_v52 }
0x2483   :  { %3431 = vrot.lane.b32.xlu0 %v10398_v22, %s9742_s13 }
0x2487   :  { %3527 = vrot.lane.b32.xlu0 %v10412_v32, %s9744_s15 }
0x24f2   :  { %v3421_v27 = vpop.xlane.xlu0 %3420 }
0x24f3   :  { %9453 = vrcp.f32 %v3421_v27 }
0x24f6   :  { %v3424_v11 = vpop.xlane.xlu0 %3423 }
0x24f7   :  { %9455 = vrcp.f32 %v3424_v11 }
0x24fa   :  { %v3432_v20 = vpop.permute.xlu0 %3431 }
0x24fb   :  { %v3437_v48 = vsel %vm627_vm6, %v3432_v20, 0 }
0x24fc   :  { %8720 = vmatpush3.bf16.msra.mxu1 %v3437_v48 }
0x24fd   :  { %8731 = vmatprep.subr.bf16.mxu1 %v9737_v6 }
0x24fe   :  { %v3528_v26 = vpop.permute.xlu0 %3527 }
0x2500   :  { %v9454_v49 = vpop.eup %9453 }
0x2501   :  { %v3426_v12 = vmul.f32 %v9454_v49, %v9450_v8 }
0x2503   :  { %v3429_v13 = vpack.c.bf16 %v3426_v12, %v3426_v12 }
0x2504   :  { %v9456_v14 = vpop.eup %9455 }
0x2505   :  { %8722 = vmatmul.mubr.msk.bf16.vlgmr.msra.gmra.mxu1 %vm502_vm5, %v3429_v13  ;;  %v3428_v17 = vmul.f32 %v9456_v14, %v9452_v59 }
0x2506   :  { %8732 = vmatpush3.bf16.xpose.msra.mxu1 %v3535_v15  ;;  %8733 = vmatprep.mubr.msk.bf16.mxu1 %vm9738_vm4, %v9737_v6 }
0x2507   :  { %v3430_v24 = vpack.c.bf16 %v3428_v17, %v3428_v17  ;;  %8743 = vmatprep.subr.bf16.mxu1 %v9737_v6 }
0x2509   :  { %8728 = vmatmul.mubr.msk.bf16.vlgmr.msra.gmra.mxu0 %vm502_vm5, %v3430_v24 }
0x250a   :  { %8738 = vmatpush3.bf16.xpose.msra.mxu0 %v3585_v4  ;;  %8739 = vmatprep.mubr.msk.bf16.mxu0 %vm9738_vm4, %v9737_v6 }
0x250b   :  { %8749 = vmatprep.subr.bf16.mxu0 %v9737_v6 }
0x250d   :  { %8734 = vmatmul.mubr.msk.bf16.vlgmr.msra.gmra.mxu1 %vm502_vm5, %v3528_v26 }
0x250e   :  { %8745 = vmatprep.mubr.msk.bf16.mxu1 %vm9738_vm4, %v9737_v6 }
0x2511   :  { %8740 = vmatmul.mubr.msk.bf16.vlgmr.msra.gmra.mxu0 %vm502_vm5, %v3578_v25 }
0x2512   :  { %8751 = vmatprep.mubr.msk.bf16.mxu0 %vm9738_vm4, %v9737_v6 }
0x25c5   :  { %v10516_v23 = vpop.f32.mrf.mxu1 }
0x25c7   :  { %v8723_v30 = vpop.f32.mrf.mxu1 }
0x25c9   :  { %v3476_v28 = vpop.f32.mrf.mxu1  ;;  %v10518_v34 = vpop.f32.mrf.mxu0 }
0x25ca   :  { %v9245_v37 = vpack.i.bf16 %v10518_v34, %v10516_v23 }
0x25cb   :  { %v8724_v38 = vpop.f32.mrf.mxu1  ;;  %v8729_v44 = vpop.f32.mrf.mxu0 }
0x25cd   :  { %v3524_v33 = vpop.f32.mrf.mxu0  ;;  %v3571_v5 = vpop.f32.mrf.mxu1 }
0x25ce   :  { %v3572_v57 = vadd.f32 %v3571_v5, %v10434_v45 }
0x25cf   :  { %v8730_v16 = vpop.f32.mrf.mxu0  ;;  %v8735_v19 = vpop.f32.mrf.mxu1 }
0x25d0   :  { %v3627_v46 = vsel %vm502_vm5, %v3572_v57, -inf }
0x25d1   :  { %v3621_v58 = vpop.f32.mrf.mxu0  ;;  %3628 = vmax.xlane.f32.xlu0 %v3627_v46  ;;  %v3574_v47 = vpop.f32.mrf.mxu1 }
0x25d2   :  { %v3622_v51 = vadd.f32 %v3621_v58, %v10434_v45 }
0x25d3   :  { %v8736_v53 = vpop.f32.mrf.mxu1  ;;  %v8741_v41 = vpop.f32.mrf.mxu0 }
0x25d4   :  { %v3630_v7 = vsel %vm502_vm5, %v3622_v51, -inf }
0x25d5   :  { %3631 = vmax.xlane.f32.xlu1 %v3630_v7  ;;  %v3624_v56 = vpop.f32.mrf.mxu0 }
0x25d7   :  { %v8742_v29 = vpop.f32.mrf.mxu0 }
0x25e6   :  { %3699 = vrot.lane.b32.xlu1 %v10405_v63, %s9745_s10 }
0x25ea   :  { %3749 = vrot.lane.b32.xlu1 %v10398_v22, %s9746_s27 }
0x25ee   :  { %3799 = vrot.lane.b32.xlu1 %v10405_v63, %s9746_s27 }
0x25f2   :  { %3797 = vrot.lane.b32.xlu1 %v10419_v36, %s9747_s16 }
0x265a   :  { %v3629_v60 = vpop.xlane.xlu0 %3628 }
0x265b   :  { %v3633_v61 = vsub.f32 %v3572_v57, %v3629_v60 }
0x265d   :  { %v3635_v0 = vmul.f32 1.442695, %v3633_v61 }
0x265e   :  { %v3632_v39 = vpop.xlane.xlu1 %3631 }
0x265f   :  { %9457 = vpow2.f32 %v3635_v0  ;;  %v3634_v2 = vsub.f32 %v3622_v51, %v3632_v39 }
0x2661   :  { %v3637_v21 = vmul.f32 1.442695, %v3634_v2 }
0x2662   :  { %v3700_v3 = vpop.permute.xlu1 %3699 }
0x2663   :  { %9459 = vpow2.f32 %v3637_v21  ;;  %v3705_v8 = vsel %vm627_vm6, %v3700_v3, 0 }
0x2664   :  { %8750 = vmatpush3.bf16.msra.mxu0 %v3705_v8 }
0x2665   :  { %8761 = vmatprep.subr.bf16.mxu0 %v9737_v6 }
0x2666   :  { %v3750_v42 = vpop.permute.xlu1 %3749 }
0x2667   :  { %v3755_v15 = vsel %vm502_vm5, %v3750_v42, 0 }
0x266a   :  { %v3800_v17 = vpop.permute.xlu1 %3799 }
0x266b   :  { %v3805_v24 = vsel %vm502_vm5, %v3800_v17, 0 }
0x266c   :  { %v9458_v10 = vpop.eup %9457 }
0x266d   :  { %v3639_v59 = vsel %vm502_vm5, %v9458_v10, 0.0 }
0x266e   :  { %3640 = vadd.xlane.f32.xlu0 %v3639_v59  ;;  %v3798_v26 = vpop.permute.xlu1 %3797 }
0x2670   :  { %v9460_v52 = vpop.eup %9459 }
0x2671   :  { %v3642_v36 = vsel %vm502_vm5, %v9460_v52, 0.0 }
0x2672   :  { %3643 = vadd.xlane.f32.xlu0 %v3642_v36 }
0x2688   :  { %3651 = vrot.lane.b32.xlu0 %v10398_v22, %s9745_s10 }
0x268c   :  { %3747 = vrot.lane.b32.xlu0 %v10412_v32, %s9747_s16 }
0x26f7   :  { %v3641_v27 = vpop.xlane.xlu0 %3640 }
0x26f8   :  { %9461 = vrcp.f32 %v3641_v27 }
0x26fb   :  { %v3644_v11 = vpop.xlane.xlu0 %3643 }
0x26fc   :  { %9463 = vrcp.f32 %v3644_v11 }
0x26ff   :  { %v3652_v20 = vpop.permute.xlu0 %3651 }
0x2700   :  { %v3657_v48 = vsel %vm627_vm6, %v3652_v20, 0 }
0x2701   :  { %8744 = vmatpush3.bf16.msra.mxu1 %v3657_v48 }
0x2702   :  { %8755 = vmatprep.subr.bf16.mxu1 %v9737_v6 }
0x2703   :  { %v3748_v4 = vpop.permute.xlu0 %3747 }
0x2705   :  { %v9462_v49 = vpop.eup %9461 }
0x2706   :  { %v3646_v12 = vmul.f32 %v9462_v49, %v9458_v10 }
0x2708   :  { %v3649_v13 = vpack.c.bf16 %v3646_v12, %v3646_v12 }
0x2709   :  { %v9464_v14 = vpop.eup %9463 }
0x270a   :  { %8746 = vmatmul.mubr.msk.bf16.vlgmr.msra.gmra.mxu1 %vm502_vm5, %v3649_v13  ;;  %v3648_v32 = vmul.f32 %v9464_v14, %v9460_v52 }
0x270b   :  { %8756 = vmatpush3.bf16.xpose.msra.mxu1 %v3755_v15  ;;  %8757 = vmatprep.mubr.msk.bf16.mxu1 %vm9738_vm4, %v9737_v6 }
0x270c   :  { %v3650_v18 = vpack.c.bf16 %v3648_v32, %v3648_v32  ;;  %8767 = vmatprep.subr.bf16.mxu1 %v9737_v6 }
0x270e   :  { %8752 = vmatmul.mubr.msk.bf16.vlgmr.msra.gmra.mxu0 %vm502_vm5, %v3650_v18 }
0x270f   :  { %8762 = vmatpush3.bf16.xpose.msra.mxu0 %v3805_v24  ;;  %8763 = vmatprep.mubr.msk.bf16.mxu0 %vm9738_vm4, %v9737_v6 }
0x2710   :  { %8773 = vmatprep.subr.bf16.mxu0 %v9737_v6 }
0x2712   :  { %8758 = vmatmul.mubr.msk.bf16.vlgmr.msra.gmra.mxu1 %vm502_vm5, %v3748_v4 }
0x2713   :  { %8769 = vmatprep.mubr.msk.bf16.mxu1 %vm9738_vm4, %v9737_v6 }
0x2716   :  { %8764 = vmatmul.mubr.msk.bf16.vlgmr.msra.gmra.mxu0 %vm502_vm5, %v3798_v26 }
0x2717   :  { %8775 = vmatprep.mubr.msk.bf16.mxu0 %vm9738_vm4, %v9737_v6 }
0x27ca   :  { %v3693_v25 = vpop.f32.mrf.mxu1 }
0x27cc   :  { %v8747_v30 = vpop.f32.mrf.mxu1 }
0x27cd   :  { %v2916_v30 = vsel %vm218_vm2, %v10429_v40, 0.0 }
0x27ce   :  { %v3696_v28 = vpop.f32.mrf.mxu1  ;;  %v3741_v38 = vpop.f32.mrf.mxu0 }
0x27cf   :  { %v9250_v44 = vpack.i.bf16 %v3741_v38, %v3693_v25 }
0x27d0   :  { %v8748_v33 = vpop.f32.mrf.mxu1  ;;  %v8753_v5 = vpop.f32.mrf.mxu0 }
0x27d2   :  { %v3744_v57 = vpop.f32.mrf.mxu0  ;;  %v3791_v16 = vpop.f32.mrf.mxu1 }
0x27d3   :  { %v3792_v19 = vadd.f32 %v3791_v16, %v10434_v45 }
0x27d4   :  { %v8754_v46 = vpop.f32.mrf.mxu0  ;;  %v8759_v58 = vpop.f32.mrf.mxu1 }
0x27d5   :  { %v3847_v47 = vsel %vm502_vm5, %v3792_v19, -inf }
0x27d6   :  { %v3841_v51 = vpop.f32.mrf.mxu0  ;;  %3848 = vmax.xlane.f32.xlu0 %v3847_v47  ;;  %v3794_v53 = vpop.f32.mrf.mxu1 }
0x27d7   :  { %v3842_v41 = vadd.f32 %v3841_v51, %v10434_v45 }
0x27d8   :  { %v8760_v7 = vpop.f32.mrf.mxu1  ;;  %v8765_v56 = vpop.f32.mrf.mxu0 }
0x27d9   :  { %v3850_v29 = vsel %vm502_vm5, %v3842_v41, -inf }
0x27da   :  { %3851 = vmax.xlane.f32.xlu1 %v3850_v29  ;;  %v3844_v60 = vpop.f32.mrf.mxu0 }
0x27dc   :  { %v8766_v61 = vpop.f32.mrf.mxu0 }
0x27eb   :  { %3919 = vrot.lane.b32.xlu1 %v10405_v63, %s9748_s17 }
0x27ef   :  { %4004 = vrot.lane.b32.xlu1 %v10372_v55, %s9749_s18 }
0x27f3   :  { %9246 = vrot.lane.b32.xlu1 %v9245_v37, %s9730_s28  ;;  %v2908_v37 = vadd.f32 %v10431_v43, %v10350_v1 }
0x27f5   :  { %v10584_v52 = vadd.f32 %v10425_v9, %v2908_v37 }
0x27f7   :  { %v2919_v36 = vsel %vm218_vm2, %v10584_v52, 0.0 }
0x285f   :  { %v3849_v0 = vpop.xlane.xlu0 %3848 }
0x2860   :  { %v3853_v39 = vsub.f32 %v3792_v19, %v3849_v0  ;;  %v7989_v0 = vld [vmem:[#allocation10 + $0x19] ss:$0 sm:$0xff] }
0x2862   :  { %v3855_v2 = vmul.f32 1.442695, %v3853_v39 }
0x2863   :  { %v3852_v21 = vpop.xlane.xlu1 %3851 }
0x2864   :  { %9465 = vpow2.f32 %v3855_v2  ;;  %v3854_v3 = vsub.f32 %v3842_v41, %v3852_v21 }
0x2866   :  { %v3857_v8 = vmul.f32 1.442695, %v3854_v3 }
0x2867   :  { %v3920_v10 = vpop.permute.xlu1 %3919 }
0x2868   :  { %9467 = vpow2.f32 %v3857_v8  ;;  %v3925_v59 = vsel %vm627_vm6, %v3920_v10, 0 }
0x2869   :  { %8774 = vmatpush3.bf16.msra.mxu0 %v3925_v59 }
0x286a   :  { %8787 = vmatprep.subr.bf16.mxu0 %v9737_v6 }
0x286b   :  { %v4005_v9 = vpop.permute.xlu1 %4004 }
0x286f   :  { %v9247_v28 = vpop.permute.xlu1 %9246 }
0x2870   :  { %v9249_v38 = vunpack.i.h.bf16 %v9247_v28 }
0x2871   :  { %v9466_v55 = vpop.eup %9465 }
0x2872   :  { %v3859_v63 = vsel %vm502_vm5, %v9466_v55, 0.0  ;;  %v3992_v16 = vsel %vm502_vm5, %v10476_v35, %v9249_v38 }
0x2873   :  { %3860 = vadd.xlane.f32.xlu0 %v3859_v63 }
0x2875   :  { %v9468_v23 = vpop.eup %9467 }
0x2876   :  { %v3862_v34 = vsel %vm502_vm5, %v9468_v23, 0.0 }
0x2877   :  { %3863 = vadd.xlane.f32.xlu0 %v3862_v34 }
0x288d   :  { %3871 = vrot.lane.b32.xlu0 %v10398_v22, %s9748_s17 }
0x2891   :  { %9251 = vrot.lane.b32.xlu0 %v9250_v44, %s9750_s6  ;;  %v9248_v44 = vunpack.i.l.bf16 %v9247_v28 }
0x2893   :  { %v3991_v19 = vsel %vm502_vm5, %v10474_v31, %v9248_v44 }
0x2895   :  { %4002 = vrot.lane.b32.xlu0 %v10376_v62, %s9749_s18 }
0x28b4   :  { %2920 = vadd.xlane.f32.xlu0 %v2919_v36  ;;  %v10626_v36 = vld [vmem:[#allocation9 + $0x1c] ss:$12 sps:$4 sm:$0xff]  }
0x28fc   :  { %v3861_v27 = vpop.xlane.xlu0 %3860 }
0x28fd   :  { %9469 = vrcp.f32 %v3861_v27 }
0x2900   :  { %v3864_v11 = vpop.xlane.xlu0 %3863 }
0x2901   :  { %9471 = vrcp.f32 %v3864_v11 }
0x2904   :  { %v3872_v22 = vpop.permute.xlu0 %3871 }
0x2905   :  { %v3877_v20 = vsel %vm627_vm6, %v3872_v22, 0 }
0x2906   :  { %8768 = vmatpush3.bf16.msra.mxu1 %v3877_v20 }
0x2907   :  { %8779 = vmatprep.subr.bf16.mxu1 %v9737_v6 }
0x2908   :  { %v9252_v42 = vpop.permute.xlu0 %9251 }
0x2909   :  { %v9254_v33 = vunpack.i.h.bf16 %v9252_v42  ;;  %v9253_v5 = vunpack.i.l.bf16 %v9252_v42 }
0x290a   :  { %v9470_v62 = vpop.eup %9469 }
0x290b   :  { %v3866_v48 = vmul.f32 %v9470_v62, %v9466_v55  ;;  %v3994_v47 = vsel %vm1407_vm7, %v3992_v16, %v9254_v33  ;;  %v3993_v51 = vsel %vm1407_vm7, %v3991_v19, %v9253_v5  ;;  %v7966_v16 = vld [vmem:[#allocation10 + $0x15] ss:$0 sm:$0xff] }
0x290c   :  { %v4003_v13 = vpop.permute.xlu0 %4002 }
0x290d   :  { %v3869_v1 = vpack.c.bf16 %v3866_v48, %v3866_v48 }
0x290e   :  { %v9472_v43 = vpop.eup %9471 }
0x290f   :  { %v3868_v49 = vmul.f32 %v9472_v43, %v9468_v23  ;;  %8770 = vmatmul.mubr.msk.bf16.vlgmr.msra.gmra.mxu1 %vm502_vm5, %v3869_v1 }
0x2910   :  { %8780 = vmatpush3.bf16.msra.mxu1 %v4005_v9  ;;  %8783 = vmatprep.mubr.msk.bf16.mxu1 %vm9738_vm4, %v9737_v6 }
0x2911   :  { %v3870_v12 = vpack.c.bf16 %v3868_v49, %v3868_v49  ;;  %8781 = vmatprep.subr.bf16.mxu1 %v9737_v6  ;;  %v10642_v49 = vld [vmem:[#allocation10 + $0x1c] ss:$0 sm:$0xff] }
0x2913   :  { %8776 = vmatmul.mubr.msk.bf16.vlgmr.msra.gmra.mxu0 %vm502_vm5, %v3870_v12 }
0x2914   :  { %8782 = vmatpush3.bf16.msra.mxu1 %v4003_v13  ;;  %8791 = vmatprep.mubr.msk.bf16.mxu0 %vm9738_vm4, %v9737_v6 }
0x2915   :  { %8795 = vmatprep.subr.bf16.mxu1 %v9737_v6  ;;  %8788 = vmatpush3.bf16.msra.mxu0 %v10626_v36 }
0x2916   :  { %8789 = vmatprep.subr.bf16.mxu0 %v9737_v6 }
0x293d   :  { %v2921_v61 = vpop.xlane.xlu0 %2920 }
0x293e   :  { %v2923_v2 = vmul.f32 0.03125, %v2921_v61 }
0x2940   :  { %v2925_v59 = vsub.f32 %v10584_v52, %v2923_v2  ;;  %v10630_v52 = vld [vmem:[#allocation9 + $0x4] ss:$12 sps:$4 sm:$0xff]  }
0x2941   :  { %8790 = vmatpush3.bf16.msra.mxu0 %v10630_v52 }
0x2942   :  { %v2927_v37 = vmul.f32 %v2925_v59, %v2925_v59  ;;  %8803 = vmatprep.subr.bf16.mxu0 %v9737_v6 }
0x29cf   :  { %v3913_v14 = vpop.f32.mrf.mxu1 }
0x29d1   :  { %v8771_v15 = vpop.f32.mrf.mxu1 }
0x29d3   :  { %v3916_v32 = vpop.f32.mrf.mxu1  ;;  %v3961_v17 = vpop.f32.mrf.mxu0 }
0x29d4   :  { %v9255_v18 = vpack.i.bf16 %v3961_v17, %v3913_v14 }
0x29d5   :  { %v8772_v24 = vpop.f32.mrf.mxu1  ;;  %v8777_v4 = vpop.f32.mrf.mxu0 }
0x29d6   :  { %9256 = vrot.lane.b32.xlu1 %v9255_v18, %s9751_s0 }
0x29d7   :  { %v3964_v26 = vpop.f32.mrf.mxu0 }
0x29d9   :  { %v8778_v25 = vpop.f32.mrf.mxu0 }
0x29da   :  { %v7965_v25 = vld [vmem:[#allocation10 + $0x14] ss:$0 sm:$0xff] }
0x29fa   :  { %2917 = vadd.xlane.f32.xlu1 %v2916_v30 }
0x2a48   :  { %v9257_v57 = vpop.permute.xlu1 %9256 }
0x2a49   :  { %v9259_v46 = vunpack.i.h.bf16 %v9257_v57  ;;  %v9258_v58 = vunpack.i.l.bf16 %v9257_v57 }
0x2a4b   :  { %v3996_v53 = vsel %vm1410_vm8, %v3994_v47, %v9259_v46  ;;  %v3995_v41 = vsel %vm1410_vm8, %v3993_v51, %v9258_v58 }
0x2a4c   :  { %v3997_v7 = vpack.c.bf16 %v3996_v53, %v3995_v41 }
0x2a4e   :  { %8784 = vmatmul.mubr.msk.bf16.vlgmr.msra.gmra.mxu1 %vm218_vm2, %v3997_v7  ;;  %v7991_v7 = vld [vmem:[#allocation10 + $0x1a] ss:$0 sm:$0xff] }
0x2a4f   :  { %8799 = vmatprep.mubr.msk.bf16.mxu1 %vm9738_vm4, %v9737_v6 }
0x2a83   :  { %v2918_v35 = vpop.xlane.xlu1 %2917 }
0x2a84   :  { %v2922_v56 = vmul.f32 0.03125, %v2918_v35 }
0x2a86   :  { %v2924_v31 = vsub.f32 %v10429_v40, %v2922_v56 }
0x2a88   :  { %v2926_v29 = vmul.f32 %v2924_v31, %v2924_v31 }
0x2a8a   :  { %v2928_v60 = vsel %vm218_vm2, %v2926_v29, 0.0  ;;  %v7992_v29 = vld [vmem:[#allocation10 + $0x1b] ss:$0 sm:$0xff] }
0x2a8b   :  { %2929 = vadd.xlane.f32.xlu1 %v2928_v60 }
0x2b0e   :  { %v4045_v39 = vpop.f32.mrf.mxu1 }
0x2b0f   :  { %v4046_v21 = vadd.f32 %v7989_v0, %v4045_v39 }
0x2b10   :  { %v8785_v3 = vpop.f32.mrf.mxu1 }
0x2b11   :  { %v10615_v8 = vadd.f32 %v4046_v21, %v9882_v50  ;;  %v2931_v50 = vsel %vm218_vm2, %v2927_v37, 0.0 }
0x2b12   :  { %v4048_v10 = vpop.f32.mrf.mxu1 }
0x2b13   :  { %v4049_v55 = vadd.f32 %v7989_v0, %v4048_v10  ;;  %v4054_v40 = vsel %vm218_vm2, %v10615_v8, 0.0 }
0x2b14   :  { %4055 = vadd.xlane.f32.xlu0 %v4054_v40  ;;  %v8786_v63 = vpop.f32.mrf.mxu1  ;;  %v2930_v12 = vpop.xlane.xlu1 %2929 }
0x2b15   :  { %v10621_v23 = vadd.f32 %v4049_v55, %v9886_v54  ;;  %v2934_v14 = vmul.f32 0.03125, %v2930_v12 }
0x2b17   :  { %v4057_v34 = vsel %vm218_vm2, %v10621_v23, 0.0  ;;  %v2936_v32 = vadd.f32 1e-05, %v2934_v14 }
0x2b18   :  { %4058 = vadd.xlane.f32.xlu0 %v4057_v34 }
0x2b1c   :  { %2932 = vadd.xlane.f32.xlu0 %v2931_v50 }
0x2b9d   :  { %v4056_v54 = vpop.xlane.xlu0 %4055 }
0x2b9e   :  { %v4060_v27 = vmul.f32 0.03125, %v4056_v54 }
0x2ba0   :  { %v4062_v11 = vsub.f32 %v10615_v8, %v4060_v27 }
0x2ba1   :  { %v4059_v22 = vpop.xlane.xlu0 %4058 }
0x2ba2   :  { %v4061_v20 = vmul.f32 0.03125, %v4059_v22  ;;  %v4064_v62 = vmul.f32 %v4062_v11, %v4062_v11 }
0x2ba4   :  { %v4063_v48 = vsub.f32 %v10621_v23, %v4061_v20  ;;  %v4066_v1 = vsel %vm218_vm2, %v4064_v62, 0.0 }
0x2ba5   :  { %4067 = vadd.xlane.f32.xlu1 %v4066_v1  ;;  %v2933_v42 = vpop.xlane.xlu0 %2932 }
0x2ba6   :  { %v4065_v43 = vmul.f32 %v4063_v48, %v4063_v48  ;;  %v2935_v13 = vmul.f32 0.03125, %v2933_v42 }
0x2ba8   :  { %v4069_v9 = vsel %vm218_vm2, %v4065_v43, 0.0  ;;  %v2937_v15 = vadd.f32 1e-05, %v2935_v13 }
0x2ba9   :  { %4070 = vadd.xlane.f32.xlu0 %v4069_v9 }
0x2baa   :  { %9473 = vrsqrt.f32 %v2937_v15 }
0x2bab   :  { %9475 = vrsqrt.f32 %v2936_v32 }
0x2bb6   :  { %4155 = vrot.lane.b32.xlu1 %v10626_v36, %s9739_s1 }
0x2bb7   :  { %v9474_v17 = vpop.eup %9473 }
0x2bb8   :  { %v9476_v18 = vpop.eup %9475  ;;  %v2941_v24 = vmul.f32 %v9474_v17, %v2925_v59 }
0x2bb9   :  { %v2940_v4 = vmul.f32 %v9476_v18, %v2924_v31 }
0x2bba   :  { %4160 = vrot.lane.b32.xlu1 %v10642_v49, %s9739_s1  ;;  %v2948_v28 = vmul.f32 %v7965_v25, %v2941_v24 }
0x2bbb   :  { %v2947_v44 = vmul.f32 %v7965_v25, %v2940_v4 }
0x2bbc   :  { %v2955_v19 = vadd.f32 %v7966_v16, %v2948_v28 }
0x2bbd   :  { %v2954_v47 = vadd.f32 %v7966_v16, %v2947_v44 }
0x2bbf   :  { %4153 = vrot.lane.b32.xlu0 %v10630_v52, %s9739_s1  ;;  %v10647_v51 = vpack.c.bf16 %v2955_v19, %v2954_v47 }
0x2c2e   :  { %v4068_v26 = vpop.xlane.xlu1 %4067 }
0x2c2f   :  { %v4072_v30 = vmul.f32 0.03125, %v4068_v26 }
0x2c31   :  { %v4074_v38 = vadd.f32 1e-05, %v4072_v30 }
0x2c32   :  { %v4156_v33 = vpop.permute.xlu1 %4155  ;;  %v4071_v5 = vpop.xlane.xlu0 %4070 }
0x2c33   :  { %9477 = vrsqrt.f32 %v4074_v38  ;;  %v4073_v57 = vmul.f32 0.03125, %v4071_v5  ;;  %8796 = vmatpush3.bf16.msra.mxu1 %v4156_v33 }
0x2c34   :  { %8797 = vmatprep.subr.bf16.mxu1 %v9737_v6 }
0x2c35   :  { %v4075_v46 = vadd.f32 1e-05, %v4073_v57 }
0x2c36   :  { %v4154_v58 = vpop.permute.xlu0 %4153  ;;  %v4161_v2 = vpop.permute.xlu1 %4160 }
0x2c37   :  { %9479 = vrsqrt.f32 %v4075_v46  ;;  %8798 = vmatpush3.bf16.msra.mxu1 %v4154_v58 }
0x2c38   :  { %8809 = vmatprep.subr.bf16.mxu1 %v9737_v6 }
0x2c3a   :  { %8800 = vmatmul.mubr.msk.bf16.vlgmr.msra.gmra.mxu1 %vm218_vm2, %v10647_v51 }
0x2c3b   :  { %8811 = vmatprep.mubr.msk.bf16.mxu1 %vm9738_vm4, %v9737_v6 }
0x2c40   :  { %v9478_v53 = vpop.eup %9477 }
0x2c41   :  { %v4078_v41 = vmul.f32 %v9478_v53, %v4062_v11 }
0x2c43   :  { %v4085_v56 = vmul.f32 %v7991_v7, %v4078_v41 }
0x2c44   :  { %v9480_v35 = vpop.eup %9479 }
0x2c45   :  { %v4079_v31 = vmul.f32 %v9480_v35, %v4063_v48  ;;  %v4092_v61 = vadd.f32 %v7992_v29, %v4085_v56 }
0x2c47   :  { %v4086_v60 = vmul.f32 %v7991_v7, %v4079_v31 }
0x2c49   :  { %v4093_v0 = vadd.f32 %v7992_v29, %v4086_v60 }
0x2c4b   :  { %v4095_v39 = vpack.c.bf16 %v4093_v0, %v4092_v61 }
0x2c4d   :  { %8792 = vmatmul.mubr.msk.bf16.vlgmr.msra.gmra.mxu0 %vm218_vm2, %v4095_v39 }
0x2c4e   :  { %8805 = vmatprep.mubr.msk.bf16.mxu0 %vm9738_vm4, %v9737_v6 }
0x2cfa   :  { %v4200_v21 = vpop.f32.mrf.mxu1 }
0x2cfb   :  { %v4201_v3 = vadd.f32 %v4200_v21, %v4161_v2 }
0x2cfc   :  { %v8801_v10 = vpop.f32.mrf.mxu1 }
0x2cfd   :  { %v10657_v59 = vpack.c.bf16 %v4201_v3, %v4201_v3 }
0x2cfe   :  { %v4203_v55 = vpop.f32.mrf.mxu1 }
0x2cff   :  { %v4204_v40 = vadd.f32 %v4203_v55, %v4161_v2  ;;  %v4218_v63 = vsel %vm502_vm5, %v10657_v59, 0 }
0x2d00   :  { %v8802_v34 = vpop.f32.mrf.mxu1  ;;  %8804 = vmatpush3.bf16.xpose.msra.mxu0 %v4218_v63 }
0x2d01   :  { %v10661_v37 = vpack.c.bf16 %v4204_v40, %v4204_v40  ;;  %8815 = vmatprep.subr.bf16.mxu0 %v9737_v6 }
0x2d03   :  { %v4264_v50 = vsel %vm502_vm5, %v10661_v37, 0 }
0x2d04   :  { %8810 = vmatpush3.bf16.xpose.msra.mxu1 %v4264_v50 }
0x2d05   :  { %8821 = vmatprep.subr.bf16.mxu1 %v9737_v6 }
0x2d0d   :  { %v4145_v54 = vpop.f32.mrf.mxu0 }
0x2d0e   :  { %v4146_v27 = vadd.f32 %v10642_v49, %v4145_v54 }
0x2d0f   :  { %v8793_v11 = vpop.f32.mrf.mxu0 }
0x2d10   :  { %v4208_v22 = vmul.f32 0.35355338, %v4146_v27 }
0x2d11   :  { %v4148_v20 = vpop.f32.mrf.mxu0 }
0x2d12   :  { %v10668_v62 = vpack.c.bf16 %v4208_v22, %v4208_v22  ;;  %v4149_v48 = vadd.f32 %v10642_v49, %v4148_v20 }
0x2d13   :  { %v8794_v1 = vpop.f32.mrf.mxu0 }
0x2d14   :  { %v4209_v43 = vmul.f32 0.35355338, %v4149_v48  ;;  %8806 = vmatmul.mubr.msk.bf16.vlgmr.msra.gmra.mxu0 %vm502_vm5, %v10668_v62 }
0x2d15   :  { %8817 = vmatprep.mubr.msk.bf16.mxu0 %vm9738_vm4, %v9737_v6 }
0x2d16   :  { %v10675_v9 = vpack.c.bf16 %v4209_v43, %v4209_v43 }
0x2d18   :  { %8812 = vmatmul.mubr.msk.bf16.vlgmr.msra.gmra.mxu1 %vm502_vm5, %v10675_v9 }
0x2d19   :  { %8823 = vmatprep.mubr.msk.bf16.mxu1 %vm9738_vm4, %v9737_v6 }
0x2dd4   :  { %v4254_v42 = vpop.f32.mrf.mxu0 }
0x2dd5   :  { %v4306_v12 = vsel %vm502_vm5, %v4254_v42, -inf }
0x2dd6   :  { %4307 = vmax.xlane.f32.xlu1 %v4306_v12  ;;  %v8807_v49 = vpop.f32.mrf.mxu0 }
0x2dd8   :  { %v4257_v13 = vpop.f32.mrf.mxu0  ;;  %v4300_v14 = vpop.f32.mrf.mxu1 }
0x2dd9   :  { %v4309_v15 = vsel %vm502_vm5, %v4300_v14, -inf }
0x2dda   :  { %v8808_v32 = vpop.f32.mrf.mxu0  ;;  %4310 = vmax.xlane.f32.xlu0 %v4309_v15  ;;  %v8813_v17 = vpop.f32.mrf.mxu1 }
0x2ddc   :  { %v4303_v18 = vpop.f32.mrf.mxu1 }
0x2dde   :  { %v8814_v24 = vpop.f32.mrf.mxu1 }
0x2de7   :  { %4380 = vrot.lane.b32.xlu1 %v10661_v37, %s9739_s1 }
0x2deb   :  { %4431 = vrot.lane.b32.xlu1 %v10657_v59, %s9741_s8 }
0x2e5f   :  { %v4308_v4 = vpop.xlane.xlu1 %4307 }
0x2e60   :  { %v4312_v26 = vsub.f32 %v4254_v42, %v4308_v4 }
0x2e62   :  { %v4314_v25 = vmul.f32 1.442695, %v4312_v26 }
0x2e63   :  { %v4381_v30 = vpop.permute.xlu1 %4380  ;;  %v4311_v28 = vpop.xlane.xlu0 %4310 }
0x2e64   :  { %9481 = vpow2.f32 %v4314_v25  ;;  %v4386_v38 = vsel %vm627_vm6, %v4381_v30, 0  ;;  %v4313_v44 = vsub.f32 %v4300_v14, %v4311_v28 }
0x2e65   :  { %8822 = vmatpush3.bf16.msra.mxu1 %v4386_v38 }
0x2e66   :  { %v4316_v33 = vmul.f32 1.442695, %v4313_v44  ;;  %8833 = vmatprep.subr.bf16.mxu1 %v9737_v6 }
0x2e67   :  { %v4432_v46 = vpop.permute.xlu1 %4431 }
0x2e68   :  { %9483 = vpow2.f32 %v4316_v33  ;;  %v4437_v29 = vsel %vm502_vm5, %v4432_v46, 0 }
0x2e71   :  { %v9482_v5 = vpop.eup %9481 }
0x2e72   :  { %v4318_v57 = vsel %vm502_vm5, %v9482_v5, 0.0 }
0x2e73   :  { %4319 = vadd.xlane.f32.xlu0 %v4318_v57 }
0x2e75   :  { %v9484_v16 = vpop.eup %9483 }
0x2e76   :  { %v4321_v19 = vsel %vm502_vm5, %v9484_v16, 0.0 }
0x2e77   :  { %4322 = vadd.xlane.f32.xlu1 %v4321_v19 }
0x2e88   :  { %4482 = vrot.lane.b32.xlu1 %v10661_v37, %s9741_s8 }
0x2e89   :  { %4331 = vrot.lane.b32.xlu0 %v10657_v59, %s9739_s1 }
0x2e8c   :  { %4480 = vrot.lane.b32.xlu1 %v10675_v9, %s9741_s8 }
0x2e8d   :  { %4429 = vrot.lane.b32.xlu0 %v10668_v62, %s9741_s8 }
0x2efc   :  { %v4320_v58 = vpop.xlane.xlu0 %4319 }
0x2efd   :  { %9485 = vrcp.f32 %v4320_v58 }
0x2f00   :  { %v4323_v47 = vpop.xlane.xlu1 %4322  ;;  %v4332_v53 = vpop.permute.xlu0 %4331 }
0x2f01   :  { %9487 = vrcp.f32 %v4323_v47  ;;  %v4337_v41 = vsel %vm627_vm6, %v4332_v53, 0 }
0x2f02   :  { %8816 = vmatpush3.bf16.msra.mxu0 %v4337_v41 }
0x2f03   :  { %8827 = vmatprep.subr.bf16.mxu0 %v9737_v6 }
0x2f04   :  { %v4483_v61 = vpop.permute.xlu1 %4482  ;;  %v4430_v2 = vpop.permute.xlu0 %4429 }
0x2f05   :  { %v4488_v39 = vsel %vm502_vm5, %v4483_v61, 0 }
0x2f08   :  { %v4481_v21 = vpop.permute.xlu1 %4480 }
0x2f0a   :  { %v9486_v7 = vpop.eup %9485 }
0x2f0b   :  { %v4325_v35 = vmul.f32 %v9486_v7, %v9482_v5 }
0x2f0d   :  { %v4328_v56 = vpack.c.bf16 %v4325_v35, %v4325_v35 }
0x2f0e   :  { %v9488_v31 = vpop.eup %9487 }
0x2f0f   :  { %v4327_v60 = vmul.f32 %v9488_v31, %v9484_v16  ;;  %8818 = vmatmul.mubr.msk.bf16.vlgmr.msra.gmra.mxu0 %vm502_vm5, %v4328_v56 }
0x2f10   :  { %8828 = vmatpush3.bf16.xpose.msra.mxu0 %v4437_v29  ;;  %8829 = vmatprep.mubr.msk.bf16.mxu0 %vm9738_vm4, %v9737_v6 }
0x2f11   :  { %v4329_v0 = vpack.c.bf16 %v4327_v60, %v4327_v60  ;;  %8839 = vmatprep.subr.bf16.mxu0 %v9737_v6 }
0x2f13   :  { %8824 = vmatmul.mubr.msk.bf16.vlgmr.msra.gmra.mxu1 %vm502_vm5, %v4329_v0 }
0x2f14   :  { %8834 = vmatpush3.bf16.xpose.msra.mxu1 %v4488_v39  ;;  %8835 = vmatprep.mubr.msk.bf16.mxu1 %vm9738_vm4, %v9737_v6 }
0x2f15   :  { %8845 = vmatprep.subr.bf16.mxu1 %v9737_v6 }
0x2f17   :  { %8830 = vmatmul.mubr.msk.bf16.vlgmr.msra.gmra.mxu0 %vm502_vm5, %v4430_v2 }
0x2f18   :  { %8841 = vmatprep.mubr.msk.bf16.mxu0 %vm9738_vm4, %v9737_v6 }
0x2f1b   :  { %8836 = vmatmul.mubr.msk.bf16.vlgmr.msra.gmra.mxu1 %vm502_vm5, %v4481_v21 }
0x2f1c   :  { %8847 = vmatprep.mubr.msk.bf16.mxu1 %vm9738_vm4, %v9737_v6 }
0x2fcf   :  { %v10717_v3 = vpop.f32.mrf.mxu0 }
0x2fd1   :  { %v8819_v10 = vpop.f32.mrf.mxu0 }
0x2fd3   :  { %v4376_v55 = vpop.f32.mrf.mxu0  ;;  %v10719_v40 = vpop.f32.mrf.mxu1 }
0x2fd5   :  { %v8820_v63 = vpop.f32.mrf.mxu0  ;;  %v8825_v34 = vpop.f32.mrf.mxu1 }
0x2fd7   :  { %v4425_v50 = vpop.f32.mrf.mxu1  ;;  %v4473_v54 = vpop.f32.mrf.mxu0 }
0x2fd8   :  { %v4530_v27 = vsel %vm502_vm5, %v4473_v54, -inf }
0x2fd9   :  { %4531 = vmax.xlane.f32.xlu0 %v4530_v27  ;;  %v8826_v11 = vpop.f32.mrf.mxu1  ;;  %v8831_v22 = vpop.f32.mrf.mxu0 }
0x2fdb   :  { %v4476_v20 = vpop.f32.mrf.mxu0  ;;  %v4524_v48 = vpop.f32.mrf.mxu1 }
0x2fdc   :  { %v4533_v1 = vsel %vm502_vm5, %v4524_v48, -inf }
0x2fdd   :  { %v8832_v43 = vpop.f32.mrf.mxu0  ;;  %4534 = vmax.xlane.f32.xlu1 %v4533_v1  ;;  %v8837_v42 = vpop.f32.mrf.mxu1 }
0x2fdf   :  { %v4527_v12 = vpop.f32.mrf.mxu1 }
0x2fe1   :  { %v8838_v49 = vpop.f32.mrf.mxu1 }
0x2fee   :  { %4602 = vrot.lane.b32.xlu1 %v10661_v37, %s9740_s12 }
0x2ff2   :  { %4652 = vrot.lane.b32.xlu1 %v10657_v59, %s9744_s15 }
0x2ff6   :  { %4702 = vrot.lane.b32.xlu1 %v10661_v37, %s9744_s15 }
0x2ffa   :  { %4700 = vrot.lane.b32.xlu1 %v10675_v9, %s9744_s15 }
0x3062   :  { %v4532_v13 = vpop.xlane.xlu0 %4531 }
0x3063   :  { %v4536_v14 = vsub.f32 %v4473_v54, %v4532_v13 }
0x3065   :  { %v4538_v15 = vmul.f32 1.442695, %v4536_v14 }
0x3066   :  { %v4535_v32 = vpop.xlane.xlu1 %4534 }
0x3067   :  { %9489 = vpow2.f32 %v4538_v15  ;;  %v4537_v17 = vsub.f32 %v4524_v48, %v4535_v32 }
0x3069   :  { %v4540_v18 = vmul.f32 1.442695, %v4537_v17 }
0x306a   :  { %v4603_v24 = vpop.permute.xlu1 %4602 }
0x306b   :  { %9491 = vpow2.f32 %v4540_v18  ;;  %v4608_v4 = vsel %vm627_vm6, %v4603_v24, 0 }
0x306c   :  { %8846 = vmatpush3.bf16.msra.mxu1 %v4608_v4 }
0x306d   :  { %8857 = vmatprep.subr.bf16.mxu1 %v9737_v6 }
0x306e   :  { %v4653_v16 = vpop.permute.xlu1 %4652 }
0x306f   :  { %v4658_v47 = vsel %vm502_vm5, %v4653_v16, 0 }
0x3072   :  { %v4703_v41 = vpop.permute.xlu1 %4702 }
0x3073   :  { %v4708_v35 = vsel %vm502_vm5, %v4703_v41, 0 }
0x3074   :  { %v9490_v26 = vpop.eup %9489 }
0x3075   :  { %v4542_v25 = vsel %vm502_vm5, %v9490_v26, 0.0 }
0x3076   :  { %4543 = vadd.xlane.f32.xlu0 %v4542_v25  ;;  %v4701_v31 = vpop.permute.xlu1 %4700 }
0x3078   :  { %v9492_v30 = vpop.eup %9491 }
0x3079   :  { %v4545_v28 = vsel %vm502_vm5, %v9492_v30, 0.0 }
0x307a   :  { %4546 = vadd.xlane.f32.xlu0 %v4545_v28 }
0x3090   :  { %4554 = vrot.lane.b32.xlu0 %v10657_v59, %s9740_s12 }
0x3094   :  { %4650 = vrot.lane.b32.xlu0 %v10668_v62, %s9744_s15 }
0x30ff   :  { %v4544_v38 = vpop.xlane.xlu0 %4543 }
0x3100   :  { %9493 = vrcp.f32 %v4544_v38 }
0x3103   :  { %v4547_v44 = vpop.xlane.xlu0 %4546 }
0x3104   :  { %9495 = vrcp.f32 %v4547_v44 }
0x3107   :  { %v4555_v33 = vpop.permute.xlu0 %4554 }
0x3108   :  { %v4560_v5 = vsel %vm627_vm6, %v4555_v33, 0 }
0x3109   :  { %8840 = vmatpush3.bf16.msra.mxu0 %v4560_v5 }
0x310a   :  { %8851 = vmatprep.subr.bf16.mxu0 %v9737_v6 }
0x310b   :  { %v4651_v56 = vpop.permute.xlu0 %4650 }
0x310d   :  { %v9494_v57 = vpop.eup %9493 }
0x310e   :  { %v4549_v19 = vmul.f32 %v9494_v57, %v9490_v26 }
0x3110   :  { %v4552_v46 = vpack.c.bf16 %v4549_v19, %v4549_v19 }
0x3111   :  { %v9496_v58 = vpop.eup %9495 }
0x3112   :  { %v4551_v53 = vmul.f32 %v9496_v58, %v9492_v30  ;;  %8842 = vmatmul.mubr.msk.bf16.vlgmr.msra.gmra.mxu0 %vm502_vm5, %v4552_v46 }
0x3113   :  { %8852 = vmatpush3.bf16.xpose.msra.mxu0 %v4658_v47  ;;  %8853 = vmatprep.mubr.msk.bf16.mxu0 %vm9738_vm4, %v9737_v6 }
0x3114   :  { %v4553_v7 = vpack.c.bf16 %v4551_v53, %v4551_v53  ;;  %8863 = vmatprep.subr.bf16.mxu0 %v9737_v6 }
0x3116   :  { %8848 = vmatmul.mubr.msk.bf16.vlgmr.msra.gmra.mxu1 %vm502_vm5, %v4553_v7 }
0x3117   :  { %8858 = vmatpush3.bf16.xpose.msra.mxu1 %v4708_v35  ;;  %8859 = vmatprep.mubr.msk.bf16.mxu1 %vm9738_vm4, %v9737_v6 }
0x3118   :  { %8869 = vmatprep.subr.bf16.mxu1 %v9737_v6 }
0x311a   :  { %8854 = vmatmul.mubr.msk.bf16.vlgmr.msra.gmra.mxu0 %vm502_vm5, %v4651_v56 }
0x311b   :  { %8865 = vmatprep.mubr.msk.bf16.mxu0 %vm9738_vm4, %v9737_v6 }
0x311e   :  { %8860 = vmatmul.mubr.msk.bf16.vlgmr.msra.gmra.mxu1 %vm502_vm5, %v4701_v31 }
0x311f   :  { %8871 = vmatprep.mubr.msk.bf16.mxu1 %vm9738_vm4, %v9737_v6 }
0x31d2   :  { %v10757_v29 = vpop.f32.mrf.mxu0 }
0x31d4   :  { %v8843_v60 = vpop.f32.mrf.mxu0 }
0x31d6   :  { %v4599_v61 = vpop.f32.mrf.mxu0  ;;  %v10759_v0 = vpop.f32.mrf.mxu1 }
0x31d7   :  { %v9260_v39 = vpack.i.bf16 %v10759_v0, %v10757_v29 }
0x31d8   :  { %v8844_v2 = vpop.f32.mrf.mxu0  ;;  %v8849_v21 = vpop.f32.mrf.mxu1 }
0x31da   :  { %v4647_v10 = vpop.f32.mrf.mxu1  ;;  %v4694_v55 = vpop.f32.mrf.mxu0 }
0x31db   :  { %v4750_v63 = vsel %vm502_vm5, %v4694_v55, -inf }
0x31dc   :  { %4751 = vmax.xlane.f32.xlu0 %v4750_v63  ;;  %v8850_v34 = vpop.f32.mrf.mxu1  ;;  %v8855_v50 = vpop.f32.mrf.mxu0 }
0x31de   :  { %v4697_v54 = vpop.f32.mrf.mxu0  ;;  %v4744_v27 = vpop.f32.mrf.mxu1 }
0x31df   :  { %v4753_v11 = vsel %vm502_vm5, %v4744_v27, -inf }
0x31e0   :  { %v8856_v22 = vpop.f32.mrf.mxu0  ;;  %4754 = vmax.xlane.f32.xlu1 %v4753_v11  ;;  %v8861_v20 = vpop.f32.mrf.mxu1 }
0x31e2   :  { %v4747_v48 = vpop.f32.mrf.mxu1 }
0x31e4   :  { %v8862_v1 = vpop.f32.mrf.mxu1 }
0x31f1   :  { %4822 = vrot.lane.b32.xlu1 %v10661_v37, %s9743_s14 }
0x31f5   :  { %4872 = vrot.lane.b32.xlu1 %v10657_v59, %s9747_s16 }
0x31f9   :  { %4922 = vrot.lane.b32.xlu1 %v10661_v37, %s9747_s16 }
0x31fd   :  { %4920 = vrot.lane.b32.xlu1 %v10675_v9, %s9747_s16 }
0x3265   :  { %v4752_v43 = vpop.xlane.xlu0 %4751 }
0x3266   :  { %v4756_v42 = vsub.f32 %v4694_v55, %v4752_v43 }
0x3268   :  { %v4758_v12 = vmul.f32 1.442695, %v4756_v42 }
0x3269   :  { %v4755_v49 = vpop.xlane.xlu1 %4754 }
0x326a   :  { %9497 = vpow2.f32 %v4758_v12  ;;  %v4757_v13 = vsub.f32 %v4744_v27, %v4755_v49 }
0x326c   :  { %v4760_v14 = vmul.f32 1.442695, %v4757_v13 }
0x326d   :  { %v4823_v15 = vpop.permute.xlu1 %4822 }
0x326e   :  { %9499 = vpow2.f32 %v4760_v14  ;;  %v4828_v32 = vsel %vm627_vm6, %v4823_v15, 0 }
0x326f   :  { %8870 = vmatpush3.bf16.msra.mxu1 %v4828_v32 }
0x3270   :  { %8881 = vmatprep.subr.bf16.mxu1 %v9737_v6 }
0x3271   :  { %v4873_v38 = vpop.permute.xlu1 %4872 }
0x3272   :  { %v4878_v57 = vsel %vm502_vm5, %v4873_v38, 0 }
0x3277   :  { %v9498_v17 = vpop.eup %9497 }
0x3278   :  { %v4762_v18 = vsel %vm502_vm5, %v9498_v17, 0.0 }
0x3279   :  { %4763 = vadd.xlane.f32.xlu0 %v4762_v18 }
0x327b   :  { %v9500_v24 = vpop.eup %9499 }
0x327c   :  { %v4765_v9 = vsel %vm502_vm5, %v9500_v24, 0.0 }
0x327d   :  { %4766 = vadd.xlane.f32.xlu0 %v4765_v9 }
0x3293   :  { %4774 = vrot.lane.b32.xlu0 %v10657_v59, %s9743_s14 }
0x3297   :  { %4870 = vrot.lane.b32.xlu0 %v10668_v62, %s9747_s16  ;;  %v4923_v62 = vpop.permute.xlu1 %4922 }
0x3298   :  { %v4928_v46 = vsel %vm502_vm5, %v4923_v62, 0 }
0x329b   :  { %v4921_v47 = vpop.permute.xlu1 %4920 }
0x3302   :  { %v4764_v4 = vpop.xlane.xlu0 %4763 }
0x3303   :  { %9501 = vrcp.f32 %v4764_v4 }
0x3306   :  { %v4767_v26 = vpop.xlane.xlu0 %4766 }
0x3307   :  { %9503 = vrcp.f32 %v4767_v26 }
0x330a   :  { %v4775_v25 = vpop.permute.xlu0 %4774 }
0x330b   :  { %v4780_v30 = vsel %vm627_vm6, %v4775_v25, 0 }
0x330c   :  { %8864 = vmatpush3.bf16.msra.mxu0 %v4780_v30 }
0x330d   :  { %8875 = vmatprep.subr.bf16.mxu0 %v9737_v6 }
0x330e   :  { %v4871_v58 = vpop.permute.xlu0 %4870 }
0x3310   :  { %v9502_v28 = vpop.eup %9501 }
0x3311   :  { %v4769_v44 = vmul.f32 %v9502_v28, %v9498_v17 }
0x3313   :  { %v4772_v33 = vpack.c.bf16 %v4769_v44, %v4769_v44 }
0x3314   :  { %v9504_v5 = vpop.eup %9503 }
0x3315   :  { %v4771_v16 = vmul.f32 %v9504_v5, %v9500_v24  ;;  %8866 = vmatmul.mubr.msk.bf16.vlgmr.msra.gmra.mxu0 %vm502_vm5, %v4772_v33 }
0x3316   :  { %8876 = vmatpush3.bf16.xpose.msra.mxu0 %v4878_v57  ;;  %8877 = vmatprep.mubr.msk.bf16.mxu0 %vm9738_vm4, %v9737_v6 }
0x3317   :  { %v4773_v19 = vpack.c.bf16 %v4771_v16, %v4771_v16  ;;  %8887 = vmatprep.subr.bf16.mxu0 %v9737_v6 }
0x3319   :  { %8872 = vmatmul.mubr.msk.bf16.vlgmr.msra.gmra.mxu1 %vm502_vm5, %v4773_v19 }
0x331a   :  { %8882 = vmatpush3.bf16.xpose.msra.mxu1 %v4928_v46  ;;  %8883 = vmatprep.mubr.msk.bf16.mxu1 %vm9738_vm4, %v9737_v6 }
0x331b   :  { %8893 = vmatprep.subr.bf16.mxu1 %v9737_v6 }
0x331d   :  { %8878 = vmatmul.mubr.msk.bf16.vlgmr.msra.gmra.mxu0 %vm502_vm5, %v4871_v58 }
0x331e   :  { %8889 = vmatprep.mubr.msk.bf16.mxu0 %vm9738_vm4, %v9737_v6 }
0x3321   :  { %8884 = vmatmul.mubr.msk.bf16.vlgmr.msra.gmra.mxu1 %vm502_vm5, %v4921_v47 }
0x3322   :  { %8895 = vmatprep.mubr.msk.bf16.mxu1 %vm9738_vm4, %v9737_v6 }
0x33d5   :  { %v4816_v53 = vpop.f32.mrf.mxu0 }
0x33d7   :  { %v8867_v41 = vpop.f32.mrf.mxu0 }
0x33d9   :  { %v4819_v7 = vpop.f32.mrf.mxu0  ;;  %v4864_v35 = vpop.f32.mrf.mxu1 }
0x33da   :  { %v9265_v56 = vpack.i.bf16 %v4864_v35, %v4816_v53 }
0x33db   :  { %v8868_v31 = vpop.f32.mrf.mxu0  ;;  %v8873_v60 = vpop.f32.mrf.mxu1 }
0x33dd   :  { %v4867_v61 = vpop.f32.mrf.mxu1  ;;  %v4914_v2 = vpop.f32.mrf.mxu0 }
0x33de   :  { %v4970_v21 = vsel %vm502_vm5, %v4914_v2, -inf }
0x33df   :  { %4971 = vmax.xlane.f32.xlu0 %v4970_v21  ;;  %v8874_v10 = vpop.f32.mrf.mxu1  ;;  %v8879_v55 = vpop.f32.mrf.mxu0 }
0x33e1   :  { %v4917_v63 = vpop.f32.mrf.mxu0  ;;  %v4964_v34 = vpop.f32.mrf.mxu1 }
0x33e2   :  { %v4973_v50 = vsel %vm502_vm5, %v4964_v34, -inf }
0x33e3   :  { %v8880_v54 = vpop.f32.mrf.mxu0  ;;  %4974 = vmax.xlane.f32.xlu1 %v4973_v50  ;;  %v8885_v27 = vpop.f32.mrf.mxu1 }
0x33e5   :  { %v4967_v11 = vpop.f32.mrf.mxu1 }
0x33e7   :  { %v8886_v22 = vpop.f32.mrf.mxu1 }
0x33f4   :  { %5042 = vrot.lane.b32.xlu1 %v10661_v37, %s9746_s27 }
0x33f8   :  { %5127 = vrot.lane.b32.xlu1 %v10626_v36, %s9749_s18 }
0x33fc   :  { %9261 = vrot.lane.b32.xlu1 %v9260_v39, %s9730_s28 }
0x3468   :  { %v4972_v20 = vpop.xlane.xlu0 %4971 }
0x3469   :  { %v4976_v48 = vsub.f32 %v4914_v2, %v4972_v20 }
0x346b   :  { %v4978_v1 = vmul.f32 1.442695, %v4976_v48 }
0x346c   :  { %v4975_v43 = vpop.xlane.xlu1 %4974 }
0x346d   :  { %9505 = vpow2.f32 %v4978_v1  ;;  %v4977_v42 = vsub.f32 %v4964_v34, %v4975_v43 }
0x346f   :  { %v4980_v12 = vmul.f32 1.442695, %v4977_v42 }
0x3470   :  { %v5043_v49 = vpop.permute.xlu1 %5042 }
0x3471   :  { %9507 = vpow2.f32 %v4980_v12  ;;  %v5048_v13 = vsel %vm627_vm6, %v5043_v49, 0 }
0x3472   :  { %8894 = vmatpush3.bf16.msra.mxu1 %v5048_v13 }
0x3473   :  { %8907 = vmatprep.subr.bf16.mxu1 %v9737_v6 }
0x347a   :  { %v9506_v36 = vpop.eup %9505 }
0x347b   :  { %v4982_v37 = vsel %vm502_vm5, %v9506_v36, 0.0 }
0x347c   :  { %4983 = vadd.xlane.f32.xlu0 %v4982_v37  ;;  %v9337_v37 = vld [vmem:[#allocation9 + $0x20] ss:$12 sps:$4 sm:$0xff]  }
0x347e   :  { %v9508_v29 = vpop.eup %9507 }
0x347f   :  { %v4985_v0 = vsel %vm502_vm5, %v9508_v29, 0.0 }
0x3480   :  { %4986 = vadd.xlane.f32.xlu0 %v4985_v0  ;;  %v9339_v0 = vld [vmem:[%s11369_s9 + $0x18] sm:$0xff]  }
0x3496   :  { %4994 = vrot.lane.b32.xlu0 %v10657_v59, %s9746_s27  ;;  %v5128_v59 = vpop.permute.xlu1 %5127 }
0x349a   :  { %9266 = vrot.lane.b32.xlu0 %v9265_v56, %s9750_s6  ;;  %v9262_v19 = vpop.permute.xlu1 %9261 }
0x349b   :  { %v9264_v46 = vunpack.i.h.bf16 %v9262_v19  ;;  %v9263_v58 = vunpack.i.l.bf16 %v9262_v19 }
0x349d   :  { %v5115_v7 = vsel %vm502_vm5, %v10719_v40, %v9264_v46  ;;  %v5114_v35 = vsel %vm502_vm5, %v10717_v3, %v9263_v58  ;;  %v8014_v40 = vld [vmem:[#allocation10 + $0x1d] ss:$0 sm:$0xff] }
0x349e   :  { %5125 = vrot.lane.b32.xlu0 %v10630_v52, %s9749_s18 }
0x3505   :  { %v4984_v39 = vpop.xlane.xlu0 %4983 }
0x3506   :  { %9509 = vrcp.f32 %v4984_v39 }
0x3509   :  { %v4987_v14 = vpop.xlane.xlu0 %4986 }
0x350a   :  { %9511 = vrcp.f32 %v4987_v14 }
0x350d   :  { %v4995_v15 = vpop.permute.xlu0 %4994 }
0x350e   :  { %v5000_v32 = vsel %vm627_vm6, %v4995_v15, 0 }
0x350f   :  { %8888 = vmatpush3.bf16.msra.mxu0 %v5000_v32 }
0x3510   :  { %8899 = vmatprep.subr.bf16.mxu0 %v9737_v6 }
0x3511   :  { %v9267_v26 = vpop.permute.xlu0 %9266 }
0x3512   :  { %v9269_v47 = vunpack.i.h.bf16 %v9267_v26  ;;  %v9268_v53 = vunpack.i.l.bf16 %v9267_v26 }
0x3513   :  { %v9510_v17 = vpop.eup %9509 }
0x3514   :  { %v4989_v18 = vmul.f32 %v9510_v17, %v9506_v36  ;;  %v5116_v60 = vsel %vm1407_vm7, %v5114_v35, %v9268_v53  ;;  %v5117_v61 = vsel %vm1407_vm7, %v5115_v7, %v9269_v47 }
0x3515   :  { %v5126_v25 = vpop.permute.xlu0 %5125 }
0x3516   :  { %v4992_v24 = vpack.c.bf16 %v4989_v18, %v4989_v18 }
0x3517   :  { %v9512_v9 = vpop.eup %9511 }
0x3518   :  { %v4991_v4 = vmul.f32 %v9512_v9, %v9508_v29  ;;  %8890 = vmatmul.mubr.msk.bf16.vlgmr.msra.gmra.mxu0 %vm502_vm5, %v4992_v24  ;;  %v9338_v29 = vld [vmem:[#allocation9 + $0x8] ss:$12 sps:$4 sm:$0xff]  }
0x3519   :  { %8900 = vmatpush3.bf16.msra.mxu0 %v5128_v59  ;;  %8903 = vmatprep.mubr.msk.bf16.mxu0 %vm9738_vm4, %v9737_v6  ;;  %v8016_v59 = vld [vmem:[#allocation10 + $0x1e] ss:$0 sm:$0xff] }
0x351a   :  { %v4993_v52 = vpack.c.bf16 %v4991_v4, %v4991_v4  ;;  %8901 = vmatprep.subr.bf16.mxu0 %v9737_v6 }
0x351c   :  { %8896 = vmatmul.mubr.msk.bf16.vlgmr.msra.gmra.mxu1 %vm502_vm5, %v4993_v52 }
0x351d   :  { %8911 = vmatprep.mubr.msk.bf16.mxu1 %vm9738_vm4, %v9737_v6  ;;  %8902 = vmatpush3.bf16.msra.mxu0 %v5126_v25  ;;  %v8017_v25 = vld [vmem:[#allocation10 + $0x1f] ss:$0 sm:$0xff] }
0x351e   :  { %8915 = vmatprep.subr.bf16.mxu0 %v9737_v6  ;;  %8908 = vmatpush3.bf16.msra.mxu1 %v9337_v37 }
0x351f   :  { %8909 = vmatprep.subr.bf16.mxu1 %v9737_v6 }
0x3522   :  { %8910 = vmatpush3.bf16.msra.mxu1 %v9338_v29 }
0x3523   :  { %8927 = vmatprep.subr.bf16.mxu1 %v9737_v6 }
0x35d8   :  { %v5036_v30 = vpop.f32.mrf.mxu0 }
0x35da   :  { %v8891_v28 = vpop.f32.mrf.mxu0 }
0x35dc   :  { %v5039_v38 = vpop.f32.mrf.mxu0  ;;  %v5084_v44 = vpop.f32.mrf.mxu1 }
0x35dd   :  { %v9270_v33 = vpack.i.bf16 %v5084_v44, %v5036_v30 }
0x35de   :  { %v8892_v5 = vpop.f32.mrf.mxu0  ;;  %v8897_v57 = vpop.f32.mrf.mxu1 }
0x35df   :  { %9271 = vrot.lane.b32.xlu1 %v9270_v33, %s9751_s0  ;;  %v9340_v33 = vld [vmem:[%s11369_s9 + $0x10] sm:$0xff]   ;;  %v9341_v5 = vld [vmem:[%s11369_s9 + $0x8] sm:$0xff]   ;;  %v9342_v57 = vld [vmem:[%s11369_s9] sm:$0xff]  }
0x35e0   :  { %v5087_v16 = vpop.f32.mrf.mxu1 }
0x35e1   :  { %v8018_v16 = vld [vmem:[#allocation10 + $0x20] ss:$0 sm:$0xff] }
0x35e2   :  { %v8898_v62 = vpop.f32.mrf.mxu1 }
0x3651   :  { %v9272_v41 = vpop.permute.xlu1 %9271 }
0x3652   :  { %v9274_v56 = vunpack.i.h.bf16 %v9272_v41  ;;  %v9273_v31 = vunpack.i.l.bf16 %v9272_v41 }
0x3654   :  { %v5119_v2 = vsel %vm1410_vm8, %v5117_v61, %v9274_v56  ;;  %v5118_v21 = vsel %vm1410_vm8, %v5116_v60, %v9273_v31  ;;  %v8027_v31 = vld [vmem:[#allocation10 + $0x21] ss:$0 sm:$0xff] }
0x3655   :  { %v5120_v10 = vpack.c.bf16 %v5119_v2, %v5118_v21 }
0x3657   :  { %8904 = vmatmul.mubr.msk.bf16.vlgmr.msra.gmra.mxu0 %vm218_vm2, %v5120_v10 }
0x3658   :  { %8923 = vmatprep.mubr.msk.bf16.mxu0 %vm9738_vm4, %v9737_v6  ;;  %8916 = vmatpush3.bf16.msra.mxu0 %v9339_v0 }
0x3659   :  { %8917 = vmatprep.subr.bf16.mxu0 %v9737_v6 }
0x365c   :  { %8918 = vmatpush3.bf16.msra.mxu0 %v9340_v33 }
0x365d   :  { %8919 = vmatprep.subr.bf16.mxu0 %v9737_v6 }
0x3660   :  { %8920 = vmatpush3.bf16.msra.mxu0 %v9341_v5 }
0x3661   :  { %8921 = vmatprep.subr.bf16.mxu0 %v9737_v6 }
0x3664   :  { %8922 = vmatpush3.bf16.msra.mxu0 %v9342_v57 }
0x3665   :  { %8941 = vmatprep.subr.bf16.mxu0 %v9737_v6 }
0x3717   :  { %v5168_v55 = vpop.f32.mrf.mxu0 }
0x3718   :  { %v5169_v63 = vadd.f32 %v8014_v40, %v5168_v55 }
0x3719   :  { %v8905_v3 = vpop.f32.mrf.mxu0 }
0x371a   :  { %v10841_v34 = vadd.f32 %v5169_v63, %v10615_v8 }
0x371b   :  { %v5171_v50 = vpop.f32.mrf.mxu0 }
0x371c   :  { %v5172_v54 = vadd.f32 %v8014_v40, %v5171_v50  ;;  %v5177_v27 = vsel %vm218_vm2, %v10841_v34, 0.0 }
0x371d   :  { %5178 = vadd.xlane.f32.xlu1 %v5177_v27  ;;  %v8906_v11 = vpop.f32.mrf.mxu0 }
0x371e   :  { %v10846_v22 = vadd.f32 %v5172_v54, %v10621_v23 }
0x3720   :  { %v5180_v20 = vsel %vm218_vm2, %v10846_v22, 0.0 }
0x3721   :  { %5181 = vadd.xlane.f32.xlu0 %v5180_v20 }
0x37a6   :  { %v5179_v48 = vpop.xlane.xlu1 %5178 }
0x37a7   :  { %v5183_v1 = vmul.f32 0.03125, %v5179_v48 }
0x37a9   :  { %v5185_v43 = vsub.f32 %v10841_v34, %v5183_v1 }
0x37aa   :  { %v5182_v8 = vpop.xlane.xlu0 %5181 }
0x37ab   :  { %v5184_v42 = vmul.f32 0.03125, %v5182_v8  ;;  %v5187_v12 = vmul.f32 %v5185_v43, %v5185_v43  ;;  %v10892_v8 = vld [vmem:[#allocation9 + $0x48] ss:$12 sps:$4 sm:$0xff]  }
0x37ad   :  { %v5186_v49 = vsub.f32 %v10846_v22, %v5184_v42  ;;  %v5189_v13 = vsel %vm218_vm2, %v5187_v12, 0.0  ;;  %v10895_v42 = vld [vmem:[#allocation9 + $0x30] ss:$12 sps:$4 sm:$0xff]  }
0x37ae   :  { %5190 = vadd.xlane.f32.xlu0 %v5189_v13 }
0x37af   :  { %v5188_v36 = vmul.f32 %v5186_v49, %v5186_v49 }
0x37b1   :  { %v5192_v23 = vsel %vm218_vm2, %v5188_v36, 0.0 }
0x37b2   :  { %5193 = vadd.xlane.f32.xlu0 %v5192_v23 }
0x3837   :  { %v5191_v39 = vpop.xlane.xlu0 %5190 }
0x3838   :  { %v5195_v14 = vmul.f32 0.03125, %v5191_v39  ;;  %v8036_v39 = vld [vmem:[#allocation10 + $0x22] ss:$0 sm:$0xff] }
0x383a   :  { %v5197_v15 = vadd.f32 1e-05, %v5195_v14 }
0x383b   :  { %v5194_v32 = vpop.xlane.xlu0 %5193 }
0x383c   :  { %9513 = vrsqrt.f32 %v5197_v15  ;;  %v5196_v17 = vmul.f32 0.03125, %v5194_v32 }
0x383e   :  { %v5198_v18 = vadd.f32 1e-05, %v5196_v17  ;;  %v8037_v17 = vld [vmem:[#allocation10 + $0x23] ss:$0 sm:$0xff] }
0x3840   :  { %9515 = vrsqrt.f32 %v5198_v18 }
0x3849   :  { %v9514_v24 = vpop.eup %9513 }
0x384a   :  { %v5201_v9 = vmul.f32 %v9514_v24, %v5185_v43 }
0x384c   :  { %v5208_v52 = vmul.f32 %v8016_v59, %v5201_v9 }
0x384d   :  { %v9516_v4 = vpop.eup %9515 }
0x384e   :  { %v5202_v26 = vmul.f32 %v9516_v4, %v5186_v49  ;;  %v5215_v28 = vadd.f32 %v8017_v25, %v5208_v52  ;;  %v8038_v4 = vld [vmem:[#allocation10 + $0x24] ss:$0 sm:$0xff] }
0x3850   :  { %v5209_v30 = vmul.f32 %v8016_v59, %v5202_v26 }
0x3852   :  { %v5216_v38 = vadd.f32 %v8017_v25, %v5209_v30 }
0x3854   :  { %v5217_v44 = vpack.c.bf16 %v5216_v38, %v5215_v28 }
0x3856   :  { %8912 = vmatmul.mubr.msk.bf16.vlgmr.msra.gmra.mxu1 %vm218_vm2, %v5217_v44 }
0x3857   :  { %8931 = vmatprep.mubr.msk.bf16.mxu1 %vm9738_vm4, %v9737_v6  ;;  %8928 = vmatpush3.bf16.msra.mxu1 %v10892_v8 }
0x3858   :  { %8929 = vmatprep.subr.bf16.mxu1 %v9737_v6 }
0x385b   :  { %8930 = vmatpush3.bf16.msra.mxu1 %v10895_v42 }
0x385c   :  { %8935 = vmatprep.subr.bf16.mxu1 %v9737_v6 }
0x3916   :  { %v5272_v62 = vpop.f32.mrf.mxu1 }
0x3917   :  { %v5273_v46 = vadd.f32 %v8018_v16, %v5272_v62 }
0x3918   :  { %v8913_v19 = vpop.f32.mrf.mxu1 }
0x3919   :  { %v5279_v41 = vmax.f32 %v5273_v46, 0.0 }
0x391a   :  { %v5275_v58 = vpop.f32.mrf.mxu1 }
0x391b   :  { %v5276_v47 = vadd.f32 %v8018_v16, %v5275_v58 }
0x391c   :  { %v8914_v53 = vpop.f32.mrf.mxu1 }
0x391d   :  { %v5280_v7 = vmax.f32 %v5276_v47, 0.0 }
0x391f   :  { %v5281_v35 = vpack.c.bf16 %v5280_v7, %v5279_v41 }
0x3921   :  { %8924 = vmatmul.mubr.msk.bf16.vlgmr.msra.gmra.mxu0 %vm321_vm3, %v5281_v35 }
0x3922   :  { %8943 = vmatprep.mubr.msk.bf16.mxu0 %vm9738_vm4, %v9737_v6 }
0x39e1   :  { %v5343_v56 = vpop.f32.mrf.mxu0 }
0x39e2   :  { %v5350_v60 = vadd.f32 %v5343_v56, %v10841_v34 }
0x39e3   :  { %v8925_v61 = vpop.f32.mrf.mxu0 }
0x39e4   :  { %v10879_v2 = vadd.f32 %v8027_v31, %v5350_v60 }
0x39e5   :  { %v5346_v21 = vpop.f32.mrf.mxu0 }
0x39e6   :  { %v5351_v10 = vadd.f32 %v5346_v21, %v10846_v22  ;;  %v5377_v40 = vsel %vm218_vm2, %v10879_v2, 0.0 }
0x39e7   :  { %5378 = vadd.xlane.f32.xlu1 %v5377_v40  ;;  %v8926_v55 = vpop.f32.mrf.mxu0 }
0x39e8   :  { %v10884_v63 = vadd.f32 %v8027_v31, %v5351_v10 }
0x39ea   :  { %v5380_v3 = vsel %vm218_vm2, %v10884_v63, 0.0 }
0x39eb   :  { %5381 = vadd.xlane.f32.xlu0 %v5380_v3 }
0x3a70   :  { %v5379_v50 = vpop.xlane.xlu1 %5378 }
0x3a71   :  { %v5383_v54 = vmul.f32 0.03125, %v5379_v50 }
0x3a73   :  { %v5385_v34 = vsub.f32 %v10879_v2, %v5383_v54 }
0x3a74   :  { %v5382_v27 = vpop.xlane.xlu0 %5381 }
0x3a75   :  { %v5384_v11 = vmul.f32 0.03125, %v5382_v27  ;;  %v5387_v20 = vmul.f32 %v5385_v34, %v5385_v34 }
0x3a77   :  { %v5386_v22 = vsub.f32 %v10884_v63, %v5384_v11  ;;  %v5389_v48 = vsel %vm218_vm2, %v5387_v20, 0.0 }
0x3a78   :  { %5390 = vadd.xlane.f32.xlu1 %v5389_v48 }
0x3a79   :  { %v5388_v1 = vmul.f32 %v5386_v22, %v5386_v22 }
0x3a7b   :  { %v5392_v43 = vsel %vm218_vm2, %v5388_v1, 0.0 }
0x3a7c   :  { %5393 = vadd.xlane.f32.xlu0 %v5392_v43 }
0x3b01   :  { %v5391_v12 = vpop.xlane.xlu1 %5390 }
0x3b02   :  { %v5395_v49 = vmul.f32 0.03125, %v5391_v12 }
0x3b04   :  { %v5397_v13 = vadd.f32 1e-05, %v5395_v49 }
0x3b05   :  { %v5394_v36 = vpop.xlane.xlu0 %5393 }
0x3b06   :  { %9517 = vrsqrt.f32 %v5397_v13  ;;  %v5396_v23 = vmul.f32 0.03125, %v5394_v36 }
0x3b08   :  { %v5398_v37 = vadd.f32 1e-05, %v5396_v23 }
0x3b0a   :  { %9519 = vrsqrt.f32 %v5398_v37 }
0x3b13   :  { %v9518_v29 = vpop.eup %9517 }
0x3b14   :  { %v5401_v0 = vmul.f32 %v9518_v29, %v5385_v34 }
0x3b16   :  { %v5408_v15 = vmul.f32 %v8036_v39, %v5401_v0 }
0x3b17   :  { %v9520_v14 = vpop.eup %9519 }
0x3b18   :  { %v5402_v32 = vmul.f32 %v9520_v14, %v5386_v22  ;;  %v5415_v24 = vadd.f32 %v8037_v17, %v5408_v15 }
0x3b1a   :  { %v5409_v18 = vmul.f32 %v8036_v39, %v5402_v32 }
0x3b1c   :  { %v5416_v9 = vadd.f32 %v8037_v17, %v5409_v18 }
0x3b1e   :  { %v5417_v59 = vpack.c.bf16 %v5416_v9, %v5415_v24 }
0x3b20   :  { %8932 = vmatmul.mubr.msk.bf16.vlgmr.msra.gmra.mxu1 %vm218_vm2, %v5417_v59 }
0x3b21   :  { %8937 = vmatprep.mubr.msk.bf16.mxu1 %vm9738_vm4, %v9737_v6 }
0x3be0   :  { %v5472_v52 = vpop.f32.mrf.mxu1 }
0x3be1   :  { %v5473_v26 = vadd.f32 %v8038_v4, %v5472_v52 }
0x3be2   :  { %v8933_v25 = vpop.f32.mrf.mxu1 }
0x3be3   :  { %v10903_v30 = vpack.c.bf16 %v5473_v26, %v5473_v26  ;;  %v5480_v16 = vmul.f32 0.35355338, %v5473_v26 }
0x3be4   :  { %v5475_v28 = vpop.f32.mrf.mxu1 }
0x3be5   :  { %v5476_v38 = vadd.f32 %v8038_v4, %v5475_v28  ;;  %5487 = vrot.lane.b32.xlu1 %v10903_v30, %s9739_s1  ;;  %v10914_v46 = vpack.c.bf16 %v5480_v16, %v5480_v16 }
0x3be6   :  { %v8934_v44 = vpop.f32.mrf.mxu1 }
0x3be7   :  { %v10907_v33 = vpack.c.bf16 %v5476_v38, %v5476_v38  ;;  %v5481_v58 = vmul.f32 0.35355338, %v5476_v38 }
0x3be9   :  { %5536 = vrot.lane.b32.xlu0 %v10907_v33, %s9739_s1  ;;  %v10921_v47 = vpack.c.bf16 %v5481_v58, %v5481_v58 }
0x3c57   :  { %v5488_v5 = vpop.permute.xlu1 %5487 }
0x3c58   :  { %v5493_v57 = vsel %vm502_vm5, %v5488_v5, 0 }
0x3c59   :  { %8936 = vmatpush3.bf16.xpose.msra.mxu1 %v5493_v57 }
0x3c5a   :  { %8947 = vmatprep.subr.bf16.mxu1 %v9737_v6 }
0x3c5b   :  { %v5537_v62 = vpop.permute.xlu0 %5536 }
0x3c5c   :  { %v5542_v19 = vsel %vm502_vm5, %v5537_v62, 0 }
0x3c5d   :  { %8942 = vmatpush3.bf16.xpose.msra.mxu0 %v5542_v19 }
0x3c5e   :  { %8953 = vmatprep.subr.bf16.mxu0 %v9737_v6 }
0x3c60   :  { %8938 = vmatmul.mubr.msk.bf16.vlgmr.msra.gmra.mxu1 %vm502_vm5, %v10914_v46 }
0x3c61   :  { %8949 = vmatprep.mubr.msk.bf16.mxu1 %vm9738_vm4, %v9737_v6 }
0x3c64   :  { %8944 = vmatmul.mubr.msk.bf16.vlgmr.msra.gmra.mxu0 %vm502_vm5, %v10921_v47 }
0x3c65   :  { %8955 = vmatprep.mubr.msk.bf16.mxu0 %vm9738_vm4, %v9737_v6 }
0x3d20   :  { %v5529_v53 = vpop.f32.mrf.mxu1 }
0x3d21   :  { %v5530_v41 = vadd.f32 %v5529_v53, %v10434_v45 }
0x3d22   :  { %v8939_v7 = vpop.f32.mrf.mxu1 }
0x3d23   :  { %v5584_v35 = vsel %vm502_vm5, %v5530_v41, -inf }
0x3d24   :  { %v5578_v56 = vpop.f32.mrf.mxu0  ;;  %5585 = vmax.xlane.f32.xlu1 %v5584_v35  ;;  %v5532_v31 = vpop.f32.mrf.mxu1 }
0x3d25   :  { %v5579_v60 = vadd.f32 %v5578_v56, %v10434_v45 }
0x3d26   :  { %v8940_v61 = vpop.f32.mrf.mxu1  ;;  %v8945_v21 = vpop.f32.mrf.mxu0 }
0x3d27   :  { %v5587_v10 = vsel %vm502_vm5, %v5579_v60, -inf }
0x3d28   :  { %5588 = vmax.xlane.f32.xlu0 %v5587_v10  ;;  %v5581_v40 = vpop.f32.mrf.mxu0 }
0x3d2a   :  { %v8946_v55 = vpop.f32.mrf.mxu0 }
0x3d35   :  { %5608 = vrot.lane.b32.xlu1 %v10903_v30, %s9726_s20 }
0x3dad   :  { %v5586_v3 = vpop.xlane.xlu1 %5585 }
0x3dae   :  { %v5590_v50 = vsub.f32 %v5530_v41, %v5586_v3 }
0x3db0   :  { %v5592_v54 = vmul.f32 1.442695, %v5590_v50 }
0x3db1   :  { %v5589_v34 = vpop.xlane.xlu0 %5588  ;;  %v5609_v27 = vpop.permute.xlu1 %5608 }
0x3db2   :  { %9521 = vpow2.f32 %v5592_v54  ;;  %v5591_v11 = vsub.f32 %v5579_v60, %v5589_v34  ;;  %v5614_v20 = vsel %vm627_vm6, %v5609_v27, 0 }
0x3db3   :  { %8948 = vmatpush3.bf16.msra.mxu1 %v5614_v20 }
0x3db4   :  { %v5594_v22 = vmul.f32 1.442695, %v5591_v11  ;;  %8959 = vmatprep.subr.bf16.mxu1 %v9737_v6 }
0x3db6   :  { %9523 = vpow2.f32 %v5594_v22 }
0x3dbf   :  { %v9522_v48 = vpop.eup %9521 }
0x3dc0   :  { %v5596_v1 = vsel %vm502_vm5, %v9522_v48, 0.0 }
0x3dc1   :  { %5597 = vadd.xlane.f32.xlu1 %v5596_v1 }
0x3dc3   :  { %v9524_v43 = vpop.eup %9523 }
0x3dc4   :  { %v5599_v12 = vsel %vm502_vm5, %v9524_v43, 0.0 }
0x3dc5   :  { %5600 = vadd.xlane.f32.xlu0 %v5599_v12 }
0x3dd2   :  { %5707 = vrot.lane.b32.xlu1 %v10903_v30, %s9740_s12 }
0x3dd6   :  { %5758 = vrot.lane.b32.xlu1 %v10907_v33, %s9740_s12 }
0x3dda   :  { %5705 = vrot.lane.b32.xlu1 %v10914_v46, %s9741_s8 }
0x3ddb   :  { %5656 = vrot.lane.b32.xlu0 %v10907_v33, %s9726_s20 }
0x3ddf   :  { %5756 = vrot.lane.b32.xlu0 %v10921_v47, %s9741_s8 }
0x3e4a   :  { %v5598_v49 = vpop.xlane.xlu1 %5597 }
0x3e4b   :  { %9525 = vrcp.f32 %v5598_v49 }
0x3e4e   :  { %v5601_v13 = vpop.xlane.xlu0 %5600  ;;  %v5708_v29 = vpop.permute.xlu1 %5707 }
0x3e4f   :  { %9527 = vrcp.f32 %v5601_v13  ;;  %v5713_v32 = vsel %vm502_vm5, %v5708_v29, 0 }
0x3e52   :  { %v5657_v36 = vpop.permute.xlu0 %5656  ;;  %v5759_v17 = vpop.permute.xlu1 %5758 }
0x3e53   :  { %v5662_v23 = vsel %vm627_vm6, %v5657_v36, 0  ;;  %v5764_v24 = vsel %vm502_vm5, %v5759_v17, 0 }
0x3e54   :  { %8954 = vmatpush3.bf16.msra.mxu0 %v5662_v23 }
0x3e55   :  { %8965 = vmatprep.subr.bf16.mxu0 %v9737_v6 }
0x3e56   :  { %v5706_v9 = vpop.permute.xlu1 %5705  ;;  %v5757_v59 = vpop.permute.xlu0 %5756 }
0x3e58   :  { %v9526_v37 = vpop.eup %9525 }
0x3e59   :  { %v5603_v0 = vmul.f32 %v9526_v37, %v9522_v48 }
0x3e5b   :  { %v5606_v39 = vpack.c.bf16 %v5603_v0, %v5603_v0 }
0x3e5c   :  { %v9528_v14 = vpop.eup %9527 }
0x3e5d   :  { %v5605_v15 = vmul.f32 %v9528_v14, %v9524_v43  ;;  %8950 = vmatmul.mubr.msk.bf16.vlgmr.msra.gmra.mxu1 %vm502_vm5, %v5606_v39 }
0x3e5e   :  { %8960 = vmatpush3.bf16.xpose.msra.mxu1 %v5713_v32  ;;  %8961 = vmatprep.mubr.msk.bf16.mxu1 %vm9738_vm4, %v9737_v6 }
0x3e5f   :  { %v5607_v18 = vpack.c.bf16 %v5605_v15, %v5605_v15  ;;  %8971 = vmatprep.subr.bf16.mxu1 %v9737_v6 }
0x3e61   :  { %8956 = vmatmul.mubr.msk.bf16.vlgmr.msra.gmra.mxu0 %vm502_vm5, %v5607_v18 }
0x3e62   :  { %8966 = vmatpush3.bf16.xpose.msra.mxu0 %v5764_v24  ;;  %8967 = vmatprep.mubr.msk.bf16.mxu0 %vm9738_vm4, %v9737_v6 }
0x3e63   :  { %8977 = vmatprep.subr.bf16.mxu0 %v9737_v6 }
0x3e65   :  { %8962 = vmatmul.mubr.msk.bf16.vlgmr.msra.gmra.mxu1 %vm502_vm5, %v5706_v9 }
0x3e66   :  { %8973 = vmatprep.mubr.msk.bf16.mxu1 %vm9738_vm4, %v9737_v6 }
0x3e69   :  { %8968 = vmatmul.mubr.msk.bf16.vlgmr.msra.gmra.mxu0 %vm502_vm5, %v5757_v59 }
0x3e6a   :  { %8979 = vmatprep.mubr.msk.bf16.mxu0 %vm9738_vm4, %v9737_v6 }
0x3f1d   :  { %v10965_v4 = vpop.f32.mrf.mxu1 }
0x3f1f   :  { %v8951_v52 = vpop.f32.mrf.mxu1 }
0x3f21   :  { %v5653_v26 = vpop.f32.mrf.mxu1  ;;  %v10967_v25 = vpop.f32.mrf.mxu0 }
0x3f23   :  { %v8952_v28 = vpop.f32.mrf.mxu1  ;;  %v8957_v38 = vpop.f32.mrf.mxu0 }
0x3f25   :  { %v5701_v44 = vpop.f32.mrf.mxu0  ;;  %v5749_v5 = vpop.f32.mrf.mxu1 }
0x3f26   :  { %v5750_v57 = vadd.f32 %v5749_v5, %v10434_v45 }
0x3f27   :  { %v8958_v16 = vpop.f32.mrf.mxu0  ;;  %v8963_v62 = vpop.f32.mrf.mxu1 }
0x3f28   :  { %v5806_v19 = vsel %vm502_vm5, %v5750_v57, -inf }
0x3f29   :  { %v5800_v58 = vpop.f32.mrf.mxu0  ;;  %5807 = vmax.xlane.f32.xlu1 %v5806_v19  ;;  %v5752_v53 = vpop.f32.mrf.mxu1 }
0x3f2a   :  { %v5801_v41 = vadd.f32 %v5800_v58, %v10434_v45 }
0x3f2b   :  { %v8964_v7 = vpop.f32.mrf.mxu1  ;;  %v8969_v35 = vpop.f32.mrf.mxu0 }
0x3f2c   :  { %v5809_v56 = vsel %vm502_vm5, %v5801_v41, -inf }
0x3f2d   :  { %5810 = vmax.xlane.f32.xlu0 %v5809_v56  ;;  %v5803_v31 = vpop.f32.mrf.mxu0 }
0x3f2f   :  { %v8970_v60 = vpop.f32.mrf.mxu0 }
0x3f3a   :  { %5830 = vrot.lane.b32.xlu1 %v10903_v30, %s9742_s13 }
0x3f3e   :  { %5928 = vrot.lane.b32.xlu1 %v10903_v30, %s9743_s14 }
0x3f42   :  { %5978 = vrot.lane.b32.xlu1 %v10907_v33, %s9743_s14 }
0x3f46   :  { %5926 = vrot.lane.b32.xlu1 %v10914_v46, %s9744_s15 }
0x3fb2   :  { %v5808_v61 = vpop.xlane.xlu1 %5807 }
0x3fb3   :  { %v5812_v21 = vsub.f32 %v5750_v57, %v5808_v61 }
0x3fb5   :  { %v5814_v10 = vmul.f32 1.442695, %v5812_v21 }
0x3fb6   :  { %v5811_v40 = vpop.xlane.xlu0 %5810  ;;  %v5831_v55 = vpop.permute.xlu1 %5830 }
0x3fb7   :  { %9529 = vpow2.f32 %v5814_v10  ;;  %v5813_v3 = vsub.f32 %v5801_v41, %v5811_v40  ;;  %v5836_v50 = vsel %vm627_vm6, %v5831_v55, 0 }
0x3fb8   :  { %8972 = vmatpush3.bf16.msra.mxu1 %v5836_v50 }
0x3fb9   :  { %v5816_v54 = vmul.f32 1.442695, %v5813_v3  ;;  %8983 = vmatprep.subr.bf16.mxu1 %v9737_v6 }
0x3fba   :  { %v5929_v49 = vpop.permute.xlu1 %5928 }
0x3fbb   :  { %9531 = vpow2.f32 %v5816_v54  ;;  %v5934_v37 = vsel %vm502_vm5, %v5929_v49, 0 }
0x3fbe   :  { %v5979_v0 = vpop.permute.xlu1 %5978 }
0x3fbf   :  { %v5984_v14 = vsel %vm502_vm5, %v5979_v0, 0 }
0x3fc2   :  { %v5927_v15 = vpop.permute.xlu1 %5926 }
0x3fc4   :  { %v9530_v34 = vpop.eup %9529 }
0x3fc5   :  { %v5818_v27 = vsel %vm502_vm5, %v9530_v34, 0.0 }
0x3fc6   :  { %5819 = vadd.xlane.f32.xlu0 %v5818_v27 }
0x3fc8   :  { %v9532_v11 = vpop.eup %9531 }
0x3fc9   :  { %v5821_v20 = vsel %vm502_vm5, %v9532_v11, 0.0 }
0x3fca   :  { %5822 = vadd.xlane.f32.xlu0 %v5821_v20 }
0x3fe0   :  { %5878 = vrot.lane.b32.xlu0 %v10907_v33, %s9742_s13 }
0x3fe4   :  { %5976 = vrot.lane.b32.xlu0 %v10921_v47, %s9744_s15 }
0x404f   :  { %v5820_v22 = vpop.xlane.xlu0 %5819 }
0x4050   :  { %9533 = vrcp.f32 %v5820_v22 }
0x4053   :  { %v5823_v48 = vpop.xlane.xlu0 %5822 }
0x4054   :  { %9535 = vrcp.f32 %v5823_v48 }
0x4057   :  { %v5879_v1 = vpop.permute.xlu0 %5878 }
0x4058   :  { %v5884_v43 = vsel %vm627_vm6, %v5879_v1, 0 }
0x4059   :  { %8978 = vmatpush3.bf16.msra.mxu0 %v5884_v43 }
0x405a   :  { %8989 = vmatprep.subr.bf16.mxu0 %v9737_v6 }
0x405b   :  { %v5977_v32 = vpop.permute.xlu0 %5976 }
0x405d   :  { %v9534_v12 = vpop.eup %9533 }
0x405e   :  { %v5825_v13 = vmul.f32 %v9534_v12, %v9530_v34 }
0x4060   :  { %v5828_v36 = vpack.c.bf16 %v5825_v13, %v5825_v13 }
0x4061   :  { %v9536_v23 = vpop.eup %9535 }
0x4062   :  { %v5827_v29 = vmul.f32 %v9536_v23, %v9532_v11  ;;  %8974 = vmatmul.mubr.msk.bf16.vlgmr.msra.gmra.mxu1 %vm502_vm5, %v5828_v36 }
0x4063   :  { %8984 = vmatpush3.bf16.xpose.msra.mxu1 %v5934_v37  ;;  %8985 = vmatprep.mubr.msk.bf16.mxu1 %vm9738_vm4, %v9737_v6 }
0x4064   :  { %v5829_v39 = vpack.c.bf16 %v5827_v29, %v5827_v29  ;;  %8995 = vmatprep.subr.bf16.mxu1 %v9737_v6 }
0x4066   :  { %8980 = vmatmul.mubr.msk.bf16.vlgmr.msra.gmra.mxu0 %vm502_vm5, %v5829_v39 }
0x4067   :  { %8990 = vmatpush3.bf16.xpose.msra.mxu0 %v5984_v14  ;;  %8991 = vmatprep.mubr.msk.bf16.mxu0 %vm9738_vm4, %v9737_v6 }
0x4068   :  { %9001 = vmatprep.subr.bf16.mxu0 %v9737_v6 }
0x406a   :  { %8986 = vmatmul.mubr.msk.bf16.vlgmr.msra.gmra.mxu1 %vm502_vm5, %v5927_v15 }
0x406b   :  { %8997 = vmatprep.mubr.msk.bf16.mxu1 %vm9738_vm4, %v9737_v6 }
0x406e   :  { %8992 = vmatmul.mubr.msk.bf16.vlgmr.msra.gmra.mxu0 %vm502_vm5, %v5977_v32 }
0x406f   :  { %9003 = vmatprep.mubr.msk.bf16.mxu0 %vm9738_vm4, %v9737_v6 }
0x4122   :  { %v11007_v17 = vpop.f32.mrf.mxu1 }
0x4124   :  { %v8975_v18 = vpop.f32.mrf.mxu1 }
0x4126   :  { %v5875_v24 = vpop.f32.mrf.mxu1  ;;  %v11009_v9 = vpop.f32.mrf.mxu0 }
0x4127   :  { %v9275_v59 = vpack.i.bf16 %v11009_v9, %v11007_v17 }
0x4128   :  { %v8976_v52 = vpop.f32.mrf.mxu1  ;;  %v8981_v26 = vpop.f32.mrf.mxu0 }
0x412a   :  { %v5923_v28 = vpop.f32.mrf.mxu0  ;;  %v5970_v38 = vpop.f32.mrf.mxu1 }
0x412b   :  { %v5971_v44 = vadd.f32 %v5970_v38, %v10434_v45 }
0x412c   :  { %v8982_v5 = vpop.f32.mrf.mxu0  ;;  %v8987_v57 = vpop.f32.mrf.mxu1 }
0x412d   :  { %v6026_v16 = vsel %vm502_vm5, %v5971_v44, -inf }
0x412e   :  { %v6020_v62 = vpop.f32.mrf.mxu0  ;;  %6027 = vmax.xlane.f32.xlu1 %v6026_v16  ;;  %v5973_v19 = vpop.f32.mrf.mxu1 }
0x412f   :  { %v6021_v58 = vadd.f32 %v6020_v62, %v10434_v45 }
0x4130   :  { %v8988_v53 = vpop.f32.mrf.mxu1  ;;  %v8993_v41 = vpop.f32.mrf.mxu0 }
0x4131   :  { %v6029_v7 = vsel %vm502_vm5, %v6021_v58, -inf }
0x4132   :  { %6030 = vmax.xlane.f32.xlu0 %v6029_v7  ;;  %v6023_v35 = vpop.f32.mrf.mxu0 }
0x4134   :  { %v8994_v56 = vpop.f32.mrf.mxu0 }
0x413f   :  { %6050 = vrot.lane.b32.xlu1 %v10903_v30, %s9745_s10 }
0x4143   :  { %6148 = vrot.lane.b32.xlu1 %v10903_v30, %s9746_s27 }
0x4147   :  { %6198 = vrot.lane.b32.xlu1 %v10907_v33, %s9746_s27 }
0x414b   :  { %6146 = vrot.lane.b32.xlu1 %v10914_v46, %s9747_s16 }
0x41b7   :  { %v6028_v31 = vpop.xlane.xlu1 %6027 }
0x41b8   :  { %v6032_v60 = vsub.f32 %v5971_v44, %v6028_v31 }
0x41ba   :  { %v6034_v61 = vmul.f32 1.442695, %v6032_v60 }
0x41bb   :  { %v6031_v21 = vpop.xlane.xlu0 %6030  ;;  %v6051_v10 = vpop.permute.xlu1 %6050 }
0x41bc   :  { %9537 = vpow2.f32 %v6034_v61  ;;  %v6033_v40 = vsub.f32 %v6021_v58, %v6031_v21  ;;  %v6056_v55 = vsel %vm627_vm6, %v6051_v10, 0 }
0x41bd   :  { %8996 = vmatpush3.bf16.msra.mxu1 %v6056_v55 }
0x41be   :  { %v6036_v3 = vmul.f32 1.442695, %v6033_v40  ;;  %9007 = vmatprep.subr.bf16.mxu1 %v9737_v6 }
0x41bf   :  { %v6149_v1 = vpop.permute.xlu1 %6148 }
0x41c0   :  { %9539 = vpow2.f32 %v6036_v3  ;;  %v6154_v13 = vsel %vm502_vm5, %v6149_v1, 0 }
0x41c9   :  { %v9538_v50 = vpop.eup %9537 }
0x41ca   :  { %v6038_v54 = vsel %vm502_vm5, %v9538_v50, 0.0 }
0x41cb   :  { %6039 = vadd.xlane.f32.xlu0 %v6038_v54 }
0x41cd   :  { %v9540_v34 = vpop.eup %9539 }
0x41ce   :  { %v6041_v46 = vsel %vm502_vm5, %v9540_v34, 0.0 }
0x41cf   :  { %6042 = vadd.xlane.f32.xlu0 %v6041_v46 }
0x41e5   :  { %6098 = vrot.lane.b32.xlu0 %v10907_v33, %s9745_s10 }
0x41e9   :  { %6196 = vrot.lane.b32.xlu0 %v10921_v47, %s9747_s16  ;;  %v6199_v47 = vpop.permute.xlu1 %6198 }
0x41ea   :  { %v6204_v37 = vsel %vm502_vm5, %v6199_v47, 0 }
0x41ed   :  { %v6147_v29 = vpop.permute.xlu1 %6146 }
0x4254   :  { %v6040_v27 = vpop.xlane.xlu0 %6039 }
0x4255   :  { %9541 = vrcp.f32 %v6040_v27 }
0x4258   :  { %v6043_v11 = vpop.xlane.xlu0 %6042 }
0x4259   :  { %9543 = vrcp.f32 %v6043_v11 }
0x425c   :  { %v6099_v20 = vpop.permute.xlu0 %6098 }
0x425d   :  { %v6104_v22 = vsel %vm627_vm6, %v6099_v20, 0 }
0x425e   :  { %9002 = vmatpush3.bf16.msra.mxu0 %v6104_v22 }
0x425f   :  { %9013 = vmatprep.subr.bf16.mxu0 %v9737_v6 }
0x4260   :  { %v6197_v0 = vpop.permute.xlu0 %6196 }
0x4262   :  { %v9542_v48 = vpop.eup %9541 }
0x4263   :  { %v6045_v43 = vmul.f32 %v9542_v48, %v9538_v50 }
0x4265   :  { %v6048_v12 = vpack.c.bf16 %v6045_v43, %v6045_v43 }
0x4266   :  { %v9544_v49 = vpop.eup %9543 }
0x4267   :  { %v6047_v36 = vmul.f32 %v9544_v49, %v9540_v34  ;;  %8998 = vmatmul.mubr.msk.bf16.vlgmr.msra.gmra.mxu1 %vm502_vm5, %v6048_v12 }
0x4268   :  { %9008 = vmatpush3.bf16.xpose.msra.mxu1 %v6154_v13  ;;  %9009 = vmatprep.mubr.msk.bf16.mxu1 %vm9738_vm4, %v9737_v6 }
0x4269   :  { %v6049_v23 = vpack.c.bf16 %v6047_v36, %v6047_v36  ;;  %9019 = vmatprep.subr.bf16.mxu1 %v9737_v6 }
0x426b   :  { %9004 = vmatmul.mubr.msk.bf16.vlgmr.msra.gmra.mxu0 %vm502_vm5, %v6049_v23 }
0x426c   :  { %9014 = vmatpush3.bf16.xpose.msra.mxu0 %v6204_v37  ;;  %9015 = vmatprep.mubr.msk.bf16.mxu0 %vm9738_vm4, %v9737_v6 }
0x426d   :  { %9025 = vmatprep.subr.bf16.mxu0 %v9737_v6 }
0x426f   :  { %9010 = vmatmul.mubr.msk.bf16.vlgmr.msra.gmra.mxu1 %vm502_vm5, %v6147_v29 }
0x4270   :  { %9021 = vmatprep.mubr.msk.bf16.mxu1 %vm9738_vm4, %v9737_v6 }
0x4273   :  { %9016 = vmatmul.mubr.msk.bf16.vlgmr.msra.gmra.mxu0 %vm502_vm5, %v6197_v0 }
0x4274   :  { %9027 = vmatprep.mubr.msk.bf16.mxu0 %vm9738_vm4, %v9737_v6 }
0x4327   :  { %v6092_v39 = vpop.f32.mrf.mxu1 }
0x4329   :  { %v8999_v14 = vpop.f32.mrf.mxu1 }
0x432b   :  { %v6095_v15 = vpop.f32.mrf.mxu1  ;;  %v6140_v32 = vpop.f32.mrf.mxu0 }
0x432c   :  { %v9280_v35 = vpack.i.bf16 %v6140_v32, %v6092_v39 }
0x432d   :  { %v9000_v18 = vpop.f32.mrf.mxu1  ;;  %v9005_v24 = vpop.f32.mrf.mxu0 }
0x432f   :  { %v6143_v52 = vpop.f32.mrf.mxu0  ;;  %v6190_v26 = vpop.f32.mrf.mxu1 }
0x4330   :  { %v6191_v28 = vadd.f32 %v6190_v26, %v10434_v45 }
0x4331   :  { %v9006_v38 = vpop.f32.mrf.mxu0  ;;  %v9011_v44 = vpop.f32.mrf.mxu1 }
0x4332   :  { %v6246_v5 = vsel %vm502_vm5, %v6191_v28, -inf }
0x4333   :  { %v6240_v57 = vpop.f32.mrf.mxu0  ;;  %6247 = vmax.xlane.f32.xlu1 %v6246_v5  ;;  %v6193_v16 = vpop.f32.mrf.mxu1 }
0x4334   :  { %v6241_v62 = vadd.f32 %v6240_v57, %v10434_v45 }
0x4335   :  { %v9012_v19 = vpop.f32.mrf.mxu1  ;;  %v9017_v58 = vpop.f32.mrf.mxu0 }
0x4336   :  { %v6249_v53 = vsel %vm502_vm5, %v6241_v62, -inf }
0x4337   :  { %6250 = vmax.xlane.f32.xlu0 %v6249_v53  ;;  %v6243_v41 = vpop.f32.mrf.mxu0 }
0x4339   :  { %v9018_v7 = vpop.f32.mrf.mxu0 }
0x4344   :  { %6270 = vrot.lane.b32.xlu1 %v10903_v30, %s9748_s17 }
0x4348   :  { %6403 = vrot.lane.b32.xlu1 %v10892_v8, %s9749_s18 }
0x434c   :  { %9276 = vrot.lane.b32.xlu1 %v9275_v59, %s9730_s28 }
0x4350   :  { %9281 = vrot.lane.b32.xlu1 %v9280_v35, %s9750_s6 }
0x4354   :  { %6401 = vrot.lane.b32.xlu1 %v10895_v42, %s9749_s18 }
0x43bc   :  { %v6248_v45 = vpop.xlane.xlu1 %6247 }
0x43bd   :  { %v6252_v56 = vsub.f32 %v6191_v28, %v6248_v45  ;;  %v11104_v45 = vld [vmem:[#allocation9 + $0x4c] ss:$12 sps:$4 sm:$0xff]  }
0x43bf   :  { %v6254_v31 = vmul.f32 1.442695, %v6252_v56 }
0x43c0   :  { %v6251_v60 = vpop.xlane.xlu0 %6250  ;;  %v6271_v61 = vpop.permute.xlu1 %6270 }
0x43c1   :  { %9545 = vpow2.f32 %v6254_v31  ;;  %v6253_v30 = vsub.f32 %v6241_v62, %v6251_v60  ;;  %v6276_v8 = vsel %vm627_vm6, %v6271_v61, 0 }
0x43c2   :  { %9020 = vmatpush3.bf16.msra.mxu1 %v6276_v8 }
0x43c3   :  { %v6256_v21 = vmul.f32 1.442695, %v6253_v30  ;;  %9031 = vmatprep.subr.bf16.mxu1 %v9737_v6 }
0x43c4   :  { %v6404_v27 = vpop.permute.xlu1 %6403 }
0x43c5   :  { %9547 = vpow2.f32 %v6256_v21 }
0x43c8   :  { %v9277_v20 = vpop.permute.xlu1 %9276 }
0x43c9   :  { %v9279_v29 = vunpack.i.h.bf16 %v9277_v20  ;;  %v9278_v0 = vunpack.i.l.bf16 %v9277_v20 }
0x43cb   :  { %v6391_v32 = vsel %vm502_vm5, %v10967_v25, %v9279_v29  ;;  %v6390_v18 = vsel %vm502_vm5, %v10965_v4, %v9278_v0  ;;  %v8058_v25 = vld [vmem:[#allocation10 + $0x25] ss:$0 sm:$0xff] }
0x43cc   :  { %v9282_v22 = vpop.permute.xlu1 %9281 }
0x43cd   :  { %v9284_v39 = vunpack.i.h.bf16 %v9282_v22  ;;  %v9283_v14 = vunpack.i.l.bf16 %v9282_v22 }
0x43ce   :  { %v9546_v17 = vpop.eup %9545 }
0x43cf   :  { %v6258_v9 = vsel %vm502_vm5, %v9546_v17, 0.0  ;;  %v6392_v26 = vsel %vm1407_vm7, %v6390_v18, %v9283_v14  ;;  %v6393_v28 = vsel %vm1407_vm7, %v6391_v32, %v9284_v39 }
0x43d0   :  { %6259 = vadd.xlane.f32.xlu0 %v6258_v9  ;;  %v6402_v48 = vpop.permute.xlu1 %6401 }
0x43d2   :  { %v9548_v59 = vpop.eup %9547 }
0x43d3   :  { %v6261_v42 = vsel %vm502_vm5, %v9548_v59, 0.0 }
0x43d4   :  { %6262 = vadd.xlane.f32.xlu0 %v6261_v42 }
0x43ea   :  { %6318 = vrot.lane.b32.xlu0 %v10907_v33, %s9748_s17 }
0x4459   :  { %v6260_v10 = vpop.xlane.xlu0 %6259 }
0x445a   :  { %9549 = vrcp.f32 %v6260_v10 }
0x445d   :  { %v6263_v40 = vpop.xlane.xlu0 %6262 }
0x445e   :  { %9551 = vrcp.f32 %v6263_v40 }
0x4461   :  { %v6319_v55 = vpop.permute.xlu0 %6318 }
0x4462   :  { %v6324_v3 = vsel %vm627_vm6, %v6319_v55, 0 }
0x4463   :  { %9026 = vmatpush3.bf16.msra.mxu0 %v6324_v3 }
0x4464   :  { %9039 = vmatprep.subr.bf16.mxu0 %v9737_v6 }
0x4467   :  { %v9550_v50 = vpop.eup %9549 }
0x4468   :  { %v6265_v54 = vmul.f32 %v9550_v50, %v9546_v17 }
0x446a   :  { %v6268_v34 = vpack.c.bf16 %v6265_v54, %v6265_v54 }
0x446b   :  { %v9552_v46 = vpop.eup %9551 }
0x446c   :  { %v6267_v11 = vmul.f32 %v9552_v46, %v9548_v59  ;;  %9022 = vmatmul.mubr.msk.bf16.vlgmr.msra.gmra.mxu1 %vm502_vm5, %v6268_v34  ;;  %v8062_v59 = vld [vmem:[#allocation10 + $0x28] ss:$0 sm:$0xff] }
0x446d   :  { %9032 = vmatpush3.bf16.msra.mxu1 %v6404_v27  ;;  %9035 = vmatprep.mubr.msk.bf16.mxu1 %vm9738_vm4, %v9737_v6 }
0x446e   :  { %v6269_v33 = vpack.c.bf16 %v6267_v11, %v6267_v11  ;;  %9033 = vmatprep.subr.bf16.mxu1 %v9737_v6  ;;  %v8060_v11 = vld [vmem:[#allocation10 + $0x26] ss:$0 sm:$0xff] }
0x4470   :  { %9028 = vmatmul.mubr.msk.bf16.vlgmr.msra.gmra.mxu0 %vm502_vm5, %v6269_v33 }
0x4471   :  { %9043 = vmatprep.mubr.msk.bf16.mxu0 %vm9738_vm4, %v9737_v6  ;;  %9034 = vmatpush3.bf16.msra.mxu1 %v6402_v48  ;;  %v8061_v48 = vld [vmem:[#allocation10 + $0x27] ss:$0 sm:$0xff] }
0x4472   :  { %9047 = vmatprep.subr.bf16.mxu1 %v9737_v6  ;;  %9040 = vmatpush3.bf16.msra.mxu0 %v11104_v45 }
0x4473   :  { %9041 = vmatprep.subr.bf16.mxu0 %v9737_v6 }
0x452c   :  { %v6312_v1 = vpop.f32.mrf.mxu1 }
0x452e   :  { %v9023_v43 = vpop.f32.mrf.mxu1 }
0x4530   :  { %v6315_v12 = vpop.f32.mrf.mxu1  ;;  %v6360_v49 = vpop.f32.mrf.mxu0 }
0x4531   :  { %v9285_v13 = vpack.i.bf16 %v6360_v49, %v6312_v1 }
0x4532   :  { %v9024_v36 = vpop.f32.mrf.mxu1  ;;  %v9029_v47 = vpop.f32.mrf.mxu0 }
0x4533   :  { %9286 = vrot.lane.b32.xlu0 %v9285_v13, %s9751_s0 }
0x4534   :  { %v6363_v23 = vpop.f32.mrf.mxu0 }
0x4536   :  { %v9030_v37 = vpop.f32.mrf.mxu0 }
0x45a5   :  { %v9287_v15 = vpop.permute.xlu0 %9286 }
0x45a6   :  { %v9289_v24 = vunpack.i.h.bf16 %v9287_v15  ;;  %v9288_v52 = vunpack.i.l.bf16 %v9287_v15 }
0x45a8   :  { %v6395_v38 = vsel %vm1410_vm8, %v6393_v28, %v9289_v24  ;;  %v6394_v44 = vsel %vm1410_vm8, %v6392_v26, %v9288_v52 }
0x45a9   :  { %v6396_v5 = vpack.c.bf16 %v6395_v38, %v6394_v44 }
0x45ab   :  { %9036 = vmatmul.mubr.msk.bf16.vlgmr.msra.gmra.mxu1 %vm218_vm2, %v6396_v5 }
0x45ac   :  { %9051 = vmatprep.mubr.msk.bf16.mxu1 %vm9738_vm4, %v9737_v6 }
0x466b   :  { %v6444_v57 = vpop.f32.mrf.mxu1 }
0x466c   :  { %v6445_v16 = vadd.f32 %v8058_v25, %v6444_v57 }
0x466d   :  { %v9037_v4 = vpop.f32.mrf.mxu1 }
0x466e   :  { %v11095_v62 = vadd.f32 %v6445_v16, %v10879_v2  ;;  %v11108_v2 = vld [vmem:[#allocation9 + $0x34] ss:$12 sps:$4 sm:$0xff]  }
0x466f   :  { %v6447_v19 = vpop.f32.mrf.mxu1  ;;  %9042 = vmatpush3.bf16.msra.mxu0 %v11108_v2 }
0x4670   :  { %v6448_v58 = vadd.f32 %v8058_v25, %v6447_v19  ;;  %v6453_v53 = vsel %vm218_vm2, %v11095_v62, 0.0  ;;  %9055 = vmatprep.subr.bf16.mxu0 %v9737_v6 }
0x4671   :  { %6454 = vadd.xlane.f32.xlu0 %v6453_v53  ;;  %v9038_v41 = vpop.f32.mrf.mxu1 }
0x4672   :  { %v11100_v7 = vadd.f32 %v6448_v58, %v10884_v63 }
0x4674   :  { %v6456_v35 = vsel %vm218_vm2, %v11100_v7, 0.0 }
0x4675   :  { %6457 = vadd.xlane.f32.xlu1 %v6456_v35 }
0x4686   :  { %6551 = vrot.lane.b32.xlu1 %v11108_v2, %s9739_s1 }
0x468a   :  { %6558 = vrot.lane.b32.xlu1 %v8062_v59, %s9739_s1 }
0x46fa   :  { %v6455_v63 = vpop.xlane.xlu0 %6454 }
0x46fb   :  { %v6459_v56 = vmul.f32 0.03125, %v6455_v63 }
0x46fd   :  { %v6461_v31 = vsub.f32 %v11095_v62, %v6459_v56 }
0x46fe   :  { %v6458_v60 = vpop.xlane.xlu1 %6457 }
0x46ff   :  { %v6460_v61 = vmul.f32 0.03125, %v6458_v60  ;;  %v6463_v30 = vmul.f32 %v6461_v31, %v6461_v31 }
0x4701   :  { %v6462_v8 = vsub.f32 %v11100_v7, %v6460_v61  ;;  %v6465_v21 = vsel %vm218_vm2, %v6463_v30, 0.0 }
0x4702   :  { %6466 = vadd.xlane.f32.xlu0 %v6465_v21  ;;  %v6552_v34 = vpop.permute.xlu1 %6551 }
0x4703   :  { %v6464_v17 = vmul.f32 %v6462_v8, %v6462_v8 }
0x4705   :  { %v6468_v9 = vsel %vm218_vm2, %v6464_v17, 0.0 }
0x4706   :  { %6469 = vadd.xlane.f32.xlu0 %v6468_v9 }
0x471c   :  { %6553 = vrot.lane.b32.xlu0 %v11104_v45, %s9739_s1 }
0x478b   :  { %v6467_v42 = vpop.xlane.xlu0 %6466 }
0x478c   :  { %v6471_v10 = vmul.f32 0.03125, %v6467_v42 }
0x478e   :  { %v6473_v40 = vadd.f32 1e-05, %v6471_v10 }
0x478f   :  { %v6470_v55 = vpop.xlane.xlu0 %6469 }
0x4790   :  { %9553 = vrsqrt.f32 %v6473_v40  ;;  %v6472_v3 = vmul.f32 0.03125, %v6470_v55 }
0x4792   :  { %v6474_v50 = vadd.f32 1e-05, %v6472_v3 }
0x4793   :  { %v6554_v54 = vpop.permute.xlu0 %6553 }
0x4794   :  { %9555 = vrsqrt.f32 %v6474_v50  ;;  %9048 = vmatpush3.bf16.msra.mxu1 %v6554_v54 }
0x4795   :  { %9049 = vmatprep.subr.bf16.mxu1 %v9737_v6 }
0x4798   :  { %9050 = vmatpush3.bf16.msra.mxu1 %v6552_v34 }
0x4799   :  { %9061 = vmatprep.subr.bf16.mxu1 %v9737_v6 }
0x479b   :  { %9052 = vmatmul.mubr.msk.bf16.vlgmr.msra.gmra.mxu1 %vm218_vm2, %v10647_v51  ;;  %v6559_v51 = vpop.permute.xlu1 %6558 }
0x479c   :  { %9063 = vmatprep.mubr.msk.bf16.mxu1 %vm9738_vm4, %v9737_v6 }
0x479d   :  { %v9554_v46 = vpop.eup %9553 }
0x479e   :  { %v6477_v27 = vmul.f32 %v9554_v46, %v6461_v31 }
0x47a0   :  { %v6484_v20 = vmul.f32 %v8060_v11, %v6477_v27 }
0x47a1   :  { %v9556_v33 = vpop.eup %9555 }
0x47a2   :  { %v6478_v22 = vmul.f32 %v9556_v33, %v6462_v8  ;;  %v6491_v43 = vadd.f32 %v8061_v48, %v6484_v20 }
0x47a4   :  { %v6485_v1 = vmul.f32 %v8060_v11, %v6478_v22 }
0x47a6   :  { %v6492_v12 = vadd.f32 %v8061_v48, %v6485_v1 }
0x47a8   :  { %v6494_v49 = vpack.c.bf16 %v6492_v12, %v6491_v43 }
0x47aa   :  { %9044 = vmatmul.mubr.msk.bf16.vlgmr.msra.gmra.mxu0 %vm218_vm2, %v6494_v49 }
0x47ab   :  { %9057 = vmatprep.mubr.msk.bf16.mxu0 %vm9738_vm4, %v9737_v6 }
0x485b   :  { %v6595_v13 = vpop.f32.mrf.mxu1 }
0x485c   :  { %v6596_v36 = vadd.f32 %v6595_v13, %v6559_v51 }
0x485d   :  { %v9053_v47 = vpop.f32.mrf.mxu1 }
0x485e   :  { %v11130_v23 = vpack.c.bf16 %v6596_v36, %v6596_v36 }
0x485f   :  { %v6598_v37 = vpop.f32.mrf.mxu1 }
0x4860   :  { %v6599_v29 = vadd.f32 %v6598_v37, %v6559_v51  ;;  %v6613_v0 = vsel %vm502_vm5, %v11130_v23, 0 }
0x4861   :  { %v9054_v39 = vpop.f32.mrf.mxu1  ;;  %9056 = vmatpush3.bf16.xpose.msra.mxu0 %v6613_v0 }
0x4862   :  { %v11134_v14 = vpack.c.bf16 %v6599_v29, %v6599_v29  ;;  %9067 = vmatprep.subr.bf16.mxu0 %v9737_v6 }
0x4864   :  { %v6659_v15 = vsel %vm502_vm5, %v11134_v14, 0 }
0x4865   :  { %9062 = vmatpush3.bf16.xpose.msra.mxu1 %v6659_v15 }
0x4866   :  { %9073 = vmatprep.subr.bf16.mxu1 %v9737_v6 }
0x486a   :  { %v6544_v32 = vpop.f32.mrf.mxu0 }
0x486b   :  { %v6545_v18 = vadd.f32 %v8062_v59, %v6544_v32 }
0x486c   :  { %v9045_v24 = vpop.f32.mrf.mxu0 }
0x486d   :  { %v6603_v52 = vmul.f32 0.35355338, %v6545_v18 }
0x486e   :  { %v6547_v26 = vpop.f32.mrf.mxu0 }
0x486f   :  { %v11140_v28 = vpack.c.bf16 %v6603_v52, %v6603_v52  ;;  %v6548_v38 = vadd.f32 %v8062_v59, %v6547_v26 }
0x4870   :  { %v9046_v44 = vpop.f32.mrf.mxu0 }
0x4871   :  { %v6604_v5 = vmul.f32 0.35355338, %v6548_v38  ;;  %9058 = vmatmul.mubr.msk.bf16.vlgmr.msra.gmra.mxu0 %vm502_vm5, %v11140_v28 }
0x4872   :  { %9069 = vmatprep.mubr.msk.bf16.mxu0 %vm9738_vm4, %v9737_v6 }
0x4873   :  { %v11146_v25 = vpack.c.bf16 %v6604_v5, %v6604_v5 }
0x4875   :  { %9064 = vmatmul.mubr.msk.bf16.vlgmr.msra.gmra.mxu1 %vm502_vm5, %v11146_v25 }
0x4876   :  { %9075 = vmatprep.mubr.msk.bf16.mxu1 %vm9738_vm4, %v9737_v6 }
0x4931   :  { %v6649_v57 = vpop.f32.mrf.mxu0 }
0x4932   :  { %v6701_v16 = vsel %vm502_vm5, %v6649_v57, -inf }
0x4933   :  { %6702 = vmax.xlane.f32.xlu1 %v6701_v16  ;;  %v9059_v4 = vpop.f32.mrf.mxu0 }
0x4935   :  { %v6652_v19 = vpop.f32.mrf.mxu0  ;;  %v6695_v58 = vpop.f32.mrf.mxu1 }
0x4936   :  { %v6704_v53 = vsel %vm502_vm5, %v6695_v58, -inf }
0x4937   :  { %v9060_v41 = vpop.f32.mrf.mxu0  ;;  %6705 = vmax.xlane.f32.xlu0 %v6704_v53  ;;  %v9065_v35 = vpop.f32.mrf.mxu1 }
0x4939   :  { %v6698_v63 = vpop.f32.mrf.mxu1 }
0x493b   :  { %v9066_v56 = vpop.f32.mrf.mxu1 }
0x4944   :  { %6726 = vrot.lane.b32.xlu1 %v11130_v23, %s9739_s1 }
0x4948   :  { %6826 = vrot.lane.b32.xlu1 %v11130_v23, %s9741_s8 }
0x494c   :  { %6877 = vrot.lane.b32.xlu1 %v11134_v14, %s9741_s8 }
0x4950   :  { %6824 = vrot.lane.b32.xlu1 %v11140_v28, %s9741_s8 }
0x49bc   :  { %v6703_v31 = vpop.xlane.xlu1 %6702 }
0x49bd   :  { %v6707_v60 = vsub.f32 %v6649_v57, %v6703_v31 }
0x49bf   :  { %v6709_v61 = vmul.f32 1.442695, %v6707_v60 }
0x49c0   :  { %v6727_v30 = vpop.permute.xlu1 %6726  ;;  %v6706_v8 = vpop.xlane.xlu0 %6705 }
0x49c1   :  { %9557 = vpow2.f32 %v6709_v61  ;;  %v6732_v21 = vsel %vm627_vm6, %v6727_v30, 0  ;;  %v6708_v17 = vsub.f32 %v6695_v58, %v6706_v8 }
0x49c2   :  { %9068 = vmatpush3.bf16.msra.mxu0 %v6732_v21 }
0x49c3   :  { %v6711_v9 = vmul.f32 1.442695, %v6708_v17  ;;  %9079 = vmatprep.subr.bf16.mxu0 %v9737_v6 }
0x49c4   :  { %v6827_v46 = vpop.permute.xlu1 %6826 }
0x49c5   :  { %9559 = vpow2.f32 %v6711_v9  ;;  %v6832_v20 = vsel %vm502_vm5, %v6827_v46, 0 }
0x49c8   :  { %v6878_v48 = vpop.permute.xlu1 %6877 }
0x49c9   :  { %v6883_v43 = vsel %vm502_vm5, %v6878_v48, 0 }
0x49cc   :  { %v6825_v12 = vpop.permute.xlu1 %6824 }
0x49ce   :  { %v9558_v59 = vpop.eup %9557 }
0x49cf   :  { %v6713_v42 = vsel %vm502_vm5, %v9558_v59, 0.0 }
0x49d0   :  { %6714 = vadd.xlane.f32.xlu0 %v6713_v42 }
0x49d2   :  { %v9560_v10 = vpop.eup %9559 }
0x49d3   :  { %v6716_v40 = vsel %vm502_vm5, %v9560_v10, 0.0 }
0x49d4   :  { %6717 = vadd.xlane.f32.xlu0 %v6716_v40 }
0x49ea   :  { %6775 = vrot.lane.b32.xlu0 %v11134_v14, %s9739_s1 }
0x49ee   :  { %6875 = vrot.lane.b32.xlu0 %v11146_v25, %s9741_s8 }
0x4a59   :  { %v6715_v55 = vpop.xlane.xlu0 %6714 }
0x4a5a   :  { %9561 = vrcp.f32 %v6715_v55 }
0x4a5d   :  { %v6718_v3 = vpop.xlane.xlu0 %6717 }
0x4a5e   :  { %9563 = vrcp.f32 %v6718_v3 }
0x4a61   :  { %v6776_v50 = vpop.permute.xlu0 %6775 }
0x4a62   :  { %v6781_v54 = vsel %vm627_vm6, %v6776_v50, 0 }
0x4a63   :  { %9074 = vmatpush3.bf16.msra.mxu1 %v6781_v54 }
0x4a64   :  { %9085 = vmatprep.subr.bf16.mxu1 %v9737_v6 }
0x4a65   :  { %v6876_v49 = vpop.permute.xlu0 %6875 }
0x4a67   :  { %v9562_v34 = vpop.eup %9561 }
0x4a68   :  { %v6720_v27 = vmul.f32 %v9562_v34, %v9558_v59 }
0x4a6a   :  { %v6723_v11 = vpack.c.bf16 %v6720_v27, %v6720_v27 }
0x4a6b   :  { %v9564_v33 = vpop.eup %9563 }
0x4a6c   :  { %v6722_v22 = vmul.f32 %v9564_v33, %v9560_v10  ;;  %9070 = vmatmul.mubr.msk.bf16.vlgmr.msra.gmra.mxu0 %vm502_vm5, %v6723_v11 }
0x4a6d   :  { %9080 = vmatpush3.bf16.xpose.msra.mxu0 %v6832_v20  ;;  %9081 = vmatprep.mubr.msk.bf16.mxu0 %vm9738_vm4, %v9737_v6 }
0x4a6e   :  { %v6724_v1 = vpack.c.bf16 %v6722_v22, %v6722_v22  ;;  %9091 = vmatprep.subr.bf16.mxu0 %v9737_v6 }
0x4a70   :  { %9076 = vmatmul.mubr.msk.bf16.vlgmr.msra.gmra.mxu1 %vm502_vm5, %v6724_v1 }
0x4a71   :  { %9086 = vmatpush3.bf16.xpose.msra.mxu1 %v6883_v43  ;;  %9087 = vmatprep.mubr.msk.bf16.mxu1 %vm9738_vm4, %v9737_v6 }
0x4a72   :  { %9097 = vmatprep.subr.bf16.mxu1 %v9737_v6 }
0x4a74   :  { %9082 = vmatmul.mubr.msk.bf16.vlgmr.msra.gmra.mxu0 %vm502_vm5, %v6825_v12 }
0x4a75   :  { %9093 = vmatprep.mubr.msk.bf16.mxu0 %vm9738_vm4, %v9737_v6 }
0x4a78   :  { %9088 = vmatmul.mubr.msk.bf16.vlgmr.msra.gmra.mxu1 %vm502_vm5, %v6876_v49 }
0x4a79   :  { %9099 = vmatprep.mubr.msk.bf16.mxu1 %vm9738_vm4, %v9737_v6 }
0x4b2c   :  { %v11188_v51 = vpop.f32.mrf.mxu0 }
0x4b2e   :  { %v9071_v13 = vpop.f32.mrf.mxu0 }
0x4b30   :  { %v6771_v36 = vpop.f32.mrf.mxu0  ;;  %v11190_v47 = vpop.f32.mrf.mxu1 }
0x4b32   :  { %v9072_v37 = vpop.f32.mrf.mxu0  ;;  %v9077_v29 = vpop.f32.mrf.mxu1 }
0x4b34   :  { %v6820_v0 = vpop.f32.mrf.mxu1  ;;  %v6868_v39 = vpop.f32.mrf.mxu0 }
0x4b35   :  { %v6925_v15 = vsel %vm502_vm5, %v6868_v39, -inf }
0x4b36   :  { %6926 = vmax.xlane.f32.xlu1 %v6925_v15  ;;  %v9078_v32 = vpop.f32.mrf.mxu1  ;;  %v9083_v18 = vpop.f32.mrf.mxu0 }
0x4b38   :  { %v6871_v24 = vpop.f32.mrf.mxu0  ;;  %v6919_v52 = vpop.f32.mrf.mxu1 }
0x4b39   :  { %v6928_v26 = vsel %vm502_vm5, %v6919_v52, -inf }
0x4b3a   :  { %v9084_v38 = vpop.f32.mrf.mxu0  ;;  %6929 = vmax.xlane.f32.xlu0 %v6928_v26  ;;  %v9089_v44 = vpop.f32.mrf.mxu1 }
0x4b3c   :  { %v6922_v5 = vpop.f32.mrf.mxu1 }
0x4b3e   :  { %v9090_v57 = vpop.f32.mrf.mxu1 }
0x4b47   :  { %6949 = vrot.lane.b32.xlu1 %v11130_v23, %s9740_s12 }
0x4b4b   :  { %7047 = vrot.lane.b32.xlu1 %v11130_v23, %s9744_s15 }
0x4b4f   :  { %7097 = vrot.lane.b32.xlu1 %v11134_v14, %s9744_s15 }
0x4b53   :  { %7045 = vrot.lane.b32.xlu1 %v11140_v28, %s9744_s15 }
0x4bbf   :  { %v6927_v16 = vpop.xlane.xlu1 %6926 }
0x4bc0   :  { %v6931_v4 = vsub.f32 %v6868_v39, %v6927_v16 }
0x4bc2   :  { %v6933_v19 = vmul.f32 1.442695, %v6931_v4 }
0x4bc3   :  { %v6950_v58 = vpop.permute.xlu1 %6949  ;;  %v6930_v53 = vpop.xlane.xlu0 %6929 }
0x4bc4   :  { %9565 = vpow2.f32 %v6933_v19  ;;  %v6955_v41 = vsel %vm627_vm6, %v6950_v58, 0  ;;  %v6932_v35 = vsub.f32 %v6919_v52, %v6930_v53 }
0x4bc5   :  { %9092 = vmatpush3.bf16.msra.mxu0 %v6955_v41 }
0x4bc6   :  { %v6935_v63 = vmul.f32 1.442695, %v6932_v35  ;;  %9103 = vmatprep.subr.bf16.mxu0 %v9737_v6 }
0x4bc7   :  { %v7048_v59 = vpop.permute.xlu1 %7047 }
0x4bc8   :  { %9567 = vpow2.f32 %v6935_v63  ;;  %v7053_v55 = vsel %vm502_vm5, %v7048_v59, 0 }
0x4bcb   :  { %v7098_v50 = vpop.permute.xlu1 %7097 }
0x4bcc   :  { %v7103_v34 = vsel %vm502_vm5, %v7098_v50, 0 }
0x4bcf   :  { %v7046_v46 = vpop.permute.xlu1 %7045 }
0x4bd1   :  { %v9566_v56 = vpop.eup %9565 }
0x4bd2   :  { %v6937_v31 = vsel %vm502_vm5, %v9566_v56, 0.0 }
0x4bd3   :  { %6938 = vadd.xlane.f32.xlu0 %v6937_v31 }
0x4bd5   :  { %v9568_v60 = vpop.eup %9567 }
0x4bd6   :  { %v6940_v61 = vsel %vm502_vm5, %v9568_v60, 0.0 }
0x4bd7   :  { %6941 = vadd.xlane.f32.xlu0 %v6940_v61 }
0x4bed   :  { %6997 = vrot.lane.b32.xlu0 %v11134_v14, %s9740_s12 }
0x4bf1   :  { %7095 = vrot.lane.b32.xlu0 %v11146_v25, %s9744_s15 }
0x4c5c   :  { %v6939_v30 = vpop.xlane.xlu0 %6938 }
0x4c5d   :  { %9569 = vrcp.f32 %v6939_v30 }
0x4c60   :  { %v6942_v8 = vpop.xlane.xlu0 %6941 }
0x4c61   :  { %9571 = vrcp.f32 %v6942_v8 }
0x4c64   :  { %v6998_v21 = vpop.permute.xlu0 %6997 }
0x4c65   :  { %v7003_v17 = vsel %vm627_vm6, %v6998_v21, 0 }
0x4c66   :  { %9098 = vmatpush3.bf16.msra.mxu1 %v7003_v17 }
0x4c67   :  { %9109 = vmatprep.subr.bf16.mxu1 %v9737_v6 }
0x4c68   :  { %v7096_v27 = vpop.permute.xlu0 %7095 }
0x4c6a   :  { %v9570_v9 = vpop.eup %9569 }
0x4c6b   :  { %v6944_v42 = vmul.f32 %v9570_v9, %v9566_v56 }
0x4c6d   :  { %v6947_v10 = vpack.c.bf16 %v6944_v42, %v6944_v42 }
0x4c6e   :  { %v9572_v40 = vpop.eup %9571 }
0x4c6f   :  { %v6946_v3 = vmul.f32 %v9572_v40, %v9568_v60  ;;  %9094 = vmatmul.mubr.msk.bf16.vlgmr.msra.gmra.mxu0 %vm502_vm5, %v6947_v10 }
0x4c70   :  { %9104 = vmatpush3.bf16.xpose.msra.mxu0 %v7053_v55  ;;  %9105 = vmatprep.mubr.msk.bf16.mxu0 %vm9738_vm4, %v9737_v6 }
0x4c71   :  { %v6948_v54 = vpack.c.bf16 %v6946_v3, %v6946_v3  ;;  %9115 = vmatprep.subr.bf16.mxu0 %v9737_v6 }
0x4c73   :  { %9100 = vmatmul.mubr.msk.bf16.vlgmr.msra.gmra.mxu1 %vm502_vm5, %v6948_v54 }
0x4c74   :  { %9110 = vmatpush3.bf16.xpose.msra.mxu1 %v7103_v34  ;;  %9111 = vmatprep.mubr.msk.bf16.mxu1 %vm9738_vm4, %v9737_v6 }
0x4c75   :  { %9121 = vmatprep.subr.bf16.mxu1 %v9737_v6 }
0x4c77   :  { %9106 = vmatmul.mubr.msk.bf16.vlgmr.msra.gmra.mxu0 %vm502_vm5, %v7046_v46 }
0x4c78   :  { %9117 = vmatprep.mubr.msk.bf16.mxu0 %vm9738_vm4, %v9737_v6 }
0x4c7b   :  { %9112 = vmatmul.mubr.msk.bf16.vlgmr.msra.gmra.mxu1 %vm502_vm5, %v7096_v27 }
0x4c7c   :  { %9123 = vmatprep.mubr.msk.bf16.mxu1 %vm9738_vm4, %v9737_v6 }
0x4d2f   :  { %v11228_v11 = vpop.f32.mrf.mxu0 }
0x4d31   :  { %v9095_v33 = vpop.f32.mrf.mxu0 }
0x4d33   :  { %v6994_v20 = vpop.f32.mrf.mxu0  ;;  %v11230_v22 = vpop.f32.mrf.mxu1 }
0x4d34   :  { %v9290_v48 = vpack.i.bf16 %v11230_v22, %v11228_v11 }
0x4d35   :  { %v9096_v1 = vpop.f32.mrf.mxu0  ;;  %v9101_v43 = vpop.f32.mrf.mxu1 }
0x4d37   :  { %v7042_v12 = vpop.f32.mrf.mxu1  ;;  %v7089_v49 = vpop.f32.mrf.mxu0 }
0x4d38   :  { %v7145_v13 = vsel %vm502_vm5, %v7089_v49, -inf }
0x4d39   :  { %7146 = vmax.xlane.f32.xlu1 %v7145_v13  ;;  %v9102_v36 = vpop.f32.mrf.mxu1  ;;  %v9107_v37 = vpop.f32.mrf.mxu0 }
0x4d3b   :  { %v7092_v29 = vpop.f32.mrf.mxu0  ;;  %v7139_v0 = vpop.f32.mrf.mxu1 }
0x4d3c   :  { %v7148_v39 = vsel %vm502_vm5, %v7139_v0, -inf }
0x4d3d   :  { %v9108_v15 = vpop.f32.mrf.mxu0  ;;  %7149 = vmax.xlane.f32.xlu0 %v7148_v39  ;;  %v9113_v32 = vpop.f32.mrf.mxu1 }
0x4d3f   :  { %v7142_v18 = vpop.f32.mrf.mxu1 }
0x4d41   :  { %v9114_v24 = vpop.f32.mrf.mxu1 }
0x4d4a   :  { %7169 = vrot.lane.b32.xlu1 %v11130_v23, %s9743_s14 }
0x4d4e   :  { %7267 = vrot.lane.b32.xlu1 %v11130_v23, %s9747_s16 }
0x4d52   :  { %7317 = vrot.lane.b32.xlu1 %v11134_v14, %s9747_s16 }
0x4d56   :  { %7265 = vrot.lane.b32.xlu1 %v11140_v28, %s9747_s16 }
0x4dc2   :  { %v7147_v52 = vpop.xlane.xlu1 %7146 }
0x4dc3   :  { %v7151_v26 = vsub.f32 %v7089_v49, %v7147_v52 }
0x4dc5   :  { %v7153_v38 = vmul.f32 1.442695, %v7151_v26 }
0x4dc6   :  { %v7170_v44 = vpop.permute.xlu1 %7169  ;;  %v7150_v5 = vpop.xlane.xlu0 %7149 }
0x4dc7   :  { %9573 = vpow2.f32 %v7153_v38  ;;  %v7175_v57 = vsel %vm627_vm6, %v7170_v44, 0  ;;  %v7152_v16 = vsub.f32 %v7139_v0, %v7150_v5 }
0x4dc8   :  { %9116 = vmatpush3.bf16.msra.mxu0 %v7175_v57 }
0x4dc9   :  { %v7155_v4 = vmul.f32 1.442695, %v7152_v16  ;;  %9127 = vmatprep.subr.bf16.mxu0 %v9737_v6 }
0x4dca   :  { %v7268_v60 = vpop.permute.xlu1 %7267 }
0x4dcb   :  { %9575 = vpow2.f32 %v7155_v4  ;;  %v7273_v21 = vsel %vm502_vm5, %v7268_v60, 0 }
0x4dd4   :  { %v9574_v19 = vpop.eup %9573 }
0x4dd5   :  { %v7157_v58 = vsel %vm502_vm5, %v9574_v19, 0.0 }
0x4dd6   :  { %7158 = vadd.xlane.f32.xlu0 %v7157_v58 }
0x4dd8   :  { %v9576_v53 = vpop.eup %9575 }
0x4dd9   :  { %v7160_v28 = vsel %vm502_vm5, %v9576_v53, 0.0 }
0x4dda   :  { %7161 = vadd.xlane.f32.xlu0 %v7160_v28 }
0x4df0   :  { %7217 = vrot.lane.b32.xlu0 %v11134_v14, %s9743_s14 }
0x4df4   :  { %7315 = vrot.lane.b32.xlu0 %v11146_v25, %s9747_s16  ;;  %v7318_v25 = vpop.permute.xlu1 %7317 }
0x4df5   :  { %v7323_v59 = vsel %vm502_vm5, %v7318_v25, 0 }
0x4df8   :  { %v7266_v42 = vpop.permute.xlu1 %7265 }
0x4e5f   :  { %v7159_v41 = vpop.xlane.xlu0 %7158 }
0x4e60   :  { %9577 = vrcp.f32 %v7159_v41 }
0x4e63   :  { %v7162_v35 = vpop.xlane.xlu0 %7161 }
0x4e64   :  { %9579 = vrcp.f32 %v7162_v35 }
0x4e67   :  { %v7218_v63 = vpop.permute.xlu0 %7217 }
0x4e68   :  { %v7223_v56 = vsel %vm627_vm6, %v7218_v63, 0 }
0x4e69   :  { %9122 = vmatpush3.bf16.msra.mxu1 %v7223_v56 }
0x4e6a   :  { %9133 = vmatprep.subr.bf16.mxu1 %v9737_v6 }
0x4e6b   :  { %v7316_v10 = vpop.permute.xlu0 %7315 }
0x4e6d   :  { %v9578_v31 = vpop.eup %9577 }
0x4e6e   :  { %v7164_v61 = vmul.f32 %v9578_v31, %v9574_v19 }
0x4e70   :  { %v7167_v30 = vpack.c.bf16 %v7164_v61, %v7164_v61 }
0x4e71   :  { %v9580_v8 = vpop.eup %9579 }
0x4e72   :  { %v7166_v17 = vmul.f32 %v9580_v8, %v9576_v53  ;;  %9118 = vmatmul.mubr.msk.bf16.vlgmr.msra.gmra.mxu0 %vm502_vm5, %v7167_v30 }
0x4e73   :  { %9128 = vmatpush3.bf16.xpose.msra.mxu0 %v7273_v21  ;;  %9129 = vmatprep.mubr.msk.bf16.mxu0 %vm9738_vm4, %v9737_v6 }
0x4e74   :  { %v7168_v9 = vpack.c.bf16 %v7166_v17, %v7166_v17  ;;  %9139 = vmatprep.subr.bf16.mxu0 %v9737_v6 }
0x4e76   :  { %9124 = vmatmul.mubr.msk.bf16.vlgmr.msra.gmra.mxu1 %vm502_vm5, %v7168_v9 }
0x4e77   :  { %9134 = vmatpush3.bf16.xpose.msra.mxu1 %v7323_v59  ;;  %9135 = vmatprep.mubr.msk.bf16.mxu1 %vm9738_vm4, %v9737_v6 }
0x4e78   :  { %9145 = vmatprep.subr.bf16.mxu1 %v9737_v6 }
0x4e7a   :  { %9130 = vmatmul.mubr.msk.bf16.vlgmr.msra.gmra.mxu0 %vm502_vm5, %v7266_v42 }
0x4e7b   :  { %9141 = vmatprep.mubr.msk.bf16.mxu0 %vm9738_vm4, %v9737_v6 }
0x4e7e   :  { %9136 = vmatmul.mubr.msk.bf16.vlgmr.msra.gmra.mxu1 %vm502_vm5, %v7316_v10 }
0x4e7f   :  { %9147 = vmatprep.mubr.msk.bf16.mxu1 %vm9738_vm4, %v9737_v6 }
0x4f32   :  { %v7211_v40 = vpop.f32.mrf.mxu0 }
0x4f34   :  { %v9119_v55 = vpop.f32.mrf.mxu0 }
0x4f36   :  { %v7214_v3 = vpop.f32.mrf.mxu0  ;;  %v7259_v50 = vpop.f32.mrf.mxu1 }
0x4f37   :  { %v9295_v0 = vpack.i.bf16 %v7259_v50, %v7211_v40 }
0x4f38   :  { %v9120_v54 = vpop.f32.mrf.mxu0  ;;  %v9125_v34 = vpop.f32.mrf.mxu1 }
0x4f3a   :  { %v7262_v46 = vpop.f32.mrf.mxu1  ;;  %v7309_v27 = vpop.f32.mrf.mxu0 }
0x4f3b   :  { %v7365_v33 = vsel %vm502_vm5, %v7309_v27, -inf }
0x4f3c   :  { %7366 = vmax.xlane.f32.xlu1 %v7365_v33  ;;  %v9126_v20 = vpop.f32.mrf.mxu1  ;;  %v9131_v1 = vpop.f32.mrf.mxu0 }
0x4f3e   :  { %v7312_v43 = vpop.f32.mrf.mxu0  ;;  %v7359_v12 = vpop.f32.mrf.mxu1 }
0x4f3f   :  { %v7368_v49 = vsel %vm502_vm5, %v7359_v12, -inf }
0x4f40   :  { %v9132_v13 = vpop.f32.mrf.mxu0  ;;  %7369 = vmax.xlane.f32.xlu0 %v7368_v49  ;;  %v9137_v36 = vpop.f32.mrf.mxu1 }
0x4f42   :  { %v7362_v37 = vpop.f32.mrf.mxu1 }
0x4f44   :  { %v9138_v29 = vpop.f32.mrf.mxu1 }
0x4f4d   :  { %7389 = vrot.lane.b32.xlu1 %v11130_v23, %s9746_s27 }
0x4f51   :  { %7522 = vrot.lane.b32.xlu1 %v11104_v45, %s9749_s18 }
0x4f55   :  { %9291 = vrot.lane.b32.xlu1 %v9290_v48, %s9730_s28 }
0x4f59   :  { %9296 = vrot.lane.b32.xlu1 %v9295_v0, %s9750_s6 }
0x4f5d   :  { %7520 = vrot.lane.b32.xlu1 %v11108_v2, %s9749_s18 }
0x4fc5   :  { %v7367_v39 = vpop.xlane.xlu1 %7366 }
0x4fc6   :  { %v7371_v15 = vsub.f32 %v7309_v27, %v7367_v39 }
0x4fc8   :  { %v7373_v32 = vmul.f32 1.442695, %v7371_v15 }
0x4fc9   :  { %v7390_v18 = vpop.permute.xlu1 %7389  ;;  %v7370_v24 = vpop.xlane.xlu0 %7369 }
0x4fca   :  { %9581 = vpow2.f32 %v7373_v32  ;;  %v7395_v23 = vsel %vm627_vm6, %v7390_v18, 0  ;;  %v7372_v45 = vsub.f32 %v7359_v12, %v7370_v24 }
0x4fcb   :  { %9140 = vmatpush3.bf16.msra.mxu0 %v7395_v23 }
0x4fcc   :  { %v7375_v52 = vmul.f32 1.442695, %v7372_v45  ;;  %9151 = vmatprep.subr.bf16.mxu0 %v9737_v6 }
0x4fcd   :  { %v7523_v58 = vpop.permute.xlu1 %7522 }
0x4fce   :  { %9583 = vpow2.f32 %v7375_v52  ;;  %v9349_v52 = vld [vmem:[#allocation9 + $0x50] ss:$12 sps:$4 sm:$0xff]  }
0x4fd1   :  { %v9292_v28 = vpop.permute.xlu1 %9291 }
0x4fd2   :  { %v9294_v25 = vunpack.i.h.bf16 %v9292_v28  ;;  %v9293_v9 = vunpack.i.l.bf16 %v9292_v28 }
0x4fd4   :  { %v7510_v40 = vsel %vm502_vm5, %v11190_v47, %v9294_v25  ;;  %v7509_v55 = vsel %vm502_vm5, %v11188_v51, %v9293_v9  ;;  %v8083_v47 = vld [vmem:[#allocation10 + $0x29] ss:$0 sm:$0xff] }
0x4fd5   :  { %v9297_v41 = vpop.permute.xlu1 %9296 }
0x4fd6   :  { %v9299_v59 = vunpack.i.h.bf16 %v9297_v41  ;;  %v9298_v42 = vunpack.i.l.bf16 %v9297_v41 }
0x4fd7   :  { %v9582_v11 = vpop.eup %9581 }
0x4fd8   :  { %v7377_v22 = vsel %vm502_vm5, %v9582_v11, 0.0  ;;  %v7512_v54 = vsel %vm1407_vm7, %v7510_v40, %v9299_v59  ;;  %v7511_v34 = vsel %vm1407_vm7, %v7509_v55, %v9298_v42  ;;  %v8096_v55 = vld [vmem:[#allocation10 + $0x2d] ss:$0 sm:$0xff] }
0x4fd9   :  { %7378 = vadd.xlane.f32.xlu0 %v7377_v22  ;;  %v7521_v35 = vpop.permute.xlu1 %7520  ;;  %v9351_v22 = vld [vmem:[%s11369_s9 + $0x38] sm:$0xff]  }
0x4fdb   :  { %v9584_v48 = vpop.eup %9583 }
0x4fdc   :  { %v7380_v2 = vsel %vm502_vm5, %v9584_v48, 0.0 }
0x4fdd   :  { %7381 = vadd.xlane.f32.xlu0 %v7380_v2 }
0x4ff3   :  { %7437 = vrot.lane.b32.xlu0 %v11134_v14, %s9746_s27 }
0x5062   :  { %v7379_v26 = vpop.xlane.xlu0 %7378 }
0x5063   :  { %9585 = vrcp.f32 %v7379_v26 }
0x5066   :  { %v7382_v38 = vpop.xlane.xlu0 %7381 }
0x5067   :  { %9587 = vrcp.f32 %v7382_v38 }
0x506a   :  { %v7438_v44 = vpop.permute.xlu0 %7437 }
0x506b   :  { %v7443_v5 = vsel %vm627_vm6, %v7438_v44, 0 }
0x506c   :  { %9146 = vmatpush3.bf16.msra.mxu1 %v7443_v5 }
0x506d   :  { %9159 = vmatprep.subr.bf16.mxu1 %v9737_v6 }
0x5070   :  { %v9586_v57 = vpop.eup %9585 }
0x5071   :  { %v7384_v16 = vmul.f32 %v9586_v57, %v9582_v11  ;;  %v9350_v11 = vld [vmem:[#allocation9 + $0x38] ss:$12 sps:$4 sm:$0xff]  }
0x5073   :  { %v7387_v4 = vpack.c.bf16 %v7384_v16, %v7384_v16 }
0x5074   :  { %v9588_v19 = vpop.eup %9587 }
0x5075   :  { %v7386_v53 = vmul.f32 %v9588_v19, %v9584_v48  ;;  %9142 = vmatmul.mubr.msk.bf16.vlgmr.msra.gmra.mxu0 %vm502_vm5, %v7387_v4  ;;  %v8085_v4 = vld [vmem:[#allocation10 + $0x2a] ss:$0 sm:$0xff] }
0x5076   :  { %9152 = vmatpush3.bf16.msra.mxu0 %v7523_v58  ;;  %9155 = vmatprep.mubr.msk.bf16.mxu0 %vm9738_vm4, %v9737_v6 }
0x5077   :  { %v7388_v14 = vpack.c.bf16 %v7386_v53, %v7386_v53  ;;  %9153 = vmatprep.subr.bf16.mxu0 %v9737_v6 }
0x5079   :  { %9148 = vmatmul.mubr.msk.bf16.vlgmr.msra.gmra.mxu1 %vm502_vm5, %v7388_v14  ;;  %v8086_v14 = vld [vmem:[#allocation10 + $0x2b] ss:$0 sm:$0xff] }
0x507a   :  { %9163 = vmatprep.mubr.msk.bf16.mxu1 %vm9738_vm4, %v9737_v6  ;;  %9154 = vmatpush3.bf16.msra.mxu0 %v7521_v35 }
0x507b   :  { %9167 = vmatprep.subr.bf16.mxu0 %v9737_v6  ;;  %9160 = vmatpush3.bf16.msra.mxu1 %v9349_v52 }
0x507c   :  { %9161 = vmatprep.subr.bf16.mxu1 %v9737_v6 }
0x507f   :  { %9162 = vmatpush3.bf16.msra.mxu1 %v9350_v11  ;;  %v8097_v11 = vld [vmem:[#allocation10 + $0x2e] ss:$0 sm:$0xff] }
0x5080   :  { %9179 = vmatprep.subr.bf16.mxu1 %v9737_v6 }
0x5135   :  { %v7431_v63 = vpop.f32.mrf.mxu0 }
0x5137   :  { %v9143_v56 = vpop.f32.mrf.mxu0 }
0x5138   :  { %v9352_v56 = vld [vmem:[%s11369_s9 + $0x30] sm:$0xff]  }
0x5139   :  { %v7434_v31 = vpop.f32.mrf.mxu0  ;;  %v7479_v60 = vpop.f32.mrf.mxu1 }
0x513a   :  { %v9300_v61 = vpack.i.bf16 %v7479_v60, %v7431_v63  ;;  %v9353_v31 = vld [vmem:[%s11369_s9 + $0x28] sm:$0xff]   ;;  %v9354_v60 = vld [vmem:[%s11369_s9 + $0x20] sm:$0xff]  }
0x513b   :  { %v9144_v30 = vpop.f32.mrf.mxu0  ;;  %v9149_v8 = vpop.f32.mrf.mxu1 }
0x513c   :  { %9301 = vrot.lane.b32.xlu0 %v9300_v61, %s9751_s0  ;;  %v8087_v61 = vld [vmem:[#allocation10 + $0x2c] ss:$0 sm:$0xff] }
0x513d   :  { %v7482_v21 = vpop.f32.mrf.mxu1 }
0x513f   :  { %v9150_v17 = vpop.f32.mrf.mxu1 }
0x51ae   :  { %v9302_v10 = vpop.permute.xlu0 %9301 }
0x51af   :  { %v9304_v3 = vunpack.i.h.bf16 %v9302_v10  ;;  %v9303_v50 = vunpack.i.l.bf16 %v9302_v10 }
0x51b1   :  { %v7514_v46 = vsel %vm1410_vm8, %v7512_v54, %v9304_v3  ;;  %v7513_v27 = vsel %vm1410_vm8, %v7511_v34, %v9303_v50 }
0x51b2   :  { %v7515_v33 = vpack.c.bf16 %v7514_v46, %v7513_v27 }
0x51b4   :  { %9156 = vmatmul.mubr.msk.bf16.vlgmr.msra.gmra.mxu0 %vm218_vm2, %v7515_v33 }
0x51b5   :  { %9175 = vmatprep.mubr.msk.bf16.mxu0 %vm9738_vm4, %v9737_v6  ;;  %9168 = vmatpush3.bf16.msra.mxu0 %v9351_v22 }
0x51b6   :  { %9169 = vmatprep.subr.bf16.mxu0 %v9737_v6 }
0x51b9   :  { %9170 = vmatpush3.bf16.msra.mxu0 %v9352_v56 }
0x51ba   :  { %9171 = vmatprep.subr.bf16.mxu0 %v9737_v6 }
0x51bd   :  { %9172 = vmatpush3.bf16.msra.mxu0 %v9353_v31 }
0x51be   :  { %9173 = vmatprep.subr.bf16.mxu0 %v9737_v6 }
0x51c1   :  { %9174 = vmatpush3.bf16.msra.mxu0 %v9354_v60 }
0x5274   :  { %v7563_v20 = vpop.f32.mrf.mxu0 }
0x5275   :  { %v7564_v1 = vadd.f32 %v8083_v47, %v7563_v20 }
0x5276   :  { %v9157_v51 = vpop.f32.mrf.mxu0 }
0x5277   :  { %v11312_v43 = vadd.f32 %v7564_v1, %v11095_v62 }
0x5278   :  { %v7566_v12 = vpop.f32.mrf.mxu0 }
0x5279   :  { %v7567_v49 = vadd.f32 %v8083_v47, %v7566_v12  ;;  %v7572_v13 = vsel %vm218_vm2, %v11312_v43, 0.0 }
0x527a   :  { %7573 = vadd.xlane.f32.xlu0 %v7572_v13  ;;  %v9158_v36 = vpop.f32.mrf.mxu0 }
0x527b   :  { %v11317_v37 = vadd.f32 %v7567_v49, %v11100_v7 }
0x527d   :  { %v7575_v29 = vsel %vm218_vm2, %v11317_v37, 0.0 }
0x527e   :  { %7576 = vadd.xlane.f32.xlu1 %v7575_v29 }
0x5303   :  { %v7574_v0 = vpop.xlane.xlu0 %7573 }
0x5304   :  { %v7578_v39 = vmul.f32 0.03125, %v7574_v0 }
0x5306   :  { %v7580_v15 = vsub.f32 %v11312_v43, %v7578_v39  ;;  %v9355_v39 = vld [vmem:[#allocation6 + $0x8] sm:$0xff]  }
0x5307   :  { %v7577_v62 = vpop.xlane.xlu1 %7576 }
0x5308   :  { %v7579_v32 = vmul.f32 0.03125, %v7577_v62  ;;  %v7582_v18 = vmul.f32 %v7580_v15, %v7580_v15 }
0x530a   :  { %v7581_v24 = vsub.f32 %v11317_v37, %v7579_v32  ;;  %v7584_v23 = vsel %vm218_vm2, %v7582_v18, 0.0 }
0x530b   :  { %7585 = vadd.xlane.f32.xlu0 %v7584_v23 }
0x530c   :  { %v7583_v45 = vmul.f32 %v7581_v24, %v7581_v24 }
0x530e   :  { %v7587_v7 = vsel %vm218_vm2, %v7583_v45, 0.0 }
0x530f   :  { %7588 = vadd.xlane.f32.xlu0 %v7587_v7 }
0x5394   :  { %v7586_v48 = vpop.xlane.xlu0 %7585 }
0x5395   :  { %v7590_v2 = vmul.f32 0.03125, %v7586_v48 }
0x5397   :  { %v7592_v26 = vadd.f32 1e-05, %v7590_v2 }
0x5398   :  { %v7589_v38 = vpop.xlane.xlu0 %7588 }
0x5399   :  { %9589 = vrsqrt.f32 %v7592_v26  ;;  %v7591_v44 = vmul.f32 0.03125, %v7589_v38  ;;  %v8098_v26 = vld [vmem:[#allocation10 + $0x2f] ss:$0 sm:$0xff] }
0x539b   :  { %v7593_v5 = vadd.f32 1e-05, %v7591_v44 }
0x539d   :  { %9591 = vrsqrt.f32 %v7593_v5 }
0x53a6   :  { %v9590_v57 = vpop.eup %9589 }
0x53a7   :  { %v7596_v16 = vmul.f32 %v9590_v57, %v7580_v15  ;;  %v9356_v15 = vld [vmem:[#allocation6] sm:$0xff]   ;;  %v8099_v57 = vld [vmem:[#allocation10 + $0x3] ss:$0 sm:$0xff] }
0x53a9   :  { %v7603_v58 = vmul.f32 %v8085_v4, %v7596_v16 }
0x53aa   :  { %v9592_v19 = vpop.eup %9591 }
0x53ab   :  { %v7597_v53 = vmul.f32 %v9592_v19, %v7581_v24  ;;  %v7610_v41 = vadd.f32 %v8086_v14, %v7603_v58 }
0x53ad   :  { %v7604_v28 = vmul.f32 %v8085_v4, %v7597_v53 }
0x53af   :  { %v7611_v35 = vadd.f32 %v8086_v14, %v7604_v28 }
0x53b1   :  { %v7612_v63 = vpack.c.bf16 %v7611_v35, %v7610_v41 }
0x53b3   :  { %9164 = vmatmul.mubr.msk.bf16.vlgmr.msra.gmra.mxu1 %vm218_vm2, %v7612_v63 }
0x53b4   :  { %9183 = vmatprep.mubr.msk.bf16.mxu1 %vm9738_vm4, %v9737_v6  ;;  %9180 = vmatpush3.bf16.msra.mxu1 %v9355_v39 }
0x53b5   :  { %9181 = vmatprep.subr.bf16.mxu1 %v9737_v6 }
0x53b8   :  { %9182 = vmatpush3.bf16.msra.mxu1 %v9356_v15 }
0x5473   :  { %v7667_v30 = vpop.f32.mrf.mxu1 }
0x5474   :  { %v7668_v21 = vadd.f32 %v8087_v61, %v7667_v30 }
0x5475   :  { %v9165_v8 = vpop.f32.mrf.mxu1 }
0x5476   :  { %v7674_v59 = vmax.f32 %v7668_v21, 0.0 }
0x5477   :  { %v7670_v17 = vpop.f32.mrf.mxu1 }
0x5478   :  { %v7671_v25 = vadd.f32 %v8087_v61, %v7670_v17 }
0x5479   :  { %v9166_v9 = vpop.f32.mrf.mxu1 }
0x547a   :  { %v7675_v42 = vmax.f32 %v7671_v25, 0.0 }
0x547c   :  { %v7676_v10 = vpack.c.bf16 %v7675_v42, %v7674_v59 }
0x547e   :  { %9176 = vmatmul.mubr.msk.bf16.vlgmr.msra.gmra.mxu0 %vm321_vm3, %v7676_v10 }
0x553e   :  { %v7738_v40 = vpop.f32.mrf.mxu0 }
0x553f   :  { %v7745_v3 = vadd.f32 %v7738_v40, %v11312_v43 }
0x5540   :  { %v9177_v50 = vpop.f32.mrf.mxu0 }
0x5541   :  { %v7752_v54 = vadd.f32 %v8096_v55, %v7745_v3 }
0x5542   :  { %v7741_v34 = vpop.f32.mrf.mxu0 }
0x5543   :  { %v7746_v46 = vadd.f32 %v7741_v34, %v11317_v37  ;;  %v7754_v27 = vsel %vm218_vm2, %v7752_v54, 0.0 }
0x5544   :  { %7755 = vadd.xlane.f32.xlu0 %v7754_v27  ;;  %v9178_v33 = vpop.f32.mrf.mxu0 }
0x5545   :  { %v7753_v47 = vadd.f32 %v8096_v55, %v7746_v46 }
0x5547   :  { %v7757_v20 = vsel %vm218_vm2, %v7753_v47, 0.0 }
0x5548   :  { %7758 = vadd.xlane.f32.xlu1 %v7757_v20 }
0x55cd   :  { %v7756_v1 = vpop.xlane.xlu0 %7755 }
0x55ce   :  { %v7760_v51 = vmul.f32 0.03125, %v7756_v1 }
0x55d0   :  { %v7762_v12 = vsub.f32 %v7752_v54, %v7760_v51 }
0x55d1   :  { %v7759_v49 = vpop.xlane.xlu1 %7758 }
0x55d2   :  { %v7761_v13 = vmul.f32 0.03125, %v7759_v49  ;;  %v7764_v36 = vmul.f32 %v7762_v12, %v7762_v12 }
0x55d4   :  { %v7763_v43 = vsub.f32 %v7753_v47, %v7761_v13  ;;  %v7766_v29 = vsel %vm218_vm2, %v7764_v36, 0.0 }
0x55d5   :  { %7767 = vadd.xlane.f32.xlu0 %v7766_v29 }
0x55d6   :  { %v7765_v0 = vmul.f32 %v7763_v43, %v7763_v43 }
0x55d8   :  { %v7769_v37 = vsel %vm218_vm2, %v7765_v0, 0.0 }
0x55d9   :  { %7770 = vadd.xlane.f32.xlu1 %v7769_v37 }
0x565e   :  { %v7768_v62 = vpop.xlane.xlu0 %7767 }
0x565f   :  { %v7772_v32 = vmul.f32 0.03125, %v7768_v62 }
0x5661   :  { %v7774_v18 = vadd.f32 1e-05, %v7772_v32 }
0x5662   :  { %v7771_v24 = vpop.xlane.xlu1 %7770 }
0x5663   :  { %9593 = vrsqrt.f32 %v7774_v18  ;;  %v7773_v23 = vmul.f32 0.03125, %v7771_v24 }
0x5665   :  { %v7775_v45 = vadd.f32 1e-05, %v7773_v23 }
0x5667   :  { %9595 = vrsqrt.f32 %v7775_v45 }
0x5670   :  { %v9594_v7 = vpop.eup %9593 }
0x5671   :  { %v7778_v52 = vmul.f32 %v9594_v7, %v7762_v12 }
0x5673   :  { %v7785_v48 = vmul.f32 %v8097_v11, %v7778_v52 }
0x5674   :  { %v9596_v22 = vpop.eup %9595 }
0x5675   :  { %v7779_v2 = vmul.f32 %v9596_v22, %v7763_v43  ;;  %v7792_v44 = vadd.f32 %v8098_v26, %v7785_v48 }
0x5677   :  { %v7786_v38 = vmul.f32 %v8097_v11, %v7779_v2 }
0x5679   :  { %v7793_v6 = vadd.f32 %v8098_v26, %v7786_v38 }
0x567b   :  { %v7798_v5 = vpack.c.bf16 %v7793_v6, %v7792_v44 }
0x567d   :  { %9184 = vmatmul.mubr.msk.bf16.vlgmr.msra.gmra.mxu1 %vm218_vm2, %v7798_v5 }
0x573d   :  { %v7853_v16 = vpop.f32.mrf.mxu1 }
0x573e   :  { %v7854_v4 = vadd.f32 %v8099_v57, %v7853_v16 }
0x573f   :  { %v9185_v19 = vpop.f32.mrf.mxu1 }
0x5740   :  { %7860 = vst [vmem:[%s11371_s11] sm:$0xff] %v7854_v4 }
0x5741   :  { %v7856_v58 = vpop.f32.mrf.mxu1 }
0x5742   :  { %v7857_v53 = vadd.f32 %v8099_v57, %v7856_v58 }
0x5743   :  { %v9186_v14 = vpop.f32.mrf.mxu1 }
0x5744   :  { %7861 = vst [vmem:[%s11371_s11 + $0x8] sm:$0xff] %v7857_v53 }
0x5745   :  { %7866 = vsyncpa [#allocation3], 1 }
0x5746   :  { %7867 = vsyncpa [#allocation5], 1 }
0x5747   :  { %7868 = vsyncpa [#allocation8], 1 }
0x5748   :  { %7869 = vsyncpa [#allocation11], 1 }

</bundles_post_ra>
